<compile_context>
chip_gen: v7x
topology: tpu7x:2x2x1
jax: 0.10.0
libtpu: 0.0.40
codegen_flags: <defaults>
</compile_context>

<pallas_src>
import jax
import jax.numpy as jnp
from jax.experimental import pallas as pl
from jax.experimental.pallas import tpu as pltpu


# ----------------------------------------------------------------------------
# Fused kernel: conv1+bn1+relu -> conv2+bn2+relu -> conv3+bn3+residual+relu
# Processes a block of B (n,t) slices per grid step, channels-last layout.
# ----------------------------------------------------------------------------
def _bottleneck_fused_kernel(x_ref, w1_ref, b1_ref, w2_ref, b2_ref,
                             w3_ref, b3_ref, o_ref, pad_ref):
    B, H, W, Cin = x_ref.shape
    P = w1_ref.shape[1]
    M = B * H * W

    x = x_ref[...]                       # (B, H, W, Cin) bf16
    x2d = x.reshape(M, Cin)

    # conv1 (1x1x1, BN scale folded into w1) + bias + ReLU (f32 epilogue)
    y1 = jnp.dot(x2d, w1_ref[...], preferred_element_type=jnp.float32)
    y1 = jnp.maximum(y1 + b1_ref[...], 0.0)
    y1 = y1.astype(jnp.bfloat16).reshape(B, H, W, P)

    # conv2 (1,3,3), stride 1, pad (0,1,1): stage y1 into a padded VMEM scratch.
    # Zero ONLY the 1-wide halo border every step (interior is fully
    # overwritten), then write the interior.
    pad_ref[:, 0:1, :, :] = jnp.zeros((B, 1, W + 2, P), jnp.bfloat16)
    pad_ref[:, H + 1:H + 2, :, :] = jnp.zeros((B, 1, W + 2, P), jnp.bfloat16)
    pad_ref[:, 1:H + 1, 0:1, :] = jnp.zeros((B, H, 1, P), jnp.bfloat16)
    pad_ref[:, 1:H + 1, W + 1:W + 2, :] = jnp.zeros((B, H, 1, P), jnp.bfloat16)
    pad_ref[:, 1:H + 1, 1:W + 1, :] = y1

    # im2col: concatenate the 9 shifted windows along channels (K = 9*P) and
    # run ONE MXU matmul (w2 is pre-reshaped to (9*P, P) in the wrapper).
    cols = [pad_ref[:, kh:kh + H, kw:kw + W, :].reshape(M, P)
            for kh in range(3) for kw in range(3)]
    xcol = jnp.concatenate(cols, axis=-1)                        # (M, 9*P) bf16
    y2 = jnp.dot(xcol, w2_ref[...], preferred_element_type=jnp.float32)
    y2 = jnp.maximum(y2 + b2_ref[...], 0.0).astype(jnp.bfloat16)

    # conv3 (1x1x1, BN folded) + bias + identity residual + ReLU, bf16 store.
    y3 = jnp.dot(y2, w3_ref[...], preferred_element_type=jnp.float32)
    y3 = y3 + b3_ref[...] + x2d.astype(jnp.float32)
    o_ref[...] = jnp.maximum(y3, 0.0).reshape(B, H, W, Cin).astype(o_ref.dtype)


# ----------------------------------------------------------------------------
# Generation-aware VMEM budgeting and block picking
# ----------------------------------------------------------------------------
def _vmem_caps():
    """(block working-set budget, Mosaic vmem_limit_bytes), per TensorCore."""
    cap = 64 * 1024 * 1024  # conservative default (v7x per-TC VMEM)
    try:
        info = pltpu.get_tpu_info()
        cap = int(getattr(info, "vmem_capacity_bytes", 0)) or cap
    except Exception:
        pass
    budget = int(cap * 0.45)       # leaves headroom for pipeline double-buffers
    vmem_limit = int(cap * 0.85)   # leaves headroom for compiler internals
    return budget, vmem_limit


def _pick_block_nt(NT, H, W, Cin, P, budget_bytes):
    """Largest divisor of NT whose per-step VMEM footprint fits the budget,
    preferring >= 4 grid steps (>= 2 per core on a 2-TC chip) for pipelining."""
    lane_p = max(P, 128)                       # 128-lane padding of P=32 dims
    col_k = ((9 * P + 127) // 128) * 128       # lane-padded im2col K

    def est(b):
        m = b * H * W
        return (2 * m * Cin * 2                      # bf16 input, double-buffered
                + 2 * m * Cin * 2                    # bf16 output, double-buffered
                + b * (H + 2) * (W + 2) * lane_p * 2  # padded scratch (lane-padded)
                + m * col_k * 2                      # im2col staging (bf16)
                + 4 * m * lane_p * 4                 # f32/bf16 working values
                + m * Cin * 4)                       # f32 pre-store value

    divs = [b for b in range(1, NT + 1) if NT % b == 0 and est(b) <= budget_bytes]
    if not divs:
        return 1
    for min_steps in (4, 2, 1):
        pref = [b for b in divs if NT // b >= min_steps]
        if pref:
            return max(pref)
    return max(divs)


# ----------------------------------------------------------------------------
# Channels-last forward (primary, no layout transposes around the kernel)
# ----------------------------------------------------------------------------
def bottleneck3d_forward_cl(x_cl, params, *, stride=1, block_nt=None):
    """x_cl: (N, T, H, W, Cin), any float dtype. Returns (N, T, H, W, Cin) bf16."""
    assert stride == 1, "fused kernel supports stride=1 / downsample=None only"
    N, T, H, W, Cin = x_cl.shape
    P = params["w1"].shape[1]
    assert params["w3"].shape[1] == Cin, (
        "identity residual requires inplanes == planes*expansion")

    budget, vmem_limit = _vmem_caps()
    NT = N * T
    B = block_nt if block_nt is not None else _pick_block_nt(NT, H, W, Cin, P, budget)
    assert NT % B == 0
    grid = (NT // B,)

    xl = x_cl.reshape(NT, H, W, Cin).astype(jnp.bfloat16)

    # Fold eval-mode BN scale into conv weights; keep biases in f32.
    w1 = (params["w1"] * params["s1"]).astype(jnp.bfloat16)                  # (Cin, P)
    w2 = (params["w2"] * params["s2"].reshape(1, 1, 1, P)).astype(jnp.bfloat16)
    w2 = w2.reshape(9 * P, P)                                                # (9P, P)
    w3 = (params["w3"] * params["s3"]).astype(jnp.bfloat16)                  # (P, Cin)
    b1 = params["b1"].astype(jnp.float32)   # (1, P)
    b2 = params["b2"].astype(jnp.float32)   # (1, P)
    b3 = params["b3"].astype(jnp.float32)   # (1, Cin)

    out = pl.pallas_call(
        _bottleneck_fused_kernel,
        out_shape=jax.ShapeDtypeStruct((NT, H, W, Cin), jnp.bfloat16),
        grid_spec=pltpu.PrefetchScalarGridSpec(
            num_scalar_prefetch=0,
            grid=grid,
            in_specs=[
                pl.BlockSpec((B, H, W, Cin), lambda i: (i, 0, 0, 0)),
                pl.BlockSpec((Cin, P), lambda i: (0, 0)),
                pl.BlockSpec((1, P), lambda i: (0, 0)),
                pl.BlockSpec((9 * P, P), lambda i: (0, 0)),
                pl.BlockSpec((1, P), lambda i: (0, 0)),
                pl.BlockSpec((P, Cin), lambda i: (0, 0)),
                pl.BlockSpec((1, Cin), lambda i: (0, 0)),
            ],
            out_specs=pl.BlockSpec((B, H, W, Cin), lambda i: (i, 0, 0, 0)),
            scratch_shapes=[pltpu.VMEM((B, H + 2, W + 2, P), jnp.bfloat16)],
        ),
        compiler_params=pltpu.CompilerParams(
            dimension_semantics=("parallel",),
            vmem_limit_bytes=vmem_limit,
        ),
    )(xl, w1, b1, w2, b2, w3, b3)

    return out.reshape(N, T, H, W, Cin)


def bottleneck3d_forward(x, params, *, stride=1, block_nt=None):
    """NCDHW convenience wrapper matching the PyTorch module's layout contract.
    NOTE: the two transposes are full-tensor HBM passes executed by XLA outside
    the kernel; prefer bottleneck3d_forward_cl (channels-last end-to-end)."""
    x_cl = jnp.transpose(x, (0, 2, 3, 4, 1))
    out_cl = bottleneck3d_forward_cl(x_cl, params, stride=stride, block_nt=block_nt)
    return jnp.transpose(out_cl, (0, 4, 1, 2, 3))


# ----------------------------------------------------------------------------
# Parameter init (deterministic, synthetic) with eval-mode BN folding
# ----------------------------------------------------------------------------
def init_params(key, inplanes, planes, eps=1e-5):
    exp = 4
    ks = jax.random.split(key, 15)

    def bn_fold(kg, kb, km, kv, c):
        gamma = 1.0 + 0.1 * jax.random.normal(kg, (c,))
        beta = 0.1 * jax.random.normal(kb, (c,))
        mean = 0.1 * jax.random.normal(km, (c,))
        var = jnp.abs(jax.random.normal(kv, (c,))) + 0.5
        s = gamma / jnp.sqrt(var + eps)
        b = beta - mean * s
        return (s.reshape(1, c).astype(jnp.float32),
                b.reshape(1, c).astype(jnp.float32))

    w1 = (0.1 * jax.random.normal(ks[0], (inplanes, planes))).astype(jnp.float32)
    w2 = (0.1 * jax.random.normal(ks[1], (3, 3, planes, planes))).astype(jnp.float32)
    w3 = (0.1 * jax.random.normal(ks[2], (planes, planes * exp))).astype(jnp.float32)
    s1, b1 = bn_fold(ks[3], ks[4], ks[5], ks[6], planes)
    s2, b2 = bn_fold(ks[7], ks[8], ks[9], ks[10], planes)
    s3, b3 = bn_fold(ks[11], ks[12], ks[13], ks[14], planes * exp)
    return dict(w1=w1, w2=w2, w3=w3, s1=s1, b1=b1, s2=s2, b2=b2, s3=s3, b3=b3)


# ----------------------------------------------------------------------------
# Plain-jnp channels-last reference, same bf16-matmul / f32-accumulate recipe
# ----------------------------------------------------------------------------
def bottleneck3d_reference_cl(x_cl, params):
    N, T, H, W, Cin = x_cl.shape
    P = params["w1"].shape[1]

    xl = x_cl.astype(jnp.bfloat16)
    w1 = (params["w1"] * params["s1"]).astype(jnp.bfloat16)
    w2 = (params["w2"] * params["s2"].reshape(1, 1, 1, P)).astype(jnp.bfloat16)
    w3 = (params["w3"] * params["s3"]).astype(jnp.bfloat16)
    b1, b2, b3 = params["b1"], params["b2"], params["b3"]

    o1 = jnp.einsum("nthwc,cd->nthwd", xl, w1, preferred_element_type=jnp.float32)
    o1 = jnp.maximum(o1 + b1, 0.0).astype(jnp.bfloat16)

    o1p = jnp.pad(o1, ((0, 0), (0, 0), (1, 1), (1, 1), (0, 0)))
    acc = jnp.zeros((N, T, H, W, P), jnp.float32)
    for kh in range(3):
        for kw in range(3):
            xs = o1p[:, :, kh:kh + H, kw:kw + W, :]
            acc = acc + jnp.einsum("nthwc,cd->nthwd", xs, w2[kh, kw],
                                   preferred_element_type=jnp.float32)
    o2 = jnp.maximum(acc + b2, 0.0).astype(jnp.bfloat16)

    o3 = jnp.einsum("nthwc,cd->nthwd", o2, w3, preferred_element_type=jnp.float32)
    o3 = o3 + b3 + xl.astype(jnp.float32)
    return jnp.maximum(o3, 0.0)


if __name__ == "__main__":
    key = jax.random.PRNGKey(0)
    k_x, k_p = jax.random.split(key)

    planes = 32
    inplanes = planes * 4  # identity residual requires inplanes == planes*expansion
    N, T, H, W = 2, 4, 16, 16

    x = jax.random.normal(k_x, (N, inplanes, T, H, W), dtype=jnp.float32)
    params = init_params(k_p, inplanes, planes)

    # Primary channels-last path (no layout transposes around the kernel).
    x_cl = jnp.transpose(x, (0, 2, 3, 4, 1))
    out_cl = jax.block_until_ready(bottleneck3d_forward_cl(x_cl, params))
    ref_cl = bottleneck3d_reference_cl(x_cl, params)
    assert out_cl.shape == (N, T, H, W, inplanes), out_cl.shape
    assert out_cl.dtype == jnp.bfloat16
    max_err = float(jnp.max(jnp.abs(out_cl.astype(jnp.float32) - ref_cl)))
    assert jnp.allclose(out_cl.astype(jnp.float32), ref_cl,
                        atol=6e-2, rtol=6e-2), max_err

    # NCDHW wrapper matching the PyTorch module's layout contract.
    out_ncdhw = jax.block_until_ready(bottleneck3d_forward(x, params))
    ref_ncdhw = jnp.transpose(ref_cl, (0, 4, 1, 2, 3))
    assert out_ncdhw.shape == (N, inplanes, T, H, W), out_ncdhw.shape
    assert jnp.allclose(out_ncdhw.astype(jnp.float32), ref_ncdhw,
                        atol=6e-2, rtol=6e-2)

    print("KERNEL_OK")
</pallas_src>

<mosaic_0001>
module attributes {stable_mosaic.version = 11 : i64} {
  func.func @_bottleneck_fused_kernel(%arg0: i32, %arg1: memref<2x16x16x128xbf16, #tpu.memory_space<vmem>>, %arg2: memref<128x32xbf16, #tpu.memory_space<vmem>>, %arg3: memref<1x32xf32, #tpu.memory_space<vmem>>, %arg4: memref<288x32xbf16, #tpu.memory_space<vmem>>, %arg5: memref<1x32xf32, #tpu.memory_space<vmem>>, %arg6: memref<32x128xbf16, #tpu.memory_space<vmem>>, %arg7: memref<1x128xf32, #tpu.memory_space<vmem>>, %arg8: memref<2x16x16x128xbf16, #tpu.memory_space<vmem>>, %arg9: memref<2x18x18x32xbf16, #tpu.memory_space<vmem>>) attributes {dimension_semantics = [#tpu.dimension_semantics<parallel>], iteration_bounds = array<i64: 4>, scalar_prefetch = 0 : i64, scratch_operands = 1 : i64, tpu.core_type = #tpu.core_type<tc>, window_params = [{transform_indices = @transform_0, window_bounds = array<i64: 2, 16, 16, 128>}, {pipeline_mode = #tpu.pipeline_mode<synchronous>, transform_indices = @transform_1, window_bounds = array<i64: 128, 32>}, {pipeline_mode = #tpu.pipeline_mode<synchronous>, transform_indices = @transform_2, window_bounds = array<i64: 1, 32>}, {pipeline_mode = #tpu.pipeline_mode<synchronous>, transform_indices = @transform_3, window_bounds = array<i64: 288, 32>}, {pipeline_mode = #tpu.pipeline_mode<synchronous>, transform_indices = @transform_4, window_bounds = array<i64: 1, 32>}, {pipeline_mode = #tpu.pipeline_mode<synchronous>, transform_indices = @transform_5, window_bounds = array<i64: 32, 128>}, {pipeline_mode = #tpu.pipeline_mode<synchronous>, transform_indices = @transform_6, window_bounds = array<i64: 1, 128>}, {transform_indices = @transform_7, window_bounds = array<i64: 2, 16, 16, 128>}]} {
    %c0 = arith.constant 0 : index
    %c0_0 = arith.constant 0 : index
    %c0_1 = arith.constant 0 : index
    %c0_2 = arith.constant 0 : index
    %0 = vector.load %arg1[%c0, %c0_0, %c0_1, %c0_2] : memref<2x16x16x128xbf16, #tpu.memory_space<vmem>>, vector<2x16x16x128xbf16>
    %1 = vector.shape_cast %0 : vector<2x16x16x128xbf16> to vector<512x128xbf16>
    %c0_3 = arith.constant 0 : index
    %c0_4 = arith.constant 0 : index
    %2 = vector.load %arg2[%c0_3, %c0_4] : memref<128x32xbf16, #tpu.memory_space<vmem>>, vector<128x32xbf16>
    %cst = arith.constant dense<0.000000e+00> : vector<512x32xf32>
    %3 = tpu.matmul %1, %2, %cst {dimension_numbers = #tpu.dot_dimension_numbers<[1], [0], [0], [1], [0, 0, 1, 1], [], []>} : vector<512x128xbf16>, vector<128x32xbf16>, vector<512x32xf32> -> vector<512x32xf32>
    %c0_5 = arith.constant 0 : index
    %c0_6 = arith.constant 0 : index
    %4 = vector.load %arg3[%c0_5, %c0_6] : memref<1x32xf32, #tpu.memory_space<vmem>>, vector<1x32xf32>
    %5 = vector.broadcast %4 : vector<1x32xf32> to vector<512x32xf32>
    %6 = arith.addf %3, %5 : vector<512x32xf32>
    %cst_7 = arith.constant 0.000000e+00 : f32
    %7 = vector.broadcast %cst_7 : f32 to vector<512x32xf32>
    %8 = arith.maximumf %6, %7 : vector<512x32xf32>
    %9 = arith.truncf %8 : vector<512x32xf32> to vector<512x32xbf16>
    %10 = vector.shape_cast %9 : vector<512x32xbf16> to vector<2x16x16x32xbf16>
    %cst_8 = arith.constant 0.000000e+00 : bf16
    %11 = vector.broadcast %cst_8 : bf16 to vector<2x1x18x32xbf16>
    %c0_9 = arith.constant 0 : index
    %c0_10 = arith.constant 0 : index
    %c0_11 = arith.constant 0 : index
    %c0_12 = arith.constant 0 : index
    %12 = vector.load %arg9[%c0_9, %c0_10, %c0_11, %c0_12] : memref<2x18x18x32xbf16, #tpu.memory_space<vmem>>, vector<2x1x18x32xbf16>
    tpu.vector_store %arg9[%c0_9, %c0_10, %c0_11, %c0_12], %11 {strides = array<i32>} : memref<2x18x18x32xbf16, #tpu.memory_space<vmem>>, vector<2x1x18x32xbf16>,
    %cst_13 = arith.constant 0.000000e+00 : bf16
    %13 = vector.broadcast %cst_13 : bf16 to vector<2x1x18x32xbf16>
    %c0_14 = arith.constant 0 : index
    %c17 = arith.constant 17 : index
    %c0_15 = arith.constant 0 : index
    %c0_16 = arith.constant 0 : index
    %14 = vector.load %arg9[%c0_14, %c17, %c0_15, %c0_16] : memref<2x18x18x32xbf16, #tpu.memory_space<vmem>>, vector<2x1x18x32xbf16>
    tpu.vector_store %arg9[%c0_14, %c17, %c0_15, %c0_16], %13 {strides = array<i32>} : memref<2x18x18x32xbf16, #tpu.memory_space<vmem>>, vector<2x1x18x32xbf16>,
    %cst_17 = arith.constant 0.000000e+00 : bf16
    %15 = vector.broadcast %cst_17 : bf16 to vector<2x16x1x32xbf16>
    %c0_18 = arith.constant 0 : index
    %c1 = arith.constant 1 : index
    %c0_19 = arith.constant 0 : index
    %c0_20 = arith.constant 0 : index
    %16 = vector.load %arg9[%c0_18, %c1, %c0_19, %c0_20] : memref<2x18x18x32xbf16, #tpu.memory_space<vmem>>, vector<2x16x1x32xbf16>
    tpu.vector_store %arg9[%c0_18, %c1, %c0_19, %c0_20], %15 {strides = array<i32>} : memref<2x18x18x32xbf16, #tpu.memory_space<vmem>>, vector<2x16x1x32xbf16>,
    %cst_21 = arith.constant 0.000000e+00 : bf16
    %17 = vector.broadcast %cst_21 : bf16 to vector<2x16x1x32xbf16>
    %c0_22 = arith.constant 0 : index
    %c1_23 = arith.constant 1 : index
    %c17_24 = arith.constant 17 : index
    %c0_25 = arith.constant 0 : index
    %18 = vector.load %arg9[%c0_22, %c1_23, %c17_24, %c0_25] : memref<2x18x18x32xbf16, #tpu.memory_space<vmem>>, vector<2x16x1x32xbf16>
    tpu.vector_store %arg9[%c0_22, %c1_23, %c17_24, %c0_25], %17 {strides = array<i32>} : memref<2x18x18x32xbf16, #tpu.memory_space<vmem>>, vector<2x16x1x32xbf16>,
    %c0_26 = arith.constant 0 : index
    %c1_27 = arith.constant 1 : index
    %c1_28 = arith.constant 1 : index
    %c0_29 = arith.constant 0 : index
    %19 = vector.load %arg9[%c0_26, %c1_27, %c1_28, %c0_29] : memref<2x18x18x32xbf16, #tpu.memory_space<vmem>>, vector<2x16x16x32xbf16>
    tpu.vector_store %arg9[%c0_26, %c1_27, %c1_28, %c0_29], %10 {strides = array<i32>} : memref<2x18x18x32xbf16, #tpu.memory_space<vmem>>, vector<2x16x16x32xbf16>,
    %c0_30 = arith.constant 0 : index
    %c0_31 = arith.constant 0 : index
    %c0_32 = arith.constant 0 : index
    %c0_33 = arith.constant 0 : index
    %20 = vector.load %arg9[%c0_30, %c0_31, %c0_32, %c0_33] : memref<2x18x18x32xbf16, #tpu.memory_space<vmem>>, vector<2x16x16x32xbf16>
    %21 = vector.shape_cast %20 : vector<2x16x16x32xbf16> to vector<512x32xbf16>
    %c0_34 = arith.constant 0 : index
    %c0_35 = arith.constant 0 : index
    %c1_36 = arith.constant 1 : index
    %c0_37 = arith.constant 0 : index
    %22 = vector.load %arg9[%c0_34, %c0_35, %c1_36, %c0_37] : memref<2x18x18x32xbf16, #tpu.memory_space<vmem>>, vector<2x16x16x32xbf16>
    %23 = vector.shape_cast %22 : vector<2x16x16x32xbf16> to vector<512x32xbf16>
    %c0_38 = arith.constant 0 : index
    %c0_39 = arith.constant 0 : index
    %c2 = arith.constant 2 : index
    %c0_40 = arith.constant 0 : index
    %24 = vector.load %arg9[%c0_38, %c0_39, %c2, %c0_40] : memref<2x18x18x32xbf16, #tpu.memory_space<vmem>>, vector<2x16x16x32xbf16>
    %25 = vector.shape_cast %24 : vector<2x16x16x32xbf16> to vector<512x32xbf16>
    %c0_41 = arith.constant 0 : index
    %c1_42 = arith.constant 1 : index
    %c0_43 = arith.constant 0 : index
    %c0_44 = arith.constant 0 : index
    %26 = vector.load %arg9[%c0_41, %c1_42, %c0_43, %c0_44] : memref<2x18x18x32xbf16, #tpu.memory_space<vmem>>, vector<2x16x16x32xbf16>
    %27 = vector.shape_cast %26 : vector<2x16x16x32xbf16> to vector<512x32xbf16>
    %c0_45 = arith.constant 0 : index
    %c1_46 = arith.constant 1 : index
    %c1_47 = arith.constant 1 : index
    %c0_48 = arith.constant 0 : index
    %28 = vector.load %arg9[%c0_45, %c1_46, %c1_47, %c0_48] : memref<2x18x18x32xbf16, #tpu.memory_space<vmem>>, vector<2x16x16x32xbf16>
    %29 = vector.shape_cast %28 : vector<2x16x16x32xbf16> to vector<512x32xbf16>
    %c0_49 = arith.constant 0 : index
    %c1_50 = arith.constant 1 : index
    %c2_51 = arith.constant 2 : index
    %c0_52 = arith.constant 0 : index
    %30 = vector.load %arg9[%c0_49, %c1_50, %c2_51, %c0_52] : memref<2x18x18x32xbf16, #tpu.memory_space<vmem>>, vector<2x16x16x32xbf16>
    %31 = vector.shape_cast %30 : vector<2x16x16x32xbf16> to vector<512x32xbf16>
    %c0_53 = arith.constant 0 : index
    %c2_54 = arith.constant 2 : index
    %c0_55 = arith.constant 0 : index
    %c0_56 = arith.constant 0 : index
    %32 = vector.load %arg9[%c0_53, %c2_54, %c0_55, %c0_56] : memref<2x18x18x32xbf16, #tpu.memory_space<vmem>>, vector<2x16x16x32xbf16>
    %33 = vector.shape_cast %32 : vector<2x16x16x32xbf16> to vector<512x32xbf16>
    %c0_57 = arith.constant 0 : index
    %c2_58 = arith.constant 2 : index
    %c1_59 = arith.constant 1 : index
    %c0_60 = arith.constant 0 : index
    %34 = vector.load %arg9[%c0_57, %c2_58, %c1_59, %c0_60] : memref<2x18x18x32xbf16, #tpu.memory_space<vmem>>, vector<2x16x16x32xbf16>
    %35 = vector.shape_cast %34 : vector<2x16x16x32xbf16> to vector<512x32xbf16>
    %c0_61 = arith.constant 0 : index
    %c2_62 = arith.constant 2 : index
    %c2_63 = arith.constant 2 : index
    %c0_64 = arith.constant 0 : index
    %36 = vector.load %arg9[%c0_61, %c2_62, %c2_63, %c0_64] : memref<2x18x18x32xbf16, #tpu.memory_space<vmem>>, vector<2x16x16x32xbf16>
    %37 = vector.shape_cast %36 : vector<2x16x16x32xbf16> to vector<512x32xbf16>
    %38 = tpu.concatenate %21, %23, %25, %27, %29, %31, %33, %35, %37 in 1 : vector<512x32xbf16>, vector<512x32xbf16>, vector<512x32xbf16>, vector<512x32xbf16>, vector<512x32xbf16>, vector<512x32xbf16>, vector<512x32xbf16>, vector<512x32xbf16>, vector<512x32xbf16> -> vector<512x288xbf16>
    %c0_65 = arith.constant 0 : index
    %c0_66 = arith.constant 0 : index
    %39 = vector.load %arg4[%c0_65, %c0_66] : memref<288x32xbf16, #tpu.memory_space<vmem>>, vector<288x32xbf16>
    %cst_67 = arith.constant dense<0.000000e+00> : vector<512x32xf32>
    %40 = tpu.matmul %38, %39, %cst_67 {dimension_numbers = #tpu.dot_dimension_numbers<[1], [0], [0], [1], [0, 0, 1, 1], [], []>} : vector<512x288xbf16>, vector<288x32xbf16>, vector<512x32xf32> -> vector<512x32xf32>
    %c0_68 = arith.constant 0 : index
    %c0_69 = arith.constant 0 : index
    %41 = vector.load %arg5[%c0_68, %c0_69] : memref<1x32xf32, #tpu.memory_space<vmem>>, vector<1x32xf32>
    %42 = vector.broadcast %41 : vector<1x32xf32> to vector<512x32xf32>
    %43 = arith.addf %40, %42 : vector<512x32xf32>
    %cst_70 = arith.constant 0.000000e+00 : f32
    %44 = vector.broadcast %cst_70 : f32 to vector<512x32xf32>
    %45 = arith.maximumf %43, %44 : vector<512x32xf32>
    %46 = arith.truncf %45 : vector<512x32xf32> to vector<512x32xbf16>
    %c0_71 = arith.constant 0 : index
    %c0_72 = arith.constant 0 : index
    %47 = vector.load %arg6[%c0_71, %c0_72] : memref<32x128xbf16, #tpu.memory_space<vmem>>, vector<32x128xbf16>
    %cst_73 = arith.constant dense<0.000000e+00> : vector<512x128xf32>
    %48 = tpu.matmul %46, %47, %cst_73 {dimension_numbers = #tpu.dot_dimension_numbers<[1], [0], [0], [1], [0, 0, 1, 1], [], []>} : vector<512x32xbf16>, vector<32x128xbf16>, vector<512x128xf32> -> vector<512x128xf32>
    %c0_74 = arith.constant 0 : index
    %c0_75 = arith.constant 0 : index
    %49 = vector.load %arg7[%c0_74, %c0_75] : memref<1x128xf32, #tpu.memory_space<vmem>>, vector<1x128xf32>
    %50 = vector.broadcast %49 : vector<1x128xf32> to vector<512x128xf32>
    %51 = arith.addf %48, %50 : vector<512x128xf32>
    %52 = arith.extf %1 : vector<512x128xbf16> to vector<512x128xf32>
    %53 = arith.addf %51, %52 : vector<512x128xf32>
    %cst_76 = arith.constant 0.000000e+00 : f32
    %54 = vector.broadcast %cst_76 : f32 to vector<512x128xf32>
    %55 = arith.maximumf %53, %54 : vector<512x128xf32>
    %56 = vector.shape_cast %55 : vector<512x128xf32> to vector<2x16x16x128xf32>
    %57 = arith.truncf %56 : vector<2x16x16x128xf32> to vector<2x16x16x128xbf16>
    %c0_77 = arith.constant 0 : index
    %c0_78 = arith.constant 0 : index
    %c0_79 = arith.constant 0 : index
    %c0_80 = arith.constant 0 : index
    %58 = vector.load %arg8[%c0_77, %c0_78, %c0_79, %c0_80] : memref<2x16x16x128xbf16, #tpu.memory_space<vmem>>, vector<2x16x16x128xbf16>
    tpu.vector_store %arg8[%c0_77, %c0_78, %c0_79, %c0_80], %57 {strides = array<i32>} : memref<2x16x16x128xbf16, #tpu.memory_space<vmem>>, vector<2x16x16x128xbf16>,
    return
  }
  func.func @transform_0(%arg0: i32) -> (i32, i32, i32, i32) {
    %c0_i32 = arith.constant 0 : i32
    %c0_i32_0 = arith.constant 0 : i32
    %c0_i32_1 = arith.constant 0 : i32
    %c0_i32_2 = arith.constant 0 : i32
    return %arg0, %c0_i32, %c0_i32_0, %c0_i32_1 : i32, i32, i32, i32
  }
  func.func @transform_1(%arg0: i32) -> (i32, i32) {
    %c0_i32 = arith.constant 0 : i32
    %c0_i32_0 = arith.constant 0 : i32
    %c0_i32_1 = arith.constant 0 : i32
    return %c0_i32, %c0_i32_0 : i32, i32
  }
  func.func @transform_2(%arg0: i32) -> (i32, i32) {
    %c0_i32 = arith.constant 0 : i32
    %c0_i32_0 = arith.constant 0 : i32
    %c0_i32_1 = arith.constant 0 : i32
    return %c0_i32, %c0_i32_0 : i32, i32
  }
  func.func @transform_3(%arg0: i32) -> (i32, i32) {
    %c0_i32 = arith.constant 0 : i32
    %c0_i32_0 = arith.constant 0 : i32
    %c0_i32_1 = arith.constant 0 : i32
    return %c0_i32, %c0_i32_0 : i32, i32
  }
  func.func @transform_4(%arg0: i32) -> (i32, i32) {
    %c0_i32 = arith.constant 0 : i32
    %c0_i32_0 = arith.constant 0 : i32
    %c0_i32_1 = arith.constant 0 : i32
    return %c0_i32, %c0_i32_0 : i32, i32
  }
  func.func @transform_5(%arg0: i32) -> (i32, i32) {
    %c0_i32 = arith.constant 0 : i32
    %c0_i32_0 = arith.constant 0 : i32
    %c0_i32_1 = arith.constant 0 : i32
    return %c0_i32, %c0_i32_0 : i32, i32
  }
  func.func @transform_6(%arg0: i32) -> (i32, i32) {
    %c0_i32 = arith.constant 0 : i32
    %c0_i32_0 = arith.constant 0 : i32
    %c0_i32_1 = arith.constant 0 : i32
    return %c0_i32, %c0_i32_0 : i32, i32
  }
  func.func @transform_7(%arg0: i32) -> (i32, i32, i32, i32) {
    %c0_i32 = arith.constant 0 : i32
    %c0_i32_0 = arith.constant 0 : i32
    %c0_i32_1 = arith.constant 0 : i32
    %c0_i32_2 = arith.constant 0 : i32
    return %arg0, %c0_i32, %c0_i32_0, %c0_i32_1 : i32, i32, i32, i32
  }
}

</mosaic_0001>

<bundles_post_ra>
// kernel: tpu_custom_call.1
= control target key start
LH: loop header
LB: loop body
LE: loop exit
PB: predicated region body
PF: predicated region fallthrough
CT: control target
= control target key end

     0   :  { %12 = vsyncpa [#allocation4], 0  ;;  %s16321_s0 = inlined_call_operand.hbm [shape: bf16[8,16,16,128], index: 0, kind: input, shape index: {}]   ;;  %s16322_s1 = inlined_call_operand.vmem [shape: bf16[128,32], index: 1, kind: input, shape index: {}]   ;;  %s16323_s2 = inlined_call_operand.vmem [shape: f32[1,32], index: 2, kind: input, shape index: {}]   ;;  %s16324_s3 = inlined_call_operand.vmem [shape: bf16[288,32], index: 3, kind: input, shape index: {}]   ;;  %s16325_s4 = inlined_call_operand.vmem [shape: f32[1,32], index: 4, kind: input, shape index: {}]   ;;  %s16326_s5 = inlined_call_operand.vmem [shape: bf16[32,128], index: 5, kind: input, shape index: {}]   ;;  %s16327_s6 = inlined_call_operand.vmem [shape: f32[1,128], index: 6, kind: input, shape index: {}]   ;;  %s16328_s7 = inlined_call_operand.hbm [shape: bf16[8,16,16,128], index: 7, kind: output, shape index: {}]  }
   0x1   :  { %14 = vsyncpa [#allocation4 + $0x1], 0 }
   0x2   :  { %15 = vsyncpa [#allocation5], 0 }
   0x3   :  { %17 = vsyncpa [#allocation5 + $0x1], 0  ;;  %s11560_s24 = smov 0   ;;  %s11562_s25 = smov 0  }
   0x4   :  { %s11564_s26 = smov 0   ;;  %s11566_s27 = smov 0  }
   0x5 LB: > { %s11581_s28 = sadd.s32 4294967295, %s11509_s27   ;;  %s9697_s29 = sadd.s32 4294967294, %s11509_s27   ;;  %s11509_s27 = sphi %s11566_s27, %s16794_s27   ;;  %s11505_s26 = sphi %s11564_s26, %s16793_s26   ;;  %s11501_s25 = sphi %s11562_s25, %s16792_s25   ;;  %s11497_s24 = sphi %s11560_s24, %s16791_s24  }
   0x6   : > { %s11585_s30 = sadd.s32 1, %s11509_s27   ;;  %s30_s8 = sadd.s32 1, %s11505_s26 }
   0x7   : > { %s27_s9 = ssub.s32 %s11509_s27, %s11585_s30  ;;  %p37_p0 = scmp.ne.s32.totalorder %s11505_s26, %s11501_s25 }
   0x8   : > { %p28_p1 = scmp.eq.s32.totalorder %s27_s9, 0  ;;  %p38_p2 = scmp.eq.s32.totalorder %s11509_s27, 0 }
   0x9   : > { %p43_p3 = scmp.ne.s32.totalorder %s11501_s25, %s11497_s24  ;;  %p44_p4 = scmp.eq.s32.totalorder %s11581_s28, 0 }
   0xa   : > { %s11597_s10 = scalar_select %p28_p1, %s11505_s26, %s30_s8  }
   0xb   : > { %p11599_p5 = por %p38_p2, %p37_p0  ;;  %p11603_p6 = por %p44_p4, %p43_p3 }
   0xc   : > { %p193_p7 = scmp.eq.s32.totalorder %s11581_s28, 3  ;;  %p199_p8 = scmp.eq.s32.totalorder %s9697_s29, 3 }
   0xd   : > { %p11027_p9 = scmp.lt.s32.totalorder %s11509_s27, 4  ;;  %s237_s15 = sand.u32 1, %s11505_s26  }
   0xe   : > { %p11609_p10 = por %p193_p7, %p37_p0  ;;  %p11613_p11 = por %p199_p8, %p43_p3 }
   0xf   : > { %s10353_s16 = sshll.u32 %s11509_s27, 12  ;;  %s9700_s17 = sshll.u32 %s237_s15, 8 }
  0x10   : > { %s16368_s13 = scalar_select %p11609_p10, 1, 0 }
  0x11   : > { %s16369_s14 = scalar_select %p11613_p11, 1, 0 }
  0x12   : > { %s11622_s20 = scalar_lea.hbm %s16321_s0, %s10353_s16  ;;  %s241_s21 = scalar_lea.vmem [#allocation3], %s9700_s17 }
  0x13   : > { %s249_s22 = sshll.u32 %s241_s21, 4  ;;  %p11626_p12 = pnand %p11027_p9, %p11599_p5  ;;  %s11630_s22 = int_to_ptr.vmem [resolvable:$true] %s249_s22 }
  0x14   : > { %s11632_s29 = scalar_lea.sflag [#allocation4], %s237_s15  ;;  %s11413_s8 = scalar_lea.hbm %s11622_s20, 4096 }
  0x15   : > { %p11414_p13 = scmp.ne.s32.totalorder %s11622_s20, %s11413_s8  ;;  %p11415_p0 = pneg %p11626_p12 }
  0x16   : > { %s11418_s16 = scalar_lea.hbm %s16321_s0, 16384  ;;  %p11419_p3 = scmp.lt.u32.totalorder %s11622_s20, %s16321_s0 }
  0x17   : > { %p11416_p1 = pnand %p11415_p0, %p11414_p13  ;;  %p11420_p4 = scmp.lt.u32.totalorder %s11418_s16, %s11413_s8 }
  0x18   : > { %p11422_p7 = scmp.lt.u32.totalorder %s11413_s8, %s11622_s20 }
  0x19   : > { %p11417_p2 = pneg %p11416_p1  ;;  %p11421_p5 = por %p11420_p4, %p11419_p3 }
  0x1b   : > { %p11423_p8 = por %p11422_p7, %p11421_p5 }
  0x1d   : > { %p11424_p9 = pnand %p11423_p8, %p11417_p2 }
  0x1f   : > { %11427 = shalt.err (!%p11424_p9)
}
  0x20   : > { %s11428_s15 = scalar_lea.vmem %s11630_s22, 4096  ;;  %s11511_s19 = smov [#allocation3]  }
  0x21   : > { %p11429_p13 = scmp.ne.s32.totalorder %s11630_s22, %s11428_s15  ;;  %s11433_s21 = sshll.u32 %s11511_s19, 4  ;;  %s11434_s21 = int_to_ptr.vmem [resolvable:$false] %s11433_s21 }
  0x22   : > { %s11435_s9 = scalar_lea.vmem %s11434_s21, 8192  ;;  %p11436_p10 = scmp.lt.s32.totalorder %s11630_s22, %s11434_s21 }
  0x23   : > { %p11431_p1 = pnand %p11429_p13, %p11415_p0  ;;  %p11437_p3 = scmp.lt.s32.totalorder %s11435_s9, %s11428_s15 }
  0x25   : > { %p11432_p11 = pneg %p11431_p1  ;;  %p11438_p4 = por %p11437_p3, %p11436_p10 }
  0x27   : > { %p11439_p5 = pnand %p11438_p4, %p11432_p11 }
  0x29   : > { %11442 = shalt.err (!%p11439_p5)
}
  0x2a   : > { %s11512_s8 = smov 64   ;;  %s11513_s11 = smov 4  }
  0x2b   : > { %11022 = dma.hbm_to_vmem [thread:$0]  (!%p11626_p12), %s11622_s20, 4096, %s11630_s22, %s11632_s29, %s11512_s8, %s11512_s8, %s11513_s11  }
  0x2c   : > { %p9704_p0 = scmp.ge.s32.totalorder %s11509_s27, 1  ;;  %p257_p2 = scmp.lt.s32.totalorder %s11509_s27, 5 }
  0x2e   : > { %p258_p7 = pnand %p9704_p0, %p257_p2 }
  0x30   : > { %261 = sbr.rel (%p258_p7) target bundleno = 1624 (0x658), region = 48 }
  0x37   : > { %s11663_s16 = sand.u32 1, %s11501_s25  }
  0x38   : > { %s9705_s17 = sshll.u32 %s11663_s16, 8  ;;  %s264_s18 = scalar_lea.sflag [#allocation4], %s11663_s16 }
  0x39   : > { %s11669_s15 = scalar_lea.vmem [#allocation3], %s9705_s17 }
  0x3a   : > { %11488 = dma.done.wait (%p11603_p6), %s264_s18, 4096  }
  0x3b   : > { %11490 = vsyncadd (%p11603_p6), %s264_s18, 4294963200  ;;  %v11068_v0 = vld [vmem:[%s16322_s1] sm:$0xff]   ;;  %v11069_v1 = vld [vmem:[%s16322_s1 + $0x8] sm:$0xff]   ;;  %vm1013_vm0 = vcmask 257024   ;;  %vm1016_vm1 = vcmask 253952   ;;  %v16331_v30 = vmov 0  }
  0x3c   : > { %10783 = vmatprep.subr.bf16.mxu0 %v11068_v0  ;;  %10999 = vmatprep.subr.bf16.mxu1 %v11068_v0  ;;  %v11070_v2 = vld [vmem:[%s16322_s1 + $0x10] sm:$0xff]   ;;  %v11071_v3 = vld [vmem:[%s16322_s1 + $0x18] sm:$0xff]   ;;  %v11072_v6 = vld [vmem:[%s16322_s1 + $0x20] sm:$0xff]   ;;  %vm1030_vm2 = vsmask.f32 256  ;;  %v16371_v31 = vmov 0 }
  0x3d   : > { %10784 = vmatpush3.bf16.msra.mxu0 %v11068_v0  ;;  %11007 = vmatpush3.bf16.msra.mxu1 %v11068_v0  ;;  %v301_v4 = vld [vmem:[%s11669_s15] sm:$0xff]   ;;  %v11073_v7 = vld [vmem:[%s16322_s1 + $0x28] sm:$0xff]   ;;  %v11075_v9 = vld [vmem:[%s16322_s1 + $0x38] sm:$0xff]   ;;  %1022 = vst.msk [vmem:[#allocation2 + $0xcc] sm:$0xf] %vm1013_vm0, %v16331_v30  ;;  %v16374_v40 = vmov 0 }
  0x3e   : > { %10785 = vmatprep.subr.bf16.mxu0 %v11069_v1  ;;  %11000 = vmatprep.subr.bf16.mxu1 %v11069_v1  ;;  %v333_v5 = vld [vmem:[%s11669_s15 + $0x80] sm:$0xff]   ;;  %v303_v10 = vld [vmem:[%s11669_s15 + $0x8] sm:$0xff]   ;;  %v305_v12 = vld [vmem:[%s11669_s15 + $0x10] sm:$0xff]   ;;  %1023 = vst.msk [vmem:[#allocation2 + $0xd0] sm:$0xf] %vm1013_vm0, %v16331_v30  ;;  %vm3249_vm6 = vcmask 1042432  }
  0x3f   : > { %10799 = vmatprep.mubr.bf16.mxu0 %v301_v4  ;;  %10831 = vmatprep.mubr.bf16.mxu1 %v333_v5  ;;  %v11074_v8 = vld [vmem:[%s16322_s1 + $0x30] sm:$0xff]   ;;  %v335_v11 = vld [vmem:[%s11669_s15 + $0x88] sm:$0xff]   ;;  %v337_v13 = vld [vmem:[%s11669_s15 + $0x90] sm:$0xff]   ;;  %1014 = vst.msk [vmem:[#allocation2] sm:$0xf] %vm1013_vm0, %v16331_v30  ;;  %vm3250_vm7 = vcmask 1046532  }
  0x40   : > { %v307_v14 = vld [vmem:[%s11669_s15 + $0x18] sm:$0xff]   ;;  %v309_v16 = vld [vmem:[%s11669_s15 + $0x20] sm:$0xff]   ;;  %v311_v18 = vld [vmem:[%s11669_s15 + $0x28] sm:$0xff]   ;;  %1015 = vst.msk [vmem:[#allocation2 + $0x4] sm:$0xf] %vm1013_vm0, %v16331_v30  ;;  %s11515_s21 = smov 64  }
  0x41   : > { %10786 = vmatpush3.bf16.msra.mxu0 %v11069_v1  ;;  %11008 = vmatpush3.bf16.msra.mxu1 %v11069_v1  ;;  %v339_v15 = vld [vmem:[%s11669_s15 + $0x98] sm:$0xff]   ;;  %v341_v17 = vld [vmem:[%s11669_s15 + $0xa0] sm:$0xff]   ;;  %v343_v19 = vld [vmem:[%s11669_s15 + $0xa8] sm:$0xff]   ;;  %1017 = vst.msk [vmem:[#allocation2 + $0x8] sm:$0x1] %vm1016_vm1, %v16331_v30  ;;  %s11516_s12 = smov 32  }
  0x42   : > { %10787 = vmatprep.subr.bf16.mxu0 %v11070_v2  ;;  %11001 = vmatprep.subr.bf16.mxu1 %v11070_v2  ;;  %v313_v20 = vld [vmem:[%s11669_s15 + $0x30] sm:$0xff]   ;;  %v315_v21 = vld [vmem:[%s11669_s15 + $0x38] sm:$0xff]   ;;  %v317_v22 = vld [vmem:[%s11669_s15 + $0x40] sm:$0xff]   ;;  %1018 = vst.msk [vmem:[#allocation2 + $0xd8] sm:$0xf] %vm1013_vm0, %v16331_v30  ;;  %s11517_s9 = smov 96  }
  0x43   : > { %v319_v23 = vld [vmem:[%s11669_s15 + $0x48] sm:$0xff]   ;;  %v321_v24 = vld [vmem:[%s11669_s15 + $0x50] sm:$0xff]   ;;  %v323_v25 = vld [vmem:[%s11669_s15 + $0x58] sm:$0xff]   ;;  %1019 = vst.msk [vmem:[#allocation2 + $0xdc] sm:$0xf] %vm1013_vm0, %v16331_v30  ;;  %vm7253_vm15 = vcmask 261120  }
  0x44   : > { %v325_v26 = vld [vmem:[%s11669_s15 + $0x60] sm:$0xff]   ;;  %v327_v27 = vld [vmem:[%s11669_s15 + $0x68] sm:$0xff]   ;;  %v329_v28 = vld [vmem:[%s11669_s15 + $0x70] sm:$0xff]   ;;  %1020 = vst.msk [vmem:[#allocation2 + $0xe0] sm:$0x1] %vm1016_vm1, %v16331_v30  ;;  %s16094_s29 = scalar_lea.vmem [#allocation6], %s9705_s17 }
  0x45   : > { %10788 = vmatpush3.bf16.msra.mxu0 %v11070_v2  ;;  %11009 = vmatpush3.bf16.msra.mxu1 %v11070_v2  ;;  %v331_v29 = vld [vmem:[%s11669_s15 + $0x78] sm:$0xff]   ;;  %1024 = vst.msk [vmem:[#allocation2 + $0xd4] sm:$0x1] %vm1016_vm1, %v16331_v30  ;;  %1027 = vst.msk [vmem:[#allocation2 + $0x1ac] sm:$0x1] %vm1016_vm1, %v16331_v30  ;;  %s9624_s8 = sshll.u32 %s16094_s29, 4  ;;  %s16274_s8 = int_to_ptr.vmem [resolvable:$true] %s9624_s8 }
  0x46   : > { %10789 = vmatprep.subr.bf16.mxu0 %v11071_v3  ;;  %11002 = vmatprep.subr.bf16.mxu1 %v11071_v3  ;;  %1025 = vst.msk [vmem:[#allocation2 + $0x1a4] sm:$0xf] %vm1013_vm0, %v16331_v30  ;;  %1026 = vst.msk [vmem:[#allocation2 + $0x1a8] sm:$0xf] %vm1013_vm0, %v16331_v30  ;;  %v1035_v32 = vld [vmem:[#allocation2 + $0x18] sm:$0x1] }
  0x47   : > { %vm11748_vm3 = vmand %vm1016_vm1, %vm1030_vm2  ;;  %vm1128_vm4 = vsmask.f32 7938  ;;  %v1083_v33 = vld [vmem:[#allocation2 + $0xf0] sm:$0x1]  ;;  %v1032_v36 = vld [vmem:[#allocation2 + $0xc] sm:$0x1] }
  0x48   : > { %v16372_v31 = vsel %vm11748_vm3, 4294967295, %v16371_v31  ;;  %v1036_v34 = vsel %vm11748_vm3, 0, %v1035_v32  ;;  %v1084_v35 = vsel %vm11748_vm3, 0, %v1083_v33  ;;  %v1080_v37 = vld [vmem:[#allocation2 + $0xe4] sm:$0x1]  ;;  %v1033_v38 = vsel %vm11748_vm3, 0, %v1032_v36  ;;  %vm11762_vm5 = vmand %vm1016_vm1, %vm1128_vm4 }
  0x49   : > { %10790 = vmatpush3.bf16.msra.mxu0 %v11071_v3  ;;  %11010 = vmatpush3.bf16.msra.mxu1 %v11071_v3  ;;  %16373 = vst [vmem:[#allocation9_spill] sm:$0xff] %v16372_v31  ;;  %1037 = vst [vmem:[#allocation2 + $0x18] sm:$0x1] %v1036_v34  ;;  %v1081_v39 = vsel %vm11748_vm3, 0, %v1080_v37  ;;  %v16375_v40 = vsel %vm11762_vm5, 4294967295, %v16374_v40  ;;  %vm7350_vm1 = vcmask 523264  }
  0x4a   : > { %10791 = vmatprep.subr.bf16.mxu0 %v11072_v6  ;;  %11003 = vmatprep.subr.bf16.mxu1 %v11072_v6  ;;  %1085 = vst [vmem:[#allocation2 + $0xf0] sm:$0x1] %v1084_v35  ;;  %16376 = vst [vmem:[#allocation10_spill] sm:$0xff] %v16375_v40  ;;  %v1133_v41 = vld [vmem:[#allocation2 + $0x20] sm:$0x1]  ;;  %p16789_p10 = scmp.ne.s32.totalorder %s16368_s13, 0 }
  0x4b   : > { %1034 = vst [vmem:[#allocation2 + $0xc] sm:$0x1] %v1033_v38  ;;  %1082 = vst [vmem:[#allocation2 + $0xe4] sm:$0x1] %v1081_v39  ;;  %v1134_v42 = vsel %vm11762_vm5, 0, %v1133_v41 }
  0x4c   : > { %1135 = vst [vmem:[#allocation2 + $0x20] sm:$0x1] %v1134_v42  ;;  %v1181_v43 = vld [vmem:[#allocation2 + $0xf8] sm:$0x1]  ;;  %v11768_v44 = vld [vmem:[#allocation2 + $0x4] sm:$0xf]  ;;  %vm11781_vm8 = vmor %vm3249_vm6, %vm3250_vm7 }
  0x4d   : > { %10792 = vmatpush3.bf16.msra.mxu0 %v11072_v6  ;;  %11011 = vmatpush3.bf16.msra.mxu1 %v11072_v6  ;;  %v1182_v45 = vsel %vm11762_vm5, 0, %v1181_v43  ;;  %v1130_v46 = vld [vmem:[#allocation2 + $0x14] sm:$0x1]  ;;  %v1178_v47 = vld [vmem:[#allocation2 + $0xec] sm:$0x1]  ;;  %v3254_v48 = vrot.slane %v11768_v44, 5  ;;  %vm11915_vm13 = vmand %vm1013_vm0, %vm1128_vm4 }
  0x4e   : > { %10793 = vmatprep.subr.bf16.mxu0 %v11073_v7  ;;  %11004 = vmatprep.subr.bf16.mxu1 %v11073_v7  ;;  %1183 = vst [vmem:[#allocation2 + $0xf8] sm:$0x1] %v1182_v45  ;;  %v1131_v49 = vsel %vm11762_vm5, 0, %v1130_v46  ;;  %v1179_v50 = vsel %vm11762_vm5, 0, %v1178_v47  ;;  %v2318_v51 = vld [vmem:[#allocation2 + $0x8] sm:$0x1] }
  0x4f   : > { %1132 = vst [vmem:[#allocation2 + $0x14] sm:$0x1] %v1131_v49  ;;  %1180 = vst [vmem:[#allocation2 + $0xec] sm:$0x1] %v1179_v50  ;;  %v4723_v52 = vld [vmem:[#allocation2 + $0xcc] sm:$0xf] }
  0x50   : > { %v11777_v53 = vld [vmem:[#allocation2 + $0xd0] sm:$0xf]  ;;  %v3121_v55 = vld [vmem:[#allocation2] sm:$0xe]  ;;  %v3256_v56 = vrot.slane %v3254_v48, 4  ;;  %v3257_v58 = vrot.slane %v2318_v51, 5 }
  0x51   : > { %10794 = vmatpush3.bf16.msra.mxu0 %v11073_v7  ;;  %11012 = vmatpush3.bf16.msra.mxu1 %v11073_v7  ;;  %v10115_v54 = vcombine.low %v4723_v52, %v11777_v53  ;;  %v9812_v57 = vrot.slane %v3121_v55, 9  ;;  %v5150_v59 = vshrl.u32 %v4723_v52, 16  ;;  %v2287_v61 = vld [vmem:[#allocation2 + $0xdc] sm:$0xf]  ;;  %v2254_v62 = vld [vmem:[#allocation2] sm:$0xf] }
  0x52   : > { %10795 = vmatprep.subr.bf16.mxu0 %v11074_v8  ;;  %11005 = vmatprep.subr.bf16.mxu1 %v11074_v8  ;;  %v5153_v63 = vshll.u32 %v4723_v52, 16  ;;  %v3258_v1 = vsel %vm11781_vm8, %v3256_v56, %v3257_v58  ;;  %v3366_v2 = vrot.slane %v2287_v61, 5  ;;  %v2334_v4 = vld [vmem:[#allocation2 + $0xe0] sm:$0x1]  ;;  %v3137_v5 = vld [vmem:[#allocation2 + $0xd8] sm:$0xe] }
  0x53   : > { %6963 = vrot.lane.b32.xlu0 %v10115_v54, %s11515_s21  ;;  %v3255_v0 = vsel %vm11781_vm8, %v9812_v57, %v3254_v48  ;;  %v2354_v6 = vshrl.u32 %v2254_v62, 16  ;;  %v9828_v7 = vrot.slane %v3137_v5, 9  ;;  %vm2350_vm9 = vsmask.f32 3328  ;;  %v1139_v39 = vld [vmem:[#allocation2 + $0x38] sm:$0x1] }
  0x54   : > { %v9972_v3 = vcombine.low %v3255_v0, %v3258_v1  ;;  %vm2351_vm10 = vsmask.f32 7440  ;;  %v2747_v34 = vshll.u32 %v2287_v61, 16  ;;  %v2751_v38 = vshrl.u32 %v2287_v61, 16  ;;  %v1086_v61 = vld [vmem:[#allocation2 + $0xfc] sm:$0x1] }
  0x55   : > { %10796 = vmatpush3.bf16.msra.mxu0 %v11074_v8  ;;  %11013 = vmatpush3.bf16.msra.mxu1 %v11074_v8  ;;  %v3368_v8 = vrot.slane %v3366_v2, 4  ;;  %v1140_v45 = vsel %vm11762_vm5, 0, %v1139_v39  ;;  %vm11813_vm11 = vmor %vm2350_vm9, %vm2351_vm10  ;;  %v2757_v49 = vshll.u32 %v2334_v4, 16  ;;  %v5159_v50 = vshll.u32 %v11777_v53, 16  ;;  %v347_v1 = vld [vmem:[%s11669_s15 + $0xb8] sm:$0xff]  }
  0x56   : > { %10797 = vmatprep.subr.bf16.mxu0 %v11075_v9  ;;  %11006 = vmatprep.subr.bf16.mxu1 %v11075_v9  ;;  %v2753_v48 = vrot.slane %v2751_v38, 4  ;;  %1141 = vst [vmem:[#allocation2 + $0x38] sm:$0x1] %v1140_v45  ;;  %v1087_v0 = vsel %vm11748_vm3, 0, %v1086_v61  ;;  %v1148_v38 = vld [vmem:[#allocation2 + $0x5c] sm:$0x1] }
  0x57   : > { %6293 = vrot.lane.b32.xlu1 %v9972_v3, %s11515_s21  ;;  %1088 = vst [vmem:[#allocation2 + $0xfc] sm:$0x1] %v1087_v0  ;;  %v1149_v39 = vsel %vm11762_vm5, 0, %v1148_v38  ;;  %v1157_v45 = vld [vmem:[#allocation2 + $0x80] sm:$0x1] }
  0x58   : > { %1150 = vst [vmem:[#allocation2 + $0x5c] sm:$0x1] %v1149_v39  ;;  %v1160_v61 = vld [vmem:[#allocation2 + $0x8c] sm:$0x1]  ;;  %vm1386_vm12 = vsmask.f32 4368 }
  0x59   : > { %10798 = vmatpush3.bf16.msra.mxu0 %v11075_v9  ;;  %11014 = vmatpush3.bf16.msra.mxu1 %v11075_v9  ;;  %v3369_v9 = vrot.slane %v2334_v4, 5  ;;  %v1044_v4 = vld [vmem:[#allocation2 + $0x3c] sm:$0x1]  ;;  %vm11949_vm14 = vmor %vm1030_vm2, %vm1386_vm12  ;;  %vm7415_vm2 = vcmask 785408  }
  0x5a   : > { %8015 = vmatprep.subr.bf16.mxu1 %v16331_v30 }
  0x5c   : > { %10800 = vmatmul.mubr.bf16.vlgmr.msra.gmra.mrb[0].mxu0 %v303_v10  ;;  %10832 = vmatmul.mubr.bf16.vlgmr.msra.gmra.mrb[0].mxu1 %v335_v11  ;;  %v2363_v10 = vshll.u32 %v11768_v44, 16  ;;  %v1038_v11 = vld [vmem:[#allocation2 + $0x24] sm:$0x1] }
  0x5d   : > { %10803 = vmatprep.mubr.bf16.mxu0 %v305_v12  ;;  %10835 = vmatprep.mubr.bf16.mxu1 %v337_v13  ;;  %v5163_v12 = vshrl.u32 %v11777_v53, 16  ;;  %v11792_v13 = vrot.slane %v5150_v59, 4  ;;  %v1089_v59 = vld [vmem:[#allocation2 + $0x108] sm:$0x1] }
  0x5e   : > { %v1090_v53 = vsel %vm11748_vm3, 0, %v1089_v59  ;;  %v1163_v59 = vld [vmem:[#allocation2 + $0x98] sm:$0x1] }
  0x5f   : > { %v5165_v57 = vrot.slane %v5163_v12, 4  ;;  %1091 = vst [vmem:[#allocation2 + $0x108] sm:$0x1] %v1090_v53  ;;  %v1071_v53 = vld [vmem:[#allocation2 + $0xa8] sm:$0x1] }
  0x60   : > { %v1072_v0 = vsel %vm11748_vm3, 0, %v1071_v53 }
  0x61   : > { %1073 = vst [vmem:[#allocation2 + $0xa8] sm:$0x1] %v1072_v0 }
  0x64   : > { %10804 = vmatmul.mubr.bf16.gmra.mrb[4].mxu0 %v307_v14  ;;  %10836 = vmatmul.mubr.bf16.gmra.mrb[4].mxu1 %v339_v15  ;;  %v11794_v14 = vrot.slane %v5153_v63, 5  ;;  %v2373_v15 = vshll.u32 %v2318_v51, 16 }
  0x65   : > { %10807 = vmatprep.mubr.bf16.mxu0 %v309_v16  ;;  %10839 = vmatprep.mubr.bf16.mxu1 %v341_v17  ;;  %v1041_v16 = vld [vmem:[#allocation2 + $0x30] sm:$0x1]  ;;  %v1039_v17 = vsel %vm11748_vm3, 0, %v1038_v11 }
  0x66   : > { %1040 = vst [vmem:[#allocation2 + $0x24] sm:$0x1] %v1039_v17  ;;  %v2375_v37 = vrot.slane %v2373_v15, 5  ;;  %v5156_v54 = vor.u32 %v11794_v14, %v11792_v13 }
  0x6c   : > { %10808 = vmatmul.mubr.bf16.gmra.mrb[8].mxu0 %v311_v18  ;;  %10840 = vmatmul.mubr.bf16.gmra.mrb[8].mxu1 %v343_v19  ;;  %v3367_v18 = vsel %vm11781_vm8, %v9828_v7, %v3366_v2  ;;  %v3370_v19 = vsel %vm11781_vm8, %v3368_v8, %v3369_v9  ;;  %v5161_v7 = vrot.slane %v5159_v50, 5  ;;  %v5157_v8 = vrot.slane %v5156_v54, 4  ;;  %v1047_v9 = vld [vmem:[#allocation2 + $0x48] sm:$0x1] }
  0x6d   : > { %10811 = vmatprep.mubr.bf16.mxu0 %v313_v20  ;;  %v1042_v20 = vsel %vm11748_vm3, 0, %v1041_v16  ;;  %v1048_v12 = vsel %vm11748_vm3, 0, %v1047_v9 }
  0x6e   : > { %1043 = vst [vmem:[#allocation2 + $0x30] sm:$0x1] %v1042_v20  ;;  %v5166_v14 = vor.u32 %v5165_v57, %v5161_v7  ;;  %1049 = vst [vmem:[#allocation2 + $0x48] sm:$0x1] %v1048_v12  ;;  %v349_v57 = vld [vmem:[%s11669_s15 + $0xc0] sm:$0xff]  }
  0x70   : > { %v5167_v17 = vrot.slane %v5166_v14, 4 }
  0x74   : > { %10812 = vmatmul.mubr.bf16.gmra.mrb[12].mxu0 %v315_v21  ;;  %v9988_v21 = vcombine.low %v3367_v18, %v3370_v19  ;;  %v5162_v19 = vsel %vm11813_vm11, %v5157_v8, %v5161_v7  ;;  %v11895_v7 = vld [vmem:[%s16323_s2] ss:$0 sm:$0xff] }
  0x75   : > { %10815 = vmatprep.mubr.bf16.mxu0 %v317_v22  ;;  %v2356_v22 = vrot.slane %v2354_v6, 4  ;;  %v4772_v6 = vld [vmem:[#allocation2 + $0xd4] sm:$0x1] }
  0x76   : > { %6325 = vrot.lane.b32.xlu1 %v9988_v21, %s11515_s21  ;;  %v5169_v15 = vshll.u32 %v4772_v6, 16  ;;  %v1145_v21 = vld [vmem:[#allocation2 + $0x50] sm:$0x1] }
  0x78   : > { %v5171_v18 = vrot.slane %v5169_v15, 5 }
  0x7a   : > { %v5172_v20 = vsel %vm11813_vm11, %v5167_v17, %v5171_v18 }
  0x7c   : > { %10816 = vmatmul.mubr.bf16.gmra.mrb[16].mxu0 %v319_v23  ;;  %v2357_v23 = vshll.u32 %v2254_v62, 16  ;;  %v2759_v62 = vrot.slane %v2757_v49, 5  ;;  %v1154_v49 = vld [vmem:[#allocation2 + $0x74] sm:$0x1] }
  0x7d   : > { %10819 = vmatprep.mubr.bf16.mxu0 %v321_v24  ;;  %v345_v24 = vld [vmem:[%s11669_s15 + $0xb0] sm:$0xff]   ;;  %v1155_v50 = vsel %vm11762_vm5, 0, %v1154_v49 }
  0x7e   : > { %10843 = vmatprep.mubr.bf16.mxu1 %v345_v24  ;;  %v1187_v24 = vld [vmem:[#allocation2 + $0x110] sm:$0x1]  ;;  %1156 = vst [vmem:[#allocation2 + $0x74] sm:$0x1] %v1155_v50 }
  0x7f   : > { %10844 = vmatmul.mubr.bf16.gmra.mrb[12].mxu1 %v347_v1  ;;  %v1068_v1 = vld [vmem:[#allocation2 + $0x9c] sm:$0x1] }
  0x80   : > { %10847 = vmatprep.mubr.bf16.mxu1 %v349_v57 }
  0x84   : > { %10820 = vmatmul.mubr.bf16.gmra.mrb[20].mxu0 %v323_v25  ;;  %v2365_v25 = vrot.slane %v2363_v10, 5  ;;  %v1045_v10 = vsel %vm11748_vm3, 0, %v1044_v4  ;;  %v1166_v4 = vld [vmem:[#allocation2 + $0xa4] sm:$0x1] }
  0x85   : > { %10823 = vmatprep.mubr.bf16.mxu0 %v325_v26  ;;  %v2367_v26 = vshrl.u32 %v11768_v44, 16  ;;  %v2749_v44 = vrot.slane %v2747_v34, 5  ;;  %1046 = vst [vmem:[#allocation2 + $0x3c] sm:$0x1] %v1045_v10  ;;  %v1167_v6 = vsel %vm11762_vm5, 0, %v1166_v4 }
  0x86   : > { %1168 = vst [vmem:[#allocation2 + $0xa4] sm:$0x1] %v1167_v6 }
  0x87   : > { %v2369_v36 = vrot.slane %v2367_v26, 4  ;;  %v2754_v56 = vor.u32 %v2753_v48, %v2749_v44  ;;  %v1188_v26 = vsel %vm11762_vm5, 0, %v1187_v24  ;;  %v1158_v48 = vsel %vm11762_vm5, 0, %v1157_v45 }
  0x88   : > { %1189 = vst [vmem:[#allocation2 + $0x110] sm:$0x1] %v1188_v26  ;;  %1159 = vst [vmem:[#allocation2 + $0x80] sm:$0x1] %v1158_v48 }
  0x89   : > { %v2370_v47 = vor.u32 %v2369_v36, %v2365_v25  ;;  %v2755_v5 = vrot.slane %v2754_v56, 4  ;;  %v1151_v36 = vld [vmem:[#allocation2 + $0x68] sm:$0x1] }
  0x8b   : > { %v2371_v55 = vrot.slane %v2370_v47, 4  ;;  %v2760_v13 = vsel %vm11813_vm11, %v2755_v5, %v2759_v62  ;;  %v1164_v62 = vsel %vm11762_vm5, 0, %v1163_v59  ;;  %v16381_v59 = vmov 0 }
  0x8c   : > { %10824 = vmatmul.mubr.bf16.gmra.mrb[24].mxu0 %v327_v27  ;;  %v2286_v27 = vld [vmem:[#allocation2 + $0xd8] sm:$0xf]  ;;  %1165 = vst [vmem:[#allocation2 + $0x98] sm:$0x1] %v1164_v62  ;;  %v16382_v59 = vsel %vm11915_vm13, 4294967295, %v16381_v59 }
  0x8d   : > { %10827 = vmatprep.mubr.bf16.mxu0 %v329_v28  ;;  %v1136_v28 = vld [vmem:[#allocation2 + $0x2c] sm:$0x1]  ;;  %v2738_v32 = vshrl.u32 %v2286_v27, 16  ;;  %v2741_v33 = vshll.u32 %v2286_v27, 16  ;;  %v2376_v63 = vsel %vm11813_vm11, %v2371_v55, %v2375_v37  ;;  %v1152_v37 = vsel %vm11762_vm5, 0, %v1151_v36  ;;  %16383 = vst [vmem:[#allocation11_spill] sm:$0xff] %v16382_v59 }
  0x8e   : > { %v1137_v35 = vsel %vm11762_vm5, 0, %v1136_v28  ;;  %v1184_v28 = vld [vmem:[#allocation2 + $0x104] sm:$0x1]  ;;  %1153 = vst [vmem:[#allocation2 + $0x68] sm:$0x1] %v1152_v37 }
  0x8f   : > { %1138 = vst [vmem:[#allocation2 + $0x2c] sm:$0x1] %v1137_v35  ;;  %v2740_v42 = vrot.slane %v2738_v32, 4  ;;  %v2743_v43 = vrot.slane %v2741_v33, 5  ;;  %v1050_v32 = vld [vmem:[#allocation2 + $0x54] sm:$0x1] }
  0x90   : > { %v1053_v33 = vld [vmem:[#allocation2 + $0x60] sm:$0x1]  ;;  %v1051_v34 = vsel %vm11748_vm3, 0, %v1050_v32  ;;  %v1062_v55 = vld [vmem:[#allocation2 + $0x84] sm:$0x1] }
  0x91   : > { %v2744_v52 = vor.u32 %v2743_v43, %v2740_v42  ;;  %v1054_v35 = vsel %vm11748_vm3, 0, %v1053_v33  ;;  %1052 = vst [vmem:[#allocation2 + $0x54] sm:$0x1] %v1051_v34  ;;  %v1059_v42 = vld [vmem:[#allocation2 + $0x78] sm:$0x1]  ;;  %v1063_v56 = vsel %vm11748_vm3, 0, %v1062_v55 }
  0x92   : > { %1055 = vst [vmem:[#allocation2 + $0x60] sm:$0x1] %v1054_v35  ;;  %v1060_v43 = vsel %vm11748_vm3, 0, %v1059_v42  ;;  %1064 = vst [vmem:[#allocation2 + $0x84] sm:$0x1] %v1063_v56 }
  0x93   : > { %v2745_v2 = vrot.slane %v2744_v52, 4  ;;  %1061 = vst [vmem:[#allocation2 + $0x78] sm:$0x1] %v1060_v43  ;;  %v1065_v52 = vld [vmem:[#allocation2 + $0x90] sm:$0x1] }
  0x94   : > { %10828 = vmatmul.mubr.bf16.gmra.mrb[28].mxu0 %v331_v29  ;;  %v2359_v29 = vrot.slane %v2357_v23, 5  ;;  %v1146_v23 = vsel %vm11762_vm5, 0, %v1145_v21  ;;  %v1066_v54 = vsel %vm11748_vm3, 0, %v1065_v52  ;;  %v2037_v43 = vld [vmem:[#allocation2 + $0x18] sm:$0xf] }
  0x95   : > { %v2750_v11 = vsel %vm11813_vm11, %v2745_v2, %v2749_v44  ;;  %1147 = vst [vmem:[#allocation2 + $0x50] sm:$0x1] %v1146_v23  ;;  %v1056_v44 = vld [vmem:[#allocation2 + $0x6c] sm:$0x1]  ;;  %1067 = vst [vmem:[#allocation2 + $0x90] sm:$0x1] %v1066_v54 }
  0x96   : > { %v2360_v41 = vor.u32 %v2359_v29, %v2356_v22  ;;  %v9956_v16 = vcombine.low %v2750_v11, %v2760_v13  ;;  %v10147_v22 = vcombine.low %v5162_v19, %v5172_v20  ;;  %v1185_v29 = vsel %vm11762_vm5, 0, %v1184_v28  ;;  %v2149_v54 = vld [vmem:[#allocation2 + $0xf0] sm:$0xf]  ;;  %v2030_v62 = vld [vmem:[#allocation2 + $0xc] sm:$0xf] }
  0x97   : > { %1186 = vst [vmem:[#allocation2 + $0x104] sm:$0x1] %v1185_v29  ;;  %v1057_v47 = vsel %vm11748_vm3, 0, %v1056_v44  ;;  %v1069_v2 = vsel %vm11748_vm3, 0, %v1068_v1 }
  0x98   : > { %v2361_v51 = vrot.slane %v2360_v41, 4  ;;  %6165 = vrot.lane.b32.xlu1 %v9956_v16, %s11516_s12  ;;  %v11104_v41 = vld [vmem:[%s16324_s3 + $0x80] sm:$0xff]   ;;  %1058 = vst [vmem:[#allocation2 + $0x6c] sm:$0x1] %v1057_v47  ;;  %1070 = vst [vmem:[#allocation2 + $0x9c] sm:$0x1] %v1069_v2 }
  0x99   : > { %10863 = vmatprep.subr.bf16.mxu0 %v11104_v41 }
  0x9a   : > { %v2366_v58 = vsel %vm11813_vm11, %v2361_v51, %v2365_v25  ;;  %v1142_v25 = vld [vmem:[#allocation2 + $0x44] sm:$0x1]  ;;  %10864 = vmatpush3.bf16.msra.mxu0 %v11104_v41  ;;  %v11106_v51 = vld [vmem:[%s16324_s3 + $0x88] sm:$0xff]  }
  0x9b   : > { %v9940_v3 = vcombine.low %v2366_v58, %v2376_v63  ;;  %v1143_v27 = vsel %vm11762_vm5, 0, %v1142_v25  ;;  %10865 = vmatprep.subr.bf16.mxu0 %v11106_v51  ;;  %v351_v58 = vld [vmem:[%s11669_s15 + $0xc8] sm:$0xff]   ;;  %v1161_v63 = vsel %vm11762_vm5, 0, %v1160_v61 }
  0x9c   : > { %1144 = vst [vmem:[#allocation2 + $0x44] sm:$0x1] %v1143_v27  ;;  %10848 = vmatmul.mubr.bf16.gmra.mrb[16].mxu1 %v351_v58  ;;  %1162 = vst [vmem:[#allocation2 + $0x8c] sm:$0x1] %v1161_v63 }
  0x9d   : > { %6133 = vrot.lane.b32.xlu0 %v9940_v3, %s11516_s12  ;;  %v1169_v3 = vld [vmem:[#allocation2 + $0xb0] sm:$0x1] }
  0x9e   : > { %10866 = vmatpush3.bf16.msra.mxu0 %v11106_v51  ;;  %v1170_v5 = vsel %vm11762_vm5, 0, %v1169_v3 }
  0x9f   : > { %1171 = vst [vmem:[#allocation2 + $0xb0] sm:$0x1] %v1170_v5 }
  0xa1   : > { %7123 = vrot.lane.b32.xlu0 %v10147_v22, %s11517_s9 }
 0x12f   : > { %v10801_v8 = vpop.f32.mrb[0].mxu0  ;;  %v10833_v9 = vpop.f32.mrb[0].mxu1 }
 0x130   : > { %v671_v10 = vadd.f32 %v10801_v8, %v11895_v7  ;;  %v799_v11 = vadd.f32 %v10833_v9, %v11895_v7  ;;  %v662_v12 = vpop.f32.mrb[1].mxu0  ;;  %v790_v13 = vpop.f32.mrb[1].mxu1  ;;  %v2142_v8 = vld [vmem:[#allocation2 + $0xe4] sm:$0xf] }
 0x131   : > { %v663_v14 = vadd.f32 %v11895_v7, %v662_v12  ;;  %v791_v15 = vadd.f32 %v11895_v7, %v790_v13  ;;  %v10802_v16 = vpop.f32.mrb[2].mxu0  ;;  %v10834_v17 = vpop.f32.mrb[2].mxu1 }
 0x132   : > { %v919_v18 = vmax.f32 %v671_v10, 0.0  ;;  %v951_v19 = vmax.f32 %v799_v11, 0.0  ;;  %v674_v20 = vadd.f32 %v10802_v16, %v11895_v7  ;;  %v802_v21 = vadd.f32 %v10834_v17, %v11895_v7  ;;  %v665_v22 = vpop.f32.mrb[3].mxu0  ;;  %v793_v23 = vpop.f32.mrb[3].mxu1 }
 0x133   : > { %v917_v24 = vmax.f32 %v663_v14, 0.0  ;;  %v949_v25 = vmax.f32 %v791_v15, 0.0  ;;  %v666_v26 = vadd.f32 %v11895_v7, %v665_v22  ;;  %v794_v27 = vadd.f32 %v11895_v7, %v793_v23 }
 0x134   : > { %v10356_v28 = vpack.c.bf16 %v919_v18, %v919_v18  ;;  %v10388_v29 = vpack.c.bf16 %v951_v19, %v951_v19  ;;  %v920_v32 = vmax.f32 %v674_v20, 0.0  ;;  %v952_v33 = vmax.f32 %v802_v21, 0.0 }
 0x135   : > { %v10354_v34 = vpack.c.bf16 %v917_v24, %v917_v24  ;;  %v10386_v35 = vpack.c.bf16 %v949_v25, %v949_v25  ;;  %v918_v36 = vmax.f32 %v666_v26, 0.0  ;;  %v950_v37 = vmax.f32 %v794_v27, 0.0 }
 0x136   : > { %v1406_v38 = vshrl.u32 %v10356_v28, 16  ;;  %v1409_v39 = vshll.u32 %v10356_v28, 16  ;;  %v1678_v41 = vshrl.u32 %v10388_v29, 16  ;;  %v1681_v42 = vshll.u32 %v10388_v29, 16  ;;  %v2041_v28 = vld [vmem:[#allocation2 + $0x20] sm:$0x1] }
 0x137   : > { %v1389_v44 = vshrl.u32 %v10354_v34, 16  ;;  %v1392_v45 = vshll.u32 %v10354_v34, 16  ;;  %v1661_v47 = vshrl.u32 %v10386_v35, 16  ;;  %v1664_v48 = vshll.u32 %v10386_v35, 16  ;;  %v10805_v49 = vpop.f32.mrb[4].mxu0  ;;  %v11905_v50 = vpop.f32.mrb[4].mxu1 }
 0x138   : > { %v11907_v51 = vrot.slane %v1406_v38, 7  ;;  %v11909_v52 = vrot.slane %v1678_v41, 7  ;;  %v10357_v55 = vpack.c.bf16 %v920_v32, %v920_v32  ;;  %v10389_v56 = vpack.c.bf16 %v952_v33, %v952_v33  ;;  %v678_v57 = vpop.f32.mrb[5].mxu0  ;;  %v11911_v58 = vpop.f32.mrb[5].mxu1  ;;  %v2153_v38 = vld [vmem:[#allocation2 + $0xf8] sm:$0x1] }
 0x139   : > { %v11919_v61 = vrot.slane %v1389_v44, 7  ;;  %v11921_v63 = vrot.slane %v1661_v47, 7  ;;  %v10355_v53 = vpack.c.bf16 %v918_v36, %v918_v36  ;;  %v10387_v0 = vpack.c.bf16 %v950_v37, %v950_v37  ;;  %v11923_v1 = vpop.f32.mrb[6].mxu0  ;;  %v11925_v2 = vpop.f32.mrb[6].mxu1 }
 0x13a   : > { %v1411_v3 = vor.u32 %v1409_v39, %v11907_v51  ;;  %v1412_v4 = vrot.slane %v11907_v51, 4  ;;  %v1683_v5 = vor.u32 %v1681_v42, %v11909_v52  ;;  %v1684_v6 = vrot.slane %v11909_v52, 4  ;;  %v11931_v9 = vpop.f32.mrb[7].mxu0  ;;  %v11933_v10 = vpop.f32.mrb[7].mxu1 }
 0x13b   : > { %v1394_v11 = vor.u32 %v1392_v45, %v11919_v61  ;;  %v1395_v12 = vrot.slane %v11919_v61, 4  ;;  %v1666_v13 = vor.u32 %v1664_v48, %v11921_v63  ;;  %v1667_v14 = vrot.slane %v11921_v63, 4  ;;  %v2034_v45 = vld [vmem:[#allocation2 + $0x14] sm:$0x1] }
 0x13c   : > { %v2038_v15 = vsel %vm11915_vm13, %v1411_v3, %v2037_v43  ;;  %v2150_v16 = vsel %vm11915_vm13, %v1683_v5, %v2149_v54  ;;  %v1414_v17 = vshrl.u32 %v10357_v55, 16  ;;  %v1417_v18 = vshll.u32 %v10357_v55, 16 }
 0x13d   : > { %2039 = vst [vmem:[#allocation2 + $0x18] sm:$0xf] %v2038_v15  ;;  %2151 = vst [vmem:[#allocation2 + $0xf0] sm:$0xf] %v2150_v16  ;;  %v2031_v19 = vsel %vm11915_vm13, %v1394_v11, %v2030_v62  ;;  %v2143_v20 = vsel %vm11915_vm13, %v1666_v13, %v2142_v8  ;;  %v1686_v21 = vshrl.u32 %v10389_v56, 16  ;;  %v1689_v22 = vshll.u32 %v10389_v56, 16 }
 0x13e   : > { %2032 = vst [vmem:[#allocation2 + $0xc] sm:$0xf] %v2031_v19  ;;  %2144 = vst [vmem:[#allocation2 + $0xe4] sm:$0xf] %v2143_v20  ;;  %v1416_v23 = vrot.slane %v1414_v17, 7  ;;  %v1397_v24 = vshrl.u32 %v10355_v53, 16  ;;  %v687_v33 = vadd.f32 %v10805_v49, %v11895_v7  ;;  %v679_v34 = vadd.f32 %v11895_v7, %v678_v57 }
 0x13f   : > { %v1400_v25 = vshll.u32 %v10355_v53, 16  ;;  %v1669_v26 = vshrl.u32 %v10387_v0, 16  ;;  %v16384_v27 = vmov 0  ;;  %v1688_v29 = vrot.slane %v1686_v21, 7  ;;  %v10809_v35 = vpop.f32.mrb[8].mxu0 }
 0x140   : > { %v16385_v27 = vsel %vm11949_vm14, 4294967295, %v16384_v27  ;;  %v1672_v32 = vshll.u32 %v10387_v0, 16  ;;  %v1419_v36 = vor.u32 %v1417_v18, %v1416_v23  ;;  %v1421_v37 = vrot.slane %v1416_v23, 4  ;;  %v694_v42 = vpop.f32.mrb[9].mxu0  ;;  %v2146_v56 = vld [vmem:[#allocation2 + $0xec] sm:$0x1] }
 0x141   : > { %16386 = vst [vmem:[#allocation12_spill] sm:$0xff] %v16385_v27  ;;  %v1399_v39 = vrot.slane %v1397_v24, 7  ;;  %v1671_v41 = vrot.slane %v1669_v26, 7  ;;  %v1691_v43 = vor.u32 %v1689_v22, %v1688_v29  ;;  %v1693_v44 = vrot.slane %v1688_v29, 4  ;;  %v11955_v51 = vpop.f32.mrb[10].mxu0 }
 0x142   : > { %v923_v47 = vmax.f32 %v687_v33, 0.0  ;;  %v921_v48 = vmax.f32 %v679_v34, 0.0  ;;  %v1420_v52 = vsel %vm11949_vm14, %v1412_v4, %v1419_v36  ;;  %v2042_v49 = vsel %vm11748_vm3, %v1421_v37, %v2041_v28  ;;  %v11961_v57 = vpop.f32.mrb[11].mxu0  ;;  %v2044_v23 = vld [vmem:[#allocation2 + $0x24] sm:$0xf] }
 0x143   : > { %v1402_v54 = vor.u32 %v1400_v25, %v1399_v39  ;;  %v1404_v55 = vrot.slane %v1399_v39, 4  ;;  %2040 = vst.msk [vmem:[#allocation2 + $0x1c] sm:$0xf] %vm1013_vm0, %v1420_v52  ;;  %2043 = vst [vmem:[#allocation2 + $0x20] sm:$0x1] %v2042_v49  ;;  %v1692_v61 = vsel %vm11949_vm14, %v1684_v6, %v1691_v43  ;;  %v2154_v62 = vsel %vm11748_vm3, %v1693_v44, %v2153_v38 }
 0x144   : > { %v1674_v63 = vor.u32 %v1672_v32, %v1671_v41  ;;  %v1676_v53 = vrot.slane %v1671_v41, 4  ;;  %2152 = vst.msk [vmem:[#allocation2 + $0xf4] sm:$0xf] %vm1013_vm0, %v1692_v61  ;;  %2155 = vst [vmem:[#allocation2 + $0xf8] sm:$0x1] %v2154_v62  ;;  %v10360_v4 = vpack.c.bf16 %v923_v47, %v923_v47  ;;  %v10358_v5 = vpack.c.bf16 %v921_v48, %v921_v48 }
 0x145   : > { %v1403_v0 = vsel %vm11949_vm14, %v1395_v12, %v1402_v54  ;;  %v2035_v3 = vsel %vm11748_vm3, %v1404_v55, %v2034_v45  ;;  %v690_v11 = vadd.f32 %v11923_v1, %v11895_v7  ;;  %v682_v12 = vadd.f32 %v11895_v7, %v11931_v9  ;;  %v2051_v26 = vld [vmem:[#allocation2 + $0x30] sm:$0xf]  ;;  %v2048_v49 = vld [vmem:[#allocation2 + $0x2c] sm:$0x1] }
 0x146   : > { %2033 = vst.msk [vmem:[#allocation2 + $0x10] sm:$0xf] %vm1013_vm0, %v1403_v0  ;;  %2036 = vst [vmem:[#allocation2 + $0x14] sm:$0x1] %v2035_v3  ;;  %v1675_v6 = vsel %vm11949_vm14, %v1667_v14, %v1674_v63  ;;  %v2147_v8 = vsel %vm11748_vm3, %v1676_v53, %v2146_v56  ;;  %v1440_v13 = vshrl.u32 %v10360_v4, 16  ;;  %v1443_v15 = vshll.u32 %v10360_v4, 16 }
 0x147   : > { %2145 = vst.msk [vmem:[#allocation2 + $0xe8] sm:$0xf] %vm1013_vm0, %v1675_v6  ;;  %2148 = vst [vmem:[#allocation2 + $0xec] sm:$0x1] %v2147_v8  ;;  %v1423_v16 = vshrl.u32 %v10358_v5, 16  ;;  %v1426_v17 = vshll.u32 %v10358_v5, 16  ;;  %v703_v14 = vadd.f32 %v10809_v35, %v11895_v7  ;;  %v815_v20 = vadd.f32 %v11905_v50, %v11895_v7 }
 0x148   : > { %v924_v18 = vmax.f32 %v690_v11, 0.0  ;;  %v922_v19 = vmax.f32 %v682_v12, 0.0  ;;  %v11986_v21 = vpop.f32.mrb[12].mxu0  ;;  %v1442_v1 = vrot.slane %v1440_v13, 7  ;;  %v695_v9 = vadd.f32 %v11895_v7, %v694_v42  ;;  %v2055_v56 = vld [vmem:[#allocation2 + $0x38] sm:$0x1] }
 0x149   : > { %v1425_v22 = vrot.slane %v1423_v16, 7  ;;  %v807_v24 = vadd.f32 %v11895_v7, %v11911_v58  ;;  %v11991_v25 = vpop.f32.mrb[13].mxu0  ;;  %v927_v32 = vmax.f32 %v703_v14, 0.0  ;;  %v955_v33 = vmax.f32 %v815_v20, 0.0  ;;  %v2065_v14 = vld [vmem:[#allocation2 + $0x48] sm:$0xf] }
 0x14a   : > { %v10361_v28 = vpack.c.bf16 %v924_v18, %v924_v18  ;;  %v10359_v29 = vpack.c.bf16 %v922_v19, %v922_v19  ;;  %v11993_v34 = vpop.f32.mrb[14].mxu0  ;;  %v1445_v50 = vor.u32 %v1443_v15, %v1442_v1  ;;  %v1446_v35 = vrot.slane %v1442_v1, 4  ;;  %v2163_v20 = vld [vmem:[#allocation2 + $0x108] sm:$0xf] }
 0x14b   : > { %v1428_v36 = vor.u32 %v1426_v17, %v1425_v22  ;;  %v1429_v37 = vrot.slane %v1425_v22, 4  ;;  %v11995_v38 = vpop.f32.mrb[15].mxu0  ;;  %v10364_v45 = vpack.c.bf16 %v927_v32, %v927_v32  ;;  %v10392_v47 = vpack.c.bf16 %v955_v33, %v955_v33  ;;  %v12019_v22 = vpop.f32.mrb[8].mxu1 }
 0x14c   : > { %v1448_v39 = vshrl.u32 %v10361_v28, 16  ;;  %v1451_v41 = vshll.u32 %v10361_v28, 16  ;;  %v1431_v42 = vshrl.u32 %v10359_v29, 16  ;;  %v1434_v43 = vshll.u32 %v10359_v29, 16 }
 0x14d   : > { %v2052_v58 = vsel %vm11915_vm13, %v1445_v50, %v2051_v26  ;;  %v2045_v44 = vsel %vm11915_vm13, %v1428_v36, %v2044_v23  ;;  %v925_v54 = vmax.f32 %v695_v9, 0.0  ;;  %v953_v55 = vmax.f32 %v807_v24, 0.0 }
 0x14e   : > { %2053 = vst [vmem:[#allocation2 + $0x30] sm:$0xf] %v2052_v58  ;;  %2046 = vst [vmem:[#allocation2 + $0x24] sm:$0xf] %v2045_v44  ;;  %v1450_v48 = vrot.slane %v1448_v39, 7  ;;  %v1433_v52 = vrot.slane %v1431_v42, 7  ;;  %v818_v36 = vadd.f32 %v11925_v2, %v11895_v7  ;;  %v810_v42 = vadd.f32 %v11895_v7, %v11933_v10 }
 0x14f   : > { %v1474_v61 = vshrl.u32 %v10364_v45, 16  ;;  %v1477_v62 = vshll.u32 %v10364_v45, 16  ;;  %v1712_v63 = vshrl.u32 %v10392_v47, 16  ;;  %v1715_v53 = vshll.u32 %v10392_v47, 16  ;;  %v12001_v6 = vpop.f32.mrb[16].mxu0  ;;  %v12053_v10 = vpop.f32.mrb[9].mxu1 }
 0x150   : > { %v1453_v0 = vor.u32 %v1451_v41, %v1450_v48  ;;  %v1455_v3 = vrot.slane %v1450_v48, 4  ;;  %v1436_v4 = vor.u32 %v1434_v43, %v1433_v52  ;;  %v1438_v5 = vrot.slane %v1433_v52, 4  ;;  %v12007_v15 = vpop.f32.mrb[17].mxu0  ;;  %v2058_v43 = vld [vmem:[#allocation2 + $0x3c] sm:$0xf] }
 0x151   : > { %v12003_v8 = vrot.slane %v1474_v61, 7  ;;  %v12005_v11 = vrot.slane %v1712_v63, 7  ;;  %v10362_v12 = vpack.c.bf16 %v925_v54, %v925_v54  ;;  %v10390_v13 = vpack.c.bf16 %v953_v55, %v953_v55  ;;  %v12017_v1 = vpop.f32.mrb[18].mxu0  ;;  %v2156_v58 = vld [vmem:[#allocation2 + $0xfc] sm:$0xf] }
 0x152   : > { %v1454_v16 = vsel %vm11949_vm14, %v1446_v35, %v1453_v0  ;;  %v2056_v17 = vsel %vm11748_vm3, %v1455_v3, %v2055_v56  ;;  %v1437_v18 = vsel %vm11949_vm14, %v1429_v37, %v1436_v4  ;;  %v2049_v19 = vsel %vm11748_vm3, %v1438_v5, %v2048_v49  ;;  %v12025_v24 = vpop.f32.mrb[19].mxu0 }
 0x153   : > { %2054 = vst.msk [vmem:[#allocation2 + $0x34] sm:$0xf] %vm1013_vm0, %v1454_v16  ;;  %2057 = vst [vmem:[#allocation2 + $0x38] sm:$0x1] %v2056_v17  ;;  %v1479_v23 = vor.u32 %v1477_v62, %v12003_v8  ;;  %v1717_v9 = vor.u32 %v1715_v53, %v12005_v11  ;;  %v1457_v26 = vshrl.u32 %v10362_v12, 16  ;;  %v1460_v28 = vshll.u32 %v10362_v12, 16 }
 0x154   : > { %2047 = vst.msk [vmem:[#allocation2 + $0x28] sm:$0xf] %vm1013_vm0, %v1437_v18  ;;  %2050 = vst [vmem:[#allocation2 + $0x2c] sm:$0x1] %v2049_v19  ;;  %v1695_v29 = vshrl.u32 %v10390_v13, 16  ;;  %v1698_v32 = vshll.u32 %v10390_v13, 16  ;;  %v706_v35 = vadd.f32 %v11955_v51, %v11895_v7  ;;  %v698_v41 = vadd.f32 %v11895_v7, %v11961_v57 }
 0x155   : > { %v2066_v33 = vsel %vm11915_vm13, %v1479_v23, %v2065_v14  ;;  %v2164_v50 = vsel %vm11915_vm13, %v1717_v9, %v2163_v20  ;;  %v12035_v37 = vrot.slane %v1457_v26, 7  ;;  %v956_v45 = vmax.f32 %v818_v36, 0.0  ;;  %v2069_v23 = vld [vmem:[#allocation2 + $0x50] sm:$0x1] }
 0x156   : > { %2067 = vst [vmem:[#allocation2 + $0x48] sm:$0xf] %v2066_v33  ;;  %2165 = vst [vmem:[#allocation2 + $0x108] sm:$0xf] %v2164_v50  ;;  %v12037_v39 = vrot.slane %v1695_v29, 7  ;;  %v928_v44 = vmax.f32 %v706_v35, 0.0  ;;  %v719_v51 = vadd.f32 %v11986_v21, %v11895_v7  ;;  %v711_v2 = vadd.f32 %v11895_v7, %v11991_v25 }
 0x157   : > { %v1480_v47 = vrot.slane %v12003_v8, 4  ;;  %v1718_v48 = vrot.slane %v12005_v11, 4  ;;  %v1462_v52 = vor.u32 %v1460_v28, %v12035_v37  ;;  %v12051_v49 = vpop.f32.mrb[20].mxu0  ;;  %v10393_v55 = vpack.c.bf16 %v956_v45, %v956_v45  ;;  %v12063_v11 = vpop.f32.mrb[10].mxu1  ;;  %v2167_v28 = vld [vmem:[#allocation2 + $0x110] sm:$0x1] }
 0x158   : > { %v1700_v57 = vor.u32 %v1698_v32, %v12037_v39  ;;  %v10365_v54 = vpack.c.bf16 %v928_v44, %v928_v44  ;;  %v926_v56 = vmax.f32 %v698_v41, 0.0  ;;  %v954_v61 = vmax.f32 %v810_v42, 0.0  ;;  %v12055_v21 = vpop.f32.mrb[21].mxu0  ;;  %v12068_v19 = vpop.f32.mrb[11].mxu1 }
 0x159   : > { %v2059_v25 = vsel %vm11915_vm13, %v1462_v52, %v2058_v43  ;;  %v931_v63 = vmax.f32 %v719_v51, 0.0  ;;  %v929_v53 = vmax.f32 %v711_v2, 0.0  ;;  %v1720_v4 = vshrl.u32 %v10393_v55, 16  ;;  %v12061_v8 = vpop.f32.mrb[22].mxu0 }
 0x15a   : > { %v2157_v62 = vsel %vm11915_vm13, %v1700_v57, %v2156_v58  ;;  %2060 = vst [vmem:[#allocation2 + $0x3c] sm:$0xf] %v2059_v25  ;;  %v1482_v0 = vshrl.u32 %v10365_v54, 16  ;;  %v1485_v3 = vshll.u32 %v10365_v54, 16  ;;  %v1723_v5 = vshll.u32 %v10393_v55, 16  ;;  %v12066_v18 = vpop.f32.mrb[23].mxu0 }
 0x15b   : > { %2158 = vst [vmem:[#allocation2 + $0xfc] sm:$0xf] %v2157_v62  ;;  %v1463_v12 = vrot.slane %v12035_v37, 4  ;;  %v10363_v13 = vpack.c.bf16 %v926_v56, %v926_v56  ;;  %v10391_v16 = vpack.c.bf16 %v954_v61, %v954_v61  ;;  %v10368_v17 = vpack.c.bf16 %v931_v63, %v931_v63  ;;  %v2062_v57 = vld [vmem:[#allocation2 + $0x44] sm:$0x1] }
 0x15c   : > { %v1701_v14 = vrot.slane %v12037_v39, 4  ;;  %v1484_v20 = vrot.slane %v1482_v0, 7  ;;  %v1722_v9 = vrot.slane %v1720_v4, 7  ;;  %v10366_v26 = vpack.c.bf16 %v929_v53, %v929_v53  ;;  %v2160_v54 = vld [vmem:[#allocation2 + $0x104] sm:$0x1] }
 0x15d   : > { %v1465_v29 = vshrl.u32 %v10363_v13, 16  ;;  %v1468_v32 = vshll.u32 %v10363_v13, 16  ;;  %v1703_v33 = vshrl.u32 %v10391_v16, 16  ;;  %v1706_v50 = vshll.u32 %v10391_v16, 16  ;;  %v12089_v0 = vld [vmem:[#allocation2 + $0xf4] sm:$0xf] }
 0x15e   : > { %v1487_v35 = vor.u32 %v1485_v3, %v1484_v20  ;;  %v1489_v36 = vrot.slane %v1484_v20, 4  ;;  %v1725_v37 = vor.u32 %v1723_v5, %v1722_v9  ;;  %v1727_v41 = vrot.slane %v1722_v9, 4  ;;  %v12108_v9 = vld [vmem:[#allocation2 + $0x1c] sm:$0xf] }
 0x15f   : > { %v1467_v42 = vrot.slane %v1465_v29, 7  ;;  %v1705_v43 = vrot.slane %v1703_v33, 7  ;;  %v1508_v58 = vshrl.u32 %v10368_v17, 16  ;;  %v1511_v44 = vshll.u32 %v10368_v17, 16  ;;  %v12071_v45 = vpop.f32.mrb[24].mxu0 }
 0x160   : > { %v1488_v39 = vsel %vm11949_vm14, %v1480_v47, %v1487_v35  ;;  %v2070_v51 = vsel %vm11748_vm3, %v1489_v36, %v2069_v23  ;;  %v1726_v2 = vsel %vm11949_vm14, %v1718_v48, %v1725_v37  ;;  %v2168_v52 = vsel %vm11748_vm3, %v1727_v41, %v2167_v28  ;;  %v12081_v55 = vpop.f32.mrb[25].mxu0  ;;  %v2079_v17 = vld [vmem:[#allocation2 + $0x60] sm:$0xf]  ;;  %v5557_v35 = vld [vmem:[#allocation2 + $0x18] sm:$0xe] }
 0x161   : > { %2068 = vst.msk [vmem:[#allocation2 + $0x4c] sm:$0xf] %vm1013_vm0, %v1488_v39  ;;  %2071 = vst [vmem:[#allocation2 + $0x50] sm:$0x1] %v2070_v51  ;;  %v1470_v47 = vor.u32 %v1468_v32, %v1467_v42  ;;  %v1472_v56 = vrot.slane %v1467_v42, 4  ;;  %v1708_v61 = vor.u32 %v1706_v50, %v1705_v43  ;;  %v1710_v25 = vrot.slane %v1705_v43, 4 }
 0x162   : > { %2166 = vst.msk [vmem:[#allocation2 + $0x10c] sm:$0xf] %vm1013_vm0, %v1726_v2  ;;  %2169 = vst [vmem:[#allocation2 + $0x110] sm:$0x1] %v2168_v52  ;;  %v12085_v62 = vpop.f32.mrb[26].mxu0  ;;  %v12087_v48 = vrot.slane %v1508_v58, 7  ;;  %v722_v41 = vadd.f32 %v11993_v34, %v11895_v7  ;;  %v714_v42 = vadd.f32 %v11895_v7, %v11995_v38 }
 0x163   : > { %v1491_v63 = vshrl.u32 %v10366_v26, 16  ;;  %v1494_v53 = vshll.u32 %v10366_v26, 16  ;;  %v12091_v3 = vpop.f32.mrb[27].mxu0  ;;  %v1471_v4 = vsel %vm11949_vm14, %v1463_v12, %v1470_v47  ;;  %v2063_v5 = vsel %vm11748_vm3, %v1472_v56, %v2062_v57  ;;  %v12106_v12 = vld [vmem:[#allocation2 + $0xf0] sm:$0xf] }
 0x164   : > { %v1709_v13 = vsel %vm11949_vm14, %v1701_v14, %v1708_v61  ;;  %v2161_v16 = vsel %vm11748_vm3, %v1710_v25, %v2160_v54  ;;  %2061 = vst.msk [vmem:[#allocation2 + $0x40] sm:$0xf] %vm1013_vm0, %v1471_v4  ;;  %2064 = vst [vmem:[#allocation2 + $0x44] sm:$0x1] %v2063_v5  ;;  %v1513_v20 = vor.u32 %v1511_v44, %v12087_v48  ;;  %v2072_v26 = vld [vmem:[#allocation2 + $0x54] sm:$0xf] }
 0x165   : > { %2159 = vst.msk [vmem:[#allocation2 + $0x100] sm:$0xf] %vm1013_vm0, %v1709_v13  ;;  %2162 = vst [vmem:[#allocation2 + $0x104] sm:$0x1] %v2161_v16  ;;  %v12104_v23 = vrot.slane %v1491_v63, 7  ;;  %v10116_v14 = vcombine.low %v12106_v12, %v12089_v0  ;;  %v5687_v50 = vrot.slane %v12108_v9, 5 }
 0x166   : > { %v2080_v28 = vsel %vm11915_vm13, %v1513_v20, %v2079_v17  ;;  %v12115_v32 = vld [vmem:[#allocation2 + $0x18] sm:$0xf]  ;;  %v12129_v43 = vld [vmem:[#allocation2 + $0x1c] sm:$0xf]  ;;  %v12131_v58 = vld [vmem:[#allocation2 + $0x20] sm:$0x1] }
 0x167   : > { %v1496_v29 = vor.u32 %v1494_v53, %v12104_v23  ;;  %2081 = vst [vmem:[#allocation2 + $0x60] sm:$0xf] %v2080_v28  ;;  %6965 = vrot.lane.b32.xlu0 %v10116_v14, %s11515_s21  ;;  %v10100_v33 = vcombine.low %v12115_v32, %v12108_v9  ;;  %v12121_v36 = vpop.f32.mrb[28].mxu0  ;;  %v932_v51 = vmax.f32 %v722_v41, 0.0  ;;  %v930_v2 = vmax.f32 %v714_v42, 0.0 }
 0x168   : > { %v12133_v44 = vpop.f32.mrb[29].mxu0  ;;  %v12138_v52 = vld [vmem:[#allocation2 + $0x18] sm:$0xf]  ;;  %v9876_v38 = vrot.slane %v5557_v35, 9  ;;  %v5689_v54 = vrot.slane %v5687_v50, 4  ;;  %v5690_v47 = vrot.slane %v12131_v58, 5  ;;  %v735_v35 = vadd.f32 %v12001_v6, %v11895_v7 }
 0x169   : > { %v2073_v37 = vsel %vm11915_vm13, %v1496_v29, %v2072_v26  ;;  %6933 = vrot.lane.b32.xlu1 %v10100_v33, %s11515_s21  ;;  %v12136_v39 = vpop.f32.mrb[30].mxu0  ;;  %v10005_v34 = vcombine.low %v12138_v52, %v12129_v43  ;;  %v10369_v56 = vpack.c.bf16 %v932_v51, %v932_v51  ;;  %v10367_v61 = vpack.c.bf16 %v930_v2, %v930_v2  ;;  %v4341_v53 = vld [vmem:[#allocation2 + $0x18] sm:$0xe]  ;;  %v12150_v17 = vld [vmem:[#allocation2 + $0x20] sm:$0x1] }
 0x16a   : > { %2074 = vst [vmem:[#allocation2 + $0x54] sm:$0xf] %v2073_v37  ;;  %v12140_v57 = vpop.f32.mrb[31].mxu0  ;;  %v5688_v25 = vsel %vm11781_vm8, %v9876_v38, %v5687_v50  ;;  %v5691_v63 = vsel %vm11781_vm8, %v5689_v54, %v5690_v47  ;;  %v1514_v20 = vrot.slane %v12087_v48, 4  ;;  %v1497_v26 = vrot.slane %v12104_v23, 4 }
 0x16b   : > { %v1516_v4 = vshrl.u32 %v10369_v56, 16  ;;  %v1519_v5 = vshll.u32 %v10369_v56, 16  ;;  %v1499_v13 = vshrl.u32 %v10367_v61, 16  ;;  %v1502_v16 = vshll.u32 %v10367_v61, 16  ;;  %v2083_v33 = vld [vmem:[#allocation2 + $0x68] sm:$0x1] }
 0x16c   : > { %v10164_v14 = vcombine.low %v5688_v25, %v5691_v63  ;;  %v4477_v28 = vrot.slane %v12129_v43, 5  ;;  %v727_v37 = vadd.f32 %v11895_v7, %v12007_v15  ;;  %v2076_v41 = vld [vmem:[#allocation2 + $0x5c] sm:$0x1]  ;;  %v9845_v42 = vrot.slane %v4341_v53, 9  ;;  %v12165_v15 = vld [vmem:[#allocation2 + $0xf4] sm:$0xf] }
 0x16d   : > { %6487 = vrot.lane.b32.xlu1 %v10005_v34, %s11517_s9  ;;  %v1518_v29 = vrot.slane %v1516_v4, 7  ;;  %v1501_v50 = vrot.slane %v1499_v13, 7  ;;  %v4480_v48 = vrot.slane %v12150_v17, 5  ;;  %v935_v47 = vmax.f32 %v735_v35, 0.0  ;;  %v4357_v35 = vld [vmem:[#allocation2 + $0xf0] sm:$0xe] }
 0x16e   : > { %10867 = vmatprep.mubr.msk.bf16.mxu0 %vm7253_vm15, %v10164_v14  ;;  %v4479_v51 = vrot.slane %v4477_v28, 4  ;;  %v4478_v54 = vsel %vm11781_vm8, %v9845_v42, %v4477_v28  ;;  %v933_v56 = vmax.f32 %v727_v37, 0.0  ;;  %v12187_v42 = vld [vmem:[#allocation2 + $0xf8] sm:$0x1] }
 0x16f   : > { %v1521_v23 = vor.u32 %v1519_v5, %v1518_v29  ;;  %v1523_v2 = vrot.slane %v1518_v29, 4  ;;  %v1504_v34 = vor.u32 %v1502_v16, %v1501_v50  ;;  %v1506_v38 = vrot.slane %v1501_v50, 4  ;;  %v12177_v16 = vld [vmem:[#allocation2 + $0xf0] sm:$0xf] }
 0x170   : > { %v4481_v6 = vsel %vm11781_vm8, %v4479_v51, %v4480_v48  ;;  %v10372_v5 = vpack.c.bf16 %v935_v47, %v935_v47  ;;  %v10370_v13 = vpack.c.bf16 %v933_v56, %v933_v56  ;;  %v4589_v51 = vrot.slane %v12165_v15, 5  ;;  %v2093_v48 = vld [vmem:[#allocation2 + $0x78] sm:$0xf] }
 0x171   : > { %v1522_v61 = vsel %vm11949_vm14, %v1514_v20, %v1521_v23  ;;  %v2084_v25 = vsel %vm11748_vm3, %v1523_v2, %v2083_v33  ;;  %v1505_v63 = vsel %vm11949_vm14, %v1497_v26, %v1504_v34  ;;  %v2077_v53 = vsel %vm11748_vm3, %v1506_v38, %v2076_v41  ;;  %v2086_v23 = vld [vmem:[#allocation2 + $0x6c] sm:$0xf] }
 0x172   : > { %2082 = vst.msk [vmem:[#allocation2 + $0x64] sm:$0xf] %vm1013_vm0, %v1522_v61  ;;  %2085 = vst [vmem:[#allocation2 + $0x68] sm:$0x1] %v2084_v25  ;;  %v10069_v4 = vcombine.low %v4478_v54, %v4481_v6  ;;  %v10021_v20 = vcombine.low %v12177_v16, %v12165_v15  ;;  %v738_v26 = vadd.f32 %v12017_v1, %v11895_v7  ;;  %v1542_v14 = vshrl.u32 %v10372_v5, 16 }
 0x173   : > { %2075 = vst.msk [vmem:[#allocation2 + $0x58] sm:$0xf] %vm1013_vm0, %v1505_v63  ;;  %2078 = vst [vmem:[#allocation2 + $0x5c] sm:$0x1] %v2077_v53  ;;  %v1545_v28 = vshll.u32 %v10372_v5, 16  ;;  %v1525_v29 = vshrl.u32 %v10370_v13, 16  ;;  %v730_v2 = vadd.f32 %v11895_v7, %v12025_v24 }
 0x174   : > { %6743 = vrot.lane.b32.xlu0 %v10069_v4, %s11516_s12  ;;  %v1528_v33 = vshll.u32 %v10370_v13, 16  ;;  %6519 = vrot.lane.b32.xlu1 %v10021_v20, %s11517_s9  ;;  %v936_v50 = vmax.f32 %v738_v26, 0.0  ;;  %v1544_v37 = vrot.slane %v1542_v14, 7  ;;  %v9861_v54 = vrot.slane %v4357_v35, 9  ;;  %v12193_v6 = vld [vmem:[#allocation2 + $0x10] sm:$0xf] }
 0x175   : > { %v12185_v41 = vrot.slane %v1525_v29, 7  ;;  %v4591_v61 = vrot.slane %v4589_v51, 4  ;;  %v4592_v25 = vrot.slane %v12187_v42, 5  ;;  %v934_v5 = vmax.f32 %v730_v2, 0.0  ;;  %v12200_v24 = vld [vmem:[#allocation2 + $0xc] sm:$0xf] }
 0x176   : > { %v10373_v1 = vpack.c.bf16 %v936_v50, %v936_v50  ;;  %v1547_v34 = vor.u32 %v1545_v28, %v1544_v37  ;;  %v1548_v63 = vrot.slane %v1544_v37, 4  ;;  %v4590_v20 = vsel %vm11781_vm8, %v9861_v54, %v4589_v51  ;;  %v2097_v28 = vld [vmem:[#allocation2 + $0x80] sm:$0x1]  ;;  %v3540_v37 = vld [vmem:[#allocation2 + $0x14] sm:$0x1] }
 0x177   : > { %v1530_v38 = vor.u32 %v1528_v33, %v12185_v41  ;;  %v4593_v26 = vsel %vm11781_vm8, %v4591_v61, %v4592_v25  ;;  %v10004_v14 = vcombine.low %v12200_v24, %v12193_v6  ;;  %v10371_v33 = vpack.c.bf16 %v934_v5, %v934_v5  ;;  %v12210_v51 = vld [vmem:[#allocation2 + $0x28] sm:$0xf]  ;;  %v5558_v2 = vld [vmem:[#allocation2 + $0x24] sm:$0xe] }
 0x178   : > { %v1550_v47 = vshrl.u32 %v10373_v1, 16  ;;  %v1553_v56 = vshll.u32 %v10373_v1, 16  ;;  %v2094_v53 = vsel %vm11915_vm13, %v1547_v34, %v2093_v48  ;;  %v10085_v29 = vcombine.low %v4590_v20, %v4593_v26  ;;  %v4340_v48 = vld [vmem:[#allocation2 + $0xc] sm:$0xe] }
 0x179   : > { %v2087_v4 = vsel %vm11915_vm13, %v1530_v38, %v2086_v23  ;;  %2095 = vst [vmem:[#allocation2 + $0x78] sm:$0xf] %v2094_v53  ;;  %6485 = vrot.lane.b32.xlu1 %v10004_v14, %s11517_s9  ;;  %v1533_v23 = vshrl.u32 %v10371_v33, 16  ;;  %v1536_v1 = vshll.u32 %v10371_v33, 16  ;;  %v4470_v54 = vrot.slane %v12193_v6, 5 }
 0x17a   : > { %2088 = vst [vmem:[#allocation2 + $0x6c] sm:$0xf] %v2087_v4  ;;  %v1552_v13 = vrot.slane %v1550_v47, 7  ;;  %6775 = vrot.lane.b32.xlu0 %v10085_v29, %s11516_s12  ;;  %v1531_v47 = vrot.slane %v12185_v41, 4  ;;  %v9844_v61 = vrot.slane %v4340_v48, 9  ;;  %v751_v25 = vadd.f32 %v12051_v49, %v11895_v7 }
 0x17b   : > { %v4758_v53 = vld [vmem:[#allocation2 + $0x2c] sm:$0x1]  ;;  %v2090_v4 = vld [vmem:[#allocation2 + $0x74] sm:$0x1]  ;;  %v4472_v5 = vrot.slane %v4470_v54, 4  ;;  %v5694_v20 = vrot.slane %v12210_v51, 5 }
 0x17c   : > { %v1555_v50 = vor.u32 %v1553_v56, %v1552_v13  ;;  %v1557_v35 = vrot.slane %v1552_v13, 4  ;;  %v1535_v56 = vrot.slane %v1533_v23, 7  ;;  %v4473_v13 = vrot.slane %v3540_v37, 5 }
 0x17d   : > { %v4471_v41 = vsel %vm11781_vm8, %v9844_v61, %v4470_v54  ;;  %v5696_v49 = vrot.slane %v5694_v20, 4  ;;  %v12239_v54 = vld [vmem:[#allocation2 + $0xd0] sm:$0xf] }
 0x17e   : > { %v1556_v34 = vsel %vm11949_vm14, %v1548_v63, %v1555_v50  ;;  %v2098_v38 = vsel %vm11748_vm3, %v1557_v35, %v2097_v28  ;;  %v9877_v63 = vrot.slane %v5558_v2, 9  ;;  %v1538_v26 = vor.u32 %v1536_v1, %v1535_v56  ;;  %16387 = vst [vmem:[#allocation13_spill] sm:$0xff] %v12239_v54 }
 0x17f   : > { %2096 = vst.msk [vmem:[#allocation2 + $0x7c] sm:$0xf] %vm1013_vm0, %v1556_v34  ;;  %2099 = vst [vmem:[#allocation2 + $0x80] sm:$0x1] %v2098_v38  ;;  %v1540_v14 = vrot.slane %v1535_v56, 4  ;;  %v939_v28 = vmax.f32 %v751_v25, 0.0  ;;  %v4474_v29 = vsel %vm11781_vm8, %v4472_v5, %v4473_v13  ;;  %v743_v2 = vadd.f32 %v11895_v7, %v12055_v21 }
 0x180   : > { %v5695_v33 = vsel %vm11781_vm8, %v9877_v63, %v5694_v20  ;;  %v5697_v50 = vrot.slane %v4758_v53, 5  ;;  %v1539_v35 = vsel %vm11949_vm14, %v1531_v47, %v1538_v26  ;;  %v10068_v48 = vcombine.low %v4471_v41, %v4474_v29  ;;  %v3509_v38 = vld [vmem:[#allocation2 + $0xe8] sm:$0xf]  ;;  %v12243_v5 = vld [vmem:[#allocation2 + $0xe4] sm:$0xf] }
 0x181   : > { %v2091_v37 = vsel %vm11748_vm3, %v1540_v14, %v2090_v4  ;;  %v10376_v23 = vpack.c.bf16 %v939_v28, %v939_v28  ;;  %2089 = vst.msk [vmem:[#allocation2 + $0x70] sm:$0xf] %vm1013_vm0, %v1539_v35  ;;  %v754_v34 = vadd.f32 %v12061_v8, %v11895_v7  ;;  %v16330_v47 = vrot.slane %v12239_v54, 5  ;;  %v2107_v8 = vld [vmem:[#allocation2 + $0x90] sm:$0xf] }
 0x182   : > { %2092 = vst [vmem:[#allocation2 + $0x74] sm:$0x1] %v2091_v37  ;;  %v5698_v1 = vsel %vm11781_vm8, %v5696_v49, %v5697_v50  ;;  %6741 = vrot.lane.b32.xlu0 %v10068_v48, %s11516_s12  ;;  %v937_v53 = vmax.f32 %v743_v2, 0.0  ;;  %v10020_v21 = vcombine.low %v12243_v5, %v3509_v38  ;;  %v746_v26 = vadd.f32 %v11895_v7, %v12066_v18  ;;  %v12253_v41 = vld [vmem:[#allocation2 + $0xd4] sm:$0x1] }
 0x183   : > { %v1576_v56 = vshrl.u32 %v10376_v23, 16  ;;  %v1579_v61 = vshll.u32 %v10376_v23, 16  ;;  %v10165_v25 = vcombine.low %v5695_v33, %v5698_v1  ;;  %v940_v4 = vmax.f32 %v754_v34, 0.0  ;;  %16389 = vst [vmem:[#allocation15_spill] sm:$0xff] %v12253_v41  ;;  %v3556_v33 = vld [vmem:[#allocation2 + $0xec] sm:$0x1] }
 0x184   : > { %v10374_v63 = vpack.c.bf16 %v937_v53, %v937_v53  ;;  %v12251_v14 = vrot.slane %v16330_v47, 4  ;;  %6517 = vrot.lane.b32.xlu1 %v10020_v21, %s11517_s9  ;;  %v4356_v49 = vld [vmem:[#allocation2 + $0xe4] sm:$0xe]  ;;  %v5559_v23 = vld [vmem:[#allocation2 + $0x30] sm:$0xe]  ;;  %v5174_v7 = vshrl.u32 %v12106_v12, 16 }
 0x185   : > { %v1578_v13 = vrot.slane %v1576_v56, 7  ;;  %10868 = vmatmul.mubr.msk.bf16.vlgmr.msra.gmra.mrb[32].mxu0 %vm7253_vm15, %v10165_v25  ;;  %v10377_v20 = vpack.c.bf16 %v940_v4, %v940_v4  ;;  %v2100_v2 = vld [vmem:[#allocation2 + $0x84] sm:$0xf]  ;;  %v938_v34 = vmax.f32 %v746_v26, 0.0  ;;  %v4759_v56 = vld [vmem:[#allocation2 + $0x38] sm:$0x1] }
 0x186   : > { %16388 = vst [vmem:[#allocation14_spill] sm:$0xff] %v12251_v14  ;;  %v1559_v50 = vshrl.u32 %v10374_v63, 16  ;;  %v1562_v35 = vshll.u32 %v10374_v63, 16  ;;  %v9860_v53 = vrot.slane %v4356_v49, 9  ;;  %v4582_v4 = vrot.slane %v3509_v38, 5 }
 0x187   : > { %v1581_v29 = vor.u32 %v1579_v61, %v1578_v13  ;;  %v1584_v37 = vshrl.u32 %v10377_v20, 16  ;;  %v1587_v48 = vshll.u32 %v10377_v20, 16  ;;  %v1582_v18 = vrot.slane %v1578_v13, 4  ;;  %v12260_v21 = vld [vmem:[#allocation2 + $0x34] sm:$0xf] }
 0x188   : > { %v1561_v61 = vrot.slane %v1559_v50, 7  ;;  %v2111_v63 = vld [vmem:[#allocation2 + $0x98] sm:$0x1]  ;;  %v10375_v47 = vpack.c.bf16 %v938_v34, %v938_v34  ;;  %v4585_v20 = vrot.slane %v3556_v33, 5  ;;  %v9878_v28 = vrot.slane %v5559_v23, 9 }
 0x189   : > { %v2108_v1 = vsel %vm11915_vm13, %v1581_v29, %v2107_v8  ;;  %v1586_v25 = vrot.slane %v1584_v37, 7  ;;  %v5701_v30 = vrot.slane %v12260_v21, 5  ;;  %v5704_v8 = vrot.slane %v4759_v56, 5  ;;  %v12263_v50 = vld [vmem:[#allocation2 + $0x1c] sm:$0xf] }
 0x18a   : > { %2109 = vst [vmem:[#allocation2 + $0x90] sm:$0xf] %v2108_v1  ;;  %v1564_v13 = vor.u32 %v1562_v35, %v1561_v61  ;;  %v1565_v29 = vrot.slane %v1561_v61, 4  ;;  %v1567_v26 = vshrl.u32 %v10375_v47, 16  ;;  %v1570_v41 = vshll.u32 %v10375_v47, 16 }
 0x18b   : > { %v1589_v54 = vor.u32 %v1587_v48, %v1586_v25  ;;  %v1591_v14 = vrot.slane %v1586_v25, 4  ;;  %v4584_v1 = vrot.slane %v4582_v4, 4  ;;  %v4583_v35 = vsel %vm11781_vm8, %v9860_v53, %v4582_v4  ;;  %v3123_v37 = vld [vmem:[#allocation2 + $0x18] sm:$0xe]  ;;  %v12282_v61 = vld [vmem:[#allocation2 + $0x30] sm:$0xf] }
 0x18c   : > { %v2101_v38 = vsel %vm11915_vm13, %v1564_v13, %v2100_v2  ;;  %v1569_v47 = vrot.slane %v1567_v26, 7  ;;  %v5702_v23 = vsel %vm11781_vm8, %v9878_v28, %v5701_v30  ;;  %v5703_v2 = vrot.slane %v5701_v30, 4  ;;  %v5560_v13 = vld [vmem:[#allocation2 + $0x3c] sm:$0xe] }
 0x18d   : > { %v1590_v49 = vsel %vm11949_vm14, %v1582_v18, %v1589_v54  ;;  %v2112_v33 = vsel %vm11748_vm3, %v1591_v14, %v2111_v63  ;;  %2102 = vst [vmem:[#allocation2 + $0x84] sm:$0xf] %v2101_v38  ;;  %v4586_v48 = vsel %vm11781_vm8, %v4584_v1, %v4585_v20  ;;  %v12278_v54 = vld [vmem:[#allocation2 + $0x20] sm:$0x1]  ;;  %v5177_v14 = vshll.u32 %v12106_v12, 16 }
 0x18e   : > { %2110 = vst.msk [vmem:[#allocation2 + $0x94] sm:$0xf] %vm1013_vm0, %v1590_v49  ;;  %2113 = vst [vmem:[#allocation2 + $0x98] sm:$0x1] %v2112_v33  ;;  %v2104_v18 = vld [vmem:[#allocation2 + $0x8c] sm:$0x1]  ;;  %v10084_v34 = vcombine.low %v4583_v35, %v4586_v48  ;;  %v1572_v25 = vor.u32 %v1570_v41, %v1569_v47  ;;  %v5705_v4 = vsel %vm11781_vm8, %v5703_v2, %v5704_v8 }
 0x18f   : > { %v3268_v56 = vrot.slane %v12263_v50, 5  ;;  %v1574_v53 = vrot.slane %v1569_v47, 4  ;;  %v9814_v63 = vrot.slane %v3123_v37, 9  ;;  %v4700_v20 = vld [vmem:[#allocation2 + $0x40] sm:$0xf]  ;;  %v12286_v28 = vrot.slane %v5174_v7, 4 }
 0x190   : > { %6773 = vrot.lane.b32.xlu0 %v10084_v34, %s11516_s12  ;;  %v10166_v30 = vcombine.low %v5702_v23, %v5705_v4  ;;  %v3271_v1 = vrot.slane %v12278_v54, 5  ;;  %v4760_v38 = vld [vmem:[#allocation2 + $0x44] sm:$0x1]  ;;  %v1573_v49 = vsel %vm11949_vm14, %v1565_v29, %v1572_v25  ;;  %v10102_v7 = vcombine.low %v12282_v61, %v12260_v21  ;;  %v12305_v29 = vld [vmem:[%s16323_s2] ss:$0 sm:$0xff] }
 0x191   : > { %v3270_v26 = vrot.slane %v3268_v56, 4  ;;  %v2105_v41 = vsel %vm11748_vm3, %v1574_v53, %v2104_v18  ;;  %v3269_v8 = vsel %vm11781_vm8, %v9814_v63, %v3268_v56  ;;  %2103 = vst.msk [vmem:[#allocation2 + $0x88] sm:$0xf] %vm1013_vm0, %v1573_v49  ;;  %v767_v35 = vadd.f32 %v12305_v29, %v12071_v45  ;;  %v12309_v48 = vld [vmem:[#allocation2 + $0xf4] sm:$0xf] }
 0x192   : > { %2106 = vst [vmem:[#allocation2 + $0x8c] sm:$0x1] %v2105_v41  ;;  %10871 = vmatprep.mubr.msk.bf16.mxu0 %vm7253_vm15, %v10166_v30  ;;  %v9879_v37 = vrot.slane %v5560_v13, 9  ;;  %v5708_v47 = vrot.slane %v4700_v20, 5  ;;  %v5711_v23 = vrot.slane %v4760_v38, 5  ;;  %v759_v2 = vadd.f32 %v12305_v29, %v12081_v55 }
 0x193   : > { %v3272_v33 = vsel %vm11781_vm8, %v3270_v26, %v3271_v1  ;;  %v770_v18 = vadd.f32 %v12305_v29, %v12085_v62  ;;  %v3139_v34 = vld [vmem:[#allocation2 + $0xf0] sm:$0xe]  ;;  %v4790_v56 = vshrl.u32 %v12115_v32, 16  ;;  %v943_v25 = vmax.f32 %v767_v35, 0.0  ;;  %v12319_v4 = vld [vmem:[#allocation2 + $0xf8] sm:$0x1] }
 0x194   : > { %v9974_v21 = vcombine.low %v3269_v8, %v3272_v33  ;;  %6937 = vrot.lane.b32.xlu0 %v10102_v7, %s11515_s21  ;;  %v5709_v45 = vsel %vm11781_vm8, %v9879_v37, %v5708_v47  ;;  %v5710_v53 = vrot.slane %v5708_v47, 4  ;;  %v4793_v63 = vshll.u32 %v12115_v32, 16 }
 0x195   : > { %v941_v55 = vmax.f32 %v759_v2, 0.0  ;;  %v944_v20 = vmax.f32 %v770_v18, 0.0  ;;  %v3380_v62 = vrot.slane %v12309_v48, 5  ;;  %v10380_v13 = vpack.c.bf16 %v943_v25, %v943_v25  ;;  %v2121_v18 = vld [vmem:[#allocation2 + $0xa8] sm:$0xf] }
 0x196   : > { %6297 = vrot.lane.b32.xlu1 %v9974_v21, %s11515_s21  ;;  %v5712_v30 = vsel %vm11781_vm8, %v5710_v53, %v5711_v23  ;;  %v9830_v26 = vrot.slane %v3139_v34, 9  ;;  %v762_v1 = vadd.f32 %v12305_v29, %v12091_v3  ;;  %v3383_v8 = vrot.slane %v12319_v4, 5  ;;  %v2114_v34 = vld [vmem:[#allocation2 + $0x9c] sm:$0xf] }
 0x197   : > { %v10167_v38 = vcombine.low %v5709_v45, %v5712_v30  ;;  %v10378_v49 = vpack.c.bf16 %v941_v55, %v941_v55  ;;  %v10381_v41 = vpack.c.bf16 %v944_v20, %v944_v20  ;;  %v1610_v32 = vshrl.u32 %v10380_v13, 16 }
 0x198   : > { %v1613_v7 = vshll.u32 %v10380_v13, 16  ;;  %v3382_v33 = vrot.slane %v3380_v62, 4  ;;  %v942_v35 = vmax.f32 %v762_v1, 0.0  ;;  %v3381_v3 = vsel %vm11781_vm8, %v9830_v26, %v3380_v62  ;;  %v2125_v13 = vld [vmem:[#allocation2 + $0xb0] sm:$0x1]  ;;  %v11124_v62 = vld [vmem:[%s16324_s3] sm:$0xff]  }
 0x199   : > { %10872 = vmatmul.mubr.msk.bf16.gmra.mrb[36].mxu0 %vm7253_vm15, %v10167_v38  ;;  %v1593_v37 = vshrl.u32 %v10378_v49, 16  ;;  %v1596_v47 = vshll.u32 %v10378_v49, 16  ;;  %v1618_v21 = vshrl.u32 %v10381_v41, 16  ;;  %v1621_v2 = vshll.u32 %v10381_v41, 16  ;;  %8016 = vmatpush1.bf16.msra.mxu1 %v11124_v62 }
 0x19a   : > { %v1612_v23 = vrot.slane %v1610_v32, 7  ;;  %v3384_v25 = vsel %vm11781_vm8, %v3382_v33, %v3383_v8  ;;  %v10379_v45 = vpack.c.bf16 %v942_v35, %v942_v35  ;;  %v12336_v53 = vrot.slane %v5177_v14, 5  ;;  %v12338_v32 = vld [vmem:[#allocation2 + $0x10] sm:$0xf]  ;;  %v2118_v33 = vld [vmem:[#allocation2 + $0xa4] sm:$0x1] }
 0x19b   : > { %v1595_v55 = vrot.slane %v1593_v37, 7  ;;  %v1620_v20 = vrot.slane %v1618_v21, 7  ;;  %v9990_v30 = vcombine.low %v3381_v3, %v3384_v25  ;;  %v12343_v26 = vrot.slane %v4790_v56, 4  ;;  %v12346_v35 = vld [vmem:[#allocation2 + $0x108] sm:$0xf] }
 0x19c   : > { %v1615_v1 = vor.u32 %v1613_v7, %v1612_v23  ;;  %v1616_v38 = vrot.slane %v1612_v23, 4  ;;  %v1601_v49 = vshrl.u32 %v10379_v45, 16  ;;  %v1604_v41 = vshll.u32 %v10379_v45, 16  ;;  %v3122_v7 = vld [vmem:[#allocation2 + $0xc] sm:$0xe] }
 0x19d   : > { %v1598_v8 = vor.u32 %v1596_v47, %v1595_v55  ;;  %v1623_v12 = vor.u32 %v1621_v2, %v1620_v20  ;;  %v1625_v14 = vrot.slane %v1620_v20, 4  ;;  %6329 = vrot.lane.b32.xlu1 %v9990_v30, %s11515_s21  ;;  %v5561_v37 = vld [vmem:[#allocation2 + $0x48] sm:$0xe]  ;;  %v4795_v21 = vrot.slane %v4793_v63, 5  ;;  %v12350_v45 = vld [vmem:[#allocation2 + $0x4c] sm:$0xf] }
 0x19e   : > { %v2122_v23 = vsel %vm11915_vm13, %v1615_v1, %v2121_v18  ;;  %v1599_v3 = vrot.slane %v1595_v55, 4  ;;  %v1603_v25 = vrot.slane %v1601_v49, 7  ;;  %16390 = vst [vmem:[#allocation16_spill] sm:$0xff] %v12350_v45  ;;  %v4803_v56 = vshrl.u32 %v12108_v9, 16  ;;  %v12359_v20 = vld [vmem:[#allocation2 + $0x10c] sm:$0xf] }
 0x19f   : > { %2123 = vst [vmem:[#allocation2 + $0xa8] sm:$0xf] %v2122_v23  ;;  %v2115_v47 = vsel %vm11915_vm13, %v1598_v8, %v2114_v34  ;;  %v1624_v2 = vsel %vm11949_vm14, %v1616_v38, %v1623_v12  ;;  %v2126_v63 = vsel %vm11748_vm3, %v1625_v14, %v2125_v13  ;;  %16391 = vst [vmem:[#allocation17_spill] sm:$0xff] %v12359_v20  ;;  %v4761_v18 = vld [vmem:[#allocation2 + $0x50] sm:$0x1]  ;;  %v16392_v55 = vmov 0  }
 0x1a0   : > { %8017 = vmatprep.subr.bf16.mxu1 %v16392_v55  ;;  %2116 = vst [vmem:[#allocation2 + $0x9c] sm:$0xf] %v2115_v47  ;;  %2124 = vst.msk [vmem:[#allocation2 + $0xac] sm:$0xf] %vm1013_vm0, %v1624_v2  ;;  %v1606_v1 = vor.u32 %v1604_v41, %v1603_v25  ;;  %v1608_v49 = vrot.slane %v1603_v25, 4  ;;  %v10118_v34 = vcombine.low %v12346_v35, %v12359_v20  ;;  %v9813_v62 = vrot.slane %v3122_v7, 9 }
 0x1a1   : > { %2127 = vst [vmem:[#allocation2 + $0xb0] sm:$0x1] %v2126_v63  ;;  %v12366_v38 = vld [vmem:[#allocation2 + $0x14] sm:$0x1]  ;;  %v3261_v13 = vrot.slane %v12338_v32, 5  ;;  %v9880_v8 = vrot.slane %v5561_v37, 9  ;;  %v4796_v7 = vor.u32 %v4795_v21, %v12343_v26 }
 0x1a2   : > { %v5715_v12 = vrot.slane %v12350_v45, 5  ;;  %v11126_v14 = vld [vmem:[%s16324_s3 + $0x8] sm:$0xff]   ;;  %v1607_v23 = vsel %vm11949_vm14, %v1599_v3, %v1606_v1  ;;  %v2119_v41 = vsel %vm11748_vm3, %v1608_v49, %v2118_v33  ;;  %6969 = vrot.lane.b32.xlu0 %v10118_v34, %s11515_s21  ;;  %v5718_v25 = vrot.slane %v4761_v18, 5  ;;  %v1077_v47 = vld [vmem:[#allocation2 + $0xc0] sm:$0x1] }
 0x1a3   : > { %v5562_v2 = vld [vmem:[#allocation2 + $0x54] sm:$0xe]  ;;  %2117 = vst.msk [vmem:[#allocation2 + $0xa0] sm:$0xf] %vm1013_vm0, %v1607_v23  ;;  %2120 = vst [vmem:[#allocation2 + $0xa4] sm:$0x1] %v2119_v41  ;;  %8018 = vmatpush1.bf16.msra.mxu1 %v11126_v14  ;;  %v3262_v33 = vsel %vm11781_vm8, %v9813_v62, %v3261_v13 }
 0x1a4   : > { %v3263_v37 = vrot.slane %v3261_v13, 4  ;;  %v3264_v63 = vrot.slane %v12366_v38, 5  ;;  %v5716_v30 = vsel %vm11781_vm8, %v9880_v8, %v5715_v12  ;;  %v5717_v3 = vrot.slane %v5715_v12, 4  ;;  %v4704_v1 = vld [vmem:[#allocation2 + $0x58] sm:$0xf]  ;;  %8019 = vmatprep.subr.bf16.mxu1 %v16392_v55 }
 0x1a5   : > { %v4799_v18 = vshll.u32 %v12108_v9, 16  ;;  %v4805_v26 = vrot.slane %v4803_v56, 4  ;;  %v4809_v21 = vshll.u32 %v12131_v58, 16  ;;  %v4762_v49 = vld [vmem:[#allocation2 + $0x5c] sm:$0x1]  ;;  %v783_v12 = vadd.f32 %v12305_v29, %v12121_v36 }
 0x1a6   : > { %v3265_v34 = vsel %vm11781_vm8, %v3263_v37, %v3264_v63  ;;  %v5719_v8 = vsel %vm11781_vm8, %v5717_v3, %v5718_v25  ;;  %v1078_v62 = vsel %vm11748_vm3, 0, %v1077_v47  ;;  %v1074_v13 = vld [vmem:[#allocation2 + $0xb4] sm:$0x1]  ;;  %v4797_v14 = vrot.slane %v4796_v7, 4  ;;  %v1175_v37 = vld [vmem:[#allocation2 + $0xc8] sm:$0x1] }
 0x1a7   : > { %v9973_v9 = vcombine.low %v3262_v33, %v3265_v34  ;;  %v10168_v56 = vcombine.low %v5716_v30, %v5719_v8  ;;  %v4801_v58 = vrot.slane %v4799_v18, 5  ;;  %1079 = vst [vmem:[#allocation2 + $0xc0] sm:$0x1] %v1078_v62  ;;  %v947_v23 = vmax.f32 %v783_v12, 0.0  ;;  %v11129_v33 = vld [vmem:[%s16324_s3 + $0x10] sm:$0xff]  }
 0x1a8   : > { %v9881_v41 = vrot.slane %v5562_v2, 9  ;;  %v5722_v45 = vrot.slane %v4704_v1, 5  ;;  %v5725_v20 = vrot.slane %v4762_v49, 5  ;;  %v4811_v36 = vrot.slane %v4809_v21, 5  ;;  %v12406_v1 = vld [vmem:[#allocation2 + $0xe8] sm:$0xf]  ;;  %8020 = vmatpush1.bf16.msra.mxu1 %v11129_v33 }
 0x1a9   : > { %6295 = vrot.lane.b32.xlu1 %v9973_v9, %s11515_s21  ;;  %10875 = vmatprep.mubr.msk.bf16.mxu0 %vm7253_vm15, %v10168_v56  ;;  %v4806_v25 = vor.u32 %v4805_v26, %v4801_v58  ;;  %v775_v47 = vadd.f32 %v12305_v29, %v12133_v44  ;;  %v1075_v30 = vsel %vm11748_vm3, 0, %v1074_v13  ;;  %v10384_v7 = vpack.c.bf16 %v947_v23, %v947_v23  ;;  %v3138_v49 = vld [vmem:[#allocation2 + $0xe4] sm:$0xe]  ;;  %v12417_v12 = vld [vmem:[#allocation2 + $0xec] sm:$0x1]  ;;  %v11130_v33 = vld [vmem:[%s16324_s3 + $0x18] sm:$0xff]  }
 0x1aa   : > { %v5723_v63 = vsel %vm11781_vm8, %v9881_v41, %v5722_v45  ;;  %v5724_v2 = vrot.slane %v5722_v45, 4  ;;  %1076 = vst [vmem:[#allocation2 + $0xb4] sm:$0x1] %v1075_v30  ;;  %v786_v3 = vadd.f32 %v12305_v29, %v12136_v39  ;;  %v4802_v44 = vsel %vm11813_vm11, %v4797_v14, %v4801_v58  ;;  %8021 = vmatprep.subr.bf16.mxu1 %v16392_v55  ;;  %v4716_v27 = vld [vmem:[#allocation2 + $0xa0] sm:$0xf] }
 0x1ab   : > { %v4807_v18 = vrot.slane %v4806_v25, 4  ;;  %v945_v26 = vmax.f32 %v775_v47, 0.0  ;;  %v1176_v21 = vsel %vm11762_vm5, 0, %v1175_v37  ;;  %v1644_v45 = vshrl.u32 %v10384_v7, 16  ;;  %v1172_v37 = vld [vmem:[#allocation2 + $0xbc] sm:$0x1] }
 0x1ac   : > { %v1647_v34 = vshll.u32 %v10384_v7, 16  ;;  %v5726_v39 = vsel %vm11781_vm8, %v5724_v2, %v5725_v20  ;;  %v948_v8 = vmax.f32 %v786_v3, 0.0  ;;  %1177 = vst [vmem:[#allocation2 + $0xc8] sm:$0x1] %v1176_v21  ;;  %v3373_v56 = vrot.slane %v12406_v1, 5  ;;  %8022 = vmatpush1.bf16.msra.mxu1 %v11130_v33 }
 0x1ad   : > { %v4812_v62 = vsel %vm11813_vm11, %v4807_v18, %v4811_v36  ;;  %v10169_v13 = vcombine.low %v5723_v63, %v5726_v39  ;;  %v10382_v9 = vpack.c.bf16 %v945_v26, %v945_v26  ;;  %v1646_v58 = vrot.slane %v1644_v45, 7  ;;  %8023 = vmatprep.subr.bf16.mxu1 %v16392_v55  ;;  %v4708_v33 = vld [vmem:[#allocation2 + $0x70] sm:$0xf]  ;;  %v4768_v59 = vld [vmem:[#allocation2 + $0xa4] sm:$0x1] }
 0x1ae   : > { %v10132_v14 = vcombine.low %v4802_v44, %v4812_v62  ;;  %v10385_v23 = vpack.c.bf16 %v948_v8, %v948_v8  ;;  %v9829_v41 = vrot.slane %v3138_v49, 9  ;;  %v2135_v20 = vld [vmem:[#allocation2 + $0xc0] sm:$0xf]  ;;  %v3375_v30 = vrot.slane %v3373_v56, 4  ;;  %v12441_v62 = vld [vmem:[#allocation2 + $0x24] sm:$0xf] }
 0x1af   : > { %10876 = vmatmul.mubr.msk.bf16.gmra.mrb[40].mxu0 %vm7253_vm15, %v10169_v13  ;;  %v1627_v25 = vshrl.u32 %v10382_v9, 16  ;;  %v1630_v47 = vshll.u32 %v10382_v9, 16  ;;  %v3376_v7 = vrot.slane %v12417_v12, 5  ;;  %v1649_v36 = vor.u32 %v1647_v34, %v1646_v58 }
 0x1b0   : > { %7093 = vrot.lane.b32.xlu0 %v10132_v14, %s11517_s9  ;;  %v1652_v63 = vshrl.u32 %v10385_v23, 16  ;;  %v1655_v2 = vshll.u32 %v10385_v23, 16  ;;  %v3374_v3 = vsel %vm11781_vm8, %v9829_v41, %v3373_v56  ;;  %v778_v26 = vadd.f32 %v12305_v29, %v12140_v57 }
 0x1b1   : > { %v12431_v44 = vrot.slane %v1627_v25, 7  ;;  %v3377_v18 = vsel %vm11781_vm8, %v3375_v30, %v3376_v7  ;;  %v1173_v21 = vsel %vm11762_vm5, 0, %v1172_v37  ;;  %v1650_v49 = vrot.slane %v1646_v58, 4  ;;  %v2128_v34 = vld [vmem:[#allocation2 + $0xb4] sm:$0xf] }
 0x1b2   : > { %v2136_v45 = vsel %vm11915_vm13, %v1649_v36, %v2135_v20  ;;  %v1654_v39 = vrot.slane %v1652_v63, 7  ;;  %v9989_v8 = vcombine.low %v3374_v3, %v3377_v18  ;;  %1174 = vst [vmem:[#allocation2 + $0xbc] sm:$0x1] %v1173_v21  ;;  %v5187_v13 = vshrl.u32 %v12089_v0, 16  ;;  %v12455_v7 = vld [vmem:[#allocation2 + $0x30] sm:$0xf] }
 0x1b3   : > { %v3600_v9 = vshll.u32 %v12138_v52, 16  ;;  %2137 = vst [vmem:[#allocation2 + $0xc0] sm:$0xf] %v2136_v45  ;;  %v1632_v57 = vor.u32 %v1630_v47, %v12431_v44  ;;  %v2139_v56 = vld [vmem:[#allocation2 + $0xc8] sm:$0x1]  ;;  %v946_v14 = vmax.f32 %v778_v26, 0.0  ;;  %v10101_v37 = vcombine.low %v12441_v62, %v12210_v51 }
 0x1b4   : > { %v3610_v58 = vshrl.u32 %v12129_v43, 16  ;;  %v1657_v23 = vor.u32 %v1655_v2, %v1654_v39  ;;  %v1659_v41 = vrot.slane %v1654_v39, 4  ;;  %6327 = vrot.lane.b32.xlu1 %v9989_v8, %s11515_s21  ;;  %v3981_v25 = vshrl.u32 %v12177_v16, 16  ;;  %v4706_v36 = vld [vmem:[#allocation2 + $0x64] sm:$0xf] }
 0x1b5   : > { %v2129_v47 = vsel %vm11915_vm13, %v1632_v57, %v2128_v34  ;;  %v10383_v30 = vpack.c.bf16 %v946_v14, %v946_v14  ;;  %v5563_v63 = vld [vmem:[#allocation2 + $0x60] sm:$0xe]  ;;  %v16393_v2 = vshrl.u32 %v12138_v52, 16  ;;  %6935 = vrot.lane.b32.xlu0 %v10101_v37, %s11515_s21  ;;  %v4763_v26 = vld [vmem:[#allocation2 + $0x68] sm:$0x1]  ;;  %v12470_v45 = vrot.slane %v3600_v9, 5 }
 0x1b6   : > { %2130 = vst [vmem:[#allocation2 + $0xb4] sm:$0xf] %v2129_v47  ;;  %v1658_v51 = vsel %vm11949_vm14, %v1650_v49, %v1657_v23  ;;  %v2140_v18 = vsel %vm11748_vm3, %v1659_v41, %v2139_v56  ;;  %v11131_v21 = vld [vmem:[%s16324_s3 + $0x20] sm:$0xff]   ;;  %v3984_v52 = vshll.u32 %v12177_v16, 16  ;;  %v12474_v49 = vld [vmem:[#allocation2 + $0x34] sm:$0xf] }
 0x1b7   : > { %v12459_v3 = vrot.slane %v16393_v2, 4  ;;  %2138 = vst.msk [vmem:[#allocation2 + $0xc4] sm:$0xf] %vm1013_vm0, %v1658_v51  ;;  %2141 = vst [vmem:[#allocation2 + $0xc8] sm:$0x1] %v2140_v18  ;;  %v1635_v34 = vshrl.u32 %v10383_v30, 16  ;;  %v10007_v57 = vcombine.low %v12455_v7, %v12474_v49  ;;  %8024 = vmatpush1.bf16.msra.mxu1 %v11131_v21 }
 0x1b8   : > { %v1638_v39 = vshll.u32 %v10383_v30, 16  ;;  %v12476_v8 = vrot.slane %v3610_v58, 4  ;;  %v9882_v56 = vrot.slane %v5563_v63, 9  ;;  %v5729_v14 = vrot.slane %v4706_v36, 5  ;;  %v12483_v37 = vld [vmem:[#allocation2 + $0xf8] sm:$0x1]  ;;  %8025 = vmatprep.subr.bf16.mxu1 %v16392_v55 }
 0x1b9   : > { %v12480_v9 = vrot.slane %v3981_v25, 4  ;;  %v1633_v16 = vrot.slane %v12431_v44, 4  ;;  %v1637_v23 = vrot.slane %v1635_v34, 7  ;;  %v5732_v41 = vrot.slane %v4763_v26, 5  ;;  %v2132_v58 = vld [vmem:[#allocation2 + $0xbc] sm:$0x1]  ;;  %6491 = vrot.lane.b32.xlu1 %v10007_v57, %s11517_s9 }
 0x1ba   : > { %v5730_v47 = vsel %vm11781_vm8, %v9882_v56, %v5729_v14  ;;  %v5731_v30 = vrot.slane %v5729_v14, 4  ;;  %v5180_v25 = vor.u32 %v12336_v53, %v12286_v28  ;;  %v5183_v36 = vshll.u32 %v12089_v0, 16  ;;  %v353_v44 = vld [vmem:[%s11669_s15 + $0xd0] sm:$0xff]   ;;  %v5564_v26 = vld [vmem:[#allocation2 + $0x6c] sm:$0xe] }
 0x1bb   : > { %v3986_v63 = vrot.slane %v3984_v52, 5  ;;  %v1640_v2 = vor.u32 %v1638_v39, %v1637_v23  ;;  %v1642_v51 = vrot.slane %v1637_v23, 4  ;;  %v5189_v18 = vrot.slane %v5187_v13, 4  ;;  %v355_v21 = vld [vmem:[%s11669_s15 + $0xd8] sm:$0xff]   ;;  %v4764_v28 = vld [vmem:[#allocation2 + $0x74] sm:$0x1]  ;;  %10851 = vmatprep.mubr.bf16.mxu1 %v353_v44 }
 0x1bc   : > { %v3603_v34 = vor.u32 %v12470_v45, %v12459_v3  ;;  %v5733_v57 = vsel %vm11781_vm8, %v5731_v30, %v5732_v41  ;;  %v5185_v56 = vrot.slane %v5183_v36, 5  ;;  %v5193_v14 = vshll.u32 %v12483_v37, 16  ;;  %v11132_v3 = vld [vmem:[%s16324_s3 + $0x28] sm:$0xff]   ;;  %10852 = vmatmul.mubr.bf16.gmra.mrb[20].mxu1 %v355_v21 }
 0x1bd   : > { %v3573_v53 = vshrl.u32 %v12200_v24, 16  ;;  %v1641_v52 = vsel %vm11949_vm14, %v1633_v16, %v1640_v2  ;;  %v2133_v13 = vsel %vm11748_vm3, %v1642_v51, %v2132_v58  ;;  %v10170_v39 = vcombine.low %v5730_v47, %v5733_v57  ;;  %v12510_v2 = vld [vmem:[#allocation2 + $0x108] sm:$0xf]  ;;  %v1095_v58 = vld [vmem:[#allocation2 + $0x120] sm:$0x1]  ;;  %8026 = vmatpush1.bf16.msra.mxu1 %v11132_v3 }
 0x1be   : > { %v3576_v45 = vshll.u32 %v12200_v24, 16  ;;  %2131 = vst.msk [vmem:[#allocation2 + $0xb8] sm:$0xf] %vm1013_vm0, %v1641_v52  ;;  %2134 = vst [vmem:[#allocation2 + $0xbc] sm:$0x1] %v2133_v13  ;;  %v5181_v23 = vrot.slane %v5180_v25, 4  ;;  %v5190_v41 = vor.u32 %v5189_v18, %v5185_v56  ;;  %v3987_v47 = vor.u32 %v3986_v63, %v12480_v9  ;;  %8027 = vmatprep.subr.bf16.mxu1 %v16392_v55 }
 0x1bf   : > { %v9883_v30 = vrot.slane %v5564_v26, 9  ;;  %10879 = vmatprep.mubr.msk.bf16.mxu0 %vm7253_vm15, %v10170_v39  ;;  %v5736_v36 = vrot.slane %v4708_v33, 5  ;;  %v5739_v16 = vrot.slane %v4764_v28, 5  ;;  %v3994_v51 = vshrl.u32 %v12165_v15, 16  ;;  %v12514_v20 = vld [vmem:[#allocation2 + $0x10c] sm:$0xf] }
 0x1c0   : > { %v5191_v57 = vrot.slane %v5190_v41, 4  ;;  %v5195_v24 = vrot.slane %v5193_v14, 5  ;;  %v12517_v25 = vrot.slane %v3573_v53, 4  ;;  %v10023_v26 = vcombine.low %v12510_v2, %v12514_v20  ;;  %v11133_v9 = vld [vmem:[%s16324_s3 + $0x30] sm:$0xff]   ;;  %v1193_v41 = vld [vmem:[#allocation2 + $0x128] sm:$0x1] }
 0x1c1   : > { %v5737_v33 = vsel %vm11781_vm8, %v9883_v30, %v5736_v36  ;;  %v5738_v18 = vrot.slane %v5736_v36, 4  ;;  %v12526_v63 = vrot.slane %v3576_v45, 5  ;;  %v5186_v14 = vsel %vm11813_vm11, %v5181_v23, %v5185_v56  ;;  %v1092_v3 = vld [vmem:[#allocation2 + $0x114] sm:$0x1]  ;;  %8028 = vmatpush1.bf16.msra.mxu1 %v11133_v9 }
 0x1c2   : > { %v5196_v28 = vsel %vm11813_vm11, %v5191_v57, %v5195_v24  ;;  %v831_v53 = vadd.f32 %v12305_v29, %v12019_v22  ;;  %6523 = vrot.lane.b32.xlu1 %v10023_v26, %s11517_s9  ;;  %v1096_v39 = vsel %vm11748_vm3, 0, %v1095_v58  ;;  %v12540_v56 = vrot.slane %v3603_v34, 4  ;;  %v12543_v22 = vld [vmem:[#allocation2 + $0xfc] sm:$0xf]  ;;  %8029 = vmatprep.subr.bf16.mxu1 %v16392_v55  ;;  %v12553_v34 = vld [vmem:[#allocation2 + $0x100] sm:$0xf] }
 0x1c3   : > { %v10148_v52 = vcombine.low %v5186_v14, %v5196_v28  ;;  %v5740_v13 = vsel %vm11781_vm8, %v5738_v18, %v5739_v16  ;;  %1097 = vst [vmem:[#allocation2 + $0x120] sm:$0x1] %v1096_v39  ;;  %v12546_v30 = vrot.slane %v3987_v47, 4  ;;  %v12548_v36 = vrot.slane %v3994_v51, 4  ;;  %v1190_v51 = vld [vmem:[#allocation2 + $0x11c] sm:$0x1] }
 0x1c4   : > { %v10171_v45 = vcombine.low %v5737_v33, %v5740_v13  ;;  %v959_v23 = vmax.f32 %v831_v53, 0.0  ;;  %v3957_v24 = vshrl.u32 %v12243_v5, 16  ;;  %v823_v47 = vadd.f32 %v12305_v29, %v12053_v10  ;;  %v2258_v18 = vld [vmem:[#allocation2 + $0x18] sm:$0xf] }
 0x1c5   : > { %7125 = vrot.lane.b32.xlu0 %v10148_v52, %s11517_s9  ;;  %v10117_v26 = vcombine.low %v12543_v22, %v12553_v34  ;;  %v1093_v9 = vsel %vm11748_vm3, 0, %v1092_v3  ;;  %v834_v14 = vadd.f32 %v12305_v29, %v12063_v11  ;;  %v1194_v28 = vsel %vm11762_vm5, 0, %v1193_v41  ;;  %v11135_v53 = vld [vmem:[%s16324_s3 + $0x38] sm:$0xff]  }
 0x1c6   : > { %10880 = vmatmul.mubr.msk.bf16.gmra.mrb[44].mxu0 %vm7253_vm15, %v10171_v45  ;;  %v10396_v33 = vpack.c.bf16 %v959_v23, %v959_v23  ;;  %v957_v13 = vmax.f32 %v823_v47, 0.0  ;;  %1094 = vst [vmem:[#allocation2 + $0x114] sm:$0x1] %v1093_v9  ;;  %1195 = vst [vmem:[#allocation2 + $0x128] sm:$0x1] %v1194_v28  ;;  %v826_v39 = vadd.f32 %v12305_v29, %v12068_v19  ;;  %v1191_v11 = vsel %vm11762_vm5, 0, %v1190_v51 }
 0x1c7   : > { %v960_v3 = vmax.f32 %v834_v14, 0.0  ;;  %v2402_v45 = vshrl.u32 %v2258_v18, 16  ;;  %v2405_v23 = vshll.u32 %v2258_v18, 16  ;;  %8030 = vmatpush1.bf16.msra.mxu1 %v11135_v53  ;;  %1192 = vst [vmem:[#allocation2 + $0x11c] sm:$0x1] %v1191_v11  ;;  %v3960_v14 = vshll.u32 %v12243_v5, 16 }
 0x1c8   : > { %v1746_v52 = vshrl.u32 %v10396_v33, 16  ;;  %v1749_v10 = vshll.u32 %v10396_v33, 16  ;;  %v10394_v16 = vpack.c.bf16 %v957_v13, %v957_v13  ;;  %v958_v21 = vmax.f32 %v826_v39, 0.0  ;;  %8031 = vmatprep.subr.bf16.mxu1 %v16392_v55  ;;  %v11136_v53 = vld [vmem:[%s16324_s3 + $0x40] sm:$0xff]  }
 0x1c9   : > { %6967 = vrot.lane.b32.xlu0 %v10117_v26, %s11515_s21  ;;  %v2411_v33 = vshll.u32 %v12263_v50, 16  ;;  %v10397_v9 = vpack.c.bf16 %v960_v3, %v960_v3  ;;  %v2404_v19 = vrot.slane %v2402_v45, 4  ;;  %v2407_v29 = vrot.slane %v2405_v23, 5 }
 0x1ca   : > { %v1748_v41 = vrot.slane %v1746_v52, 7  ;;  %v2177_v47 = vld [vmem:[#allocation2 + $0x120] sm:$0xf]  ;;  %v2415_v26 = vshrl.u32 %v12263_v50, 16  ;;  %v1729_v28 = vshrl.u32 %v10394_v16, 16  ;;  %v1732_v18 = vshll.u32 %v10394_v16, 16 }
 0x1cb   : > { %v1754_v52 = vshrl.u32 %v10397_v9, 16  ;;  %v1757_v13 = vshll.u32 %v10397_v9, 16  ;;  %v10395_v39 = vpack.c.bf16 %v958_v21, %v958_v21  ;;  %v2408_v11 = vor.u32 %v2407_v29, %v2404_v19  ;;  %v5565_v50 = vld [vmem:[#allocation2 + $0x78] sm:$0xe]  ;;  %8032 = vmatpush1.bf16.msra.mxu1 %v11136_v53  ;;  %v4765_v53 = vld [vmem:[#allocation2 + $0x80] sm:$0x1] }
 0x1cc   : > { %v1751_v51 = vor.u32 %v1749_v10, %v1748_v41  ;;  %v1731_v45 = vrot.slane %v1729_v28, 7  ;;  %v2413_v23 = vrot.slane %v2411_v33, 5  ;;  %v2417_v44 = vrot.slane %v2415_v26, 4  ;;  %8033 = vmatprep.subr.bf16.mxu1 %v16392_v55  ;;  %v11138_v33 = vld [vmem:[%s16324_s3 + $0x48] sm:$0xff]   ;;  %v4710_v28 = vld [vmem:[#allocation2 + $0x7c] sm:$0xf] }
 0x1cd   : > { %v12586_v5 = vrot.slane %v3957_v24, 4  ;;  %v1752_v10 = vrot.slane %v1748_v41, 4  ;;  %v2170_v16 = vld [vmem:[#allocation2 + $0x114] sm:$0xf]  ;;  %v1756_v57 = vrot.slane %v1754_v52, 7  ;;  %v1737_v58 = vshrl.u32 %v10395_v39, 16 }
 0x1ce   : > { %v2178_v3 = vsel %vm11915_vm13, %v1751_v51, %v2177_v47  ;;  %v1734_v9 = vor.u32 %v1732_v18, %v1731_v45  ;;  %v1735_v21 = vrot.slane %v1731_v45, 4  ;;  %v2181_v19 = vld [vmem:[#allocation2 + $0x128] sm:$0x1]  ;;  %v1740_v29 = vshll.u32 %v10395_v39, 16  ;;  %v4343_v47 = vld [vmem:[#allocation2 + $0x30] sm:$0xe] }
 0x1cf   : > { %2179 = vst [vmem:[#allocation2 + $0x120] sm:$0xf] %v2178_v3  ;;  %v2409_v40 = vrot.slane %v2408_v11, 4  ;;  %v1759_v26 = vor.u32 %v1757_v13, %v1756_v57  ;;  %v1761_v24 = vrot.slane %v1756_v57, 4  ;;  %v1739_v51 = vrot.slane %v1737_v58, 7  ;;  %8034 = vmatpush1.bf16.msra.mxu1 %v11138_v33 }
 0x1d0   : > { %v2418_v41 = vor.u32 %v2417_v44, %v2413_v23  ;;  %v12592_v52 = vrot.slane %v3960_v14, 5  ;;  %v2171_v18 = vsel %vm11915_vm13, %v1734_v9, %v2170_v16  ;;  %v2174_v3 = vld [vmem:[#allocation2 + $0x11c] sm:$0x1]  ;;  %v2421_v39 = vshll.u32 %v12278_v54, 16  ;;  %v3543_v13 = vld [vmem:[#allocation2 + $0x38] sm:$0x1]  ;;  %8035 = vmatprep.subr.bf16.mxu1 %v16392_v55 }
 0x1d1   : > { %v9884_v11 = vrot.slane %v5565_v50, 9  ;;  %2172 = vst [vmem:[#allocation2 + $0x114] sm:$0xf] %v2171_v18  ;;  %v1760_v45 = vsel %vm11949_vm14, %v1752_v10, %v1759_v26  ;;  %v2182_v58 = vsel %vm11748_vm3, %v1761_v24, %v2181_v19  ;;  %v1742_v44 = vor.u32 %v1740_v29, %v1739_v51  ;;  %v5566_v14 = vld [vmem:[#allocation2 + $0x84] sm:$0xe] }
 0x1d2   : > { %v1744_v57 = vrot.slane %v1739_v51, 4  ;;  %2180 = vst.msk [vmem:[#allocation2 + $0x124] sm:$0xf] %vm1013_vm0, %v1760_v45  ;;  %2183 = vst [vmem:[#allocation2 + $0x128] sm:$0x1] %v2182_v58  ;;  %v2419_v16 = vrot.slane %v2418_v41, 4  ;;  %v2414_v29 = vsel %vm11813_vm11, %v2409_v40, %v2413_v23 }
 0x1d3   : > { %v2423_v54 = vrot.slane %v2421_v39, 5  ;;  %v5743_v50 = vrot.slane %v4710_v28, 5  ;;  %v5746_v9 = vrot.slane %v4765_v53, 5  ;;  %v4712_v33 = vld [vmem:[#allocation2 + $0x88] sm:$0xf]  ;;  %v1743_v10 = vsel %vm11949_vm14, %v1735_v21, %v1742_v44  ;;  %v11139_v40 = vld [vmem:[%s16324_s3 + $0x50] sm:$0xff]  }
 0x1d4   : > { %v2175_v19 = vsel %vm11748_vm3, %v1744_v57, %v2174_v3  ;;  %v9847_v26 = vrot.slane %v4343_v47, 9  ;;  %v4766_v24 = vld [vmem:[#allocation2 + $0x8c] sm:$0x1]  ;;  %2173 = vst.msk [vmem:[#allocation2 + $0x118] sm:$0xf] %vm1013_vm0, %v1743_v10  ;;  %v4491_v21 = vrot.slane %v12474_v49, 5  ;;  %8036 = vmatpush1.bf16.msra.mxu1 %v11139_v40 }
 0x1d5   : > { %2176 = vst [vmem:[#allocation2 + $0x11c] sm:$0x1] %v2175_v19  ;;  %v2424_v51 = vsel %vm11813_vm11, %v2419_v16, %v2423_v54  ;;  %v5744_v41 = vsel %vm11781_vm8, %v9884_v11, %v5743_v50  ;;  %v5745_v28 = vrot.slane %v5743_v50, 4  ;;  %v4494_v18 = vrot.slane %v3543_v13, 5  ;;  %v12622_v11 = vld [vmem:[#allocation2 + $0x24] sm:$0xf]  ;;  %8037 = vmatprep.subr.bf16.mxu1 %v16392_v55 }
 0x1d6   : > { %v9942_v53 = vcombine.low %v2414_v29, %v2424_v51  ;;  %v9885_v3 = vrot.slane %v5566_v14, 9  ;;  %v5750_v39 = vrot.slane %v4712_v33, 5  ;;  %v4492_v47 = vsel %vm11781_vm8, %v9847_v26, %v4491_v21  ;;  %v12624_v44 = vld [vmem:[#allocation2 + $0x28] sm:$0xf]  ;;  %v12626_v57 = vld [vmem:[#allocation2 + $0x10] sm:$0xf] }
 0x1d7   : > { %v5747_v23 = vsel %vm11781_vm8, %v5745_v28, %v5746_v9  ;;  %v4493_v45 = vrot.slane %v4491_v21, 4  ;;  %v5753_v58 = vrot.slane %v4766_v24, 5  ;;  %v3559_v50 = vld [vmem:[#allocation2 + $0x110] sm:$0x1]  ;;  %v4359_v9 = vld [vmem:[#allocation2 + $0x108] sm:$0xe]  ;;  %v16395_v19 = vor.u32 %v12526_v63, %v12517_v25 }
 0x1d8   : > { %6137 = vrot.lane.b32.xlu1 %v9942_v53, %s11516_s12  ;;  %v10172_v14 = vcombine.low %v5744_v41, %v5747_v23  ;;  %v5751_v16 = vsel %vm11781_vm8, %v9885_v3, %v5750_v39  ;;  %v5752_v54 = vrot.slane %v5750_v39, 4  ;;  %v16394_v33 = vshrl.u32 %v12193_v6, 16  ;;  %v12641_v26 = vld [vmem:[#allocation2 + $0x14] sm:$0x1]  ;;  %v2290_v41 = vld [vmem:[#allocation2 + $0xf0] sm:$0xf] }
 0x1d9   : > { %v12639_v29 = vrot.slane %v16395_v19, 4  ;;  %v4495_v51 = vsel %vm11781_vm8, %v4493_v45, %v4494_v18  ;;  %v12647_v28 = vld [vmem:[#allocation2 + $0xe8] sm:$0xf]  ;;  %v10006_v63 = vcombine.low %v12622_v11, %v12624_v44  ;;  %v9863_v39 = vrot.slane %v4359_v9, 9  ;;  %v11141_v40 = vld [vmem:[%s16324_s3 + $0x58] sm:$0xff]  }
 0x1da   : > { %v12634_v10 = vrot.slane %v16394_v33, 4  ;;  %10883 = vmatprep.mubr.msk.bf16.mxu0 %vm7253_vm15, %v10172_v14  ;;  %v10071_v21 = vcombine.low %v4492_v47, %v4495_v51  ;;  %v5754_v25 = vsel %vm11781_vm8, %v5752_v54, %v5753_v58  ;;  %v4603_v23 = vrot.slane %v12514_v20, 5  ;;  %v5567_v14 = vld [vmem:[#allocation2 + $0x90] sm:$0xe]  ;;  %v4714_v19 = vld [vmem:[#allocation2 + $0x94] sm:$0xf]  ;;  %8038 = vmatpush1.bf16.msra.mxu1 %v11141_v40 }
 0x1db   : > { %v10173_v3 = vcombine.low %v5751_v16, %v5754_v25  ;;  %v4606_v47 = vrot.slane %v3559_v50, 5  ;;  %v2786_v45 = vshrl.u32 %v2290_v41, 16  ;;  %v2789_v58 = vshll.u32 %v2290_v41, 16  ;;  %v4767_v41 = vld [vmem:[#allocation2 + $0x98] sm:$0x1]  ;;  %8039 = vmatprep.subr.bf16.mxu1 %v16392_v55 }
 0x1dc   : > { %6747 = vrot.lane.b32.xlu0 %v10071_v21, %s11516_s12  ;;  %6489 = vrot.lane.b32.xlu1 %v10006_v63, %s11517_s9  ;;  %v4838_v54 = vshrl.u32 %v12282_v61, 16  ;;  %v2795_v16 = vshll.u32 %v12309_v48, 16  ;;  %v2799_v9 = vshrl.u32 %v12309_v48, 16  ;;  %v2805_v33 = vshll.u32 %v12319_v4, 16  ;;  %v4342_v48 = vld [vmem:[#allocation2 + $0x24] sm:$0xe] }
 0x1dd   : > { %10884 = vmatmul.mubr.msk.bf16.gmra.mrb[48].mxu0 %vm7253_vm15, %v10173_v3  ;;  %v4604_v51 = vsel %vm11781_vm8, %v9863_v39, %v4603_v23  ;;  %v4605_v20 = vrot.slane %v4603_v23, 4  ;;  %v2788_v50 = vrot.slane %v2786_v45, 4  ;;  %v2791_v21 = vrot.slane %v2789_v58, 5  ;;  %v3542_v39 = vld [vmem:[#allocation2 + $0x2c] sm:$0x1] }
 0x1de   : > { %v4841_v25 = vshll.u32 %v12282_v61, 16  ;;  %v5222_v63 = vshrl.u32 %v12346_v35, 16  ;;  %v2797_v3 = vrot.slane %v2795_v16, 5  ;;  %v2801_v6 = vrot.slane %v2799_v9, 4  ;;  %v5568_v23 = vld [vmem:[#allocation2 + $0x9c] sm:$0xe] }
 0x1df   : > { %v4607_v4 = vsel %vm11781_vm8, %v4605_v20, %v4606_v47  ;;  %v2792_v40 = vor.u32 %v2791_v21, %v2788_v50  ;;  %v9886_v24 = vrot.slane %v5567_v14, 9  ;;  %v5757_v13 = vrot.slane %v4714_v19, 5 }
 0x1e0   : > { %v10087_v45 = vcombine.low %v4604_v51, %v4607_v4  ;;  %v2802_v58 = vor.u32 %v2801_v6, %v2797_v3  ;;  %v2807_v18 = vrot.slane %v2805_v33, 5  ;;  %v5760_v53 = vrot.slane %v4767_v41, 5 }
 0x1e1   : > { %v2793_v61 = vrot.slane %v2792_v40, 4  ;;  %v5758_v16 = vsel %vm11781_vm8, %v9886_v24, %v5757_v13  ;;  %v5759_v9 = vrot.slane %v5757_v13, 4  ;;  %v9846_v31 = vrot.slane %v4342_v48, 9  ;;  %v3558_v48 = vld [vmem:[#allocation2 + $0x104] sm:$0x1] }
 0x1e2   : > { %6779 = vrot.lane.b32.xlu0 %v10087_v45, %s11516_s12  ;;  %v2803_v47 = vrot.slane %v2802_v58, 4  ;;  %v4484_v14 = vrot.slane %v12624_v44, 5  ;;  %v4487_v19 = vrot.slane %v3542_v39, 5  ;;  %v9887_v20 = vrot.slane %v5568_v23, 9  ;;  %v12688_v44 = vld [vmem:[#allocation2 + $0xec] sm:$0x1] }
 0x1e3   : > { %v2798_v6 = vsel %vm11813_vm11, %v2793_v61, %v2797_v3  ;;  %v5761_v33 = vsel %vm11781_vm8, %v5759_v9, %v5760_v53  ;;  %v5764_v51 = vrot.slane %v4716_v27, 5  ;;  %v5767_v50 = vrot.slane %v4768_v59, 5  ;;  %v4358_v27 = vld [vmem:[#allocation2 + $0xfc] sm:$0xe]  ;;  %v11142_v59 = vld [vmem:[%s16324_s3 + $0x60] sm:$0xff]  }
 0x1e4   : > { %v2808_v24 = vsel %vm11813_vm11, %v2803_v47, %v2807_v18  ;;  %v10174_v13 = vcombine.low %v5758_v16, %v5761_v33  ;;  %v4485_v21 = vsel %vm11781_vm8, %v9846_v31, %v4484_v14  ;;  %v4486_v41 = vrot.slane %v4484_v14, 4  ;;  %v2256_v61 = vld [vmem:[#allocation2 + $0xc] sm:$0xf]  ;;  %v12717_v47 = vld [vmem:[#allocation2 + $0xfc] sm:$0xf]  ;;  %8040 = vmatpush1.bf16.msra.mxu1 %v11142_v59 }
 0x1e5   : > { %v9958_v40 = vcombine.low %v2798_v6, %v2808_v24  ;;  %v5765_v3 = vsel %vm11781_vm8, %v9887_v20, %v5764_v51  ;;  %v5766_v53 = vrot.slane %v5764_v51, 4  ;;  %v16396_v18 = vor.u32 %v12592_v52, %v12586_v5  ;;  %8041 = vmatprep.subr.bf16.mxu1 %v16392_v55 }
 0x1e6   : > { %v16397_v39 = vshrl.u32 %v12647_v28, 16  ;;  %v12705_v45 = vrot.slane %v4838_v54, 4  ;;  %10887 = vmatprep.mubr.msk.bf16.mxu0 %vm7253_vm15, %v10174_v13  ;;  %v4488_v58 = vsel %vm11781_vm8, %v4486_v41, %v4487_v19  ;;  %v12710_v16 = vrot.slane %v4841_v25, 5  ;;  %v3513_v54 = vld [vmem:[#allocation2 + $0x100] sm:$0xf] }
 0x1e7   : > { %v12699_v31 = vrot.slane %v16396_v18, 4  ;;  %v12712_v9 = vrot.slane %v5222_v63, 4  ;;  %6169 = vrot.lane.b32.xlu1 %v9958_v40, %s11516_s12  ;;  %v10070_v5 = vcombine.low %v4485_v21, %v4488_v58  ;;  %v5768_v52 = vsel %vm11781_vm8, %v5766_v53, %v5767_v50  ;;  %v11144_v50 = vld [vmem:[%s16324_s3 + $0x68] sm:$0xff]   ;;  %v4769_v53 = vld [vmem:[#allocation2 + $0xb0] sm:$0x1] }
 0x1e8   : > { %v12703_v23 = vrot.slane %v16397_v39, 4  ;;  %v5225_v14 = vshll.u32 %v12346_v35, 16  ;;  %v10175_v20 = vcombine.low %v5765_v3, %v5768_v52  ;;  %v10022_v19 = vcombine.low %v12717_v47, %v3513_v54  ;;  %v4718_v13 = vld [vmem:[#allocation2 + $0xac] sm:$0xf]  ;;  %v5569_v21 = vld [vmem:[#allocation2 + $0xa8] sm:$0xe]  ;;  %8042 = vmatpush1.bf16.msra.mxu1 %v11144_v50 }
 0x1e9   : > { %v9862_v6 = vrot.slane %v4358_v27, 9  ;;  %6745 = vrot.lane.b32.xlu0 %v10070_v5, %s11516_s12  ;;  %v4596_v25 = vrot.slane %v3513_v54, 5  ;;  %v4599_v63 = vrot.slane %v3558_v48, 5  ;;  %v2378_v33 = vshrl.u32 %v2256_v61, 16  ;;  %8043 = vmatprep.subr.bf16.mxu1 %v16392_v55  ;;  %v5570_v52 = vld [vmem:[#allocation2 + $0xb4] sm:$0xe] }
 0x1ea   : > { %v2381_v51 = vshll.u32 %v2256_v61, 16  ;;  %10888 = vmatmul.mubr.msk.bf16.gmra.mrb[52].mxu0 %vm7253_vm15, %v10175_v20  ;;  %v2387_v35 = vshll.u32 %v12338_v32, 16  ;;  %v2391_v24 = vshrl.u32 %v12338_v32, 16  ;;  %v12732_v27 = vrot.slane %v5225_v14, 5  ;;  %v16398_v54 = vld [vmem:[#allocation17_spill] sm:$0xff] }
 0x1eb   : > { %6521 = vrot.lane.b32.xlu1 %v10022_v19, %s11517_s9  ;;  %v4597_v41 = vsel %vm11781_vm8, %v9862_v6, %v4596_v25  ;;  %v4598_v48 = vrot.slane %v4596_v25, 4  ;;  %v2380_v40 = vrot.slane %v2378_v33, 4  ;;  %v2397_v39 = vshll.u32 %v12366_v38, 16  ;;  %v12739_v25 = vld [vmem:[#allocation2 + $0x48] sm:$0xf] }
 0x1ec   : > { %v2383_v3 = vrot.slane %v2381_v51, 5  ;;  %v2389_v59 = vrot.slane %v2387_v35, 5  ;;  %v2393_v18 = vrot.slane %v2391_v24, 4  ;;  %v9888_v61 = vrot.slane %v5569_v21, 9  ;;  %v4720_v33 = vld [vmem:[#allocation2 + $0xb8] sm:$0xf] }
 0x1ed   : > { %v4600_v32 = vsel %vm11781_vm8, %v4598_v48, %v4599_v63  ;;  %v5771_v5 = vrot.slane %v4718_v13, 5  ;;  %v5235_v20 = vshrl.u32 %v16398_v54, 16  ;;  %v5774_v6 = vrot.slane %v4769_v53, 5  ;;  %v4770_v35 = vld [vmem:[#allocation2 + $0xbc] sm:$0x1]  ;;  %v357_v24 = vld [vmem:[%s11669_s15 + $0xe0] sm:$0xff]  }
 0x1ee   : > { %v2384_v58 = vor.u32 %v2383_v3, %v2380_v40  ;;  %v10086_v19 = vcombine.low %v4597_v41, %v4600_v32  ;;  %v2394_v14 = vor.u32 %v2393_v18, %v2389_v59  ;;  %v4814_v13 = vshrl.u32 %v12441_v62, 16  ;;  %v359_v40 = vld [vmem:[%s11669_s15 + $0xe8] sm:$0xff]   ;;  %v16399_v18 = vld [vmem:[#allocation16_spill] sm:$0xff]  ;;  %10855 = vmatprep.mubr.bf16.mxu1 %v357_v24  ;;  %v5571_v24 = vld [vmem:[#allocation2 + $0xc0] sm:$0xe] }
 0x1ef   : > { %v5772_v63 = vsel %vm11781_vm8, %v9888_v61, %v5771_v5  ;;  %v5773_v50 = vrot.slane %v5771_v5, 4  ;;  %v2399_v41 = vrot.slane %v2397_v39, 5  ;;  %v9889_v48 = vrot.slane %v5570_v52, 9  ;;  %v2288_v61 = vld [vmem:[#allocation2 + $0xe4] sm:$0xf]  ;;  %10856 = vmatmul.mubr.bf16.gmra.mrb[24].mxu1 %v359_v40 }
 0x1f0   : > { %v2385_v51 = vrot.slane %v2384_v58, 4  ;;  %6777 = vrot.lane.b32.xlu0 %v10086_v19, %s11516_s12  ;;  %v2395_v21 = vrot.slane %v2394_v14, 4  ;;  %v10104_v32 = vcombine.low %v12739_v25, %v16399_v18  ;;  %v5778_v58 = vrot.slane %v4720_v33, 5 }
 0x1f1   : > { %v5775_v53 = vsel %vm11781_vm8, %v5773_v50, %v5774_v6  ;;  %v5781_v19 = vrot.slane %v4770_v35, 5  ;;  %v2762_v6 = vshrl.u32 %v2288_v61, 16  ;;  %v2765_v33 = vshll.u32 %v2288_v61, 16 }
 0x1f2   : > { %v2390_v3 = vsel %vm11813_vm11, %v2385_v51, %v2389_v59  ;;  %v2400_v5 = vsel %vm11813_vm11, %v2395_v21, %v2399_v41  ;;  %v10176_v4 = vcombine.low %v5772_v63, %v5775_v53  ;;  %v5779_v39 = vsel %vm11781_vm8, %v9889_v48, %v5778_v58  ;;  %v11145_v59 = vld [vmem:[%s16324_s3 + $0x70] sm:$0xff]   ;;  %v12771_v48 = vld [vmem:[#allocation2 + $0x38] sm:$0x1] }
 0x1f3   : > { %v9941_v14 = vcombine.low %v2390_v3, %v2400_v5  ;;  %v5780_v52 = vrot.slane %v5778_v58, 4  ;;  %v2771_v51 = vshll.u32 %v12406_v1, 16  ;;  %v2775_v63 = vshrl.u32 %v12406_v1, 16  ;;  %v3125_v58 = vld [vmem:[#allocation2 + $0x30] sm:$0xe]  ;;  %8044 = vmatpush1.bf16.msra.mxu1 %v11145_v59 }
 0x1f4   : > { %10891 = vmatprep.mubr.msk.bf16.mxu0 %vm7253_vm15, %v10176_v4  ;;  %6941 = vrot.lane.b32.xlu0 %v10104_v32, %s11515_s21  ;;  %v4844_v21 = vor.u32 %v12710_v16, %v12705_v45  ;;  %v11222_v4 = vld [vmem:[#allocation2 + $0x34] sm:$0xf]  ;;  %v2764_v53 = vrot.slane %v2762_v6, 4  ;;  %v2767_v18 = vrot.slane %v2765_v33, 5  ;;  %v2781_v5 = vshll.u32 %v12417_v12, 16  ;;  %v11147_v45 = vld [vmem:[%s16324_s3 + $0x78] sm:$0xff]  }
 0x1f5   : > { %6135 = vrot.lane.b32.xlu1 %v9941_v14, %s11516_s12  ;;  %v5782_v35 = vsel %vm11781_vm8, %v5780_v52, %v5781_v19  ;;  %v4847_v41 = vshll.u32 %v11222_v4, 16  ;;  %v2773_v1 = vrot.slane %v2771_v51, 5  ;;  %v12773_v32 = vld [vmem:[#allocation2 + $0x34] sm:$0xf]  ;;  %v2777_v61 = vrot.slane %v2775_v63, 4  ;;  %8045 = vmatprep.subr.bf16.mxu1 %v16392_v55 }
 0x1f6   : > { %v10177_v3 = vcombine.low %v5779_v39, %v5782_v35  ;;  %v4845_v19 = vrot.slane %v4844_v21, 4  ;;  %v2768_v16 = vor.u32 %v2767_v18, %v2764_v53  ;;  %v4851_v14 = vshrl.u32 %v11222_v4, 16  ;;  %v11223_v39 = vld [vmem:[#allocation2 + $0x38] sm:$0x1]  ;;  %v4722_v6 = vld [vmem:[#allocation2 + $0xc4] sm:$0xf] }
 0x1f7   : > { %v4849_v40 = vrot.slane %v4847_v41, 5  ;;  %v4857_v52 = vshll.u32 %v11223_v39, 16  ;;  %v12781_v33 = vrot.slane %v4814_v13, 4  ;;  %v2778_v12 = vor.u32 %v2777_v61, %v2773_v1  ;;  %v4771_v63 = vld [vmem:[#allocation2 + $0xc8] sm:$0x1]  ;;  %8046 = vmatpush1.bf16.msra.mxu1 %v11147_v45 }
 0x1f8   : > { %10892 = vmatmul.mubr.msk.bf16.gmra.mrb[56].mxu0 %vm7253_vm15, %v10177_v3  ;;  %v9816_v51 = vrot.slane %v3125_v58, 9  ;;  %v3282_v59 = vrot.slane %v12773_v32, 5  ;;  %v2769_v35 = vrot.slane %v2768_v16, 4  ;;  %v4853_v21 = vrot.slane %v4851_v14, 4  ;;  %v5572_v58 = vld [vmem:[#allocation2 + $0xcc] sm:$0xe] }
 0x1f9   : > { %v3285_v38 = vrot.slane %v12771_v48, 5  ;;  %v9890_v3 = vrot.slane %v5571_v24, 9  ;;  %v2779_v53 = vrot.slane %v2778_v12, 4  ;;  %v2783_v41 = vrot.slane %v2781_v5, 5  ;;  %v5573_v14 = vld [vmem:[#allocation2 + $0xf0] sm:$0xe] }
 0x1fa   : > { %v3284_v4 = vrot.slane %v3282_v59, 4  ;;  %v5785_v18 = vrot.slane %v4722_v6, 5  ;;  %v4850_v55 = vsel %vm11813_vm11, %v4845_v19, %v4849_v40  ;;  %v4854_v13 = vor.u32 %v4853_v21, %v4849_v40 }
 0x1fb   : > { %v4859_v39 = vrot.slane %v4857_v52, 5  ;;  %v5788_v61 = vrot.slane %v4771_v63, 5  ;;  %v2774_v50 = vsel %vm11813_vm11, %v2769_v35, %v2773_v1  ;;  %v2784_v16 = vsel %vm11813_vm11, %v2779_v53, %v2783_v41  ;;  %v3124_v35 = vld [vmem:[#allocation2 + $0x24] sm:$0xe]  ;;  %v12809_v41 = vld [vmem:[#allocation2 + $0x2c] sm:$0x1] }
 0x1fc   : > { %v5786_v24 = vsel %vm11781_vm8, %v9890_v3, %v5785_v18  ;;  %v5787_v5 = vrot.slane %v5785_v18, 4  ;;  %v9957_v6 = vcombine.low %v2774_v50, %v2784_v16  ;;  %v4855_v45 = vrot.slane %v4854_v13, 4  ;;  %v16400_v3 = vld [vmem:[#allocation15_spill] sm:$0xff]  ;;  %v16403_v18 = vld [vmem:[#allocation13_spill] sm:$0xff]  ;;  %v12817_v16 = vld [vmem:[#allocation2 + $0x28] sm:$0xf] }
 0x1fd   : > { %v3283_v19 = vsel %vm11781_vm8, %v9816_v51, %v3282_v59  ;;  %v3286_v40 = vsel %vm11781_vm8, %v3284_v4, %v3285_v38  ;;  %v3645_v52 = vshrl.u32 %v12455_v7, 16  ;;  %v5802_v1 = vrot.slane %v12483_v37, 5  ;;  %v16402_v59 = vld [vmem:[#allocation14_spill] sm:$0xff] }
 0x1fe   : > { %v5789_v12 = vsel %vm11781_vm8, %v5787_v5, %v5788_v61  ;;  %v9891_v63 = vrot.slane %v5572_v58, 9  ;;  %6167 = vrot.lane.b32.xlu1 %v9957_v6, %s11516_s12  ;;  %v4860_v50 = vsel %vm11813_vm11, %v4855_v45, %v4859_v39  ;;  %v16401_v51 = vrot.slane %v16400_v3, 5  ;;  %v12825_v45 = vld [vmem:[#allocation2 + $0x110] sm:$0x1] }
 0x1ff   : > { %v10178_v21 = vcombine.low %v5786_v24, %v5789_v12  ;;  %v9892_v53 = vrot.slane %v5573_v14, 9  ;;  %v10134_v37 = vcombine.low %v4850_v55, %v4860_v50  ;;  %v9976_v4 = vcombine.low %v3283_v19, %v3286_v40  ;;  %v12833_v50 = vld [vmem:[#allocation2 + $0x104] sm:$0x1] }
 0x200   : > { %v5796_v38 = vsel %vm11781_vm8, %v16402_v59, %v16401_v51  ;;  %v16404_v13 = vrot.slane %v16403_v18, 5  ;;  %v16405_v58 = vrot.slane %v12089_v0, 5  ;;  %v9815_v55 = vrot.slane %v3124_v35, 9  ;;  %v12836_v35 = vld [vmem:[#allocation2 + $0x3c] sm:$0xf] }
 0x201   : > { %10895 = vmatprep.mubr.msk.bf16.mxu0 %vm7253_vm15, %v10178_v21  ;;  %v3275_v6 = vrot.slane %v12817_v16, 5  ;;  %7097 = vrot.lane.b32.xlu0 %v10134_v37, %s11517_s9  ;;  %v3278_v40 = vrot.slane %v12809_v41, 5  ;;  %v5228_v12 = vor.u32 %v12732_v27, %v12712_v9  ;;  %v3140_v21 = vld [vmem:[#allocation2 + $0xfc] sm:$0xe]  ;;  %v5237_v59 = vrot.slane %v5235_v20, 4 }
 0x202   : > { %v5793_v61 = vsel %vm11781_vm8, %v9891_v63, %v16404_v13  ;;  %v5801_v39 = vrot.slane %v16405_v58, 4  ;;  %v16406_v5 = vmov %v16405_v58  ;;  %v11224_v63 = vld [vmem:[#allocation2 + $0x10c] sm:$0xf]  ;;  %6301 = vrot.lane.b32.xlu1 %v9976_v4, %s11515_s21  ;;  %v12843_v9 = vld [vmem:[#allocation2 + $0x40] sm:$0xf]  ;;  %v5241_v37 = vshll.u32 %v12825_v45, 16 }
 0x203   : > { %v10179_v24 = vcombine.low %v5793_v61, %v5796_v38  ;;  %v5800_v14 = vsel %vm11781_vm8, %v9892_v53, %v16406_v5  ;;  %v5231_v0 = vshll.u32 %v11224_v63, 16  ;;  %v3277_v51 = vrot.slane %v3275_v6, 4  ;;  %v12848_v4 = vld [vmem:[#allocation2 + $0x100] sm:$0xf]  ;;  %v12862_v63 = vld [vmem:[#allocation2 + $0x104] sm:$0x1] }
 0x204   : > { %v5803_v19 = vsel %vm11781_vm8, %v5801_v39, %v5802_v1  ;;  %v3276_v1 = vsel %vm11781_vm8, %v9815_v55, %v3275_v6  ;;  %v10103_v27 = vcombine.low %v12836_v35, %v12843_v9  ;;  %v5229_v38 = vrot.slane %v5228_v12, 4 }
 0x205   : > { %10896 = vmatmul.mubr.msk.bf16.gmra.mrb[60].mxu0 %vm7253_vm15, %v10179_v24  ;;  %v10180_v3 = vcombine.low %v5800_v14, %v5803_v19  ;;  %v5233_v53 = vrot.slane %v5231_v0, 5  ;;  %v3279_v18 = vsel %vm11781_vm8, %v3277_v51, %v3278_v40  ;;  %v9831_v13 = vrot.slane %v3140_v21, 9  ;;  %v5574_v14 = vld [vmem:[#allocation2 + $0xfc] sm:$0xe] }
 0x206   : > { %v3387_v61 = vrot.slane %v12848_v4, 5  ;;  %v3390_v20 = vrot.slane %v12833_v50, 5  ;;  %v5806_v58 = vrot.slane %v12553_v34, 5  ;;  %6939 = vrot.lane.b32.xlu0 %v10103_v27, %s11515_s21  ;;  %v9975_v39 = vcombine.low %v3276_v1, %v3279_v18 }
 0x207   : > { %10899 = vmatprep.mubr.msk.bf16.mxu0 %vm7253_vm15, %v10180_v3  ;;  %v5238_v24 = vor.u32 %v5237_v59, %v5233_v53  ;;  %v5243_v5 = vrot.slane %v5241_v37, 5  ;;  %v16407_v55 = vshll.u32 %v12441_v62, 16  ;;  %v3648_v19 = vshll.u32 %v12455_v7, 16  ;;  %v5575_v62 = vld [vmem:[#allocation2 + $0x108] sm:$0xe] }
 0x208   : > { %v3388_v40 = vsel %vm11781_vm8, %v9831_v13, %v3387_v61  ;;  %v3389_v12 = vrot.slane %v3387_v61, 4  ;;  %v12864_v0 = vrot.slane %v3645_v52, 4  ;;  %6299 = vrot.lane.b32.xlu1 %v9975_v39, %s11515_s21  ;;  %v5234_v3 = vsel %vm11813_vm11, %v5229_v38, %v5233_v53 }
 0x209   : > { %v4819_v6 = vrot.slane %v16407_v55, 5  ;;  %v5239_v1 = vrot.slane %v5238_v24, 4  ;;  %v5198_v51 = vshrl.u32 %v12543_v22, 16  ;;  %v5816_v7 = vrot.slane %v12825_v45, 5  ;;  %v2262_v55 = vld [vmem:[#allocation2 + $0x30] sm:$0xf] }
 0x20a   : > { %v3391_v59 = vsel %vm11781_vm8, %v3389_v12, %v3390_v20  ;;  %v9893_v27 = vrot.slane %v5574_v14, 9  ;;  %v5808_v18 = vrot.slane %v5806_v58, 4  ;;  %v5809_v13 = vrot.slane %v12862_v63, 5 }
 0x20b   : > { %v5244_v52 = vsel %vm11813_vm11, %v5239_v1, %v5243_v5  ;;  %v9991_v37 = vcombine.low %v3388_v40, %v3391_v59  ;;  %v9894_v53 = vrot.slane %v5575_v62, 9  ;;  %v16408_v39 = vrot.slane %v16398_v54, 5  ;;  %v12898_v1 = vld [vmem:[#allocation2 + $0x4c] sm:$0xf] }
 0x20c   : > { %v10150_v61 = vcombine.low %v5234_v3, %v5244_v52  ;;  %v5807_v38 = vsel %vm11781_vm8, %v9893_v27, %v5806_v58  ;;  %v12881_v45 = vrot.slane %v3648_v19, 5  ;;  %v5201_v14 = vshll.u32 %v12543_v22, 16  ;;  %v12896_v22 = vld [vmem:[#allocation2 + $0x48] sm:$0xf]  ;;  %16410 = vst [vmem:[#allocation17_spill] sm:$0xff] %v12898_v1 }
 0x20d   : > { %v5815_v24 = vrot.slane %v16408_v39, 4  ;;  %6331 = vrot.lane.b32.xlu1 %v9991_v37, %s11515_s21  ;;  %v5810_v5 = vsel %vm11781_vm8, %v5808_v18, %v5809_v13  ;;  %v16409_v12 = vmov %v16408_v39  ;;  %v5200_v62 = vrot.slane %v5198_v51, 4  ;;  %v12901_v27 = vld [vmem:[#allocation2 + $0x114] sm:$0xf]  ;;  %v12903_v52 = vld [vmem:[#allocation2 + $0x118] sm:$0xf] }
 0x20e   : > { %7129 = vrot.lane.b32.xlu0 %v10150_v61, %s11517_s9  ;;  %v10181_v58 = vcombine.low %v5807_v38, %v5810_v5  ;;  %v5814_v19 = vsel %vm11781_vm8, %v9894_v53, %v16409_v12  ;;  %v5211_v59 = vshrl.u32 %v12553_v34, 16  ;;  %v10009_v54 = vcombine.low %v12896_v22, %v12898_v1  ;;  %v11226_v13 = vld [vmem:[#allocation2 + $0x28] sm:$0xf]  ;;  %v11227_v53 = vld [vmem:[#allocation2 + $0x2c] sm:$0x1] }
 0x20f   : > { %v5817_v3 = vsel %vm11781_vm8, %v5815_v24, %v5816_v7  ;;  %v10119_v18 = vcombine.low %v12901_v27, %v12903_v52  ;;  %v4820_v7 = vor.u32 %v4819_v6, %v12781_v33  ;;  %v4823_v61 = vshll.u32 %v11226_v13, 16 }
 0x210   : > { %v10182_v37 = vcombine.low %v5814_v19, %v5817_v3  ;;  %10900 = vmatmul.mubr.msk.bf16.gmra.mrb[64].mxu0 %vm7253_vm15, %v10181_v58  ;;  %v4827_v51 = vshrl.u32 %v11226_v13, 16  ;;  %v5203_v38 = vrot.slane %v5201_v14, 5  ;;  %v4833_v39 = vshll.u32 %v11227_v53, 16 }
 0x211   : > { %6495 = vrot.lane.b32.xlu1 %v10009_v54, %s11517_s9  ;;  %v2450_v24 = vshrl.u32 %v2262_v55, 16  ;;  %v2453_v5 = vshll.u32 %v2262_v55, 16  ;;  %v4821_v12 = vrot.slane %v4820_v7, 4  ;;  %v4825_v19 = vrot.slane %v4823_v61, 5 }
 0x212   : > { %10903 = vmatprep.mubr.msk.bf16.mxu0 %vm7253_vm15, %v10182_v37  ;;  %6971 = vrot.lane.b32.xlu0 %v10119_v18, %s11515_s21  ;;  %v4829_v3 = vrot.slane %v4827_v51, 4  ;;  %v2459_v58 = vshll.u32 %v12773_v32, 16  ;;  %v5820_v33 = vrot.slane %v12903_v52, 5  ;;  %v4835_v6 = vrot.slane %v4833_v39, 5  ;;  %v5576_v51 = vld [vmem:[#allocation2 + $0x114] sm:$0xe] }
 0x213   : > { %v2452_v13 = vrot.slane %v2450_v24, 4  ;;  %v2455_v14 = vrot.slane %v2453_v5, 5  ;;  %v4826_v37 = vsel %vm11813_vm11, %v4821_v12, %v4825_v19  ;;  %v2463_v53 = vshrl.u32 %v12773_v32, 16 }
 0x214   : > { %v4830_v54 = vor.u32 %v4829_v3, %v4825_v19  ;;  %v2461_v21 = vrot.slane %v2459_v58, 5  ;;  %v2469_v18 = vshll.u32 %v12771_v48, 16  ;;  %v5204_v7 = vor.u32 %v5203_v38, %v5200_v62  ;;  %v12922_v58 = vld [vmem:[#allocation2 + $0x11c] sm:$0x1] }
 0x215   : > { %v2456_v55 = vor.u32 %v2455_v14, %v2452_v13  ;;  %v5207_v61 = vshll.u32 %v12553_v34, 16  ;;  %v2465_v20 = vrot.slane %v2463_v53, 4  ;;  %v5213_v39 = vrot.slane %v5211_v59, 4  ;;  %v361_v34 = vld [vmem:[%s11669_s15 + $0xf0] sm:$0xff]   ;;  %v4777_v53 = vld [vmem:[#allocation2 + $0x128] sm:$0x1] }
 0x216   : > { %v4831_v40 = vrot.slane %v4830_v54, 4  ;;  %v5217_v24 = vshll.u32 %v12862_v63, 16  ;;  %v2471_v12 = vrot.slane %v2469_v18, 5  ;;  %v5205_v19 = vrot.slane %v5204_v7, 4  ;;  %v5577_v13 = vld [vmem:[#allocation2 + $0x120] sm:$0xe]  ;;  %10859 = vmatprep.mubr.bf16.mxu1 %v361_v34 }
 0x217   : > { %v2457_v5 = vrot.slane %v2456_v55, 4  ;;  %v5209_v3 = vrot.slane %v5207_v61, 5  ;;  %v2466_v32 = vor.u32 %v2465_v20, %v2461_v21  ;;  %v9895_v38 = vrot.slane %v5576_v51, 9  ;;  %v363_v55 = vld [vmem:[%s11669_s15 + $0xf8] sm:$0xff]  }
 0x218   : > { %v4836_v48 = vsel %vm11813_vm11, %v4831_v40, %v4835_v6  ;;  %v5219_v62 = vrot.slane %v5217_v24, 5  ;;  %v5822_v40 = vrot.slane %v5820_v33, 4  ;;  %v5823_v20 = vrot.slane %v12922_v58, 5  ;;  %v4734_v6 = vld [vmem:[#allocation2 + $0x124] sm:$0xf]  ;;  %10860 = vmatmul.mubr.bf16.gmra.mrb[28].mxu1 %v363_v55 }
 0x219   : > { %v10133_v14 = vcombine.low %v4826_v37, %v4836_v48  ;;  %v2462_v59 = vsel %vm11813_vm11, %v2457_v5, %v2461_v21  ;;  %v5210_v63 = vsel %vm11813_vm11, %v5205_v19, %v5209_v3  ;;  %v5214_v54 = vor.u32 %v5213_v39, %v5209_v3  ;;  %v12968_v55 = vld [vmem:[#allocation2 + $0x3c] sm:$0xf] }
 0x21a   : > { %v2467_v18 = vrot.slane %v2466_v32, 4  ;;  %v5821_v7 = vsel %vm11781_vm8, %v9895_v38, %v5820_v33  ;;  %v9896_v61 = vrot.slane %v5577_v13, 9  ;;  %v5827_v51 = vrot.slane %v4734_v6, 5  ;;  %v4345_v32 = vld [vmem:[#allocation2 + $0x48] sm:$0xe] }
 0x21b   : > { %7095 = vrot.lane.b32.xlu0 %v10133_v14, %s11517_s9  ;;  %v5215_v37 = vrot.slane %v5214_v54, 4  ;;  %v5824_v39 = vsel %vm11781_vm8, %v5822_v40, %v5823_v20  ;;  %v5830_v24 = vrot.slane %v4777_v53, 5  ;;  %v16411_v5 = vshrl.u32 %v12510_v2, 16  ;;  %v12952_v53 = vld [vmem:[#allocation2 + $0x50] sm:$0x1] }
 0x21c   : > { %v2472_v21 = vsel %vm11813_vm11, %v2467_v18, %v2471_v12  ;;  %v10183_v48 = vcombine.low %v5821_v7, %v5824_v39  ;;  %v16412_v38 = vshll.u32 %v12510_v2, 16  ;;  %v5828_v14 = vsel %vm11781_vm8, %v9896_v61, %v5827_v51  ;;  %16413 = vst [vmem:[#allocation16_spill] sm:$0xff] %v12952_v53  ;;  %v2260_v18 = vld [vmem:[#allocation2 + $0x24] sm:$0xf] }
 0x21d   : > { %v12942_v19 = vrot.slane %v16411_v5, 4  ;;  %v9944_v33 = vcombine.low %v2462_v59, %v2472_v21  ;;  %v5220_v3 = vsel %vm11813_vm11, %v5215_v37, %v5219_v62  ;;  %v5829_v54 = vrot.slane %v5827_v51, 4  ;;  %v12956_v62 = vld [vmem:[#allocation2 + $0x34] sm:$0xf]  ;;  %v12975_v37 = vld [vmem:[#allocation2 + $0x40] sm:$0xf] }
 0x21e   : > { %v12948_v13 = vrot.slane %v16412_v38, 5  ;;  %v10149_v12 = vcombine.low %v5210_v63, %v5220_v3  ;;  %16414 = vst [vmem:[#allocation15_spill] sm:$0xff] %v12956_v62  ;;  %v16415_v2 = vshrl.u32 %v12474_v49, 16  ;;  %v12963_v63 = vld [vmem:[#allocation2 + $0x10c] sm:$0xf]  ;;  %10904 = vmatmul.mubr.msk.bf16.gmra.mrb[68].mxu0 %vm7253_vm15, %v10183_v48  ;;  %v4886_v20 = vshrl.u32 %v12739_v25, 16 }
 0x21f   : > { %16417 = vst [vmem:[#allocation13_spill] sm:$0xff] %v12963_v63  ;;  %6141 = vrot.lane.b32.xlu1 %v9944_v33, %s11516_s12  ;;  %v4889_v6 = vshll.u32 %v12739_v25, 16  ;;  %v5831_v49 = vsel %vm11781_vm8, %v5829_v54, %v5830_v24  ;;  %16418 = vst [vmem:[#allocation18_spill] sm:$0xff] %v12975_v37  ;;  %v9849_v61 = vrot.slane %v4345_v32, 9  ;;  %v10008_v21 = vcombine.low %v12968_v55, %v12975_v37  ;;  %v2292_v38 = vld [vmem:[#allocation2 + $0xfc] sm:$0xf] }
 0x220   : > { %v12961_v7 = vrot.slane %v16415_v2, 4  ;;  %7127 = vrot.lane.b32.xlu0 %v10149_v12, %s11517_s9  ;;  %v10184_v51 = vcombine.low %v5828_v14, %v5831_v49  ;;  %v4505_v39 = vrot.slane %v12898_v1, 5  ;;  %v4508_v5 = vrot.slane %v12952_v53, 5  ;;  %v4344_v54 = vld [vmem:[#allocation2 + $0x3c] sm:$0xe] }
 0x221   : > { %v4035_v33 = vor.u32 %v12948_v13, %v12942_v19  ;;  %v2426_v25 = vshrl.u32 %v2260_v18, 16  ;;  %v2429_v3 = vshll.u32 %v2260_v18, 16  ;;  %v2435_v48 = vshll.u32 %v12817_v16, 16  ;;  %v12992_v49 = vld [vmem:[#allocation2 + $0x44] sm:$0x1] }
 0x222   : > { %16416 = vst [vmem:[#allocation14_spill] sm:$0xff] %v12961_v7  ;;  %10907 = vmatprep.mubr.msk.bf16.mxu0 %vm7253_vm15, %v10184_v51  ;;  %v4506_v24 = vsel %vm11781_vm8, %v9849_v61, %v4505_v39  ;;  %v4507_v32 = vrot.slane %v4505_v39, 4  ;;  %v2439_v12 = vshrl.u32 %v12817_v16, 16  ;;  %v2445_v14 = vshll.u32 %v12809_v41, 16  ;;  %16419 = vst [vmem:[#allocation19_spill] sm:$0xff] %v12992_v49 }
 0x223   : > { %6493 = vrot.lane.b32.xlu1 %v10008_v21, %s11517_s9  ;;  %v12990_v2 = vrot.slane %v4886_v20, 4  ;;  %v2428_v19 = vrot.slane %v2426_v25, 4  ;;  %v2431_v13 = vrot.slane %v2429_v3, 5  ;;  %v2437_v18 = vrot.slane %v2435_v48, 5 }
 0x224   : > { %v12994_v34 = vrot.slane %v4889_v6, 5  ;;  %v4509_v51 = vsel %vm11781_vm8, %v4507_v32, %v4508_v5  ;;  %v2441_v21 = vrot.slane %v2439_v12, 4  ;;  %v2447_v61 = vrot.slane %v2445_v14, 5 }
 0x225   : > { %v10073_v39 = vcombine.low %v4506_v24, %v4509_v51  ;;  %v2432_v40 = vor.u32 %v2431_v13, %v2428_v19  ;;  %v9848_v16 = vrot.slane %v4344_v54, 9  ;;  %v4498_v41 = vrot.slane %v12975_v37, 5 }
 0x226   : > { %v2442_v59 = vor.u32 %v2441_v21, %v2437_v18  ;;  %v4501_v20 = vrot.slane %v12992_v49, 5  ;;  %v2810_v25 = vshrl.u32 %v2292_v38, 16  ;;  %v2813_v3 = vshll.u32 %v2292_v38, 16 }
 0x227   : > { %6751 = vrot.lane.b32.xlu0 %v10073_v39, %s11516_s12  ;;  %v2433_v48 = vrot.slane %v2432_v40, 4  ;;  %v4499_v6 = vsel %vm11781_vm8, %v9848_v16, %v4498_v41  ;;  %v4500_v7 = vrot.slane %v4498_v41, 4  ;;  %v2819_v5 = vshll.u32 %v12848_v4, 16  ;;  %v3127_v16 = vld [vmem:[#allocation2 + $0x48] sm:$0xe] }
 0x228   : > { %v2443_v32 = vrot.slane %v2442_v59, 4  ;;  %v2812_v24 = vrot.slane %v2810_v25, 4  ;;  %v2815_v12 = vrot.slane %v2813_v3, 5  ;;  %v2823_v14 = vshrl.u32 %v12848_v4, 16  ;;  %v13012_v59 = vld [vmem:[#allocation2 + $0x50] sm:$0x1] }
 0x229   : > { %v2438_v54 = vsel %vm11813_vm11, %v2433_v48, %v2437_v18  ;;  %v4502_v38 = vsel %vm11781_vm8, %v4500_v7, %v4501_v20  ;;  %v2821_v19 = vrot.slane %v2819_v5, 5  ;;  %v2829_v40 = vshll.u32 %v12833_v50, 16  ;;  %v13024_v25 = vld [vmem:[#allocation2 + $0x60] sm:$0xf]  ;;  %v13029_v5 = vld [vmem:[#allocation2 + $0x4c] sm:$0xf] }
 0x22a   : > { %v2448_v13 = vsel %vm11813_vm11, %v2443_v32, %v2447_v61  ;;  %v10072_v51 = vcombine.low %v4499_v6, %v4502_v38  ;;  %v2816_v21 = vor.u32 %v2815_v12, %v2812_v24  ;;  %v2825_v39 = vrot.slane %v2823_v14, 4  ;;  %v11231_v38 = vld [vmem:[#allocation2 + $0x4c] sm:$0xf] }
 0x22b   : > { %v16420_v4 = vor.u32 %v12881_v45, %v12864_v0  ;;  %v16422_v7 = vshrl.u32 %v12963_v63, 16  ;;  %v9943_v50 = vcombine.low %v2438_v54, %v2448_v13  ;;  %v13026_v61 = vrot.slane %v4035_v33, 4  ;;  %v13032_v0 = vld [vmem:[#allocation2 + $0x64] sm:$0xf]  ;;  %v13042_v13 = vld [vmem:[#allocation2 + $0x38] sm:$0x1] }
 0x22c   : > { %6749 = vrot.lane.b32.xlu0 %v10072_v51, %s11516_s12  ;;  %v2817_v3 = vrot.slane %v2816_v21, 4  ;;  %v2826_v48 = vor.u32 %v2825_v39, %v2821_v19  ;;  %v2831_v6 = vrot.slane %v2829_v40, 5  ;;  %v10106_v45 = vcombine.low %v13024_v25, %v13032_v0  ;;  %16425 = vst [vmem:[#allocation23_spill] sm:$0xff] %v13042_v13 }
 0x22d   : > { %v13017_v41 = vrot.slane %v16420_v4, 4  ;;  %v13022_v20 = vrot.slane %v16422_v7, 4  ;;  %16424 = vst [vmem:[#allocation22_spill] sm:$0xff] %v13026_v61  ;;  %6139 = vrot.lane.b32.xlu1 %v9943_v50, %s11516_s12  ;;  %v9818_v32 = vrot.slane %v3127_v16, 9  ;;  %v3296_v24 = vrot.slane %v13029_v5, 5 }
 0x22e   : > { %v3299_v33 = vrot.slane %v13012_v59, 5  ;;  %v2822_v12 = vsel %vm11813_vm11, %v2817_v3, %v2821_v19  ;;  %v2827_v14 = vrot.slane %v2826_v48, 4  ;;  %v4892_v54 = vor.u32 %v12994_v34, %v12990_v2  ;;  %v11233_v16 = vld [vmem:[#allocation2 + $0x50] sm:$0x1]  ;;  %v3126_v7 = vld [vmem:[#allocation2 + $0x3c] sm:$0xe] }
 0x22f   : > { %16421 = vst [vmem:[#allocation20_spill] sm:$0xff] %v13017_v41  ;;  %16423 = vst [vmem:[#allocation21_spill] sm:$0xff] %v13022_v20  ;;  %v4895_v40 = vshll.u32 %v11231_v38, 16  ;;  %v3298_v21 = vrot.slane %v3296_v24, 4  ;;  %v4899_v39 = vshrl.u32 %v11231_v38, 16  ;;  %v4905_v4 = vshll.u32 %v11233_v16, 16 }
 0x230   : > { %v4862_v50 = vshrl.u32 %v12836_v35, 16  ;;  %v4865_v18 = vshll.u32 %v12836_v35, 16  ;;  %v2832_v19 = vsel %vm11813_vm11, %v2827_v14, %v2831_v6  ;;  %6945 = vrot.lane.b32.xlu0 %v10106_v45, %s11515_s21  ;;  %v13050_v2 = vld [vmem:[#allocation2 + $0x44] sm:$0x1]  ;;  %v3621_v3 = vshrl.u32 %v12622_v11, 16 }
 0x231   : > { %v4897_v34 = vrot.slane %v4895_v40, 5  ;;  %v9959_v48 = vcombine.low %v2822_v12, %v2832_v19  ;;  %v4893_v51 = vrot.slane %v4892_v54, 4  ;;  %v4901_v38 = vrot.slane %v4899_v39, 4  ;;  %v13058_v61 = vld [vmem:[#allocation2 + $0x40] sm:$0xf] }
 0x232   : > { %v3624_v16 = vshll.u32 %v12622_v11, 16  ;;  %v3297_v20 = vsel %vm11781_vm8, %v9818_v32, %v3296_v24  ;;  %v3300_v35 = vsel %vm11781_vm8, %v3298_v21, %v3299_v33  ;;  %v9817_v6 = vrot.slane %v3126_v7, 9  ;;  %v13065_v24 = vpop.permute.xlu0 %6963 }
 0x233   : > { %6171 = vrot.lane.b32.xlu1 %v9959_v48, %s11516_s12  ;;  %v4902_v45 = vor.u32 %v4901_v38, %v4897_v34  ;;  %v4907_v14 = vrot.slane %v4905_v4, 5  ;;  %v3289_v40 = vrot.slane %v13058_v61, 5  ;;  %v3292_v12 = vrot.slane %v13050_v2, 5  ;;  %16426 = vst [vmem:[#allocation24_spill] sm:$0xff] %v13065_v24  ;;  %v13071_v4 = vld [vmem:[#allocation2 + $0x28] sm:$0xf] }
 0x234   : > { %v4864_v54 = vrot.slane %v4862_v50, 4  ;;  %v4867_v39 = vrot.slane %v4865_v18, 5  ;;  %v5246_v11 = vshrl.u32 %v12901_v27, 16  ;;  %v5249_v32 = vshll.u32 %v12901_v27, 16  ;;  %v13079_v24 = vld [vmem:[#allocation2 + $0x110] sm:$0x1] }
 0x235   : > { %v9978_v33 = vcombine.low %v3297_v20, %v3300_v35  ;;  %v4898_v21 = vsel %vm11813_vm11, %v4893_v51, %v4897_v34  ;;  %v4903_v7 = vrot.slane %v4902_v45, 4  ;;  %v3291_v19 = vrot.slane %v3289_v40, 4  ;;  %16427 = vst [vmem:[#allocation25_spill] sm:$0xff] %v13079_v24 }
 0x236   : > { %v13069_v48 = vrot.slane %v3621_v3, 4  ;;  %v3290_v50 = vsel %vm11781_vm8, %v9817_v6, %v3289_v40  ;;  %v13077_v27 = vrot.slane %v3624_v16, 5  ;;  %v2266_v3 = vld [vmem:[#allocation2 + $0x48] sm:$0xf]  ;;  %v5248_v35 = vrot.slane %v5246_v11, 4 }
 0x237   : > { %6305 = vrot.lane.b32.xlu1 %v9978_v33, %s11515_s21  ;;  %v4908_v51 = vsel %vm11813_vm11, %v4903_v7, %v4907_v14  ;;  %v3293_v34 = vsel %vm11781_vm8, %v3291_v19, %v3292_v12  ;;  %v5251_v45 = vrot.slane %v5249_v32, 5  ;;  %v5259_v38 = vshrl.u32 %v12903_v52, 16  ;;  %v13088_v40 = vld [vmem:[#allocation2 + $0x54] sm:$0xf]  ;;  %v13093_v14 = vpop.permute.xlu0 %6133  ;;  %v13095_v7 = vld [vmem:[#allocation2 + $0x58] sm:$0xf] }
 0x238   : > { %v10136_v6 = vcombine.low %v4898_v21, %v4908_v51  ;;  %v9977_v16 = vcombine.low %v3290_v50, %v3293_v34  ;;  %v4868_v18 = vor.u32 %v4867_v39, %v4864_v54  ;;  %v4871_v20 = vshll.u32 %v12843_v9, 16  ;;  %v13099_v11 = vld [vmem:[#allocation2 + $0x60] sm:$0xf]  ;;  %v11237_v32 = vld [vmem:[#allocation2 + $0x44] sm:$0x1] }
 0x239   : > { %v4875_v33 = vshrl.u32 %v12843_v9, 16  ;;  %v10105_v12 = vcombine.low %v13088_v40, %v13095_v7  ;;  %v4881_v21 = vshll.u32 %v11237_v32, 16  ;;  %v2498_v19 = vshrl.u32 %v2266_v3, 16  ;;  %v13102_v54 = vld [vmem:[#allocation2 + $0x64] sm:$0xf] }
 0x23a   : > { %7101 = vrot.lane.b32.xlu0 %v10136_v6, %s11517_s9  ;;  %v2501_v50 = vshll.u32 %v2266_v3, 16  ;;  %16428 = vst [vmem:[#allocation26_spill] sm:$0xff] %v13102_v54  ;;  %v4869_v9 = vrot.slane %v4868_v18, 4  ;;  %v4873_v39 = vrot.slane %v4871_v20, 5  ;;  %v2507_v34 = vshll.u32 %v13029_v5, 16 }
 0x23b   : > { %6303 = vrot.lane.b32.xlu1 %v9977_v16, %s11515_s21  ;;  %v4877_v51 = vrot.slane %v4875_v33, 4  ;;  %v10011_v6 = vcombine.low %v13099_v11, %v13102_v54  ;;  %v4883_v24 = vrot.slane %v4881_v21, 5  ;;  %v2500_v63 = vrot.slane %v2498_v19, 4  ;;  %v13111_v18 = vpop.permute.xlu0 %7123 }
 0x23c   : > { %v2503_v13 = vrot.slane %v2501_v50, 5  ;;  %v4874_v32 = vsel %vm11813_vm11, %v4869_v9, %v4873_v39  ;;  %v2509_v3 = vrot.slane %v2507_v34, 5  ;;  %v2511_v16 = vshrl.u32 %v13029_v5, 16  ;;  %16429 = vst [vmem:[#allocation27_spill] sm:$0xff] %v13111_v18 }
 0x23d   : > { %v4878_v41 = vor.u32 %v4877_v51, %v4873_v39  ;;  %v2517_v33 = vshll.u32 %v13012_v59, 16  ;;  %v5252_v62 = vor.u32 %v5251_v45, %v5248_v35  ;;  %v5255_v49 = vshll.u32 %v12903_v52, 16 }
 0x23e   : > { %6943 = vrot.lane.b32.xlu0 %v10105_v12, %s11515_s21  ;;  %v2504_v20 = vor.u32 %v2503_v13, %v2500_v63  ;;  %v2513_v19 = vrot.slane %v2511_v16, 4  ;;  %v5261_v50 = vrot.slane %v5259_v38, 4  ;;  %v5265_v9 = vshll.u32 %v12922_v58, 16  ;;  %v4347_v38 = vld [vmem:[#allocation2 + $0x60] sm:$0xe] }
 0x23f   : > { %6499 = vrot.lane.b32.xlu1 %v10011_v6, %s11517_s9  ;;  %v4879_v21 = vrot.slane %v4878_v41, 4  ;;  %v4005_v39 = vshrl.u32 %v12717_v47, 16  ;;  %v5253_v51 = vrot.slane %v5252_v62, 4  ;;  %v5257_v12 = vrot.slane %v5255_v49, 5  ;;  %v13127_v49 = vpop.permute.xlu1 %6293  ;;  %v13131_v16 = vld [vmem:[#allocation2 + $0x68] sm:$0x1] }
 0x240   : > { %v2505_v5 = vrot.slane %v2504_v20, 4  ;;  %v4008_v34 = vshll.u32 %v12717_v47, 16  ;;  %v2514_v59 = vor.u32 %v2513_v19, %v2509_v3  ;;  %v2519_v13 = vrot.slane %v2517_v33, 5 }
 0x241   : > { %v4884_v63 = vsel %vm11813_vm11, %v4879_v21, %v4883_v24  ;;  %v3693_v52 = vshrl.u32 %v12896_v22, 16  ;;  %v5262_v41 = vor.u32 %v5261_v50, %v5257_v12  ;;  %v5267_v45 = vrot.slane %v5265_v9, 5 }
 0x242   : > { %v10135_v35 = vcombine.low %v4874_v32, %v4884_v63  ;;  %v16430_v58 = vshrl.u32 %v13071_v4, 16  ;;  %v3696_v62 = vshll.u32 %v12896_v22, 16  ;;  %v2510_v47 = vsel %vm11813_vm11, %v2505_v5, %v2509_v3  ;;  %v13140_v22 = vpop.permute.xlu0 %6965  ;;  %v2264_v5 = vld [vmem:[#allocation2 + $0x3c] sm:$0xf] }
 0x243   : > { %v2515_v24 = vrot.slane %v2514_v59, 4  ;;  %v13135_v20 = vrot.slane %v4005_v39, 4  ;;  %v5258_v33 = vsel %vm11813_vm11, %v5253_v51, %v5257_v12  ;;  %v5263_v21 = vrot.slane %v5262_v41, 4  ;;  %16431 = vst [vmem:[#allocation28_spill] sm:$0xff] %v13140_v22 }
 0x244   : > { %v13124_v6 = vrot.slane %v16430_v58, 4  ;;  %7099 = vrot.lane.b32.xlu0 %v10135_v35, %s11517_s9  ;;  %v13142_v19 = vrot.slane %v4008_v34, 5  ;;  %v9851_v50 = vrot.slane %v4347_v38, 9  ;;  %v4519_v9 = vrot.slane %v13102_v54, 5  ;;  %v13154_v34 = vld [vmem:[#allocation2 + $0x54] sm:$0xf] }
 0x245   : > { %v2520_v3 = vsel %vm11813_vm11, %v2515_v24, %v2519_v13  ;;  %v13147_v63 = vrot.slane %v3693_v52, 4  ;;  %v5268_v59 = vsel %vm11813_vm11, %v5263_v21, %v5267_v45  ;;  %v4522_v51 = vrot.slane %v13131_v16, 5  ;;  %v13160_v52 = vld [vmem:[#allocation2 + $0x58] sm:$0xf] }
 0x246   : > { %v9946_v39 = vcombine.low %v2510_v47, %v2520_v3  ;;  %v13152_v12 = vrot.slane %v3696_v62, 5  ;;  %v10151_v35 = vcombine.low %v5258_v33, %v5268_v59  ;;  %v4520_v13 = vsel %vm11781_vm8, %v9851_v50, %v4519_v9  ;;  %v13164_v62 = vpop.permute.xlu1 %6325 }
 0x247   : > { %v4521_v41 = vrot.slane %v4519_v9, 4  ;;  %v16432_v58 = vshll.u32 %v12129_v43, 16  ;;  %v2474_v47 = vshrl.u32 %v2264_v5, 16  ;;  %v2477_v24 = vshll.u32 %v2264_v5, 16  ;;  %16433 = vst [vmem:[#allocation29_spill] sm:$0xff] %v13164_v62  ;;  %v13173_v43 = vpop.permute.xlu0 %6743 }
 0x248   : > { %6145 = vrot.lane.b32.xlu1 %v9946_v39, %s11516_s12  ;;  %7131 = vrot.lane.b32.xlu0 %v10151_v35, %s11517_s9  ;;  %v10010_v33 = vcombine.low %v13154_v34, %v13160_v52  ;;  %v2483_v3 = vshll.u32 %v13058_v61, 16  ;;  %v2487_v50 = vshrl.u32 %v13058_v61, 16  ;;  %v4346_v9 = vld [vmem:[#allocation2 + $0x54] sm:$0xe]  ;;  %v16434_v61 = vshll.u32 %v12150_v17, 16 }
 0x249   : > { %v3608_v45 = vrot.slane %v16432_v58, 5  ;;  %v4523_v21 = vsel %vm11781_vm8, %v4521_v41, %v4522_v51  ;;  %v2476_v35 = vrot.slane %v2474_v47, 4  ;;  %v13179_v58 = vld [vmem:[#allocation2 + $0x5c] sm:$0x1]  ;;  %v2479_v38 = vrot.slane %v2477_v24, 5 }
 0x24a   : > { %v10075_v39 = vcombine.low %v4520_v13, %v4523_v21  ;;  %v2485_v32 = vrot.slane %v2483_v3, 5  ;;  %v2489_v51 = vrot.slane %v2487_v50, 4  ;;  %v2493_v41 = vshll.u32 %v13050_v2, 16  ;;  %v3129_v24 = vld [vmem:[#allocation2 + $0x60] sm:$0xe]  ;;  %v13188_v3 = vpop.f32.mrb[12].mxu1 }
 0x24b   : > { %v3609_v5 = vsel %vm11813_vm11, %v12540_v56, %v3608_v45  ;;  %v3613_v59 = vor.u32 %v12476_v8, %v3608_v45  ;;  %v3618_v13 = vrot.slane %v16434_v61, 5  ;;  %v9850_v62 = vrot.slane %v4346_v9, 9 }
 0x24c   : > { %6497 = vrot.lane.b32.xlu1 %v10010_v33, %s11517_s9  ;;  %v4512_v22 = vrot.slane %v13160_v52, 5  ;;  %6755 = vrot.lane.b32.xlu0 %v10075_v39, %s11516_s12  ;;  %v2480_v8 = vor.u32 %v2479_v38, %v2476_v35  ;;  %v2490_v56 = vor.u32 %v2489_v51, %v2485_v32  ;;  %v2495_v45 = vrot.slane %v2493_v41, 5  ;;  %v13197_v38 = vpop.permute.xlu1 %6165  ;;  %v13201_v41 = vld [vmem:[#allocation2 + $0x68] sm:$0x1] }
 0x24d   : > { %v3614_v21 = vrot.slane %v3613_v59, 4  ;;  %v4515_v47 = vrot.slane %v13179_v58, 5  ;;  %v16435_v50 = vshll.u32 %v12165_v15, 16  ;;  %v4937_v39 = vshll.u32 %v13024_v25, 16  ;;  %16436 = vst [vmem:[#allocation30_spill] sm:$0xff] %v13197_v38 }
 0x24e   : > { %v4513_v17 = vsel %vm11781_vm8, %v9850_v62, %v4512_v22  ;;  %v4514_v33 = vrot.slane %v4512_v22, 4  ;;  %v2481_v35 = vrot.slane %v2480_v8, 4  ;;  %v2491_v51 = vrot.slane %v2490_v56, 4  ;;  %v13209_v62 = vpop.permute.xlu0 %6775 }
 0x24f   : > { %v3619_v2 = vsel %vm11813_vm11, %v3614_v21, %v3618_v13  ;;  %v3992_v9 = vrot.slane %v16435_v50, 5  ;;  %16437 = vst [vmem:[#allocation31_spill] sm:$0xff] %v13209_v62  ;;  %v9820_v13 = vrot.slane %v3129_v24, 9  ;;  %v13211_v21 = vpop.f32.mrb[13].mxu1  ;;  %v3313_v24 = vrot.slane %v13201_v41, 5 }
 0x250   : > { %v13199_v59 = vcombine.low %v3609_v5, %v3619_v2  ;;  %v4516_v61 = vsel %vm11781_vm8, %v4514_v33, %v4515_v47  ;;  %16438 = vst [vmem:[#allocation32_spill] sm:$0xff] %v13211_v21  ;;  %v2486_v5 = vsel %vm11813_vm11, %v2481_v35, %v2485_v32  ;;  %v2496_v8 = vsel %vm11813_vm11, %v2491_v51, %v2495_v45  ;;  %v13219_v33 = vld [vmem:[#allocation2 + $0x64] sm:$0xf]  ;;  %v13230_v45 = vld [vmem:[#allocation2 + $0x2c] sm:$0x1] }
 0x251   : > { %v3993_v22 = vsel %vm11813_vm11, %v12546_v30, %v3992_v9  ;;  %v3997_v15 = vor.u32 %v12548_v36, %v3992_v9  ;;  %v10074_v56 = vcombine.low %v4513_v17, %v4516_v61  ;;  %v16439_v47 = vshll.u32 %v12187_v42, 16  ;;  %v13223_v9 = vpop.f32.mrb[14].mxu1  ;;  %v13233_v17 = vld [vmem:[#allocation2 + $0x100] sm:$0xf]  ;;  %v3128_v51 = vld [vmem:[#allocation2 + $0x54] sm:$0xe] }
 0x252   : > { %v9945_v30 = vcombine.low %v2486_v5, %v2496_v8  ;;  %v3310_v36 = vrot.slane %v13219_v33, 5  ;;  %16440 = vst [vmem:[#allocation33_spill] sm:$0xff] %v13223_v9  ;;  %v16441_v32 = vor.u32 %v13077_v27, %v13069_v48  ;;  %v16442_v61 = vshrl.u32 %v13024_v25, 16  ;;  %v13238_v5 = vpop.permute.xlu1 %6933 }
 0x253   : > { %v4002_v2 = vrot.slane %v16439_v47, 5  ;;  %v3998_v50 = vrot.slane %v3997_v15, 4  ;;  %6753 = vrot.lane.b32.xlu0 %v10074_v56, %s11516_s12  ;;  %v4939_v8 = vrot.slane %v4937_v39, 5  ;;  %v4011_v25 = vor.u32 %v13142_v19, %v13135_v20  ;;  %v13253_v39 = vld [vmem:[#allocation2 + $0x7c] sm:$0xf] }
 0x254   : > { %v13228_v35 = vrot.slane %v16441_v32, 4  ;;  %v4936_v15 = vrot.slane %v16442_v61, 4  ;;  %6143 = vrot.lane.b32.xlu1 %v9945_v30, %s11516_s12  ;;  %v3311_v27 = vsel %vm11781_vm8, %v9820_v13, %v3310_v36  ;;  %v3312_v47 = vrot.slane %v3310_v36, 4  ;;  %v13246_v32 = vld [vmem:[#allocation2 + $0x78] sm:$0xf] }
 0x255   : > { %v4003_v48 = vsel %vm11813_vm11, %v3998_v50, %v4002_v2  ;;  %v4018_v61 = vshrl.u32 %v13233_v17, 16  ;;  %v10108_v56 = vcombine.low %v13246_v32, %v13253_v39  ;;  %v13257_v2 = vld [vmem:[#allocation2 + $0x5c] sm:$0x1]  ;;  %v3699_v13 = vor.u32 %v13152_v12, %v13147_v63  ;;  %v13268_v36 = vld [vmem:[#allocation2 + $0x58] sm:$0xf]  ;;  %v13273_v12 = vpop.f32.mrb[15].mxu1 }
 0x256   : > { %v13251_v42 = vcombine.low %v3993_v22, %v4003_v48  ;;  %v3706_v30 = vshrl.u32 %v12898_v1, 16  ;;  %v3314_v50 = vsel %vm11781_vm8, %v3312_v47, %v3313_v24  ;;  %v16444_v20 = vshll.u32 %v12626_v57, 16  ;;  %v13266_v22 = vpop.permute.xlu0 %6741  ;;  %16445 = vst [vmem:[#allocation35_spill] sm:$0xff] %v13273_v12  ;;  %v16486_v1 = vld [vmem:[#allocation13_spill] sm:$0xff] }
 0x257   : > { %v4910_v48 = vshrl.u32 %v13088_v40, 16  ;;  %6949 = vrot.lane.b32.xlu0 %v10108_v56, %s11515_s21  ;;  %v9819_v62 = vrot.slane %v3128_v51, 9  ;;  %v3303_v63 = vrot.slane %v13268_v36, 5  ;;  %v3306_v24 = vrot.slane %v13257_v2, 5 }
 0x258   : > { %16443 = vst [vmem:[#allocation34_spill] sm:$0xff] %v13251_v42  ;;  %v3584_v19 = vrot.slane %v16444_v20, 5  ;;  %v9980_v42 = vcombine.low %v3311_v27, %v3314_v50  ;;  %v4940_v47 = vor.u32 %v4939_v8, %v4936_v15  ;;  %v13280_v20 = vpop.permute.xlu1 %6487  ;;  %v4943_v56 = vshll.u32 %v13032_v0, 16 }
 0x259   : > { %v3304_v51 = vsel %vm11781_vm8, %v9819_v62, %v3303_v63  ;;  %v3305_v27 = vrot.slane %v3303_v63, 4  ;;  %v4947_v50 = vshrl.u32 %v13032_v0, 16  ;;  %v16446_v18 = vshll.u32 %v12641_v26, 16 }
 0x25a   : > { %v3589_v38 = vor.u32 %v12634_v10, %v3584_v19  ;;  %v3585_v57 = vsel %vm11813_vm11, %v12639_v29, %v3584_v19  ;;  %6309 = vrot.lane.b32.xlu1 %v9980_v42, %s11515_s21  ;;  %v11241_v29 = vld [vmem:[#allocation2 + $0x68] sm:$0x1]  ;;  %v16447_v15 = vshll.u32 %v12647_v28, 16  ;;  %v4941_v9 = vrot.slane %v4940_v47, 4 }
 0x25b   : > { %v3594_v12 = vrot.slane %v16446_v18, 5  ;;  %v4953_v19 = vshll.u32 %v11241_v29, 16  ;;  %v3307_v42 = vsel %vm11781_vm8, %v3305_v27, %v3306_v24  ;;  %v4945_v21 = vrot.slane %v4943_v56, 5  ;;  %v13299_v18 = vpop.permute.xlu0 %6773 }
 0x25c   : > { %v3590_v10 = vrot.slane %v3589_v38, 4  ;;  %v3968_v8 = vrot.slane %v16447_v15, 5  ;;  %v4949_v62 = vrot.slane %v4947_v50, 4  ;;  %v4913_v63 = vshll.u32 %v13088_v40, 16  ;;  %16448 = vst [vmem:[#allocation36_spill] sm:$0xff] %v13299_v18 }
 0x25d   : > { %v9979_v38 = vcombine.low %v3304_v51, %v3307_v42  ;;  %v4955_v15 = vrot.slane %v4953_v19, 5  ;;  %v13304_v47 = vrot.slane %v4011_v25, 4  ;;  %v13306_v27 = vrot.slane %v4018_v61, 4  ;;  %v13308_v40 = vld [vmem:[#allocation2 + $0x104] sm:$0x1] }
 0x25e   : > { %v3595_v0 = vsel %vm11813_vm11, %v3590_v10, %v3594_v12  ;;  %v3969_v26 = vsel %vm11813_vm11, %v12699_v31, %v3968_v8  ;;  %v4950_v29 = vor.u32 %v4949_v62, %v4945_v21  ;;  %v3973_v24 = vor.u32 %v12703_v23, %v3968_v8  ;;  %v13313_v31 = vld [vmem:[#allocation2 + $0x78] sm:$0xf]  ;;  %v13321_v10 = vld [vmem:[#allocation2 + $0x7c] sm:$0xf]  ;;  %v11243_v42 = vld [vmem:[#allocation2 + $0x4] sm:$0xf] }
 0x25f   : > { %v13301_v28 = vcombine.low %v3585_v57, %v3595_v0  ;;  %6307 = vrot.lane.b32.xlu1 %v9979_v38, %s11515_s21  ;;  %v13315_v57 = vpop.permute.xlu1 %6519  ;;  %v4946_v56 = vsel %vm11813_vm11, %v4941_v9, %v4945_v21  ;;  %v16450_v61 = vshll.u32 %v12688_v44, 16  ;;  %16451 = vst [vmem:[#allocation38_spill] sm:$0xff] %v13321_v10  ;;  %v13323_v19 = vrot.slane %v3699_v13, 4  ;;  %v11244_v62 = vld [vmem:[#allocation2] sm:$0xf] }
 0x260   : > { %16449 = vst [vmem:[#allocation37_spill] sm:$0xff] %v13315_v57  ;;  %v4951_v23 = vrot.slane %v4950_v29, 4  ;;  %v3974_v25 = vrot.slane %v3973_v24, 4  ;;  %v13325_v8 = vrot.slane %v3706_v30, 4  ;;  %v9908_v0 = vcombine.low %v11244_v62, %v11243_v42  ;;  %v2270_v51 = vld [vmem:[#allocation2 + $0x60] sm:$0xf] }
 0x261   : > { %v3978_v50 = vrot.slane %v16450_v61, 5  ;;  %16452 = vst [vmem:[#allocation39_spill] sm:$0xff] %v13323_v19  ;;  %v10013_v38 = vcombine.low %v13313_v31, %v13321_v10  ;;  %v4912_v12 = vrot.slane %v4910_v48, 4  ;;  %v4915_v21 = vrot.slane %v4913_v63, 5  ;;  %v13338_v61 = vpop.permute.xlu0 %6937  ;;  %v4348_v18 = vld [vmem:[#allocation2 + $0x6c] sm:$0xe] }
 0x262   : > { %16453 = vst [vmem:[#allocation40_spill] sm:$0xff] %v13325_v8  ;;  %v4956_v9 = vsel %vm11813_vm11, %v4951_v23, %v4955_v15  ;;  %v3669_v13 = vshrl.u32 %v12968_v55, 16  ;;  %v3672_v30 = vshll.u32 %v12968_v55, 16  ;;  %v2546_v63 = vshrl.u32 %v2270_v51, 16  ;;  %v11246_v23 = vld [vmem:[#allocation2 + $0x5c] sm:$0x1] }
 0x263   : > { %v3979_v44 = vsel %vm11813_vm11, %v3974_v25, %v3978_v50  ;;  %v10138_v29 = vcombine.low %v4946_v56, %v4956_v9  ;;  %6503 = vrot.lane.b32.xlu1 %v10013_v38, %s11517_s9  ;;  %v2549_v42 = vshll.u32 %v2270_v51, 16  ;;  %v2555_v15 = vshll.u32 %v13219_v33, 16  ;;  %v13348_v56 = vpop.permute.xlu1 %6485  ;;  %v13350_v50 = vld [vmem:[#allocation2 + $0x6c] sm:$0xf]  ;;  %v4349_v8 = vld [vmem:[#allocation2 + $0x78] sm:$0xe] }
 0x264   : > { %v13335_v24 = vcombine.low %v3969_v26, %v3979_v44  ;;  %v7256_v25 = vsel %vm7253_vm15, %v9908_v0, %v13093_v14  ;;  %v2559_v55 = vshrl.u32 %v13219_v33, 16  ;;  %v2565_v26 = vshll.u32 %v13201_v41, 16  ;;  %v13352_v44 = vld [vmem:[#allocation2 + $0x70] sm:$0xf] }
 0x265   : > { %7105 = vrot.lane.b32.xlu0 %v10138_v29, %s11517_s9  ;;  %v2548_v62 = vrot.slane %v2546_v63, 4  ;;  %v2551_v38 = vrot.slane %v2549_v42, 5  ;;  %v2557_v51 = vrot.slane %v2555_v15, 5  ;;  %v4916_v9 = vor.u32 %v4915_v21, %v4912_v12  ;;  %v13359_v15 = vpop.permute.xlu0 %6969 }
 0x266   : > { %16454 = vst [vmem:[#allocation41_spill] sm:$0xff] %v13335_v24  ;;  %v10107_v48 = vcombine.low %v13350_v50, %v13352_v44  ;;  %v2561_v14 = vrot.slane %v2559_v55, 4  ;;  %v4919_v0 = vshll.u32 %v13095_v7, 16  ;;  %v4923_v33 = vshrl.u32 %v13095_v7, 16  ;;  %16455 = vst [vmem:[#allocation42_spill] sm:$0xff] %v13359_v15 }
 0x267   : > { %v2552_v41 = vor.u32 %v2551_v38, %v2548_v62  ;;  %v2567_v29 = vrot.slane %v2565_v26, 5  ;;  %v4929_v57 = vshll.u32 %v11246_v23, 16  ;;  %v4917_v42 = vrot.slane %v4916_v9, 4 }
 0x268   : > { %v2562_v63 = vor.u32 %v2561_v14, %v2557_v51  ;;  %v4921_v12 = vrot.slane %v4919_v0, 5  ;;  %v4925_v21 = vrot.slane %v4923_v33, 4  ;;  %v13361_v24 = vrot.slane %v3669_v13, 4  ;;  %v2268_v33 = vld [vmem:[#allocation2 + $0x54] sm:$0xf] }
 0x269   : > { %6947 = vrot.lane.b32.xlu0 %v10107_v48, %s11515_s21  ;;  %v13363_v55 = vrot.slane %v3672_v30, 5  ;;  %v2553_v7 = vrot.slane %v2552_v41, 4  ;;  %v4931_v38 = vrot.slane %v4929_v57, 5  ;;  %v13367_v48 = vld [vmem:[#allocation2 + $0x80] sm:$0x1]  ;;  %v4982_v9 = vshrl.u32 %v13246_v32, 16  ;;  %v13373_v30 = vpop.permute.xlu1 %6517 }
 0x26a   : > { %v2563_v62 = vrot.slane %v2562_v63, 4  ;;  %v4926_v23 = vor.u32 %v4925_v21, %v4921_v12  ;;  %16456 = vst [vmem:[#allocation43_spill] sm:$0xff] %v13367_v48  ;;  %v4985_v14 = vshll.u32 %v13246_v32, 16  ;;  %v7352_v13 = vsel %vm7350_vm1, %v7256_v25, %v13127_v49  ;;  %16457 = vst [vmem:[#allocation44_spill] sm:$0xff] %v13373_v30  ;;  %v13409_v30 = vld [vmem:[#allocation2 + $0x80] sm:$0x1] }
 0x26b   : > { %v2558_v0 = vsel %vm11813_vm11, %v2553_v7, %v2557_v51  ;;  %v4922_v57 = vsel %vm11813_vm11, %v4917_v42, %v4921_v12  ;;  %v9853_v21 = vrot.slane %v4349_v8, 9  ;;  %v4533_v32 = vrot.slane %v13321_v10, 5  ;;  %v7094_v7 = vpop.permute.xlu0 %7093  ;;  %v13389_v42 = vld [vmem:[#allocation2 + $0x6c] sm:$0xf]  ;;  %v13391_v12 = vld [vmem:[#allocation2 + $0x70] sm:$0xf] }
 0x26c   : > { %v2568_v41 = vsel %vm11813_vm11, %v2563_v62, %v2567_v29  ;;  %v4927_v63 = vrot.slane %v4926_v23, 4  ;;  %v4536_v49 = vrot.slane %v13367_v48, 5  ;;  %v7514_v25 = vsel %vm7253_vm15, %v13301_v28, %v13266_v22  ;;  %16458 = vst [vmem:[#allocation45_spill] sm:$0xff] %v13391_v12 }
 0x26d   : > { %v9948_v26 = vcombine.low %v2558_v0, %v2568_v41  ;;  %v2522_v29 = vshrl.u32 %v2268_v33, 16  ;;  %v2525_v62 = vshll.u32 %v2268_v33, 16  ;;  %v4534_v23 = vsel %vm11781_vm8, %v9853_v21, %v4533_v32 }
 0x26e   : > { %v4932_v51 = vsel %vm11813_vm11, %v4927_v63, %v4931_v38  ;;  %v4535_v0 = vrot.slane %v4533_v32, 4  ;;  %v2531_v22 = vshll.u32 %v13268_v36, 16  ;;  %v2535_v38 = vshrl.u32 %v13268_v36, 16  ;;  %v13398_v63 = vld [vmem:[#allocation2 + $0x74] sm:$0x1] }
 0x26f   : > { %6149 = vrot.lane.b32.xlu1 %v9948_v26, %s11516_s12  ;;  %v10137_v8 = vcombine.low %v4922_v57, %v4932_v51  ;;  %v2524_v28 = vrot.slane %v2522_v29, 4  ;;  %v2527_v41 = vrot.slane %v2525_v62, 5  ;;  %v2541_v33 = vshll.u32 %v13257_v2, 16  ;;  %16459 = vst [vmem:[#allocation46_spill] sm:$0xff] %v13398_v63  ;;  %v13400_v26 = vpop.permute.xlu1 %6297  ;;  %v3131_v29 = vld [vmem:[#allocation2 + $0x78] sm:$0xe] }
 0x270   : > { %16460 = vst [vmem:[#allocation47_spill] sm:$0xff] %v13400_v26  ;;  %v10012_v57 = vcombine.low %v13389_v42, %v13391_v12  ;;  %v4537_v21 = vsel %vm11781_vm8, %v4535_v0, %v4536_v49  ;;  %v2533_v32 = vrot.slane %v2531_v22, 5  ;;  %v9852_v51 = vrot.slane %v4348_v18, 9 }
 0x271   : > { %7103 = vrot.lane.b32.xlu0 %v10137_v8, %s11517_s9  ;;  %v7417_v36 = vsel %vm7415_vm2, %v7352_v13, %v13348_v56  ;;  %v10077_v62 = vcombine.low %v4534_v23, %v4537_v21  ;;  %v2528_v2 = vor.u32 %v2527_v41, %v2524_v28  ;;  %v2537_v15 = vrot.slane %v2535_v38, 4  ;;  %v13417_v56 = vpop.permute.xlu0 %6935  ;;  %v13419_v13 = vld [vmem:[#allocation2 + $0x7c] sm:$0xf] }
 0x272   : > { %v2543_v8 = vrot.slane %v2541_v33, 5  ;;  %v4526_v26 = vrot.slane %v13391_v12, 5  ;;  %v4529_v19 = vrot.slane %v13398_v63, 5  ;;  %v7609_v49 = vsel %vm7350_vm1, %v7514_v25, %v13238_v5 }
 0x273   : > { %6501 = vrot.lane.b32.xlu1 %v10012_v57, %s11517_s9  ;;  %v2529_v18 = vrot.slane %v2528_v2, 4  ;;  %v2538_v0 = vor.u32 %v2537_v15, %v2533_v32  ;;  %v7673_v22 = vsel %vm7415_vm2, %v7609_v49, %v7094_v7  ;;  %v9822_v23 = vrot.slane %v3131_v29, 9  ;;  %v13431_v29 = vpop.permute.xlu1 %6329  ;;  %v13443_v49 = vld [vmem:[#allocation2 + $0x70] sm:$0xf] }
 0x274   : > { %v4527_v28 = vsel %vm11781_vm8, %v9852_v51, %v4526_v26  ;;  %v4528_v41 = vrot.slane %v4526_v26, 4  ;;  %8047 = vmatprep.mubr.bf16.mxu1 %v7673_v22  ;;  %v3324_v38 = vrot.slane %v13419_v13, 5  ;;  %v3327_v5 = vrot.slane %v13409_v30, 5  ;;  %16461 = vst [vmem:[#allocation48_spill] sm:$0xff] %v13431_v29 }
 0x275   : > { %6759 = vrot.lane.b32.xlu0 %v10077_v62, %s11516_s12  ;;  %v4984_v25 = vrot.slane %v4982_v9, 4  ;;  %v4987_v15 = vrot.slane %v4985_v14, 5  ;;  %v2534_v7 = vsel %vm11813_vm11, %v2529_v18, %v2533_v32  ;;  %v2539_v33 = vrot.slane %v2538_v0, 4  ;;  %8048 = vmatmul.mubr.bf16.vlgmr.msra.gmra.mrb[32].mxu1 %v7417_v36  ;;  %v13435_v62 = vld [vmem:[#allocation2 + $0x74] sm:$0x1] }
 0x276   : > { %v3675_v57 = vor.u32 %v13363_v55, %v13361_v24  ;;  %v4530_v26 = vsel %vm11781_vm8, %v4528_v41, %v4529_v19  ;;  %v3326_v51 = vrot.slane %v3324_v38, 4  ;;  %v3130_v9 = vld [vmem:[#allocation2 + $0x6c] sm:$0xe]  ;;  %v16462_v14 = vshrl.u32 %v13099_v11, 16  ;;  %v13451_v41 = vld [vmem:[#allocation2 + $0x90] sm:$0xf] }
 0x277   : > { %v16463_v32 = vshll.u32 %v13099_v11, 16  ;;  %v2544_v24 = vsel %vm11813_vm11, %v2539_v33, %v2543_v8  ;;  %v10076_v55 = vcombine.low %v4527_v28, %v4530_v26  ;;  %v3325_v19 = vsel %vm11781_vm8, %v9822_v23, %v3324_v38  ;;  %v13453_v11 = vpop.permute.xlu0 %7125 }
 0x278   : > { %v3743_v2 = vrot.slane %v16462_v14, 4  ;;  %v9947_v18 = vcombine.low %v2534_v7, %v2544_v24  ;;  %v3328_v0 = vsel %vm11781_vm8, %v3326_v51, %v3327_v5  ;;  %v3317_v22 = vrot.slane %v13443_v49, 5  ;;  %16464 = vst [vmem:[#allocation49_spill] sm:$0xff] %v13453_v11  ;;  %v11247_v5 = vld [vmem:[#allocation2 + $0x80] sm:$0x1]  ;;  %v13460_v51 = vpop.f32.mrb[16].mxu1 }
 0x279   : > { %v3746_v36 = vrot.slane %v16463_v32, 5  ;;  %6757 = vrot.lane.b32.xlu0 %v10076_v55, %s11516_s12  ;;  %v9821_v14 = vrot.slane %v3130_v9, 9  ;;  %v3320_v8 = vrot.slane %v13435_v62, 5  ;;  %v4988_v28 = vor.u32 %v4987_v15, %v4984_v25  ;;  %16465 = vst [vmem:[#allocation50_spill] sm:$0xff] %v13460_v51  ;;  %v13463_v9 = vld [vmem:[#allocation2 + $0x94] sm:$0xf] }
 0x27a   : > { %v4991_v7 = vshll.u32 %v13253_v39, 16  ;;  %v3754_v33 = vshrl.u32 %v13102_v54, 16  ;;  %6147 = vrot.lane.b32.xlu1 %v9947_v18, %s11516_s12  ;;  %v3319_v23 = vrot.slane %v3317_v22, 4  ;;  %v4995_v38 = vshrl.u32 %v13253_v39, 16  ;;  %v13471_v18 = vpop.permute.xlu1 %6295  ;;  %v13522_v54 = vld [vmem:[#allocation2 + $0x84] sm:$0xf] }
 0x27b   : > { %v5001_v26 = vshll.u32 %v11247_v5, 16  ;;  %v3747_v32 = vor.u32 %v3746_v36, %v3743_v2  ;;  %v3717_v24 = vshrl.u32 %v13154_v34, 16  ;;  %v10110_v25 = vcombine.low %v13451_v41, %v13463_v9 }
 0x27c   : > { %v4993_v15 = vrot.slane %v4991_v7, 5  ;;  %v16466_v55 = vshrl.u32 %v12975_v37, 16  ;;  %v9982_v39 = vcombine.low %v3325_v19, %v3328_v0  ;;  %v4989_v29 = vrot.slane %v4988_v28, 4 }
 0x27d   : > { %v4997_v5 = vrot.slane %v4995_v38, 4  ;;  %v4958_v11 = vshrl.u32 %v13350_v50, 16  ;;  %v4961_v2 = vshll.u32 %v13350_v50, 16  ;;  %6953 = vrot.lane.b32.xlu0 %v10110_v25, %s11515_s21  ;;  %v3318_v36 = vsel %vm11781_vm8, %v9821_v14, %v3317_v22  ;;  %v13491_v22 = vpop.permute.xlu0 %6967 }
 0x27e   : > { %v13469_v21 = vrot.slane %v16466_v55, 4  ;;  %v3321_v7 = vsel %vm11781_vm8, %v3319_v23, %v3320_v8  ;;  %v13480_v51 = vrot.slane %v3675_v57, 4  ;;  %6313 = vrot.lane.b32.xlu1 %v9982_v39, %s11515_s21  ;;  %v5003_v0 = vrot.slane %v5001_v26, 5  ;;  %16472 = vst [vmem:[#allocation55_spill] sm:$0xff] %v13491_v22  ;;  %v16473_v23 = vld [vmem:[#allocation15_spill] sm:$0xff]  ;;  %v13516_v22 = vpop.f32.mrb[32].mxu0 }
 0x27f   : > { %v4998_v19 = vor.u32 %v4997_v5, %v4993_v15  ;;  %v13484_v28 = vrot.slane %v3747_v32, 4  ;;  %v13487_v38 = vrot.slane %v3754_v33, 4  ;;  %v13489_v25 = vrot.slane %v3717_v24, 4  ;;  %v2274_v5 = vld [vmem:[#allocation2 + $0x78] sm:$0xf]  ;;  %v13501_v24 = vpop.permute.xlu1 %6327 }
 0x280   : > { %16467 = vst [vmem:[#allocation51_spill] sm:$0xff] %v13469_v21  ;;  %16468 = vst [vmem:[#allocation52_spill] sm:$0xff] %v13480_v51  ;;  %v9981_v14 = vcombine.low %v3318_v36, %v3321_v7  ;;  %v4994_v57 = vsel %vm11813_vm11, %v4989_v29, %v4993_v15  ;;  %v16474_v21 = vshll.u32 %v16473_v23, 16  ;;  %v3720_v26 = vshll.u32 %v13154_v34, 16  ;;  %v13506_v15 = vld [vmem:[#allocation2 + $0x90] sm:$0xf] }
 0x281   : > { %16470 = vst [vmem:[#allocation53_spill] sm:$0xff] %v13484_v28  ;;  %16471 = vst [vmem:[#allocation54_spill] sm:$0xff] %v13487_v38  ;;  %v4999_v8 = vrot.slane %v4998_v19, 4  ;;  %v3730_v32 = vshrl.u32 %v13160_v52, 16  ;;  %v4960_v50 = vrot.slane %v4958_v11, 4  ;;  %v4963_v33 = vrot.slane %v4961_v2, 5 }
 0x282   : > { %v3656_v39 = vrot.slane %v16474_v21, 5  ;;  %v13499_v38 = vpop.f32.mrb[17].mxu1  ;;  %16476 = vst [vmem:[#allocation56_spill] sm:$0xff] %v13501_v24  ;;  %6311 = vrot.lane.b32.xlu1 %v9981_v14, %s11515_s21  ;;  %v13508_v36 = vld [vmem:[#allocation2 + $0x94] sm:$0xf]  ;;  %v16478_v21 = vld [vmem:[#allocation20_spill] sm:$0xff] }
 0x283   : > { %16475 = vst [vmem:[#allocation15_spill] sm:$0xff] %v13499_v38  ;;  %v5004_v29 = vsel %vm11813_vm11, %v4999_v8, %v5003_v0  ;;  %16477 = vst [vmem:[#allocation57_spill] sm:$0xff] %v13508_v36  ;;  %v16479_v7 = vld [vmem:[#allocation14_spill] sm:$0xff]  ;;  %v16480_v2 = vld [vmem:[#allocation23_spill] sm:$0xff]  ;;  %v10015_v14 = vcombine.low %v13506_v15, %v13508_v36  ;;  %v2594_v0 = vshrl.u32 %v2274_v5, 16  ;;  %v2597_v8 = vshll.u32 %v2274_v5, 16  ;;  %v13532_v5 = vpop.permute.xlu0 %6747 }
 0x284   : > { %v3657_v34 = vsel %vm11813_vm11, %v16478_v21, %v3656_v39  ;;  %v3661_v11 = vor.u32 %v16479_v7, %v3656_v39  ;;  %v16481_v19 = vshll.u32 %v16480_v2, 16  ;;  %16482 = vst [vmem:[#allocation20_spill] sm:$0xff] %v13516_v22  ;;  %v10140_v24 = vcombine.low %v4994_v57, %v5004_v29  ;;  %v13520_v28 = vpop.f32.mrb[18].mxu1  ;;  %v13528_v57 = vld [vmem:[#allocation2 + $0x88] sm:$0xf]  ;;  %16484 = vst [vmem:[#allocation23_spill] sm:$0xff] %v13532_v5 }
 0x285   : > { %16483 = vst [vmem:[#allocation14_spill] sm:$0xff] %v13520_v28  ;;  %v2603_v21 = vshll.u32 %v13419_v13, 16  ;;  %v2607_v39 = vshrl.u32 %v13419_v13, 16  ;;  %v2613_v7 = vshll.u32 %v13409_v30, 16  ;;  %v3722_v2 = vrot.slane %v3720_v26, 5  ;;  %v13534_v28 = vpop.f32.mrb[33].mxu0 }
 0x286   : > { %v3666_v23 = vrot.slane %v16481_v19, 5  ;;  %v3662_v38 = vrot.slane %v3661_v11, 4  ;;  %7109 = vrot.lane.b32.xlu0 %v10140_v24, %s11517_s9  ;;  %v10109_v29 = vcombine.low %v13522_v54, %v13528_v57  ;;  %v2596_v19 = vrot.slane %v2594_v0, 4  ;;  %16485 = vst [vmem:[#allocation58_spill] sm:$0xff] %v13534_v28  ;;  %6507 = vrot.lane.b32.xlu1 %v10015_v14, %s11517_s9  ;;  %v13539_v24 = vpop.f32.mrb[19].mxu1  ;;  %v13544_v0 = vpop.permute.xlu1 %6491 }
 0x287   : > { %v2599_v22 = vrot.slane %v2597_v8, 5  ;;  %v2605_v30 = vrot.slane %v2603_v21, 5  ;;  %v2609_v26 = vrot.slane %v2607_v39, 4  ;;  %v4964_v11 = vor.u32 %v4963_v33, %v4960_v50  ;;  %v11250_v14 = vld [vmem:[#allocation2 + $0x74] sm:$0x1] }
 0x288   : > { %v3667_v13 = vsel %vm11813_vm11, %v3662_v38, %v3666_v23  ;;  %v2615_v37 = vrot.slane %v2613_v7, 5  ;;  %v4967_v5 = vshll.u32 %v13352_v44, 16  ;;  %v4971_v28 = vshrl.u32 %v13352_v44, 16  ;;  %v4351_v33 = vld [vmem:[#allocation2 + $0x90] sm:$0xe] }
 0x289   : > { %v13541_v51 = vcombine.low %v3657_v34, %v3667_v13  ;;  %v2600_v55 = vor.u32 %v2599_v22, %v2596_v19  ;;  %v2610_v8 = vor.u32 %v2609_v26, %v2605_v30  ;;  %v4977_v53 = vshll.u32 %v11250_v14, 16  ;;  %v16488_v19 = vld [vmem:[#allocation22_spill] sm:$0xff]  ;;  %v13555_v13 = vpop.f32.mrb[34].mxu0  ;;  %v16491_v14 = vld [vmem:[#allocation25_spill] sm:$0xff] }
 0x28a   : > { %v16487_v38 = vshll.u32 %v16486_v1, 16  ;;  %v3723_v50 = vor.u32 %v3722_v2, %v13489_v25  ;;  %6951 = vrot.lane.b32.xlu0 %v10109_v29, %s11515_s21  ;;  %v4969_v34 = vrot.slane %v4967_v5, 5  ;;  %v4965_v39 = vrot.slane %v4964_v11, 4  ;;  %16489 = vst [vmem:[#allocation13_spill] sm:$0xff] %v13555_v13  ;;  %v16490_v2 = vld [vmem:[#allocation21_spill] sm:$0xff]  ;;  %v13563_v5 = vpop.permute.xlu0 %6779  ;;  %v13565_v11 = vpop.f32.mrb[35].mxu0 }
 0x28b   : > { %v2601_v22 = vrot.slane %v2600_v55, 4  ;;  %v2611_v21 = vrot.slane %v2610_v8, 4  ;;  %v4973_v7 = vrot.slane %v4971_v28, 4  ;;  %v16492_v29 = vshll.u32 %v16491_v14, 16  ;;  %16493 = vst [vmem:[#allocation22_spill] sm:$0xff] %v13563_v5  ;;  %16494 = vst [vmem:[#allocation21_spill] sm:$0xff] %v13565_v11  ;;  %v13576_v13 = vpop.permute.xlu1 %6523 }
 0x28c   : > { %v4040_v23 = vrot.slane %v16487_v38, 5  ;;  %v13567_v28 = vrot.slane %v3730_v32, 4  ;;  %v13571_v1 = vrot.slane %v3723_v50, 4  ;;  %v3789_v14 = vshrl.u32 %v13313_v31, 16  ;;  %16495 = vst [vmem:[#allocation25_spill] sm:$0xff] %v13576_v13 }
 0x28d   : > { %v2606_v25 = vsel %vm11813_vm11, %v2601_v22, %v2605_v30  ;;  %v4050_v55 = vrot.slane %v16492_v29, 5  ;;  %v2616_v8 = vsel %vm11813_vm11, %v2611_v21, %v2615_v37  ;;  %v4974_v38 = vor.u32 %v4973_v7, %v4969_v34  ;;  %v3496_v21 = vld [vmem:[#allocation2 + $0x84] sm:$0xf]  ;;  %v2278_v5 = vld [vmem:[#allocation2 + $0x90] sm:$0xf] }
 0x28e   : > { %v4041_v44 = vsel %vm11813_vm11, %v16488_v19, %v4040_v23  ;;  %v4045_v26 = vor.u32 %v16490_v2, %v4040_v23  ;;  %v4979_v19 = vrot.slane %v4977_v53, 5  ;;  %v9950_v23 = vcombine.low %v2606_v25, %v2616_v8  ;;  %v3551_v2 = vld [vmem:[#allocation2 + $0x98] sm:$0x1]  ;;  %v11255_v11 = vld [vmem:[#allocation2 + $0x8c] sm:$0x1] }
 0x28f   : > { %v3792_v29 = vshll.u32 %v13313_v31, 16  ;;  %v4970_v32 = vsel %vm11813_vm11, %v4965_v39, %v4969_v34  ;;  %v4975_v37 = vrot.slane %v4974_v38, 4  ;;  %v13583_v53 = vsel %vm7253_vm15, %v13199_v59, %v13173_v43  ;;  %v2272_v43 = vld [vmem:[#allocation2 + $0x6c] sm:$0xf] }
 0x290   : > { %v4046_v22 = vrot.slane %v4045_v26, 4  ;;  %6153 = vrot.lane.b32.xlu1 %v9950_v23, %s11516_s12  ;;  %v9855_v7 = vrot.slane %v4351_v33, 9  ;;  %v4547_v31 = vrot.slane %v13508_v36, 5  ;;  %v3497_v26 = vld [vmem:[#allocation2 + $0x88] sm:$0xf]  ;;  %v4550_v8 = vrot.slane %v3551_v2, 5 }
 0x291   : > { %v4980_v34 = vsel %vm11813_vm11, %v4975_v37, %v4979_v19  ;;  %v10014_v38 = vcombine.low %v3496_v21, %v3497_v26  ;;  %v13598_v33 = vrot.slane %v3789_v14, 4  ;;  %v13600_v30 = vrot.slane %v3792_v29, 5  ;;  %v4350_v21 = vld [vmem:[#allocation2 + $0x84] sm:$0xe]  ;;  %v13611_v29 = vpop.permute.xlu1 %6137 }
 0x292   : > { %v4051_v50 = vsel %vm11813_vm11, %v4046_v22, %v4050_v55  ;;  %v10139_v59 = vcombine.low %v4970_v32, %v4980_v34  ;;  %v4548_v23 = vsel %vm11781_vm8, %v9855_v7, %v4547_v31  ;;  %v4549_v55 = vrot.slane %v4547_v31, 4  ;;  %v13596_v22 = vpop.permute.xlu0 %6745 }
 0x293   : > { %v13592_v39 = vcombine.low %v4041_v44, %v4051_v50  ;;  %v16497_v44 = vshll.u32 %v13071_v4, 16  ;;  %v16498_v32 = vshll.u32 %v13230_v45, 16  ;;  %v2570_v50 = vshrl.u32 %v2272_v43, 16 }
 0x294   : > { %7107 = vrot.lane.b32.xlu0 %v10139_v59, %s11517_s9  ;;  %6505 = vrot.lane.b32.xlu1 %v10014_v38, %s11517_s9  ;;  %v4551_v2 = vsel %vm11781_vm8, %v4549_v55, %v4550_v8  ;;  %v2573_v14 = vshll.u32 %v2272_v43, 16  ;;  %v2579_v34 = vshll.u32 %v13443_v49, 16  ;;  %v2583_v8 = vshrl.u32 %v13443_v49, 16  ;;  %v3550_v55 = vld [vmem:[#allocation2 + $0x8c] sm:$0x1] }
 0x295   : > { %16496 = vst [vmem:[#allocation59_spill] sm:$0xff] %v13592_v39  ;;  %v3632_v19 = vrot.slane %v16497_v44, 5  ;;  %v3642_v37 = vrot.slane %v16498_v32, 5  ;;  %v10079_v7 = vcombine.low %v4548_v23, %v4551_v2  ;;  %v2572_v59 = vrot.slane %v2570_v50, 4 }
 0x296   : > { %v2575_v38 = vrot.slane %v2573_v14, 5  ;;  %v2589_v45 = vshll.u32 %v13435_v62, 16  ;;  %v5030_v43 = vshrl.u32 %v13451_v41, 16  ;;  %v2581_v32 = vrot.slane %v2579_v34, 5  ;;  %v13623_v25 = vpop.permute.xlu0 %6777 }
 0x297   : > { %v3633_v4 = vsel %vm11813_vm11, %v13228_v35, %v3632_v19  ;;  %v3637_v31 = vor.u32 %v13124_v6, %v3632_v19  ;;  %v9854_v23 = vrot.slane %v4350_v21, 9  ;;  %v5033_v2 = vshll.u32 %v13451_v41, 16  ;;  %16499 = vst [vmem:[#allocation60_spill] sm:$0xff] %v13623_v25 }
 0x298   : > { %6763 = vrot.lane.b32.xlu0 %v10079_v7, %s11516_s12  ;;  %v2576_v35 = vor.u32 %v2575_v38, %v2572_v59  ;;  %v2585_v6 = vrot.slane %v2583_v8, 4  ;;  %v4540_v19 = vrot.slane %v3497_v26, 5  ;;  %v2591_v50 = vrot.slane %v2589_v45, 5  ;;  %v13633_v38 = vpop.permute.xlu1 %6489  ;;  %v13641_v45 = vld [vmem:[#allocation2 + $0x98] sm:$0x1] }
 0x299   : > { %v3638_v44 = vrot.slane %v3637_v31, 4  ;;  %v4543_v62 = vrot.slane %v3550_v55, 5  ;;  %v16500_v14 = vshll.u32 %v13233_v17, 16  ;;  %v3133_v31 = vld [vmem:[#allocation2 + $0x90] sm:$0xe]  ;;  %v16501_v7 = vshll.u32 %v13308_v40, 16 }
 0x29a   : > { %v2577_v21 = vrot.slane %v2576_v35, 4  ;;  %v2586_v41 = vor.u32 %v2585_v6, %v2581_v32  ;;  %v4541_v26 = vsel %vm11781_vm8, %v9854_v23, %v4540_v19  ;;  %v4542_v8 = vrot.slane %v4540_v19, 4 }
 0x29b   : > { %v3643_v49 = vsel %vm11813_vm11, %v3638_v44, %v3642_v37  ;;  %v4016_v13 = vrot.slane %v16500_v14, 5  ;;  %v4026_v59 = vrot.slane %v16501_v7, 5  ;;  %v13646_v44 = vld [vmem:[#allocation2 + $0x94] sm:$0xf]  ;;  %v9824_v35 = vrot.slane %v3133_v31, 9  ;;  %v13654_v7 = vpop.permute.xlu0 %6941 }
 0x29c   : > { %v13629_v34 = vcombine.low %v3633_v4, %v3643_v49  ;;  %v3768_v4 = vshll.u32 %v13389_v42, 16  ;;  %v2582_v40 = vsel %vm11813_vm11, %v2577_v21, %v2581_v32  ;;  %v2587_v55 = vrot.slane %v2586_v41, 4  ;;  %v3132_v32 = vld [vmem:[#allocation2 + $0x84] sm:$0xe] }
 0x29d   : > { %v4017_v37 = vsel %vm11813_vm11, %v13304_v47, %v4016_v13  ;;  %v4021_v17 = vor.u32 %v13306_v27, %v4016_v13  ;;  %v5032_v6 = vrot.slane %v5030_v43, 4  ;;  %v4544_v23 = vsel %vm11781_vm8, %v4542_v8, %v4543_v62  ;;  %v13666_v8 = vld [vmem:[#allocation2 + $0xa8] sm:$0xf] }
 0x29e   : > { %v3338_v47 = vrot.slane %v13646_v44, 5  ;;  %v5035_v49 = vrot.slane %v5033_v2, 5  ;;  %v2592_v27 = vsel %vm11813_vm11, %v2587_v55, %v2591_v50  ;;  %v10078_v13 = vcombine.low %v4541_v26, %v4544_v23  ;;  %v13672_v23 = vpop.permute.xlu1 %6169 }
 0x29f   : > { %v4022_v19 = vrot.slane %v4021_v17, 4  ;;  %v3341_v14 = vrot.slane %v13641_v45, 5  ;;  %v5006_v21 = vshrl.u32 %v13522_v54, 16  ;;  %v9949_v31 = vcombine.low %v2582_v40, %v2592_v27  ;;  %v13668_v17 = vld [vmem:[#allocation2 + $0x8c] sm:$0x1]  ;;  %16504 = vst [vmem:[#allocation62_spill] sm:$0xff] %v13672_v23 }
 0x2a0   : > { %v3340_v62 = vrot.slane %v3338_v47, 4  ;;  %v3802_v41 = vshrl.u32 %v13321_v10, 16  ;;  %v5009_v2 = vshll.u32 %v13522_v54, 16  ;;  %6761 = vrot.lane.b32.xlu0 %v10078_v13, %s11516_s12  ;;  %v3339_v26 = vsel %vm11781_vm8, %v9824_v35, %v3338_v47  ;;  %v13682_v27 = vld [vmem:[#allocation2 + $0xac] sm:$0xf] }
 0x2a1   : > { %v4027_v43 = vsel %vm11813_vm11, %v4022_v19, %v4026_v59  ;;  %v16503_v40 = vshrl.u32 %v13389_v42, 16  ;;  %v3770_v59 = vrot.slane %v3768_v4, 5  ;;  %6151 = vrot.lane.b32.xlu1 %v9949_v31, %s11516_s12  ;;  %v9823_v19 = vrot.slane %v3132_v32, 9 }
 0x2a2   : > { %v13662_v50 = vcombine.low %v4017_v37, %v4027_v43  ;;  %v3342_v54 = vsel %vm11781_vm8, %v3340_v62, %v3341_v14  ;;  %v13677_v37 = vld [vmem:[#allocation2 + $0x88] sm:$0xf]  ;;  %v3795_v35 = vor.u32 %v13600_v30, %v13598_v33  ;;  %v3778_v47 = vshrl.u32 %v13391_v12, 16  ;;  %v13788_v12 = vld [vmem:[#allocation2 + $0xb0] sm:$0x1] }
 0x2a3   : > { %v3767_v55 = vrot.slane %v16503_v40, 4  ;;  %v10112_v42 = vcombine.low %v13666_v8, %v13682_v27  ;;  %v3331_v4 = vrot.slane %v13677_v37, 5  ;;  %v5008_v13 = vrot.slane %v5006_v21, 4  ;;  %v13692_v40 = vpop.permute.xlu0 %7097 }
 0x2a4   : > { %16502 = vst [vmem:[#allocation61_spill] sm:$0xff] %v13662_v50  ;;  %v9984_v31 = vcombine.low %v3339_v26, %v3342_v54  ;;  %v3334_v43 = vrot.slane %v13668_v17, 5  ;;  %v5036_v14 = vor.u32 %v5035_v49, %v5032_v6  ;;  %v5011_v62 = vrot.slane %v5009_v2, 5  ;;  %v11252_v26 = vld [vmem:[#allocation2 + $0x98] sm:$0x1] }
 0x2a5   : > { %6957 = vrot.lane.b32.xlu0 %v10112_v42, %s11515_s21  ;;  %v3332_v30 = vsel %vm11781_vm8, %v9823_v19, %v3331_v4  ;;  %v3333_v33 = vrot.slane %v3331_v4, 4  ;;  %v5039_v32 = vshll.u32 %v13463_v9, 16  ;;  %v13694_v23 = vrot.slane %v3802_v41, 4  ;;  %v13704_v4 = vpop.permute.xlu1 %6521  ;;  %v3502_v42 = vld [vmem:[#allocation2 + $0xa8] sm:$0xf] }
 0x2a6   : > { %v3771_v39 = vor.u32 %v3770_v59, %v3767_v55  ;;  %6317 = vrot.lane.b32.xlu1 %v9984_v31, %s11515_s21  ;;  %v5043_v21 = vshrl.u32 %v13463_v9, 16  ;;  %v5049_v6 = vshll.u32 %v11252_v26, 16  ;;  %v13698_v49 = vrot.slane %v3795_v35, 4  ;;  %16507 = vst [vmem:[#allocation65_spill] sm:$0xff] %v13704_v4 }
 0x2a7   : > { %16505 = vst [vmem:[#allocation63_spill] sm:$0xff] %v13694_v23  ;;  %v3837_v2 = vshrl.u32 %v13506_v15, 16  ;;  %v3335_v54 = vsel %vm11781_vm8, %v3333_v33, %v3334_v43  ;;  %v5041_v19 = vrot.slane %v5039_v32, 5  ;;  %v5037_v55 = vrot.slane %v5036_v14, 4  ;;  %v13797_v23 = vld [vmem:[#allocation2 + $0xac] sm:$0xf] }
 0x2a8   : > { %16506 = vst [vmem:[#allocation64_spill] sm:$0xff] %v13698_v49  ;;  %v9983_v41 = vcombine.low %v3332_v30, %v3335_v54  ;;  %v5045_v59 = vrot.slane %v5043_v21, 4  ;;  %v13706_v31 = vrot.slane %v3778_v47, 4  ;;  %v5012_v26 = vor.u32 %v5011_v62, %v5008_v13  ;;  %v13725_v30 = vpop.permute.xlu0 %6939 }
 0x2a9   : > { %v5078_v35 = vshrl.u32 %v13666_v8, 16  ;;  %v13710_v50 = vrot.slane %v3771_v39, 4  ;;  %v5051_v32 = vrot.slane %v5049_v6, 5  ;;  %v13717_v47 = vsel %vm7350_vm1, %v13583_v53, %v13417_v56  ;;  %v13723_v39 = vld [vmem:[#allocation2 + $0xac] sm:$0xf]  ;;  %v6136_v43 = vpop.permute.xlu1 %6135 }
 0x2aa   : > { %16508 = vst [vmem:[#allocation66_spill] sm:$0xff] %v13706_v31  ;;  %6315 = vrot.lane.b32.xlu1 %v9983_v41, %s11515_s21  ;;  %v5046_v33 = vor.u32 %v5045_v59, %v5041_v19  ;;  %v13719_v14 = vrot.slane %v3837_v2, 4  ;;  %v5081_v62 = vshll.u32 %v13666_v8, 16  ;;  %v5042_v21 = vsel %vm11813_vm11, %v5037_v55, %v5041_v19 }
 0x2ab   : > { %16509 = vst [vmem:[#allocation67_spill] sm:$0xff] %v13710_v50  ;;  %v10017_v54 = vcombine.low %v3502_v42, %v13723_v39  ;;  %v2642_v41 = vshrl.u32 %v2278_v5, 16  ;;  %v13730_v59 = vrot.slane %v5012_v26, 4  ;;  %v2661_v56 = vshll.u32 %v13641_v45, 16  ;;  %v13740_v42 = vpop.f32.mrb[20].mxu1 }
 0x2ac   : > { %v5047_v6 = vrot.slane %v5046_v33, 4  ;;  %v13733_v53 = vrot.slane %v5078_v35, 4  ;;  %v2645_v2 = vshll.u32 %v2278_v5, 16  ;;  %v2651_v19 = vshll.u32 %v13646_v44, 16  ;;  %v13745_v5 = vld [vmem:[#allocation2 + $0x9c] sm:$0xf] }
 0x2ad   : > { %v2644_v9 = vrot.slane %v2642_v41, 4  ;;  %v2655_v55 = vshrl.u32 %v13646_v44, 16  ;;  %v13742_v26 = vrot.slane %v5081_v62, 5  ;;  %v2637_v45 = vshll.u32 %v13668_v17, 16  ;;  %v11254_v41 = vld [vmem:[#allocation2 + $0xc] sm:$0xf] }
 0x2ae   : > { %v5052_v8 = vsel %vm11813_vm11, %v5047_v6, %v5051_v32  ;;  %6511 = vrot.lane.b32.xlu1 %v10017_v54, %s11517_s9  ;;  %v2647_v33 = vrot.slane %v2645_v2, 5  ;;  %v2653_v13 = vrot.slane %v2651_v19, 5  ;;  %v5015_v32 = vshll.u32 %v13528_v57, 16  ;;  %v11253_v54 = vld [vmem:[#allocation2 + $0x10] sm:$0xf] }
 0x2af   : > { %v10142_v35 = vcombine.low %v5042_v21, %v5052_v8  ;;  %v2657_v4 = vrot.slane %v2655_v55, 4  ;;  %v5019_v6 = vshrl.u32 %v13528_v57, 16  ;;  %v9909_v25 = vcombine.low %v11254_v41, %v11253_v54  ;;  %v13751_v21 = vpop.permute.xlu0 %7129  ;;  %v3553_v2 = vld [vmem:[#allocation2 + $0xb0] sm:$0x1]  ;;  %v13753_v8 = vpop.f32.mrb[21].mxu1 }
 0x2b0   : > { %v4561_v44 = vrot.slane %v13723_v39, 5  ;;  %v2648_v62 = vor.u32 %v2647_v33, %v2644_v9  ;;  %v5025_v17 = vshll.u32 %v11255_v11, 16  ;;  %16510 = vst [vmem:[#allocation68_spill] sm:$0xff] %v13751_v21  ;;  %v2663_v19 = vrot.slane %v2661_v56, 5  ;;  %v4353_v57 = vld [vmem:[#allocation2 + $0xa8] sm:$0xe]  ;;  %v13766_v56 = vpop.permute.xlu1 %6167 }
 0x2b1   : > { %7113 = vrot.lane.b32.xlu0 %v10142_v35, %s11517_s9  ;;  %v2658_v55 = vor.u32 %v2657_v4, %v2653_v13  ;;  %v5017_v63 = vrot.slane %v5015_v32, 5  ;;  %v5021_v31 = vrot.slane %v5019_v6, 4  ;;  %v13756_v50 = vsel %vm7253_vm15, %v9909_v25, %v6136_v43  ;;  %v13760_v35 = vld [vmem:[#allocation2 + $0xa0] sm:$0xf]  ;;  %v2276_v39 = vld [vmem:[#allocation2 + $0x84] sm:$0xf] }
 0x2b2   : > { %v13758_v54 = vrot.slane %v2637_v45, 5  ;;  %v10111_v11 = vcombine.low %v13745_v5, %v13760_v35  ;;  %v2649_v9 = vrot.slane %v2648_v62, 4  ;;  %v5084_v33 = vor.u32 %v13742_v26, %v13733_v53  ;;  %16511 = vst [vmem:[#allocation69_spill] sm:$0xff] %v13766_v56  ;;  %v13768_v41 = vpop.f32.mrb[22].mxu1 }
 0x2b3   : > { %v2659_v4 = vrot.slane %v2658_v55, 4  ;;  %v5022_v32 = vor.u32 %v5021_v31, %v5017_v63  ;;  %v5027_v6 = vrot.slane %v5025_v17, 5  ;;  %16512 = vst [vmem:[#allocation70_spill] sm:$0xff] %v13768_v41  ;;  %v9857_v43 = vrot.slane %v4353_v57, 9  ;;  %v4352_v17 = vld [vmem:[#allocation2 + $0x9c] sm:$0xe]  ;;  %v13781_v57 = vpop.permute.xlu0 %6971 }
 0x2b4   : > { %v2654_v25 = vsel %vm11813_vm11, %v2649_v9, %v2653_v13  ;;  %v4563_v45 = vrot.slane %v4561_v44, 4  ;;  %v4564_v21 = vrot.slane %v3553_v2, 5  ;;  %v5018_v53 = vsel %vm11813_vm11, %v13730_v59, %v5017_v63  ;;  %16513 = vst [vmem:[#allocation71_spill] sm:$0xff] %v13781_v57  ;;  %v3552_v9 = vld [vmem:[#allocation2 + $0xa4] sm:$0x1] }
 0x2b5   : > { %6955 = vrot.lane.b32.xlu0 %v10111_v11, %s11515_s21  ;;  %v2664_v62 = vsel %vm11813_vm11, %v2659_v4, %v2663_v19  ;;  %v5023_v26 = vrot.slane %v5022_v32, 4  ;;  %v2618_v31 = vshrl.u32 %v2276_v39, 16  ;;  %v5054_v55 = vshrl.u32 %v13745_v5, 16  ;;  %v3501_v11 = vld [vmem:[#allocation2 + $0xa0] sm:$0xf] }
 0x2b6   : > { %v9952_v56 = vcombine.low %v2654_v25, %v2664_v62  ;;  %v4562_v13 = vsel %vm11781_vm8, %v9857_v43, %v4561_v44  ;;  %v2621_v2 = vshll.u32 %v2276_v39, 16  ;;  %v3500_v4 = vld [vmem:[#allocation2 + $0x9c] sm:$0xf]  ;;  %v4565_v63 = vsel %vm11781_vm8, %v4563_v45, %v4564_v21  ;;  %v13790_v25 = vpop.f32.mrb[23].mxu1  ;;  %v3135_v57 = vld [vmem:[#allocation2 + $0xa8] sm:$0xe] }
 0x2b7   : > { %v5028_v19 = vsel %vm11813_vm11, %v5023_v26, %v5027_v6  ;;  %v2620_v59 = vrot.slane %v2618_v31, 4  ;;  %v2627_v32 = vshll.u32 %v13677_v37, 16  ;;  %16514 = vst [vmem:[#allocation72_spill] sm:$0xff] %v13790_v25  ;;  %v2631_v39 = vshrl.u32 %v13677_v37, 16  ;;  %v13795_v26 = vpop.permute.xlu1 %6301  ;;  %v7096_v10 = vpop.permute.xlu0 %7095 }
 0x2b8   : > { %6157 = vrot.lane.b32.xlu1 %v9952_v56, %s11516_s12  ;;  %v10141_v44 = vcombine.low %v5018_v53, %v5028_v19  ;;  %v2623_v43 = vrot.slane %v2621_v2, 5  ;;  %v9856_v62 = vrot.slane %v4352_v17, 9  ;;  %v5057_v6 = vshll.u32 %v13745_v5, 16 }
 0x2b9   : > { %v2629_v21 = vrot.slane %v2627_v32, 5  ;;  %v4554_v45 = vrot.slane %v3501_v11, 5  ;;  %v4557_v31 = vrot.slane %v3552_v9, 5  ;;  %v10016_v49 = vcombine.low %v3500_v4, %v3501_v11  ;;  %v16536_v11 = vld [vmem:[#allocation47_spill] sm:$0xff] }
 0x2ba   : > { %7111 = vrot.lane.b32.xlu0 %v10141_v44, %s11517_s9  ;;  %v2624_v48 = vor.u32 %v2623_v43, %v2620_v59  ;;  %v2633_v56 = vrot.slane %v2631_v39, 4  ;;  %v3352_v53 = vrot.slane %v13797_v23, 5  ;;  %v10081_v2 = vcombine.low %v4562_v13, %v4565_v63  ;;  %v3134_v44 = vld [vmem:[#allocation2 + $0x9c] sm:$0xe] }
 0x2bb   : > { %v4556_v37 = vrot.slane %v4554_v45, 4  ;;  %v9826_v17 = vrot.slane %v3135_v57, 9  ;;  %v3355_v19 = vrot.slane %v13788_v12, 5  ;;  %v4555_v9 = vsel %vm11781_vm8, %v9856_v62, %v4554_v45  ;;  %v13820_v43 = vpop.permute.xlu1 %6299  ;;  %v1101_v45 = vld [vmem:[#allocation2 + $0x138] sm:$0x1] }
 0x2bc   : > { %6509 = vrot.lane.b32.xlu1 %v10016_v49, %s11517_s9  ;;  %v2625_v5 = vrot.slane %v2624_v48, 4  ;;  %v2634_v32 = vor.u32 %v2633_v56, %v2629_v21  ;;  %v3354_v25 = vrot.slane %v3352_v53, 4  ;;  %v7520_v4 = vsel %vm7253_vm15, %v13629_v34, %v13596_v22 }
 0x2bd   : > { %v13809_v13 = vrot.slane %v5084_v33, 4  ;;  %v4558_v57 = vsel %vm11781_vm8, %v4556_v37, %v4557_v31  ;;  %v13813_v63 = vrot.slane %v5054_v55, 4  ;;  %v13815_v48 = vrot.slane %v5057_v6, 5  ;;  %v13829_v55 = vld [vmem:[#allocation2 + $0xa4] sm:$0x1] }
 0x2be   : > { %6767 = vrot.lane.b32.xlu0 %v10081_v2, %s11516_s12  ;;  %v2630_v49 = vsel %vm11813_vm11, %v2625_v5, %v2629_v21  ;;  %v2635_v59 = vrot.slane %v2634_v32, 4  ;;  %v10080_v39 = vcombine.low %v4555_v9, %v4558_v57  ;;  %v3353_v22 = vsel %vm11781_vm8, %v9826_v17, %v3352_v53  ;;  %v11257_v53 = vld [vmem:[#allocation2 + $0xb0] sm:$0x1]  ;;  %v13852_v37 = vld [vmem:[#allocation2 + $0xc4] sm:$0xf] }
 0x2bf   : > { %v7676_v34 = vsel %vm7415_vm2, %v13717_v47, %v7096_v10  ;;  %v7354_v33 = vsel %vm7350_vm1, %v13756_v50, %v13471_v18  ;;  %v3356_v6 = vsel %vm11781_vm8, %v3354_v25, %v3355_v19  ;;  %v7613_v10 = vsel %vm7350_vm1, %v7520_v4, %v13338_v61  ;;  %v13840_v47 = vld [vmem:[#allocation2 + $0xa0] sm:$0xf] }
 0x2c0   : > { %v2640_v62 = vsel %vm11813_vm11, %v2635_v59, %v13758_v54  ;;  %8055 = vmatprep.mubr.bf16.mxu1 %v7676_v34  ;;  %v7420_v21 = vsel %vm7415_vm2, %v7354_v33, %v13280_v20  ;;  %v7679_v50 = vsel %vm7415_vm2, %v7613_v10, %v13692_v40  ;;  %v9825_v31 = vrot.slane %v3134_v44, 9  ;;  %v13846_v25 = vld [vmem:[#allocation2 + $0xc0] sm:$0xf]  ;;  %v13867_v34 = vpop.permute.xlu1 %6331 }
 0x2c1   : > { %v9951_v18 = vcombine.low %v2630_v49, %v2640_v62  ;;  %8056 = vmatmul.mubr.bf16.gmra.mrb[36].mxu1 %v7420_v21  ;;  %v3345_v54 = vrot.slane %v13840_v47, 5  ;;  %v3348_v20 = vrot.slane %v13829_v55, 5  ;;  %v5087_v61 = vshll.u32 %v13682_v27, 16  ;;  %v13859_v19 = vld [vmem:[%s16323_s2] ss:$0 sm:$0xff]  ;;  %v16516_v49 = vld [vmem:[#allocation17_spill] sm:$0xff] }
 0x2c2   : > { %6765 = vrot.lane.b32.xlu0 %v10080_v39, %s11516_s12  ;;  %8063 = vmatprep.mubr.bf16.mxu1 %v7679_v50  ;;  %v5091_v56 = vshrl.u32 %v13682_v27, 16  ;;  %v5097_v2 = vshll.u32 %v11257_v53, 16  ;;  %v10114_v40 = vcombine.low %v13846_v25, %v13852_v37  ;;  %v847_v5 = vadd.f32 %v13859_v19, %v13188_v3  ;;  %v1098_v39 = vld [vmem:[#allocation2 + $0x12c] sm:$0x1]  ;;  %16518 = vst [vmem:[#allocation9_spill] sm:$0xff] %v13867_v34  ;;  %v13881_v53 = vpop.f32.mrb[36].mxu0 }
 0x2c3   : > { %6155 = vrot.lane.b32.xlu1 %v9951_v18, %s11516_s12  ;;  %v3347_v17 = vrot.slane %v3345_v54, 4  ;;  %v1102_v27 = vsel %vm11748_vm3, 0, %v1101_v45  ;;  %v9986_v9 = vcombine.low %v3353_v22, %v3356_v6  ;;  %v5089_v4 = vrot.slane %v5087_v61, 5  ;;  %v16519_v21 = vld [vmem:[#allocation32_spill] sm:$0xff]  ;;  %v16520_v45 = vld [vmem:[#allocation39_spill] sm:$0xff]  ;;  %16523 = vst [vmem:[#allocation17_spill] sm:$0xff] %v13881_v53 }
 0x2c4   : > { %v5093_v57 = vrot.slane %v5091_v56, 4  ;;  %1103 = vst [vmem:[#allocation2 + $0x138] sm:$0x1] %v1102_v27  ;;  %v16517_v59 = vshll.u32 %v16516_v49, 16  ;;  %v3346_v33 = vsel %vm11781_vm8, %v9825_v31, %v3345_v54  ;;  %v963_v3 = vmax.f32 %v847_v5, 0.0  ;;  %v16521_v50 = vld [vmem:[#allocation16_spill] sm:$0xff] }
 0x2c5   : > { %v3349_v62 = vsel %vm11781_vm8, %v3347_v17, %v3348_v20  ;;  %v839_v10 = vadd.f32 %v13859_v19, %v16519_v21  ;;  %v5099_v6 = vrot.slane %v5097_v2, 5  ;;  %v16522_v61 = vshll.u32 %v16521_v50, 16  ;;  %v16524_v54 = vld [vmem:[#allocation40_spill] sm:$0xff] }
 0x2c6   : > { %v3704_v44 = vrot.slane %v16517_v59, 5  ;;  %6961 = vrot.lane.b32.xlu0 %v10114_v40, %s11515_s21  ;;  %v5094_v22 = vor.u32 %v5093_v57, %v5089_v4  ;;  %v10400_v31 = vpack.c.bf16 %v963_v3, %v963_v3  ;;  %v1099_v40 = vsel %vm11748_vm3, 0, %v1098_v39  ;;  %v13896_v39 = vpop.permute.xlu0 %7127 }
 0x2c7   : > { %v3714_v56 = vrot.slane %v16522_v61, 5  ;;  %6321 = vrot.lane.b32.xlu1 %v9986_v9, %s11515_s21  ;;  %v961_v17 = vmax.f32 %v839_v10, 0.0  ;;  %v16525_v2 = vshll.u32 %v13506_v15, 16  ;;  %v9985_v27 = vcombine.low %v3346_v33, %v3349_v62  ;;  %1100 = vst [vmem:[#allocation2 + $0x12c] sm:$0x1] %v1099_v40  ;;  %16526 = vst [vmem:[#allocation32_spill] sm:$0xff] %v13896_v39 }
 0x2c8   : > { %v3705_v18 = vsel %vm11813_vm11, %v16520_v45, %v3704_v44  ;;  %v3709_v20 = vor.u32 %v16524_v54, %v3704_v44  ;;  %v5090_v57 = vsel %vm11813_vm11, %v13809_v13, %v5089_v4  ;;  %v5095_v49 = vrot.slane %v5094_v22, 4  ;;  %v1199_v44 = vld [vmem:[#allocation2 + $0x140] sm:$0x1]  ;;  %v11260_v10 = vld [vmem:[#allocation2 + $0x1c] sm:$0xf]  ;;  %v16527_v62 = vld [vmem:[#allocation33_spill] sm:$0xff]  ;;  %v13902_v4 = vpop.permute.xlu1 %6495 }
 0x2c9   : > { %v13889_v5 = vrot.slane %v16525_v2, 5  ;;  %v1780_v59 = vshrl.u32 %v10400_v31, 16  ;;  %v1783_v9 = vshll.u32 %v10400_v31, 16  ;;  %v10398_v21 = vpack.c.bf16 %v961_v17, %v961_v17  ;;  %v11261_v45 = vld [vmem:[#allocation2 + $0x18] sm:$0xf]  ;;  %16528 = vst [vmem:[#allocation39_spill] sm:$0xff] %v13902_v4 }
 0x2ca   : > { %v3710_v3 = vrot.slane %v3709_v20, 4  ;;  %v9910_v50 = vcombine.low %v11261_v45, %v11260_v10  ;;  %v5060_v15 = vor.u32 %v13815_v48, %v13813_v63  ;;  %v5100_v33 = vsel %vm11813_vm11, %v5095_v49, %v5099_v6  ;;  %v3506_v63 = vld [vmem:[#allocation2 + $0xc0] sm:$0xf]  ;;  %v13909_v48 = vld [vmem:[#allocation2 + $0xc4] sm:$0xf]  ;;  %v13915_v10 = vpop.f32.mrb[37].mxu0 }
 0x2cb   : > { %v850_v13 = vadd.f32 %v13859_v19, %v16527_v62  ;;  %6319 = vrot.lane.b32.xlu1 %v9985_v27, %s11515_s21  ;;  %v10144_v22 = vcombine.low %v5090_v57, %v5100_v33  ;;  %v13905_v61 = vrot.slane %v1780_v59, 7  ;;  %v1763_v54 = vshrl.u32 %v10398_v21, 16  ;;  %v2191_v20 = vld [vmem:[#allocation2 + $0x138] sm:$0xf]  ;;  %16530 = vst [vmem:[#allocation16_spill] sm:$0xff] %v13915_v10  ;;  %v16531_v27 = vld [vmem:[#allocation23_spill] sm:$0xff] }
 0x2cc   : > { %v3715_v31 = vsel %vm11813_vm11, %v3710_v3, %v3714_v56  ;;  %v1766_v6 = vshll.u32 %v10398_v21, 16  ;;  %v1200_v49 = vsel %vm11762_vm5, 0, %v1199_v44  ;;  %v7523_v57 = vsel %vm7253_vm15, %v13541_v51, %v16531_v27  ;;  %v13925_v3 = vpop.f32.mrb[38].mxu0  ;;  %v13935_v33 = vld [vmem:[#allocation2 + $0xb4] sm:$0xf]  ;;  %v16535_v27 = vld [vmem:[#allocation35_spill] sm:$0xff] }
 0x2cd   : > { %v13911_v17 = vcombine.low %v3705_v18, %v3715_v31  ;;  %v964_v40 = vmax.f32 %v850_v13, 0.0  ;;  %7117 = vrot.lane.b32.xlu0 %v10144_v22, %s11517_s9  ;;  %v1785_v56 = vor.u32 %v1783_v9, %v13905_v61  ;;  %v13922_v59 = vrot.slane %v1763_v54, 7  ;;  %1201 = vst [vmem:[#allocation2 + $0x140] sm:$0x1] %v1200_v49  ;;  %16532 = vst [vmem:[#allocation40_spill] sm:$0xff] %v13925_v3  ;;  %v13937_v62 = vpop.f32.mrb[39].mxu0 }
 0x2ce   : > { %v10019_v18 = vcombine.low %v3506_v63, %v13909_v48  ;;  %v7262_v21 = vsel %vm7253_vm15, %v9910_v50, %v13611_v29  ;;  %v13929_v44 = vrot.slane %v5060_v15, 4  ;;  %v13933_v45 = vsel %vm7350_vm1, %v7523_v57, %v13725_v30  ;;  %v1196_v9 = vld [vmem:[#allocation2 + $0x134] sm:$0x1]  ;;  %16533 = vst [vmem:[#allocation33_spill] sm:$0xff] %v13937_v62  ;;  %v2184_v29 = vld [vmem:[#allocation2 + $0x12c] sm:$0xf]  ;;  %v13949_v63 = vpop.permute.xlu0 %6751 }
 0x2cf   : > { %v10401_v51 = vpack.c.bf16 %v964_v40, %v964_v40  ;;  %v2192_v31 = vsel %vm11915_vm13, %v1785_v56, %v2191_v20  ;;  %v1768_v54 = vor.u32 %v1766_v6, %v13922_v59  ;;  %v13944_v50 = vld [vmem:[#allocation2 + $0xb8] sm:$0xf]  ;;  %v842_v20 = vadd.f32 %v13859_v19, %v16535_v27  ;;  %v2282_v57 = vld [vmem:[#allocation2 + $0xa8] sm:$0xf]  ;;  %v13953_v6 = vpop.permute.xlu1 %6141  ;;  %v13967_v62 = vpop.f32.mrb[40].mxu0 }
 0x2d0   : > { %6515 = vrot.lane.b32.xlu1 %v10019_v18, %s11517_s9  ;;  %v10113_v30 = vcombine.low %v13935_v33, %v13944_v50  ;;  %2193 = vst [vmem:[#allocation2 + $0x138] sm:$0xf] %v2192_v31  ;;  %v1786_v56 = vrot.slane %v13905_v61, 4  ;;  %v1197_v31 = vsel %vm11762_vm5, 0, %v1196_v9  ;;  %v7356_v15 = vsel %vm7350_vm1, %v7262_v21, %v16536_v11  ;;  %v16537_v3 = vld [vmem:[#allocation18_spill] sm:$0xff]  ;;  %16539 = vst [vmem:[#allocation10_spill] sm:$0xff] %v13967_v62 }
 0x2d1   : > { %v1788_v40 = vshrl.u32 %v10401_v51, 16  ;;  %v1791_v49 = vshll.u32 %v10401_v51, 16  ;;  %v2185_v18 = vsel %vm11915_vm13, %v1768_v54, %v2184_v29  ;;  %v962_v13 = vmax.f32 %v842_v20, 0.0  ;;  %1198 = vst [vmem:[#allocation2 + $0x134] sm:$0x1] %v1197_v31  ;;  %v16540_v29 = vld [vmem:[#allocation19_spill] sm:$0xff] }
 0x2d2   : > { %6959 = vrot.lane.b32.xlu0 %v10113_v30, %s11515_s21  ;;  %2186 = vst [vmem:[#allocation2 + $0x12c] sm:$0xf] %v2185_v18  ;;  %v7423_v27 = vsel %vm7415_vm2, %v7356_v15, %v13633_v38  ;;  %v16538_v61 = vshll.u32 %v16537_v3, 16  ;;  %v1769_v54 = vrot.slane %v13922_v59, 4  ;;  %v16541_v9 = vshll.u32 %v16540_v29, 16  ;;  %v13972_v21 = vpop.f32.mrb[41].mxu0  ;;  %v13987_v34 = vpop.permute.xlu0 %6749 }
 0x2d3   : > { %v1790_v51 = vrot.slane %v1788_v40, 7  ;;  %8064 = vmatmul.mubr.bf16.gmra.mrb[40].mxu1 %v7423_v27  ;;  %v2690_v10 = vshrl.u32 %v2282_v57, 16  ;;  %v2693_v11 = vshll.u32 %v2282_v57, 16  ;;  %16542 = vst [vmem:[#allocation23_spill] sm:$0xff] %v13972_v21  ;;  %v10399_v31 = vpack.c.bf16 %v962_v13, %v962_v13  ;;  %v16543_v38 = vld [vmem:[#allocation52_spill] sm:$0xff]  ;;  %v13977_v15 = vpop.f32.mrb[42].mxu0 }
 0x2d4   : > { %v3680_v53 = vrot.slane %v16538_v61, 5  ;;  %v3690_v30 = vrot.slane %v16541_v9, 5  ;;  %v2195_v18 = vld [vmem:[#allocation2 + $0x140] sm:$0x1]  ;;  %16544 = vst [vmem:[#allocation11_spill] sm:$0xff] %v13977_v15  ;;  %v2699_v29 = vshll.u32 %v13797_v23, 16  ;;  %v13991_v15 = vpop.permute.xlu1 %6493 }
 0x2d5   : > { %v1793_v40 = vor.u32 %v1791_v49, %v1790_v51  ;;  %v1795_v20 = vrot.slane %v1790_v51, 4  ;;  %v16545_v61 = vld [vmem:[#allocation51_spill] sm:$0xff]  ;;  %v2692_v27 = vrot.slane %v2690_v10, 4  ;;  %v2695_v62 = vrot.slane %v2693_v11, 5  ;;  %v13981_v9 = vpop.f32.mrb[43].mxu0 }
 0x2d6   : > { %v3681_v3 = vsel %vm11813_vm11, %v16543_v38, %v3680_v53  ;;  %v3685_v59 = vor.u32 %v16545_v61, %v3680_v53  ;;  %16546 = vst [vmem:[#allocation35_spill] sm:$0xff] %v13981_v9  ;;  %v1771_v51 = vshrl.u32 %v10399_v31, 16  ;;  %v1774_v21 = vshll.u32 %v10399_v31, 16  ;;  %v13989_v38 = vpop.f32.mrb[44].mxu0  ;;  %v4355_v4 = vld [vmem:[#allocation2 + $0xc0] sm:$0xe] }
 0x2d7   : > { %v1794_v49 = vsel %vm11949_vm14, %v1786_v56, %v1793_v40  ;;  %v2196_v13 = vsel %vm11748_vm3, %v1795_v20, %v2195_v18  ;;  %16548 = vst [vmem:[#allocation47_spill] sm:$0xff] %v13989_v38  ;;  %v2696_v10 = vor.u32 %v2695_v62, %v2692_v27  ;;  %v2701_v11 = vrot.slane %v2699_v29, 5  ;;  %v13995_v56 = vpop.f32.mrb[45].mxu0 }
 0x2d8   : > { %2194 = vst.msk [vmem:[#allocation2 + $0x13c] sm:$0xf] %vm1013_vm0, %v1794_v49  ;;  %2197 = vst [vmem:[#allocation2 + $0x140] sm:$0x1] %v2196_v13  ;;  %v3686_v53 = vrot.slane %v3685_v59, 4  ;;  %v2703_v61 = vshrl.u32 %v13797_v23, 16 }
 0x2d9   : > { %16549 = vst [vmem:[#allocation18_spill] sm:$0xff] %v13995_v56  ;;  %v1773_v40 = vrot.slane %v1771_v51, 7  ;;  %v2709_v20 = vshll.u32 %v13788_v12, 16  ;;  %v5063_v18 = vshll.u32 %v13760_v35, 16  ;;  %v5067_v31 = vshrl.u32 %v13760_v35, 16  ;;  %v14002_v27 = vpop.f32.mrb[46].mxu0 }
 0x2da   : > { %v2188_v38 = vld [vmem:[#allocation2 + $0x134] sm:$0x1]  ;;  %v3691_v9 = vsel %vm11813_vm11, %v3686_v53, %v3690_v30  ;;  %v2697_v49 = vrot.slane %v2696_v10, 4  ;;  %v2705_v13 = vrot.slane %v2703_v61, 4  ;;  %v11263_v59 = vld [vmem:[#allocation2 + $0xa4] sm:$0x1]  ;;  %v14016_v61 = vpop.permute.xlu0 %6945 }
 0x2db   : > { %v5073_v62 = vshll.u32 %v11263_v59, 16  ;;  %16550 = vst [vmem:[#allocation19_spill] sm:$0xff] %v14002_v27  ;;  %v5102_v23 = vshrl.u32 %v13935_v33, 16  ;;  %v1776_v29 = vor.u32 %v1774_v21, %v1773_v40  ;;  %v1778_v51 = vrot.slane %v1773_v40, 4  ;;  %v11264_v59 = vld [vmem:[#allocation2 + $0x28] sm:$0xf] }
 0x2dc   : > { %v14005_v56 = vcombine.low %v3681_v3, %v3691_v9  ;;  %v2706_v12 = vor.u32 %v2705_v13, %v2701_v11  ;;  %v2711_v39 = vrot.slane %v2709_v20, 5  ;;  %v5065_v36 = vrot.slane %v5063_v18, 5  ;;  %v14018_v3 = vpop.f32.mrb[47].mxu0  ;;  %v6140_v9 = vpop.permute.xlu1 %6139  ;;  %v3555_v18 = vld [vmem:[#allocation2 + $0xc8] sm:$0x1] }
 0x2dd   : > { %v5069_v35 = vrot.slane %v5067_v31, 4  ;;  %v16551_v41 = vshrl.u32 %v13846_v25, 16  ;;  %v5105_v53 = vshll.u32 %v13935_v33, 16  ;;  %v1777_v10 = vsel %vm11949_vm14, %v1769_v54, %v1776_v29  ;;  %16552 = vst [vmem:[#allocation52_spill] sm:$0xff] %v14018_v3  ;;  %v14023_v31 = vpop.f32.mrb[48].mxu0 }
 0x2de   : > { %v2189_v21 = vsel %vm11748_vm3, %v1778_v51, %v2188_v38  ;;  %2187 = vst.msk [vmem:[#allocation2 + $0x130] sm:$0xf] %vm1013_vm0, %v1777_v10  ;;  %v2707_v40 = vrot.slane %v2706_v12, 4  ;;  %v5075_v33 = vrot.slane %v5073_v62, 5  ;;  %16553 = vst [vmem:[#allocation51_spill] sm:$0xff] %v14023_v31  ;;  %v16554_v54 = vshll.u32 %v13846_v25, 16 }
 0x2df   : > { %v14009_v30 = vrot.slane %v16551_v41, 4  ;;  %2190 = vst [vmem:[#allocation2 + $0x134] sm:$0x1] %v2189_v21  ;;  %v2702_v41 = vsel %vm11813_vm11, %v2697_v49, %v2701_v11  ;;  %v5070_v20 = vor.u32 %v5069_v35, %v5065_v36  ;;  %v14029_v13 = vrot.slane %v5102_v23, 4  ;;  %v11265_v29 = vld [vmem:[#allocation2 + $0x24] sm:$0xf] }
 0x2e0   : > { %v14027_v38 = vrot.slane %v16554_v54, 5  ;;  %v9911_v51 = vcombine.low %v11265_v29, %v11264_v59  ;;  %v9859_v10 = vrot.slane %v4355_v4, 9  ;;  %v2280_v21 = vld [vmem:[#allocation2 + $0x9c] sm:$0xf]  ;;  %v14031_v27 = vpop.f32.mrb[49].mxu0  ;;  %v2712_v11 = vsel %vm11813_vm11, %v2707_v40, %v2711_v39  ;;  %v14044_v59 = vpop.f32.mrb[24].mxu1 }
 0x2e1   : > { %16555 = vst [vmem:[#allocation12_spill] sm:$0xff] %v14031_v27  ;;  %v5066_v49 = vsel %vm11813_vm11, %v13929_v44, %v5065_v36  ;;  %v5071_v62 = vrot.slane %v5070_v20, 4  ;;  %v4575_v25 = vrot.slane %v13909_v48, 5  ;;  %v14039_v12 = vrot.slane %v5105_v53, 5  ;;  %v4354_v54 = vld [vmem:[#allocation2 + $0xb4] sm:$0xe] }
 0x2e2   : > { %v14042_v23 = vsel %vm7253_vm15, %v9911_v51, %v6140_v9  ;;  %v9954_v35 = vcombine.low %v2702_v41, %v2712_v11  ;;  %v4578_v4 = vrot.slane %v3555_v18, 5  ;;  %16556 = vst [vmem:[#allocation73_spill] sm:$0xff] %v14044_v59  ;;  %v3504_v40 = vld [vmem:[#allocation2 + $0xb4] sm:$0xf]  ;;  %v3505_v29 = vld [vmem:[#allocation2 + $0xb8] sm:$0xf]  ;;  %v14053_v41 = vpop.permute.xlu0 %7101 }
 0x2e3   : > { %v5076_v39 = vsel %vm11813_vm11, %v5071_v62, %v5075_v33  ;;  %v4576_v36 = vsel %vm11781_vm8, %v9859_v10, %v4575_v25  ;;  %v4577_v44 = vrot.slane %v4575_v25, 4  ;;  %v2666_v48 = vshrl.u32 %v2280_v21, 16  ;;  %v14050_v53 = vpop.f32.mrb[50].mxu0  ;;  %v3554_v33 = vld [vmem:[#allocation2 + $0xbc] sm:$0x1]  ;;  %v14057_v11 = vpop.f32.mrb[25].mxu1 }
 0x2e4   : > { %16557 = vst [vmem:[#allocation74_spill] sm:$0xff] %v14050_v53  ;;  %6161 = vrot.lane.b32.xlu1 %v9954_v35, %s11516_s12  ;;  %v10143_v9 = vcombine.low %v5066_v49, %v5076_v39  ;;  %v2669_v20 = vshll.u32 %v2280_v21, 16  ;;  %v2675_v18 = vshll.u32 %v13840_v47, 16  ;;  %v2679_v51 = vshrl.u32 %v13840_v47, 16  ;;  %16558 = vst [vmem:[#allocation75_spill] sm:$0xff] %v14057_v11  ;;  %v14062_v35 = vpop.f32.mrb[51].mxu0 }
 0x2e5   : > { %v4579_v10 = vsel %vm11781_vm8, %v4577_v44, %v4578_v4  ;;  %v2668_v62 = vrot.slane %v2666_v48, 4  ;;  %v2685_v25 = vshll.u32 %v13829_v55, 16  ;;  %v9858_v53 = vrot.slane %v4354_v54, 9  ;;  %v3136_v31 = vld [vmem:[#allocation2 + $0xb4] sm:$0xe]  ;;  %16559 = vst [vmem:[#allocation76_spill] sm:$0xff] %v14062_v35 }
 0x2e6   : > { %7115 = vrot.lane.b32.xlu0 %v10143_v9, %s11517_s9  ;;  %v10018_v21 = vcombine.low %v3504_v40, %v3505_v29  ;;  %v2671_v49 = vrot.slane %v2669_v20, 5  ;;  %v2677_v39 = vrot.slane %v2675_v18, 5  ;;  %v2681_v27 = vrot.slane %v2679_v51, 4  ;;  %v14065_v47 = vld [vmem:[#allocation2 + $0xbc] sm:$0x1]  ;;  %v14067_v3 = vpop.f32.mrb[26].mxu1 }
 0x2e7   : > { %16560 = vst [vmem:[#allocation77_spill] sm:$0xff] %v14067_v3  ;;  %v10083_v11 = vcombine.low %v4576_v36, %v4579_v10  ;;  %v2687_v59 = vrot.slane %v2685_v25, 5  ;;  %v4568_v4 = vrot.slane %v3505_v29, 5  ;;  %v4571_v44 = vrot.slane %v3554_v33, 5  ;;  %v14069_v48 = vld [vmem:[#allocation2 + $0xb8] sm:$0xf]  ;;  %v14079_v33 = vpop.permute.xlu0 %6943 }
 0x2e8   : > { %6513 = vrot.lane.b32.xlu1 %v10018_v21, %s11517_s9  ;;  %v2672_v55 = vor.u32 %v2671_v49, %v2668_v62  ;;  %v2682_v54 = vor.u32 %v2681_v27, %v2677_v39  ;;  %v9827_v35 = vrot.slane %v3136_v31, 9  ;;  %v3359_v40 = vrot.slane %v14069_v48, 5  ;;  %v2294_v10 = vld [vmem:[#allocation2 + $0x108] sm:$0xf]  ;;  %v14083_v62 = vpop.f32.mrb[52].mxu0  ;;  %v14093_v49 = vpop.f32.mrb[27].mxu1 }
 0x2e9   : > { %v4569_v9 = vsel %vm11781_vm8, %v9858_v53, %v4568_v4  ;;  %v4570_v20 = vrot.slane %v4568_v4, 4  ;;  %v3362_v18 = vrot.slane %v14065_v47, 5  ;;  %v5132_v36 = vor.u32 %v14027_v38, %v14009_v30  ;;  %16561 = vst [vmem:[#allocation78_spill] sm:$0xff] %v14083_v62  ;;  %v14085_v53 = vpop.permute.xlu1 %6171  ;;  %16563 = vst [vmem:[#allocation80_spill] sm:$0xff] %v14093_v49  ;;  %v11266_v62 = vld [vmem:[#allocation2 + $0xc8] sm:$0x1] }
 0x2ea   : > { %6771 = vrot.lane.b32.xlu0 %v10083_v11, %s11516_s12  ;;  %v2673_v29 = vrot.slane %v2672_v55, 4  ;;  %v2683_v51 = vrot.slane %v2682_v54, 4  ;;  %v3360_v27 = vsel %vm11781_vm8, %v9827_v35, %v3359_v40  ;;  %v3361_v31 = vrot.slane %v3359_v40, 4  ;;  %16562 = vst [vmem:[#allocation79_spill] sm:$0xff] %v14085_v53  ;;  %v14091_v11 = vld [vmem:[#allocation2 + $0x10c] sm:$0xf] }
 0x2eb   : > { %v4572_v25 = vsel %vm11781_vm8, %v4570_v20, %v4571_v44  ;;  %v5133_v21 = vrot.slane %v5132_v36, 4  ;;  %v5135_v30 = vshll.u32 %v13852_v37, 16  ;;  %v5139_v38 = vshrl.u32 %v13852_v37, 16  ;;  %v14101_v44 = vld [vmem:[#allocation2 + $0x110] sm:$0x1] }
 0x2ec   : > { %v2678_v35 = vsel %vm11813_vm11, %v2673_v29, %v2677_v39  ;;  %v2688_v4 = vsel %vm11813_vm11, %v2683_v51, %v2687_v59  ;;  %v10082_v55 = vcombine.low %v4569_v9, %v4572_v25  ;;  %v3363_v54 = vsel %vm11781_vm8, %v3361_v31, %v3362_v18 }
 0x2ed   : > { %v9953_v40 = vcombine.low %v2678_v35, %v2688_v4  ;;  %v9987_v20 = vcombine.low %v3360_v27, %v3363_v54  ;;  %v5137_v36 = vrot.slane %v5135_v30, 5  ;;  %v5141_v37 = vrot.slane %v5139_v38, 4  ;;  %v7100_v27 = vpop.permute.xlu0 %7099 }
 0x2ee   : > { %6769 = vrot.lane.b32.xlu0 %v10082_v55, %s11516_s12  ;;  %v5145_v53 = vshll.u32 %v11266_v62, 16  ;;  %v2834_v49 = vshrl.u32 %v2294_v10, 16  ;;  %v2837_v3 = vshll.u32 %v2294_v10, 16  ;;  %v2843_v39 = vshll.u32 %v14091_v11, 16  ;;  %v14110_v62 = vpop.permute.xlu1 %6305  ;;  %v14114_v55 = vpop.f32.mrb[53].mxu0 }
 0x2ef   : > { %6159 = vrot.lane.b32.xlu1 %v9953_v40, %s11516_s12  ;;  %v5138_v59 = vsel %vm11813_vm11, %v5133_v21, %v5137_v36  ;;  %v5142_v9 = vor.u32 %v5141_v37, %v5137_v36  ;;  %v2847_v18 = vshrl.u32 %v14091_v11, 16  ;;  %v2853_v29 = vshll.u32 %v14101_v44, 16  ;;  %16564 = vst [vmem:[#allocation81_spill] sm:$0xff] %v14114_v55 }
 0x2f0   : > { %v5147_v51 = vrot.slane %v5145_v53, 5  ;;  %v2836_v31 = vrot.slane %v2834_v49, 4  ;;  %v2839_v25 = vrot.slane %v2837_v3, 5  ;;  %v2845_v30 = vrot.slane %v2843_v39, 5  ;;  %v11267_v53 = vld [vmem:[#allocation2 + $0xbc] sm:$0x1] }
 0x2f1   : > { %v5143_v10 = vrot.slane %v5142_v9, 4  ;;  %v2849_v38 = vrot.slane %v2847_v18, 4  ;;  %v2855_v35 = vrot.slane %v2853_v29, 5  ;;  %v5108_v4 = vor.u32 %v14039_v12, %v14029_v13  ;;  %v14118_v49 = vpop.f32.mrb[54].mxu0 }
 0x2f2   : > { %v2840_v21 = vor.u32 %v2839_v25, %v2836_v31  ;;  %v5111_v54 = vshll.u32 %v13944_v50, 16  ;;  %v5115_v40 = vshrl.u32 %v13944_v50, 16  ;;  %v5121_v36 = vshll.u32 %v11267_v53, 16  ;;  %16565 = vst [vmem:[#allocation82_spill] sm:$0xff] %v14118_v49  ;;  %v14125_v12 = vpop.f32.mrb[55].mxu0 }
 0x2f3   : > { %6323 = vrot.lane.b32.xlu1 %v9987_v20, %s11515_s21  ;;  %v5148_v3 = vsel %vm11813_vm11, %v5143_v10, %v5147_v51  ;;  %v2850_v37 = vor.u32 %v2849_v38, %v2845_v30  ;;  %v5109_v39 = vrot.slane %v5108_v4, 4  ;;  %v7682_v13 = vsel %vm7415_vm2, %v13933_v45, %v7100_v27  ;;  %16566 = vst [vmem:[#allocation83_spill] sm:$0xff] %v14125_v12  ;;  %v1107_v31 = vld [vmem:[#allocation2 + $0x150] sm:$0x1]  ;;  %v14127_v25 = vpop.f32.mrb[56].mxu0 }
 0x2f4   : > { %v10146_v9 = vcombine.low %v5138_v59, %v5148_v3  ;;  %v2841_v18 = vrot.slane %v2840_v21, 4  ;;  %v5113_v29 = vrot.slane %v5111_v54, 5  ;;  %v5117_v50 = vrot.slane %v5115_v40, 4  ;;  %8071 = vmatprep.mubr.bf16.mxu1 %v7682_v13  ;;  %16567 = vst [vmem:[#allocation84_spill] sm:$0xff] %v14127_v25  ;;  %v14129_v53 = vld [vmem:[#allocation2 + $0x94] sm:$0xf] }
 0x2f5   : > { %v7526_v51 = vsel %vm7253_vm15, %v14005_v56, %v13987_v34  ;;  %v2851_v10 = vrot.slane %v2850_v37, 4  ;;  %v7358_v45 = vsel %vm7350_vm1, %v14042_v23, %v13820_v43  ;;  %v14138_v59 = vpop.f32.mrb[57].mxu0  ;;  %v5123_v4 = vrot.slane %v5121_v36, 5  ;;  %v1104_v54 = vld [vmem:[#allocation2 + $0x144] sm:$0x1]  ;;  %v14147_v56 = vpop.permute.xlu1 %6303  ;;  %v16570_v3 = vld [vmem:[#allocation50_spill] sm:$0xff] }
 0x2f6   : > { %16568 = vst [vmem:[#allocation85_spill] sm:$0xff] %v14138_v59  ;;  %7121 = vrot.lane.b32.xlu0 %v10146_v9, %s11517_s9  ;;  %v2846_v27 = vsel %vm11813_vm11, %v2841_v18, %v2845_v30  ;;  %v5118_v38 = vor.u32 %v5117_v50, %v5113_v29  ;;  %v7426_v21 = vsel %vm7415_vm2, %v7358_v45, %v13544_v0  ;;  %v3141_v40 = vld [vmem:[#allocation2 + $0x108] sm:$0xe]  ;;  %v14145_v34 = vpop.f32.mrb[58].mxu0  ;;  %v1108_v36 = vsel %vm11748_vm3, 0, %v1107_v31  ;;  %v16571_v9 = vld [vmem:[#allocation15_spill] sm:$0xff] }
 0x2f7   : > { %16569 = vst [vmem:[#allocation86_spill] sm:$0xff] %v14145_v34  ;;  %v2856_v43 = vsel %vm11813_vm11, %v2851_v10, %v2855_v35  ;;  %v5114_v23 = vsel %vm11813_vm11, %v5109_v39, %v5113_v29  ;;  %8072 = vmatmul.mubr.bf16.gmra.mrb[44].mxu1 %v7426_v21  ;;  %v863_v30 = vadd.f32 %v13859_v19, %v16570_v3  ;;  %1109 = vst [vmem:[#allocation2 + $0x150] sm:$0x1] %v1108_v36  ;;  %v1205_v35 = vld [vmem:[#allocation2 + $0x158] sm:$0x1]  ;;  %v14161_v50 = vpop.f32.mrb[59].mxu0 }
 0x2f8   : > { %v9960_v0 = vcombine.low %v2846_v27, %v2856_v43  ;;  %v5119_v37 = vrot.slane %v5118_v38, 4  ;;  %v7617_v13 = vsel %vm7350_vm1, %v7526_v51, %v13654_v7  ;;  %v855_v18 = vadd.f32 %v13859_v19, %v16571_v9  ;;  %16572 = vst [vmem:[#allocation50_spill] sm:$0xff] %v14161_v50  ;;  %v4360_v45 = vld [vmem:[#allocation2 + $0x114] sm:$0xe]  ;;  %v14167_v27 = vpop.f32.mrb[60].mxu0  ;;  %v16574_v3 = vld [vmem:[#allocation14_spill] sm:$0xff] }
 0x2f9   : > { %v967_v39 = vmax.f32 %v863_v30, 0.0  ;;  %v7685_v29 = vsel %vm7415_vm2, %v7617_v13, %v14053_v41  ;;  %v1105_v10 = vsel %vm11748_vm3, 0, %v1104_v54  ;;  %v9832_v31 = vrot.slane %v3141_v40, 9  ;;  %16573 = vst [vmem:[#allocation15_spill] sm:$0xff] %v14167_v27  ;;  %v3560_v30 = vld [vmem:[#allocation2 + $0x11c] sm:$0x1]  ;;  %v14182_v13 = vpop.permute.xlu1 %6499 }
 0x2fa   : > { %6173 = vrot.lane.b32.xlu1 %v9960_v0, %s11516_s12  ;;  %v5124_v7 = vsel %vm11813_vm11, %v5119_v37, %v5123_v4  ;;  %8079 = vmatprep.mubr.bf16.mxu1 %v7685_v29  ;;  %v965_v51 = vmax.f32 %v855_v18, 0.0  ;;  %1106 = vst [vmem:[#allocation2 + $0x144] sm:$0x1] %v1105_v10  ;;  %v3394_v38 = vrot.slane %v14091_v11, 5  ;;  %v3397_v21 = vrot.slane %v14101_v44, 5 }
 0x2fb   : > { %v10145_v41 = vcombine.low %v5114_v23, %v5124_v7  ;;  %v10404_v43 = vpack.c.bf16 %v967_v39, %v967_v39  ;;  %v866_v54 = vadd.f32 %v13859_v19, %v16574_v3  ;;  %v1206_v40 = vsel %vm11762_vm5, 0, %v1205_v35  ;;  %v14180_v37 = vld [vmem:[#allocation2 + $0x118] sm:$0xf]  ;;  %v1202_v35 = vld [vmem:[#allocation2 + $0x14c] sm:$0x1]  ;;  %v14188_v7 = vpop.f32.mrb[61].mxu0 }
 0x2fc   : > { %v10402_v36 = vpack.c.bf16 %v965_v51, %v965_v51  ;;  %v3395_v4 = vsel %vm11781_vm8, %v9832_v31, %v3394_v38  ;;  %v3396_v0 = vrot.slane %v3394_v38, 4  ;;  %1207 = vst [vmem:[#allocation2 + $0x158] sm:$0x1] %v1206_v40  ;;  %v9864_v11 = vrot.slane %v4360_v45, 9  ;;  %16575 = vst [vmem:[#allocation14_spill] sm:$0xff] %v14188_v7  ;;  %v14192_v3 = vpop.f32.mrb[62].mxu0 }
 0x2fd   : > { %7119 = vrot.lane.b32.xlu0 %v10145_v41, %s11517_s9  ;;  %v1814_v44 = vshrl.u32 %v10404_v43, 16  ;;  %v1817_v23 = vshll.u32 %v10404_v43, 16  ;;  %v968_v9 = vmax.f32 %v866_v54, 0.0  ;;  %v4610_v18 = vrot.slane %v14180_v37, 5  ;;  %16576 = vst [vmem:[#allocation87_spill] sm:$0xff] %v14192_v3 }
 0x2fe   : > { %v1797_v39 = vshrl.u32 %v10402_v36, 16  ;;  %v1800_v29 = vshll.u32 %v10402_v36, 16  ;;  %v3398_v10 = vsel %vm11781_vm8, %v3396_v0, %v3397_v21  ;;  %v4613_v31 = vrot.slane %v3560_v30, 5  ;;  %v2205_v43 = vld [vmem:[#allocation2 + $0x150] sm:$0xf]  ;;  %v14200_v30 = vpop.f32.mrb[63].mxu0 }
 0x2ff   : > { %v1816_v51 = vrot.slane %v1814_v44, 7  ;;  %v9992_v45 = vcombine.low %v3395_v4, %v3398_v10  ;;  %v10405_v38 = vpack.c.bf16 %v968_v9, %v968_v9  ;;  %v4611_v41 = vsel %vm11781_vm8, %v9864_v11, %v4610_v18  ;;  %16577 = vst [vmem:[#allocation88_spill] sm:$0xff] %v14200_v30  ;;  %v11269_v3 = vld [vmem:[#allocation2 + $0x34] sm:$0xf]  ;;  %v4735_v12 = vld [vmem:[#allocation2 + $0x12c] sm:$0xf] }
 0x300   : > { %v14194_v54 = vrot.slane %v1797_v39, 7  ;;  %v4612_v40 = vrot.slane %v4610_v18, 4  ;;  %v858_v36 = vadd.f32 %v13859_v19, %v13539_v24  ;;  %v1203_v21 = vsel %vm11762_vm5, 0, %v1202_v35  ;;  %v14208_v35 = vpop.permute.xlu1 %6145 }
 0x301   : > { %v3843_v4 = vor.u32 %v13889_v5, %v13719_v14  ;;  %v1819_v0 = vor.u32 %v1817_v23, %v1816_v51  ;;  %v2198_v44 = vld [vmem:[#allocation2 + $0x144] sm:$0xf]  ;;  %6333 = vrot.lane.b32.xlu1 %v9992_v45, %s11515_s21  ;;  %v1822_v11 = vshrl.u32 %v10405_v38, 16  ;;  %v1825_v9 = vshll.u32 %v10405_v38, 16  ;;  %1204 = vst [vmem:[#allocation2 + $0x14c] sm:$0x1] %v1203_v21 }
 0x302   : > { %v1820_v39 = vrot.slane %v1816_v51, 4  ;;  %v1802_v18 = vor.u32 %v1800_v29, %v14194_v54  ;;  %v4614_v24 = vsel %vm11781_vm8, %v4612_v40, %v4613_v31  ;;  %v966_v19 = vmax.f32 %v858_v36, 0.0  ;;  %v16578_v23 = vld [vmem:[#allocation26_spill] sm:$0xff]  ;;  %v11270_v38 = vld [vmem:[#allocation2 + $0x30] sm:$0xf]  ;;  %v14214_v51 = vpop.permute.xlu0 %7131 }
 0x303   : > { %v2206_v10 = vsel %vm11915_vm13, %v1819_v0, %v2205_v43  ;;  %v1824_v14 = vrot.slane %v1822_v11, 7  ;;  %v10088_v5 = vcombine.low %v4611_v41, %v4614_v24  ;;  %v16579_v20 = vshll.u32 %v16578_v23, 16  ;;  %16580 = vst [vmem:[#allocation26_spill] sm:$0xff] %v14214_v51  ;;  %v2209_v31 = vld [vmem:[#allocation2 + $0x158] sm:$0x1]  ;;  %v14220_v43 = vpop.f32.mrb[64].mxu0 }
 0x304   : > { %v9912_v21 = vcombine.low %v11270_v38, %v11269_v3  ;;  %2207 = vst [vmem:[#allocation2 + $0x150] sm:$0xf] %v2206_v10  ;;  %v2199_v29 = vsel %vm11915_vm13, %v1802_v18, %v2198_v44  ;;  %v10403_v40 = vpack.c.bf16 %v966_v19, %v966_v19  ;;  %v16581_v36 = vshll.u32 %v13131_v16, 16  ;;  %16582 = vst [vmem:[#allocation89_spill] sm:$0xff] %v14220_v43  ;;  %v16584_v11 = vld [vmem:[#allocation54_spill] sm:$0xff]  ;;  %v14227_v44 = vpop.f32.mrb[65].mxu0 }
 0x305   : > { %v3752_v45 = vrot.slane %v16579_v20, 5  ;;  %2200 = vst [vmem:[#allocation2 + $0x144] sm:$0xf] %v2199_v29  ;;  %v1827_v41 = vor.u32 %v1825_v9, %v1824_v14  ;;  %v1829_v0 = vrot.slane %v1824_v14, 4  ;;  %6781 = vrot.lane.b32.xlu0 %v10088_v5, %s11516_s12  ;;  %v16583_v20 = vld [vmem:[#allocation53_spill] sm:$0xff]  ;;  %v16586_v18 = vshrl.u32 %v14129_v53, 16 }
 0x306   : > { %v3762_v27 = vrot.slane %v16581_v36, 5  ;;  %v4733_v10 = vld [vmem:[#allocation2 + $0x120] sm:$0xf]  ;;  %16585 = vst [vmem:[#allocation53_spill] sm:$0xff] %v14227_v44  ;;  %v7268_v19 = vsel %vm7253_vm15, %v9912_v21, %v13953_v6  ;;  %v1805_v9 = vshrl.u32 %v10403_v40, 16  ;;  %v1808_v14 = vshll.u32 %v10403_v40, 16 }
 0x307   : > { %v3753_v3 = vsel %vm11813_vm11, %v16583_v20, %v3752_v45  ;;  %v3757_v24 = vor.u32 %v16584_v11, %v3752_v45  ;;  %v14231_v16 = vrot.slane %v16586_v18, 4  ;;  %v3516_v23 = vld [vmem:[#allocation2 + $0x114] sm:$0xf]  ;;  %v14235_v5 = vpop.f32.mrb[66].mxu0  ;;  %v1828_v38 = vsel %vm11949_vm14, %v1820_v39, %v1827_v41  ;;  %v5578_v11 = vld [vmem:[#allocation2 + $0x12c] sm:$0xe] }
 0x308   : > { %16587 = vst [vmem:[#allocation54_spill] sm:$0xff] %v14235_v5  ;;  %v2210_v45 = vsel %vm11748_vm3, %v1829_v0, %v2209_v31  ;;  %v10024_v36 = vcombine.low %v3516_v23, %v14180_v37  ;;  %v14242_v53 = vpop.f32.mrb[67].mxu0  ;;  %v1803_v20 = vrot.slane %v14194_v54, 4  ;;  %2208 = vst.msk [vmem:[#allocation2 + $0x154] sm:$0xf] %vm1013_vm0, %v1828_v38  ;;  %v1807_v6 = vrot.slane %v1805_v9, 7  ;;  %v14251_v0 = vpop.permute.xlu1 %6497 }
 0x309   : > { %v3758_v29 = vrot.slane %v3757_v24, 4  ;;  %16588 = vst [vmem:[#allocation90_spill] sm:$0xff] %v14242_v53  ;;  %2211 = vst [vmem:[#allocation2 + $0x158] sm:$0x1] %v2210_v45  ;;  %v5270_v21 = vshrl.u32 %v4733_v10, 16  ;;  %v5273_v40 = vshll.u32 %v4733_v10, 16  ;;  %v14263_v45 = vpop.permute.xlu0 %6755  ;;  %v7360_v31 = vsel %vm7350_vm1, %v7268_v19, %v13795_v26 }
 0x30a   : > { %v14246_v18 = vrot.slane %v3843_v4, 4  ;;  %v14248_v39 = vld [vmem:[#allocation2 + $0x84] sm:$0xf]  ;;  %v2202_v41 = vld [vmem:[#allocation2 + $0x14c] sm:$0x1]  ;;  %6525 = vrot.lane.b32.xlu1 %v10024_v36, %s11517_s9  ;;  %v1810_v4 = vor.u32 %v1808_v14, %v1807_v6  ;;  %v1812_v23 = vrot.slane %v1807_v6, 4 }
 0x30b   : > { %v3763_v37 = vsel %vm11813_vm11, %v3758_v29, %v3762_v27  ;;  %v14256_v54 = vld [vmem:[#allocation2 + $0x124] sm:$0xf]  ;;  %v14259_v9 = vld [vmem:[#allocation2 + $0x130] sm:$0xf]  ;;  %v14267_v5 = vld [vmem:[#allocation2 + $0x134] sm:$0x1] }
 0x30c   : > { %v10120_v24 = vcombine.low %v4733_v10, %v14256_v54  ;;  %v14261_v38 = vcombine.low %v3753_v3, %v3763_v37  ;;  %v2284_v27 = vld [vmem:[#allocation2 + $0xb4] sm:$0xf]  ;;  %v5272_v36 = vrot.slane %v5270_v21, 4  ;;  %v7429_v10 = vsel %vm7415_vm2, %v7360_v31, %v13991_v15  ;;  %v14278_v19 = vpop.f32.mrb[68].mxu0 }
 0x30d   : > { %v9897_v14 = vrot.slane %v5578_v11, 9  ;;  %v1811_v3 = vsel %vm11949_vm14, %v1803_v20, %v1810_v4  ;;  %v2203_v6 = vsel %vm11748_vm3, %v1812_v23, %v2202_v41  ;;  %v5275_v37 = vrot.slane %v5273_v40, 5  ;;  %8080 = vmatmul.mubr.bf16.gmra.mrb[48].mxu1 %v7429_v10  ;;  %16589 = vst [vmem:[#allocation91_spill] sm:$0xff] %v14278_v19  ;;  %v14289_v10 = vpop.f32.mrb[69].mxu0  ;;  %v14303_v19 = vpop.f32.mrb[28].mxu1 }
 0x30e   : > { %6973 = vrot.lane.b32.xlu0 %v10120_v24, %s11515_s21  ;;  %v5834_v26 = vrot.slane %v14259_v9, 5  ;;  %2201 = vst.msk [vmem:[#allocation2 + $0x148] sm:$0xf] %vm1013_vm0, %v1811_v3  ;;  %2204 = vst [vmem:[#allocation2 + $0x14c] sm:$0x1] %v2203_v6  ;;  %v5837_v21 = vrot.slane %v14267_v5, 5  ;;  %v14291_v3 = vpop.permute.xlu1 %6143 }
 0x30f   : > { %v16590_v15 = vshll.u32 %v13160_v52, 16  ;;  %v16591_v31 = vshll.u32 %v13179_v58, 16  ;;  %v2714_v24 = vshrl.u32 %v2284_v27, 16  ;;  %v2717_v4 = vshll.u32 %v2284_v27, 16  ;;  %16592 = vst [vmem:[#allocation92_spill] sm:$0xff] %v14289_v10  ;;  %16593 = vst [vmem:[#allocation93_spill] sm:$0xff] %v14303_v19 }
 0x310   : > { %v5835_v40 = vsel %vm11781_vm8, %v9897_v14, %v5834_v26  ;;  %v5836_v41 = vrot.slane %v5834_v26, 4  ;;  %v2723_v23 = vshll.u32 %v14069_v48, 16  ;;  %v14300_v26 = vpop.permute.xlu0 %6753  ;;  %v2733_v29 = vshll.u32 %v14065_v47, 16 }
 0x311   : > { %v3728_v11 = vrot.slane %v16590_v15, 5  ;;  %v3738_v20 = vrot.slane %v16591_v31, 5  ;;  %v2716_v58 = vrot.slane %v2714_v24, 4  ;;  %v2727_v15 = vshrl.u32 %v14069_v48, 16  ;;  %v5579_v24 = vld [vmem:[#allocation2 + $0x138] sm:$0xe] }
 0x312   : > { %v5838_v14 = vsel %vm11781_vm8, %v5836_v41, %v5837_v21  ;;  %v2719_v27 = vrot.slane %v2717_v4, 5  ;;  %v2725_v31 = vrot.slane %v2723_v23, 5  ;;  %v5283_v48 = vshrl.u32 %v14256_v54, 16  ;;  %v14307_v21 = vpop.f32.mrb[70].mxu0 }
 0x313   : > { %v3729_v52 = vsel %vm11813_vm11, %v13571_v1, %v3728_v11  ;;  %v3733_v6 = vor.u32 %v13567_v28, %v3728_v11  ;;  %v10185_v10 = vcombine.low %v5835_v40, %v5838_v14  ;;  %v2729_v53 = vrot.slane %v2727_v15, 4  ;;  %16594 = vst [vmem:[#allocation94_spill] sm:$0xff] %v14307_v21  ;;  %v11273_v40 = vld [vmem:[#allocation2 + $0x128] sm:$0x1]  ;;  %v14318_v15 = vpop.f32.mrb[29].mxu1 }
 0x314   : > { %v5276_v1 = vor.u32 %v5275_v37, %v5272_v36  ;;  %v2720_v44 = vor.u32 %v2719_v27, %v2716_v58  ;;  %v2735_v28 = vrot.slane %v2733_v29, 5  ;;  %v5279_v11 = vshll.u32 %v14256_v54, 16  ;;  %v14316_v54 = vld [vmem:[#allocation2 + $0x140] sm:$0x1]  ;;  %16595 = vst [vmem:[#allocation95_spill] sm:$0xff] %v14318_v15  ;;  %v14324_v27 = vpop.permute.xlu1 %6309 }
 0x315   : > { %v3734_v43 = vrot.slane %v3733_v6, 4  ;;  %10908 = vmatmul.mubr.msk.bf16.gmra.mrb[72].mxu0 %vm7253_vm15, %v10185_v10  ;;  %v2730_v41 = vor.u32 %v2729_v53, %v2725_v31  ;;  %v5289_v23 = vshll.u32 %v11273_v40, 16  ;;  %v14312_v6 = vld [vmem:[#allocation2 + $0x13c] sm:$0xf]  ;;  %v5285_v58 = vrot.slane %v5283_v48, 4 }
 0x316   : > { %v5277_v4 = vrot.slane %v5276_v1, 4  ;;  %v2721_v29 = vrot.slane %v2720_v44, 4  ;;  %v5281_v37 = vrot.slane %v5279_v11, 5  ;;  %v14320_v14 = vld [vmem:[#allocation2 + $0x88] sm:$0xf]  ;;  %v9898_v53 = vrot.slane %v5579_v24, 9 }
 0x317   : > { %v3739_v47 = vsel %vm11813_vm11, %v3734_v43, %v3738_v20  ;;  %v2731_v43 = vrot.slane %v2730_v41, 4  ;;  %v5841_v20 = vrot.slane %v14312_v6, 5  ;;  %v2296_v1 = vld [vmem:[#allocation2 + $0x114] sm:$0xf]  ;;  %v5291_v48 = vrot.slane %v5289_v23, 5 }
 0x318   : > { %v14314_v36 = vcombine.low %v3729_v52, %v3739_v47  ;;  %v2726_v44 = vsel %vm11813_vm11, %v2721_v29, %v2725_v31  ;;  %v5282_v52 = vsel %vm11813_vm11, %v5277_v4, %v5281_v37  ;;  %v5286_v11 = vor.u32 %v5285_v58, %v5281_v37  ;;  %v14330_v47 = vpop.permute.xlu0 %6949  ;;  %v14332_v40 = vld [vmem:[#allocation2 + $0x118] sm:$0xf]  ;;  %v14334_v10 = vld [vmem:[#allocation2 + $0x11c] sm:$0x1]  ;;  %v3561_v23 = vld [vmem:[#allocation2 + $0x128] sm:$0x1]  ;;  %v14355_v49 = vpop.permute.xlu1 %6307 }
 0x319   : > { %v2736_v24 = vsel %vm11813_vm11, %v2731_v43, %v2735_v28  ;;  %v5842_v41 = vsel %vm11781_vm8, %v9898_v53, %v5841_v20  ;;  %v5843_v21 = vrot.slane %v5841_v20, 4  ;;  %v5844_v31 = vrot.slane %v14316_v54, 5  ;;  %v14341_v58 = vpop.f32.mrb[71].mxu0  ;;  %v4361_v53 = vld [vmem:[#allocation2 + $0x120] sm:$0xe]  ;;  %v14348_v20 = vpop.f32.mrb[30].mxu1 }
 0x31a   : > { %v9955_v29 = vcombine.low %v2726_v44, %v2736_v24  ;;  %v5287_v30 = vrot.slane %v5286_v11, 4  ;;  %v2858_v4 = vshrl.u32 %v2296_v1, 16  ;;  %v2861_v37 = vshll.u32 %v2296_v1, 16  ;;  %16596 = vst [vmem:[#allocation96_spill] sm:$0xff] %v14341_v58  ;;  %16597 = vst [vmem:[#allocation97_spill] sm:$0xff] %v14348_v20  ;;  %v14357_v55 = vpop.f32.mrb[31].mxu1 }
 0x31b   : > { %v5845_v7 = vsel %vm11781_vm8, %v5843_v21, %v5844_v31  ;;  %v2867_v34 = vshll.u32 %v14332_v40, 16  ;;  %v2871_v28 = vshrl.u32 %v14332_v40, 16  ;;  %v2877_v43 = vshll.u32 %v14334_v10, 16  ;;  %v14353_v58 = vld [vmem:[#allocation2 + $0x124] sm:$0xf]  ;;  %16598 = vst [vmem:[#allocation98_spill] sm:$0xff] %v14357_v55 }
 0x31c   : > { %6163 = vrot.lane.b32.xlu1 %v9955_v29, %s11516_s12  ;;  %v5292_v1 = vsel %vm11813_vm11, %v5287_v30, %v5291_v48  ;;  %v10186_v44 = vcombine.low %v5842_v41, %v5845_v7  ;;  %v2860_v11 = vrot.slane %v2858_v4, 4  ;;  %v2863_v24 = vrot.slane %v2861_v37, 5  ;;  %v3142_v21 = vld [vmem:[#allocation2 + $0x114] sm:$0xe]  ;;  %v14361_v48 = vpop.permute.xlu0 %7105 }
 0x31d   : > { %v10152_v31 = vcombine.low %v5282_v52, %v5292_v1  ;;  %v2869_v25 = vrot.slane %v2867_v34, 5  ;;  %v2873_v50 = vrot.slane %v2871_v28, 4  ;;  %v2879_v59 = vrot.slane %v2877_v43, 5 }
 0x31e   : > { %10911 = vmatprep.mubr.msk.bf16.mxu0 %vm7253_vm15, %v10186_v44  ;;  %v2864_v29 = vor.u32 %v2863_v24, %v2860_v11  ;;  %v9865_v51 = vrot.slane %v4361_v53, 9  ;;  %v4617_v7 = vrot.slane %v14353_v58, 5  ;;  %v4620_v30 = vrot.slane %v3561_v23, 5 }
 0x31f   : > { %7133 = vrot.lane.b32.xlu0 %v10152_v31, %s11517_s9  ;;  %v2874_v52 = vor.u32 %v2873_v50, %v2869_v25  ;;  %v9833_v34 = vrot.slane %v3142_v21, 9  ;;  %v3401_v41 = vrot.slane %v14332_v40, 5  ;;  %v3404_v4 = vrot.slane %v14334_v10, 5  ;;  %v11276_v50 = vld [vmem:[#allocation2 + $0x3c] sm:$0xf] }
 0x320   : > { %v2865_v37 = vrot.slane %v2864_v29, 4  ;;  %v4618_v28 = vsel %vm11781_vm8, %v9865_v51, %v4617_v7  ;;  %v4619_v43 = vrot.slane %v4617_v7, 4  ;;  %v5294_v1 = vshrl.u32 %v4735_v12, 16 }
 0x321   : > { %v16599_v53 = vshrl.u32 %v14248_v39, 16  ;;  %v2875_v23 = vrot.slane %v2874_v52, 4  ;;  %v3403_v11 = vrot.slane %v3401_v41, 4  ;;  %v5297_v24 = vshll.u32 %v4735_v12, 16  ;;  %v14382_v52 = vpop.permute.xlu1 %6503 }
 0x322   : > { %v2870_v40 = vsel %vm11813_vm11, %v2865_v37, %v2869_v25  ;;  %v4621_v10 = vsel %vm11781_vm8, %v4619_v43, %v4620_v30  ;;  %v5296_v21 = vrot.slane %v5294_v1, 4  ;;  %v7529_v51 = vsel %vm7253_vm15, %v13911_v17, %v13949_v63  ;;  %16600 = vst [vmem:[#allocation99_spill] sm:$0xff] %v14382_v52  ;;  %v14388_v37 = vpop.permute.xlu0 %6947  ;;  %v1113_v1 = vld [vmem:[#allocation2 + $0x168] sm:$0x1] }
 0x323   : > { %v14370_v44 = vrot.slane %v16599_v53, 4  ;;  %v2880_v31 = vsel %vm11813_vm11, %v2875_v23, %v2879_v59  ;;  %v10089_v29 = vcombine.low %v4618_v28, %v4621_v10  ;;  %v5299_v7 = vrot.slane %v5297_v24, 5  ;;  %v11275_v53 = vld [vmem:[#allocation2 + $0x40] sm:$0xf]  ;;  %v1110_v23 = vld [vmem:[#allocation2 + $0x15c] sm:$0x1] }
 0x324   : > { %v9913_v55 = vcombine.low %v11276_v50, %v11275_v53  ;;  %v9961_v20 = vcombine.low %v2870_v40, %v2880_v31  ;;  %v3402_v25 = vsel %vm11781_vm8, %v9833_v34, %v3401_v41  ;;  %v3405_v30 = vsel %vm11781_vm8, %v3403_v11, %v3404_v4  ;;  %v3518_v41 = vld [vmem:[#allocation2 + $0x120] sm:$0xf] }
 0x325   : > { %v16601_v17 = vshll.u32 %v14248_v39, 16  ;;  %v14396_v59 = vsel %vm7350_vm1, %v7529_v51, %v14079_v33  ;;  %6783 = vrot.lane.b32.xlu0 %v10089_v29, %s11516_s12  ;;  %v5300_v28 = vor.u32 %v5299_v7, %v5296_v21  ;;  %v5303_v43 = vshll.u32 %v14259_v9, 16  ;;  %v14411_v40 = vld [vmem:[%s16323_s2] ss:$0 sm:$0xff]  ;;  %v14420_v21 = vld [vmem:[#allocation2 + $0x128] sm:$0x1]  ;;  %v14425_v31 = vpop.permute.xlu1 %6149 }
 0x326   : > { %v14402_v34 = vsel %vm7253_vm15, %v9913_v55, %v14291_v3  ;;  %6175 = vrot.lane.b32.xlu1 %v9961_v20, %s11516_s12  ;;  %v10121_v39 = vcombine.low %v4735_v12, %v14259_v9  ;;  %v5307_v4 = vshrl.u32 %v14259_v9, 16  ;;  %v5313_v33 = vshll.u32 %v14267_v5, 16  ;;  %v2298_v3 = vld [vmem:[#allocation2 + $0x120] sm:$0xf]  ;;  %v14415_v20 = vld [vmem:[#allocation2 + $0x124] sm:$0xf]  ;;  %v7104_v53 = vpop.permute.xlu0 %7103 }
 0x327   : > { %v14392_v63 = vrot.slane %v16601_v17, 5  ;;  %v9993_v11 = vcombine.low %v3402_v25, %v3405_v30  ;;  %v5301_v24 = vrot.slane %v5300_v28, 4  ;;  %v5305_v50 = vrot.slane %v5303_v43, 5 }
 0x328   : > { %v879_v55 = vadd.f32 %v14411_v40, %v13740_v42  ;;  %v10025_v12 = vcombine.low %v3518_v41, %v14353_v58  ;;  %v5309_v9 = vrot.slane %v5307_v4, 4  ;;  %v5315_v10 = vrot.slane %v5313_v33, 5 }
 0x329   : > { %v1114_v5 = vsel %vm11748_vm3, 0, %v1113_v1  ;;  %6975 = vrot.lane.b32.xlu0 %v10121_v39, %s11515_s21  ;;  %v5306_v51 = vsel %vm11813_vm11, %v5301_v24, %v5305_v50  ;;  %v871_v29 = vadd.f32 %v14411_v40, %v13753_v8  ;;  %v1111_v58 = vsel %vm11748_vm3, 0, %v1110_v23 }
 0x32a   : > { %v971_v42 = vmax.f32 %v879_v55, 0.0  ;;  %1115 = vst [vmem:[#allocation2 + $0x168] sm:$0x1] %v1114_v5  ;;  %6335 = vrot.lane.b32.xlu1 %v9993_v11, %s11515_s21  ;;  %v5310_v7 = vor.u32 %v5309_v9, %v5305_v50  ;;  %1112 = vst [vmem:[#allocation2 + $0x15c] sm:$0x1] %v1111_v58  ;;  %v2882_v25 = vshrl.u32 %v2298_v3, 16 }
 0x32b   : > { %v2885_v30 = vshll.u32 %v2298_v3, 16  ;;  %v2891_v17 = vshll.u32 %v14415_v20, 16  ;;  %v969_v43 = vmax.f32 %v871_v29, 0.0  ;;  %v2895_v1 = vshrl.u32 %v14415_v20, 16  ;;  %v1211_v55 = vld [vmem:[#allocation2 + $0x170] sm:$0x1] }
 0x32c   : > { %v10408_v28 = vpack.c.bf16 %v971_v42, %v971_v42  ;;  %v2901_v39 = vshll.u32 %v14420_v21, 16  ;;  %v5311_v41 = vrot.slane %v5310_v7, 4  ;;  %v2884_v8 = vrot.slane %v2882_v25, 4  ;;  %v16602_v42 = vld [vmem:[#allocation70_spill] sm:$0xff]  ;;  %v4362_v58 = vld [vmem:[#allocation2 + $0x12c] sm:$0xe] }
 0x32d   : > { %v2887_v4 = vrot.slane %v2885_v30, 5  ;;  %v2893_v33 = vrot.slane %v2891_v17, 5  ;;  %v10406_v11 = vpack.c.bf16 %v969_v43, %v969_v43  ;;  %v2897_v50 = vrot.slane %v2895_v1, 4  ;;  %v14442_v43 = vpop.permute.xlu1 %6501 }
 0x32e   : > { %v1848_v23 = vshrl.u32 %v10408_v28, 16  ;;  %v1851_v24 = vshll.u32 %v10408_v28, 16  ;;  %6527 = vrot.lane.b32.xlu1 %v10025_v12, %s11517_s9  ;;  %v5316_v3 = vsel %vm11813_vm11, %v5311_v41, %v5315_v10  ;;  %v2903_v5 = vrot.slane %v2901_v39, 5  ;;  %v3562_v28 = vld [vmem:[#allocation2 + $0x134] sm:$0x1]  ;;  %v14446_v39 = vpop.permute.xlu0 %6759 }
 0x32f   : > { %v2888_v9 = vor.u32 %v2887_v4, %v2884_v8  ;;  %v882_v29 = vadd.f32 %v14411_v40, %v16602_v42  ;;  %v10153_v7 = vcombine.low %v5306_v51, %v5316_v3  ;;  %v1831_v30 = vshrl.u32 %v10406_v11, 16  ;;  %v14455_v4 = vld [vmem:[#allocation2 + $0x130] sm:$0xf] }
 0x330   : > { %v14440_v25 = vrot.slane %v1848_v23, 7  ;;  %v1834_v17 = vshll.u32 %v10406_v11, 16  ;;  %v2898_v12 = vor.u32 %v2897_v50, %v2893_v33  ;;  %v1212_v10 = vsel %vm11762_vm5, 0, %v1211_v55 }
 0x331   : > { %v2219_v1 = vld [vmem:[#allocation2 + $0x168] sm:$0xf]  ;;  %v2889_v52 = vrot.slane %v2888_v9, 4  ;;  %v972_v15 = vmax.f32 %v882_v29, 0.0  ;;  %v7532_v51 = vsel %vm7253_vm15, %v14314_v36, %v14300_v26  ;;  %7135 = vrot.lane.b32.xlu0 %v10153_v7, %s11517_s9  ;;  %v14453_v8 = vrot.slane %v1831_v30, 7 }
 0x332   : > { %v1853_v41 = vor.u32 %v1851_v24, %v14440_v25  ;;  %1213 = vst [vmem:[#allocation2 + $0x170] sm:$0x1] %v1212_v10  ;;  %v9866_v23 = vrot.slane %v4362_v58, 9  ;;  %v2212_v11 = vld [vmem:[#allocation2 + $0x15c] sm:$0xf]  ;;  %v2899_v55 = vrot.slane %v2898_v12, 4 }
 0x333   : > { %v2894_v50 = vsel %vm11813_vm11, %v2889_v52, %v2893_v33  ;;  %v10409_v3 = vpack.c.bf16 %v972_v15, %v972_v15  ;;  %v4624_v9 = vrot.slane %v14455_v4, 5  ;;  %v1854_v26 = vrot.slane %v14440_v25, 4  ;;  %v1208_v29 = vld [vmem:[#allocation2 + $0x164] sm:$0x1]  ;;  %v16603_v12 = vld [vmem:[#allocation72_spill] sm:$0xff] }
 0x334   : > { %v2220_v36 = vsel %vm11915_vm13, %v1853_v41, %v2219_v1  ;;  %v1836_v24 = vor.u32 %v1834_v17, %v14453_v8  ;;  %v4627_v42 = vrot.slane %v3562_v28, 5  ;;  %v2904_v58 = vsel %vm11813_vm11, %v2899_v55, %v2903_v5  ;;  %v14472_v17 = vpop.permute.xlu1 %6147  ;;  %v16605_v55 = vld [vmem:[#allocation38_spill] sm:$0xff] }
 0x335   : > { %2221 = vst [vmem:[#allocation2 + $0x168] sm:$0xf] %v2220_v36  ;;  %v1856_v7 = vshrl.u32 %v10409_v3, 16  ;;  %v1859_v30 = vshll.u32 %v10409_v3, 16  ;;  %v4625_v15 = vsel %vm11781_vm8, %v9866_v23, %v4624_v9  ;;  %v9962_v33 = vcombine.low %v2894_v50, %v2904_v58  ;;  %v3143_v23 = vld [vmem:[#allocation2 + $0x120] sm:$0xe] }
 0x336   : > { %v2213_v52 = vsel %vm11915_vm13, %v1836_v24, %v2212_v11  ;;  %v4626_v25 = vrot.slane %v4624_v9, 4  ;;  %v7688_v1 = vsel %vm7415_vm2, %v14396_v59, %v7104_v53  ;;  %v874_v5 = vadd.f32 %v14411_v40, %v16603_v12  ;;  %v14481_v11 = vpop.permute.xlu0 %6757  ;;  %v16604_v53 = vld [vmem:[#allocation39_spill] sm:$0xff] }
 0x337   : > { %2214 = vst [vmem:[#allocation2 + $0x15c] sm:$0xf] %v2213_v52  ;;  %v1858_v28 = vrot.slane %v1856_v7, 7  ;;  %8087 = vmatprep.mubr.bf16.mxu1 %v7688_v1  ;;  %v1209_v10 = vsel %vm11762_vm5, 0, %v1208_v29  ;;  %v7362_v41 = vsel %vm7350_vm1, %v14402_v34, %v14147_v56  ;;  %6177 = vrot.lane.b32.xlu1 %v9962_v33, %s11516_s12  ;;  %v16606_v3 = vshll.u32 %v16605_v55, 16  ;;  %v16607_v36 = vld [vmem:[#allocation43_spill] sm:$0xff] }
 0x338   : > { %v4628_v59 = vsel %vm11781_vm8, %v4626_v25, %v4627_v42  ;;  %1210 = vst [vmem:[#allocation2 + $0x164] sm:$0x1] %v1209_v10  ;;  %v7432_v50 = vsel %vm7415_vm2, %v7362_v41, %v16604_v53  ;;  %v16608_v24 = vshll.u32 %v16607_v36, 16  ;;  %v970_v52 = vmax.f32 %v874_v5, 0.0  ;;  %v4737_v33 = vld [vmem:[#allocation2 + $0x138] sm:$0xf] }
 0x339   : > { %v3800_v9 = vrot.slane %v16606_v3, 5  ;;  %v1861_v58 = vor.u32 %v1859_v30, %v1858_v28  ;;  %v1863_v56 = vrot.slane %v1858_v28, 4  ;;  %v2223_v34 = vld [vmem:[#allocation2 + $0x170] sm:$0x1]  ;;  %v10090_v7 = vcombine.low %v4625_v15, %v4628_v59  ;;  %8088 = vmatmul.mubr.bf16.gmra.mrb[52].mxu1 %v7432_v50  ;;  %v16609_v1 = vld [vmem:[#allocation64_spill] sm:$0xff]  ;;  %v16610_v25 = vld [vmem:[#allocation63_spill] sm:$0xff]  ;;  %v14510_v50 = vpop.permute.xlu1 %6313 }
 0x33a   : > { %v3810_v29 = vrot.slane %v16608_v24, 5  ;;  %v7621_v10 = vsel %vm7350_vm1, %v7532_v51, %v14016_v61  ;;  %v9834_v41 = vrot.slane %v3143_v23, 9  ;;  %v10407_v15 = vpack.c.bf16 %v970_v52, %v970_v52  ;;  %v5580_v5 = vld [vmem:[#allocation2 + $0x144] sm:$0xe]  ;;  %v14508_v23 = vld [vmem:[#allocation2 + $0x148] sm:$0xf]  ;;  %v14515_v24 = vpop.permute.xlu0 %6953 }
 0x33b   : > { %v3801_v42 = vsel %vm11813_vm11, %v16609_v1, %v3800_v9  ;;  %v3805_v12 = vor.u32 %v16610_v25, %v3800_v9  ;;  %v1862_v53 = vsel %vm11949_vm14, %v1854_v26, %v1861_v58  ;;  %v2224_v30 = vsel %vm11748_vm3, %v1863_v56, %v2223_v34  ;;  %6785 = vrot.lane.b32.xlu0 %v10090_v7, %s11516_s12  ;;  %v14513_v36 = vld [vmem:[#allocation2 + $0x14c] sm:$0x1]  ;;  %v11279_v56 = vld [vmem:[#allocation2 + $0x48] sm:$0xf] }
 0x33c   : > { %v7691_v28 = vsel %vm7415_vm2, %v7621_v10, %v14361_v48  ;;  %2222 = vst.msk [vmem:[#allocation2 + $0x16c] sm:$0xf] %vm1013_vm0, %v1862_v53  ;;  %2225 = vst [vmem:[#allocation2 + $0x170] sm:$0x1] %v2224_v30  ;;  %v3408_v61 = vrot.slane %v14415_v20, 5  ;;  %v3411_v51 = vrot.slane %v14420_v21, 5  ;;  %v10122_v48 = vcombine.low %v4737_v33, %v14312_v6 }
 0x33d   : > { %v3806_v59 = vrot.slane %v3805_v12, 4  ;;  %8095 = vmatprep.mubr.bf16.mxu1 %v7691_v28  ;;  %v5318_v26 = vshrl.u32 %v4737_v33, 16  ;;  %16611 = vst [vmem:[#allocation70_spill] sm:$0xff] %v14510_v50  ;;  %v1839_v55 = vshrl.u32 %v10407_v15, 16  ;;  %v1842_v3 = vshll.u32 %v10407_v15, 16  ;;  %16612 = vst [vmem:[#allocation72_spill] sm:$0xff] %v14515_v24 }
 0x33e   : > { %v5321_v9 = vshll.u32 %v4737_v33, 16  ;;  %v11278_v58 = vld [vmem:[#allocation2 + $0x4c] sm:$0xf]  ;;  %v3409_v21 = vsel %vm11781_vm8, %v9834_v41, %v3408_v61  ;;  %v3410_v7 = vrot.slane %v3408_v61, 4  ;;  %v1837_v52 = vrot.slane %v14453_v8, 4 }
 0x33f   : > { %v9914_v34 = vcombine.low %v11279_v56, %v11278_v58  ;;  %v3811_v20 = vsel %vm11813_vm11, %v3806_v59, %v3810_v29  ;;  %v1841_v1 = vrot.slane %v1839_v55, 7  ;;  %v5320_v33 = vrot.slane %v5318_v26, 4  ;;  %6977 = vrot.lane.b32.xlu0 %v10122_v48, %s11515_s21  ;;  %v2216_v12 = vld [vmem:[#allocation2 + $0x164] sm:$0x1]  ;;  %v16613_v26 = vld [vmem:[#allocation45_spill] sm:$0xff] }
 0x340   : > { %v14522_v25 = vcombine.low %v3801_v42, %v3811_v20  ;;  %v3412_v10 = vsel %vm11781_vm8, %v3410_v7, %v3411_v51  ;;  %v9899_v53 = vrot.slane %v5580_v5, 9  ;;  %v5848_v30 = vrot.slane %v14508_v23, 5  ;;  %v14535_v51 = vpop.permute.xlu1 %6311  ;;  %v14537_v5 = vld [vmem:[#allocation2 + $0x98] sm:$0x1]  ;;  %v16616_v20 = vld [vmem:[#allocation67_spill] sm:$0xff] }
 0x341   : > { %v5851_v29 = vrot.slane %v14513_v36, 5  ;;  %v1844_v15 = vor.u32 %v1842_v3, %v1841_v1  ;;  %v1846_v41 = vrot.slane %v1841_v1, 4  ;;  %v9994_v28 = vcombine.low %v3409_v21, %v3412_v10  ;;  %16615 = vst [vmem:[#allocation39_spill] sm:$0xff] %v14535_v51  ;;  %v16618_v7 = vld [vmem:[#allocation46_spill] sm:$0xff]  ;;  %v5581_v10 = vld [vmem:[#allocation2 + $0x150] sm:$0xe] }
 0x342   : > { %v5323_v59 = vrot.slane %v5321_v9, 5  ;;  %v3819_v8 = vor.u32 %v14392_v63, %v14370_v44  ;;  %v5849_v42 = vsel %vm11781_vm8, %v9899_v53, %v5848_v30  ;;  %v5850_v61 = vrot.slane %v5848_v30, 4  ;;  %v14547_v63 = vpop.permute.xlu0 %7109  ;;  %v3563_v58 = vld [vmem:[#allocation2 + $0x140] sm:$0x1]  ;;  %v3144_v50 = vld [vmem:[#allocation2 + $0x12c] sm:$0xe] }
 0x343   : > { %v16614_v55 = vshll.u32 %v16613_v26, 16  ;;  %v7274_v3 = vsel %vm7253_vm15, %v9914_v34, %v14208_v35  ;;  %v1845_v9 = vsel %vm11949_vm14, %v1837_v52, %v1844_v15  ;;  %v2217_v44 = vsel %vm11748_vm3, %v1846_v41, %v2216_v12  ;;  %6337 = vrot.lane.b32.xlu1 %v9994_v28, %s11515_s21  ;;  %v16617_v34 = vld [vmem:[#allocation66_spill] sm:$0xff]  ;;  %v3520_v12 = vld [vmem:[#allocation2 + $0x12c] sm:$0xf] }
 0x344   : > { %2215 = vst.msk [vmem:[#allocation2 + $0x160] sm:$0xf] %vm1013_vm0, %v1845_v9  ;;  %2218 = vst [vmem:[#allocation2 + $0x164] sm:$0x1] %v2217_v44  ;;  %v5852_v56 = vsel %vm11781_vm8, %v5850_v61, %v5851_v29  ;;  %v16619_v52 = vshll.u32 %v16618_v7, 16  ;;  %v16620_v53 = vshrl.u32 %v14320_v14, 16  ;;  %v10026_v41 = vcombine.low %v3520_v12, %v14455_v4 }
 0x345   : > { %v3776_v48 = vrot.slane %v16614_v55, 5  ;;  %v10187_v15 = vcombine.low %v5849_v42, %v5852_v56  ;;  %v5324_v28 = vor.u32 %v5323_v59, %v5320_v33  ;;  %v14563_v29 = vrot.slane %v3819_v8, 4  ;;  %v2300_v59 = vld [vmem:[#allocation2 + $0x12c] sm:$0xf]  ;;  %v14603_v24 = vld [vmem:[#allocation2 + $0x13c] sm:$0xf] }
 0x346   : > { %v3786_v1 = vrot.slane %v16619_v52, 5  ;;  %v14560_v30 = vrot.slane %v16620_v53, 4  ;;  %v5327_v26 = vshll.u32 %v14312_v6, 16  ;;  %v5331_v55 = vshrl.u32 %v14312_v6, 16  ;;  %v14591_v12 = vpop.permute.xlu0 %6951  ;;  %v2341_v53 = vld [vmem:[#allocation2 + $0x134] sm:$0x1] }
 0x347   : > { %v3777_v35 = vsel %vm11813_vm11, %v16616_v20, %v3776_v48  ;;  %v3781_v21 = vor.u32 %v16617_v34, %v3776_v48  ;;  %v14567_v48 = vld [vmem:[#allocation2 + $0x158] sm:$0x1]  ;;  %10912 = vmatmul.mubr.msk.bf16.gmra.mrb[76].mxu0 %vm7253_vm15, %v10187_v15  ;;  %6529 = vrot.lane.b32.xlu1 %v10026_v41, %s11517_s9  ;;  %v5325_v9 = vrot.slane %v5324_v28, 4  ;;  %v5337_v44 = vshll.u32 %v14316_v54, 16  ;;  %v14578_v20 = vld [vmem:[#allocation2 + $0x154] sm:$0xf] }
 0x348   : > { %v7364_v4 = vsel %vm7350_vm1, %v7274_v3, %v14110_v62  ;;  %v9900_v33 = vrot.slane %v5581_v10, 9  ;;  %v5329_v42 = vrot.slane %v5327_v26, 5  ;;  %v5333_v56 = vrot.slane %v5331_v55, 4  ;;  %v14580_v34 = vld [vmem:[#allocation2 + $0x130] sm:$0xf] }
 0x349   : > { %v3782_v61 = vrot.slane %v3781_v21, 4  ;;  %v7435_v6 = vsel %vm7415_vm2, %v7364_v4, %v14251_v0  ;;  %v14582_v21 = vpop.permute.xlu1 %6507  ;;  %v14584_v54 = vld [vmem:[#allocation2 + $0xa8] sm:$0xf]  ;;  %v5855_v7 = vrot.slane %v14578_v20, 5  ;;  %v5858_v52 = vrot.slane %v14567_v48, 5 }
 0x34a   : > { %16621 = vst [vmem:[#allocation38_spill] sm:$0xff] %v14582_v21  ;;  %v3885_v62 = vshrl.u32 %v14584_v54, 16  ;;  %8096 = vmatmul.mubr.bf16.gmra.mrb[56].mxu1 %v7435_v6  ;;  %v5334_v0 = vor.u32 %v5333_v56, %v5329_v42  ;;  %v5339_v10 = vrot.slane %v5337_v44, 5  ;;  %v2906_v15 = vshrl.u32 %v2300_v59, 16 }
 0x34b   : > { %v3787_v8 = vsel %vm11813_vm11, %v3782_v61, %v3786_v1  ;;  %v4363_v1 = vld [vmem:[#allocation2 + $0x138] sm:$0xe]  ;;  %v2909_v41 = vshll.u32 %v2300_v59, 16  ;;  %v5330_v28 = vsel %vm11813_vm11, %v5325_v9, %v5329_v42  ;;  %v5857_v61 = vrot.slane %v5855_v7, 4 }
 0x34c   : > { %v14587_v3 = vcombine.low %v3777_v35, %v3787_v8  ;;  %v5856_v35 = vsel %vm11781_vm8, %v9900_v33, %v5855_v7  ;;  %v2915_v26 = vshll.u32 %v14580_v34, 16  ;;  %v5335_v55 = vrot.slane %v5334_v0, 4  ;;  %v4739_v0 = vld [vmem:[#allocation2 + $0x144] sm:$0xf] }
 0x34d   : > { %v2908_v4 = vrot.slane %v2906_v15, 4  ;;  %v2911_v8 = vrot.slane %v2909_v41, 5  ;;  %v2919_v6 = vshrl.u32 %v14580_v34, 16  ;;  %v5859_v44 = vsel %vm11781_vm8, %v5857_v61, %v5858_v52  ;;  %v14605_v15 = vpop.permute.xlu1 %6153  ;;  %v14608_v61 = vpop.permute.xlu0 %7107 }
 0x34e   : > { %v2917_v56 = vrot.slane %v2915_v26, 5  ;;  %v2925_v59 = vshll.u32 %v2341_v53, 16  ;;  %v9867_v21 = vrot.slane %v4363_v1, 9  ;;  %v5340_v9 = vsel %vm11813_vm11, %v5335_v55, %v5339_v10  ;;  %16622 = vst [vmem:[#allocation43_spill] sm:$0xff] %v14605_v15  ;;  %v3564_v15 = vld [vmem:[#allocation2 + $0x14c] sm:$0x1] }
 0x34f   : > { %v10188_v33 = vcombine.low %v5856_v35, %v5859_v44  ;;  %v2912_v42 = vor.u32 %v2911_v8, %v2908_v4  ;;  %v2921_v7 = vrot.slane %v2919_v6, 4  ;;  %v10154_v41 = vcombine.low %v5330_v28, %v5340_v9  ;;  %v14615_v6 = vld [vmem:[#allocation2 + $0x8c] sm:$0x1] }
 0x350   : > { %v2927_v51 = vrot.slane %v2925_v59, 5  ;;  %v4631_v19 = vrot.slane %v14603_v24, 5  ;;  %v4634_v52 = vrot.slane %v3563_v58, 5  ;;  %v9835_v10 = vrot.slane %v3144_v50, 9 }
 0x351   : > { %10915 = vmatprep.mubr.msk.bf16.mxu0 %vm7253_vm15, %v10188_v33  ;;  %v2913_v1 = vrot.slane %v2912_v42, 4  ;;  %v2922_v26 = vor.u32 %v2921_v7, %v2917_v56  ;;  %v3415_v35 = vrot.slane %v14580_v34, 5  ;;  %7137 = vrot.lane.b32.xlu0 %v10154_v41, %s11517_s9  ;;  %v3418_v28 = vrot.slane %v2341_v53, 5  ;;  %v11284_v53 = vld [vmem:[#allocation2 + $0x54] sm:$0xf] }
 0x352   : > { %v4632_v55 = vsel %vm11781_vm8, %v9867_v21, %v4631_v19  ;;  %v4633_v4 = vrot.slane %v4631_v19, 4  ;;  %v5342_v8 = vshrl.u32 %v4739_v0, 16  ;;  %v14620_v50 = vrot.slane %v3885_v62, 4  ;;  %v11283_v21 = vld [vmem:[#allocation2 + $0x58] sm:$0xf] }
 0x353   : > { %v2918_v44 = vsel %vm11813_vm11, %v2913_v1, %v2917_v56  ;;  %v2923_v59 = vrot.slane %v2922_v26, 4  ;;  %v3417_v9 = vrot.slane %v3415_v35, 4  ;;  %v5345_v42 = vshll.u32 %v4739_v0, 16  ;;  %v14629_v1 = vpop.permute.xlu1 %6505 }
 0x354   : > { %v4635_v34 = vsel %vm11781_vm8, %v4633_v4, %v4634_v52  ;;  %v5344_v33 = vrot.slane %v5342_v8, 4  ;;  %v7535_v19 = vsel %vm7253_vm15, %v14261_v38, %v14263_v45  ;;  %v9915_v7 = vcombine.low %v11284_v53, %v11283_v21  ;;  %16623 = vst [vmem:[#allocation64_spill] sm:$0xff] %v14629_v1  ;;  %v14635_v8 = vpop.permute.xlu0 %6763  ;;  %v16625_v21 = vld [vmem:[#allocation73_spill] sm:$0xff]  ;;  %v4364_v38 = vld [vmem:[#allocation2 + $0x144] sm:$0xe] }
 0x355   : > { %v2928_v41 = vsel %vm11813_vm11, %v2923_v59, %v2927_v51  ;;  %v10091_v56 = vcombine.low %v4632_v55, %v4635_v34  ;;  %v3416_v26 = vsel %vm11781_vm8, %v9835_v10, %v3415_v35  ;;  %v3419_v52 = vsel %vm11781_vm8, %v3417_v9, %v3418_v28  ;;  %16624 = vst [vmem:[#allocation63_spill] sm:$0xff] %v14635_v8  ;;  %v3522_v28 = vld [vmem:[#allocation2 + $0x138] sm:$0xf]  ;;  %v1116_v9 = vld [vmem:[#allocation2 + $0x174] sm:$0x1] }
 0x356   : > { %v9963_v62 = vcombine.low %v2918_v44, %v2928_v41  ;;  %v5347_v4 = vrot.slane %v5345_v42, 5  ;;  %v14640_v45 = vsel %vm7350_vm1, %v7535_v19, %v14388_v37  ;;  %v5351_v51 = vshll.u32 %v14508_v23, 16  ;;  %v1119_v44 = vld [vmem:[#allocation2 + $0x180] sm:$0x1]  ;;  %v2302_v41 = vld [vmem:[#allocation2 + $0x138] sm:$0xf] }
 0x357   : > { %6787 = vrot.lane.b32.xlu0 %v10091_v56, %s11516_s12  ;;  %v5355_v55 = vshrl.u32 %v14508_v23, 16  ;;  %v14647_v10 = vsel %vm7253_vm15, %v9915_v7, %v14472_v17  ;;  %v10123_v35 = vcombine.low %v4739_v0, %v14508_v23  ;;  %v5361_v37 = vshll.u32 %v14513_v36, 16  ;;  %v14654_v56 = vld [vmem:[#allocation2 + $0x13c] sm:$0xf] }
 0x358   : > { %6179 = vrot.lane.b32.xlu1 %v9963_v62, %s11516_s12  ;;  %v5348_v59 = vor.u32 %v5347_v4, %v5344_v33  ;;  %v9995_v34 = vcombine.low %v3416_v26, %v3419_v52  ;;  %v5353_v42 = vrot.slane %v5351_v51, 5  ;;  %v895_v53 = vadd.f32 %v14411_v40, %v16625_v21  ;;  %v16626_v33 = vld [vmem:[#allocation75_spill] sm:$0xff]  ;;  %v14666_v51 = vpop.permute.xlu1 %6151 }
 0x359   : > { %v5357_v19 = vrot.slane %v5355_v55, 4  ;;  %v10027_v17 = vcombine.low %v3522_v28, %v14603_v24  ;;  %v5363_v62 = vrot.slane %v5361_v37, 5  ;;  %v1120_v23 = vsel %vm11748_vm3, 0, %v1119_v44  ;;  %v14664_v4 = vld [vmem:[#allocation2 + $0x140] sm:$0x1]  ;;  %v14672_v28 = vpop.permute.xlu0 %6761 }
 0x35a   : > { %v5349_v7 = vrot.slane %v5348_v59, 4  ;;  %v975_v0 = vmax.f32 %v895_v53, 0.0  ;;  %1121 = vst [vmem:[#allocation2 + $0x180] sm:$0x1] %v1120_v23  ;;  %v887_v26 = vadd.f32 %v14411_v40, %v16626_v33  ;;  %v1117_v52 = vsel %vm11748_vm3, 0, %v1116_v9 }
 0x35b   : > { %6979 = vrot.lane.b32.xlu0 %v10123_v35, %s11515_s21  ;;  %v5358_v36 = vor.u32 %v5357_v19, %v5353_v42  ;;  %1118 = vst [vmem:[#allocation2 + $0x174] sm:$0x1] %v1117_v52  ;;  %v2930_v55 = vshrl.u32 %v2302_v41, 16  ;;  %v2933_v44 = vshll.u32 %v2302_v41, 16  ;;  %v2939_v35 = vshll.u32 %v14654_v56, 16 }
 0x35c   : > { %6339 = vrot.lane.b32.xlu1 %v9995_v34, %s11515_s21  ;;  %v5354_v24 = vsel %vm11813_vm11, %v5349_v7, %v5353_v42  ;;  %v10412_v37 = vpack.c.bf16 %v975_v0, %v975_v0  ;;  %v973_v19 = vmax.f32 %v887_v26, 0.0  ;;  %v2943_v9 = vshrl.u32 %v14654_v56, 16  ;;  %v1217_v52 = vld [vmem:[#allocation2 + $0x188] sm:$0x1] }
 0x35d   : > { %v5359_v59 = vrot.slane %v5358_v36, 4  ;;  %v2932_v21 = vrot.slane %v2930_v55, 4  ;;  %v2935_v53 = vrot.slane %v2933_v44, 5  ;;  %v2941_v23 = vrot.slane %v2939_v35, 5  ;;  %v16627_v35 = vld [vmem:[#allocation77_spill] sm:$0xff] }
 0x35e   : > { %v2949_v34 = vshll.u32 %v14664_v4, 16  ;;  %v1882_v7 = vshrl.u32 %v10412_v37, 16  ;;  %v1885_v33 = vshll.u32 %v10412_v37, 16  ;;  %v10410_v41 = vpack.c.bf16 %v973_v19, %v973_v19 }
 0x35f   : > { %v5364_v42 = vsel %vm11813_vm11, %v5359_v59, %v5363_v62  ;;  %v2936_v0 = vor.u32 %v2935_v53, %v2932_v21  ;;  %v2945_v26 = vrot.slane %v2943_v9, 4  ;;  %v898_v8 = vadd.f32 %v14411_v40, %v16627_v35  ;;  %v14683_v62 = vpop.permute.xlu1 %6317  ;;  %v14688_v9 = vpop.permute.xlu0 %6957 }
 0x360   : > { %6531 = vrot.lane.b32.xlu1 %v10027_v17, %s11517_s9  ;;  %v10155_v36 = vcombine.low %v5354_v24, %v5364_v42  ;;  %v2951_v58 = vrot.slane %v2949_v34, 5  ;;  %v14679_v1 = vrot.slane %v1882_v7, 7  ;;  %v1865_v55 = vshrl.u32 %v10410_v41, 16  ;;  %v14696_v7 = vld [vmem:[#allocation2 + $0x148] sm:$0xf] }
 0x361   : > { %v1868_v44 = vshll.u32 %v10410_v41, 16  ;;  %v2233_v59 = vld [vmem:[#allocation2 + $0x180] sm:$0xf]  ;;  %v2937_v37 = vrot.slane %v2936_v0, 4  ;;  %v2946_v19 = vor.u32 %v2945_v26, %v2941_v23  ;;  %v1218_v17 = vsel %vm11762_vm5, 0, %v1217_v52 }
 0x362   : > { %7139 = vrot.lane.b32.xlu0 %v10155_v36, %s11517_s9  ;;  %v9868_v24 = vrot.slane %v4364_v38, 9  ;;  %v7538_v21 = vsel %vm7253_vm15, %v14587_v3, %v14481_v11  ;;  %v1887_v53 = vor.u32 %v1885_v33, %v14679_v1  ;;  %v14694_v34 = vrot.slane %v1865_v55, 7  ;;  %1219 = vst [vmem:[#allocation2 + $0x188] sm:$0x1] %v1218_v17  ;;  %v2226_v41 = vld [vmem:[#allocation2 + $0x174] sm:$0xf] }
 0x363   : > { %v976_v42 = vmax.f32 %v898_v8, 0.0  ;;  %v2942_v36 = vsel %vm11813_vm11, %v2937_v37, %v2941_v23  ;;  %v2947_v52 = vrot.slane %v2946_v19, 4  ;;  %v4638_v38 = vrot.slane %v14696_v7, 5  ;;  %v1214_v8 = vld [vmem:[#allocation2 + $0x17c] sm:$0x1]  ;;  %v14714_v17 = vpop.permute.xlu1 %6315 }
 0x364   : > { %v4641_v0 = vrot.slane %v3564_v15, 5  ;;  %v1888_v26 = vrot.slane %v14679_v1, 4  ;;  %v2234_v11 = vsel %vm11915_vm13, %v1887_v53, %v2233_v59  ;;  %v1870_v3 = vor.u32 %v1868_v44, %v14694_v34  ;;  %v3145_v19 = vld [vmem:[#allocation2 + $0x138] sm:$0xe] }
 0x365   : > { %v10413_v33 = vpack.c.bf16 %v976_v42, %v976_v42  ;;  %2235 = vst [vmem:[#allocation2 + $0x180] sm:$0xf] %v2234_v11  ;;  %v2952_v55 = vsel %vm11813_vm11, %v2947_v52, %v2951_v58  ;;  %v4639_v23 = vsel %vm11781_vm8, %v9868_v24, %v4638_v38  ;;  %v4640_v35 = vrot.slane %v4638_v38, 4  ;;  %v16628_v24 = vld [vmem:[#allocation80_spill] sm:$0xff]  ;;  %v14725_v42 = vpop.permute.xlu0 %7113  ;;  %v16629_v38 = vld [vmem:[#allocation57_spill] sm:$0xff] }
 0x366   : > { %v7694_v15 = vsel %vm7415_vm2, %v14640_v45, %v14608_v61  ;;  %v2227_v1 = vsel %vm11915_vm13, %v1870_v3, %v2226_v41  ;;  %v9964_v59 = vcombine.low %v2942_v36, %v2952_v55  ;;  %v890_v53 = vadd.f32 %v14411_v40, %v16628_v24  ;;  %v4741_v11 = vld [vmem:[#allocation2 + $0x150] sm:$0xf]  ;;  %v14754_v24 = vld [vmem:[#allocation2 + $0x160] sm:$0xf] }
 0x367   : > { %v1890_v37 = vshrl.u32 %v10413_v33, 16  ;;  %v1893_v44 = vshll.u32 %v10413_v33, 16  ;;  %8103 = vmatprep.mubr.bf16.mxu1 %v7694_v15  ;;  %2228 = vst [vmem:[#allocation2 + $0x174] sm:$0xf] %v2227_v1  ;;  %v4642_v58 = vsel %vm11781_vm8, %v4640_v35, %v4641_v0  ;;  %v1215_v61 = vsel %vm11762_vm5, 0, %v1214_v8 }
 0x368   : > { %v7366_v45 = vsel %vm7350_vm1, %v14647_v10, %v14355_v49  ;;  %6181 = vrot.lane.b32.xlu1 %v9964_v59, %s11516_s12  ;;  %v10092_v36 = vcombine.low %v4639_v23, %v4642_v58  ;;  %1216 = vst [vmem:[#allocation2 + $0x17c] sm:$0x1] %v1215_v61  ;;  %v16630_v0 = vshll.u32 %v16629_v38, 16  ;;  %v974_v33 = vmax.f32 %v890_v53, 0.0  ;;  %v14749_v58 = vpop.permute.xlu1 %6511  ;;  %v14758_v53 = vld [vmem:[#allocation2 + $0xac] sm:$0xf] }
 0x369   : > { %v1892_v41 = vrot.slane %v1890_v37, 7  ;;  %v7438_v52 = vsel %vm7415_vm2, %v7366_v45, %v14182_v13  ;;  %v2237_v3 = vld [vmem:[#allocation2 + $0x188] sm:$0x1]  ;;  %v16631_v8 = vshll.u32 %v14537_v5, 16  ;;  %v7625_v10 = vsel %vm7350_vm1, %v7538_v21, %v14330_v47 }
 0x36a   : > { %v3848_v40 = vrot.slane %v16630_v0, 5  ;;  %8104 = vmatmul.mubr.bf16.gmra.mrb[60].mxu1 %v7438_v52  ;;  %v9836_v55 = vrot.slane %v3145_v19, 9  ;;  %6789 = vrot.lane.b32.xlu0 %v10092_v36, %s11516_s12  ;;  %v10411_v1 = vpack.c.bf16 %v974_v33, %v974_v33  ;;  %v7697_v59 = vsel %vm7415_vm2, %v7625_v10, %v14547_v63  ;;  %v11286_v33 = vld [vmem:[#allocation2 + $0x64] sm:$0xf] }
 0x36b   : > { %v3858_v49 = vrot.slane %v16631_v8, 5  ;;  %v1895_v35 = vor.u32 %v1893_v44, %v1892_v41  ;;  %v1897_v23 = vrot.slane %v1892_v41, 4  ;;  %v3422_v5 = vrot.slane %v14654_v56, 5  ;;  %8111 = vmatprep.mubr.bf16.mxu1 %v7697_v59  ;;  %v11287_v8 = vld [vmem:[#allocation2 + $0x60] sm:$0xf] }
 0x36c   : > { %v3849_v13 = vsel %vm11813_vm11, %v14246_v18, %v3848_v40  ;;  %v3853_v15 = vor.u32 %v14231_v16, %v3848_v40  ;;  %v3425_v37 = vrot.slane %v14664_v4, 5  ;;  %v5366_v19 = vshrl.u32 %v4741_v11, 16  ;;  %v5582_v18 = vld [vmem:[#allocation2 + $0x15c] sm:$0xe] }
 0x36d   : > { %v1896_v47 = vsel %vm11949_vm14, %v1888_v26, %v1895_v35  ;;  %v2238_v21 = vsel %vm11748_vm3, %v1897_v23, %v2237_v3  ;;  %v1873_v16 = vshrl.u32 %v10411_v1, 16  ;;  %v1876_v63 = vshll.u32 %v10411_v1, 16  ;;  %v14756_v26 = vpop.permute.xlu0 %6955  ;;  %v14769_v3 = vld [vmem:[#allocation2 + $0x164] sm:$0x1] }
 0x36e   : > { %v3854_v44 = vrot.slane %v3853_v15, 4  ;;  %2236 = vst.msk [vmem:[#allocation2 + $0x184] sm:$0xf] %vm1013_vm0, %v1896_v47  ;;  %2239 = vst [vmem:[#allocation2 + $0x188] sm:$0x1] %v2238_v21  ;;  %v3423_v56 = vsel %vm11781_vm8, %v9836_v55, %v3422_v5  ;;  %v3424_v4 = vrot.slane %v3422_v5, 4  ;;  %v10124_v36 = vcombine.low %v4741_v11, %v14578_v20  ;;  %v14779_v21 = vpop.permute.xlu1 %6157 }
 0x36f   : > { %v3898_v61 = vshrl.u32 %v14758_v53, 16  ;;  %v5369_v41 = vshll.u32 %v4741_v11, 16  ;;  %v1871_v52 = vrot.slane %v14694_v34, 4  ;;  %v1875_v38 = vrot.slane %v1873_v16, 7  ;;  %v2230_v55 = vld [vmem:[#allocation2 + $0x17c] sm:$0x1] }
 0x370   : > { %v3859_v45 = vsel %vm11813_vm11, %v3854_v44, %v3858_v49  ;;  %v3426_v40 = vsel %vm11781_vm8, %v3424_v4, %v3425_v37  ;;  %v9916_v10 = vcombine.low %v11287_v8, %v11286_v33  ;;  %6981 = vrot.lane.b32.xlu0 %v10124_v36, %s11515_s21  ;;  %v9901_v49 = vrot.slane %v5582_v18, 9  ;;  %v5583_v36 = vld [vmem:[#allocation2 + $0x168] sm:$0xe] }
 0x371   : > { %v14765_v0 = vcombine.low %v3849_v13, %v3859_v45  ;;  %v9996_v35 = vcombine.low %v3423_v56, %v3426_v40  ;;  %v5862_v11 = vrot.slane %v14754_v24, 5  ;;  %v1878_v23 = vor.u32 %v1876_v63, %v1875_v38  ;;  %v14788_v63 = vpop.permute.xlu0 %7111 }
 0x372   : > { %v1880_v34 = vrot.slane %v1875_v38, 4  ;;  %v5368_v15 = vrot.slane %v5366_v19, 4  ;;  %v5371_v13 = vrot.slane %v5369_v41, 5  ;;  %v5865_v5 = vrot.slane %v14769_v3, 5  ;;  %v3524_v41 = vld [vmem:[#allocation2 + $0x144] sm:$0xf] }
 0x373   : > { %6341 = vrot.lane.b32.xlu1 %v9996_v35, %s11515_s21  ;;  %v5863_v1 = vsel %vm11781_vm8, %v9901_v49, %v5862_v11  ;;  %v5864_v59 = vrot.slane %v5862_v11, 4  ;;  %v16632_v37 = vshll.u32 %v14320_v14, 16  ;;  %v7280_v18 = vsel %vm7253_vm15, %v9916_v10, %v14425_v31  ;;  %v14808_v35 = vld [vmem:[#allocation2 + $0x170] sm:$0x1] }
 0x374   : > { %v1879_v19 = vsel %vm11949_vm14, %v1871_v52, %v1878_v23  ;;  %v2231_v16 = vsel %vm11748_vm3, %v1880_v34, %v2230_v55  ;;  %v16633_v4 = vshll.u32 %v14615_v6, 16  ;;  %v16634_v52 = vshll.u32 %v14584_v54, 16 }
 0x375   : > { %v3824_v47 = vrot.slane %v16632_v37, 5  ;;  %2229 = vst.msk [vmem:[#allocation2 + $0x178] sm:$0xf] %vm1013_vm0, %v1879_v19  ;;  %2232 = vst [vmem:[#allocation2 + $0x17c] sm:$0x1] %v2231_v16  ;;  %v5866_v14 = vsel %vm11781_vm8, %v5864_v59, %v5865_v5  ;;  %v10028_v33 = vcombine.low %v3524_v41, %v14696_v7  ;;  %v5372_v8 = vor.u32 %v5371_v13, %v5368_v15 }
 0x376   : > { %v3834_v45 = vrot.slane %v16633_v4, 5  ;;  %v14801_v38 = vrot.slane %v16634_v52, 5  ;;  %v10189_v40 = vcombine.low %v5863_v1, %v5866_v14  ;;  %v14804_v10 = vrot.slane %v3898_v61, 4  ;;  %v2304_v61 = vld [vmem:[#allocation2 + $0x144] sm:$0xf]  ;;  %v14823_v1 = vpop.permute.xlu1 %6509 }
 0x377   : > { %v3825_v56 = vsel %vm11813_vm11, %v14563_v29, %v3824_v47  ;;  %v3829_v31 = vor.u32 %v14560_v30, %v3824_v47  ;;  %v5375_v29 = vshll.u32 %v14578_v20, 16  ;;  %v5379_v30 = vshrl.u32 %v14578_v20, 16  ;;  %6533 = vrot.lane.b32.xlu1 %v10028_v33, %s11517_s9  ;;  %v14819_v15 = vld [vmem:[#allocation2 + $0x16c] sm:$0xf]  ;;  %v14821_v13 = vld [vmem:[#allocation2 + $0x148] sm:$0xf]  ;;  %v14831_v47 = vpop.permute.xlu0 %6767 }
 0x378   : > { %10916 = vmatmul.mubr.msk.bf16.gmra.mrb[80].mxu0 %vm7253_vm15, %v10189_v40  ;;  %v5373_v54 = vrot.slane %v5372_v8, 4  ;;  %v5385_v6 = vshll.u32 %v14567_v48, 16  ;;  %v7368_v7 = vsel %vm7350_vm1, %v7280_v18, %v14324_v27  ;;  %v9902_v49 = vrot.slane %v5583_v36, 9  ;;  %v4365_v37 = vld [vmem:[#allocation2 + $0x150] sm:$0xe] }
 0x379   : > { %v3830_v55 = vrot.slane %v3829_v31, 4  ;;  %v5377_v23 = vrot.slane %v5375_v29, 5  ;;  %v5381_v34 = vrot.slane %v5379_v30, 4  ;;  %v7441_v20 = vsel %vm7415_vm2, %v7368_v7, %v14442_v43  ;;  %v2343_v19 = vld [vmem:[#allocation2 + $0x14c] sm:$0x1] }
 0x37a   : > { %v3891_v48 = vor.u32 %v14801_v38, %v14620_v50  ;;  %8112 = vmatmul.mubr.bf16.gmra.mrb[64].mxu1 %v7441_v20  ;;  %v5869_v59 = vrot.slane %v14819_v15, 5  ;;  %v5872_v5 = vrot.slane %v14808_v35, 5  ;;  %v5387_v18 = vrot.slane %v5385_v6, 5  ;;  %v3565_v38 = vld [vmem:[#allocation2 + $0x158] sm:$0x1] }
 0x37b   : > { %v3835_v11 = vsel %vm11813_vm11, %v3830_v55, %v3834_v45  ;;  %v5382_v43 = vor.u32 %v5381_v34, %v5377_v23  ;;  %v2954_v16 = vshrl.u32 %v2304_v61, 16  ;;  %v2957_v14 = vshll.u32 %v2304_v61, 16  ;;  %v3146_v29 = vld [vmem:[#allocation2 + $0x144] sm:$0xe]  ;;  %v14845_v61 = vld [vmem:[#allocation2 + $0x15c] sm:$0xf] }
 0x37c   : > { %v14827_v27 = vcombine.low %v3825_v56, %v3835_v11  ;;  %v5378_v31 = vsel %vm11813_vm11, %v5373_v54, %v5377_v23  ;;  %v5870_v50 = vsel %vm11781_vm8, %v9902_v49, %v5869_v59  ;;  %v5871_v56 = vrot.slane %v5869_v59, 4  ;;  %v14843_v49 = vld [vmem:[#allocation2 + $0x154] sm:$0xf]  ;;  %v14847_v11 = vpop.permute.xlu1 %6155 }
 0x37d   : > { %v2963_v4 = vshll.u32 %v14821_v13, 16  ;;  %v5383_v45 = vrot.slane %v5382_v43, 4  ;;  %v2956_v41 = vrot.slane %v2954_v16, 4  ;;  %v2959_v36 = vrot.slane %v2957_v14, 5 }
 0x37e   : > { %v2967_v52 = vshrl.u32 %v14821_v13, 16  ;;  %v5873_v40 = vsel %vm11781_vm8, %v5871_v56, %v5872_v5  ;;  %v2973_v8 = vshll.u32 %v2343_v19, 16  ;;  %v9869_v55 = vrot.slane %v4365_v37, 9  ;;  %v14850_v5 = vpop.permute.xlu0 %6765 }
 0x37f   : > { %v2965_v33 = vrot.slane %v2963_v4, 5  ;;  %v5388_v30 = vsel %vm11813_vm11, %v5383_v45, %v5387_v18  ;;  %v10190_v54 = vcombine.low %v5870_v50, %v5873_v40  ;;  %v2960_v6 = vor.u32 %v2959_v36, %v2956_v41 }
 0x380   : > { %v2969_v7 = vrot.slane %v2967_v52, 4  ;;  %v10156_v23 = vcombine.low %v5378_v31, %v5388_v30  ;;  %v2975_v34 = vrot.slane %v2973_v8, 5  ;;  %v4645_v20 = vrot.slane %v14843_v49, 5  ;;  %v14862_v52 = vld [vmem:[#allocation2 + $0x9c] sm:$0xf] }
 0x381   : > { %v4648_v59 = vrot.slane %v3565_v38, 5  ;;  %10919 = vmatprep.mubr.msk.bf16.mxu0 %vm7253_vm15, %v10190_v54  ;;  %v2961_v37 = vrot.slane %v2960_v6, 4  ;;  %v9837_v18 = vrot.slane %v3146_v29, 9  ;;  %v3429_v16 = vrot.slane %v14821_v13, 5  ;;  %v14873_v54 = vpop.permute.xlu1 %6321  ;;  %v14875_v6 = vpop.f32.mrb[32].mxu1 }
 0x382   : > { %v2970_v43 = vor.u32 %v2969_v7, %v2965_v33  ;;  %7141 = vrot.lane.b32.xlu0 %v10156_v23, %s11517_s9  ;;  %v4646_v14 = vsel %vm11781_vm8, %v9869_v55, %v4645_v20  ;;  %v4647_v50 = vrot.slane %v4645_v20, 4  ;;  %v3432_v31 = vrot.slane %v2343_v19, 5  ;;  %v11289_v19 = vld [vmem:[#allocation2 + $0x70] sm:$0xf]  ;;  %v11290_v55 = vld [vmem:[#allocation2 + $0x6c] sm:$0xf] }
 0x383   : > { %v5390_v56 = vshrl.u32 %v14845_v61, 16  ;;  %v14858_v4 = vrot.slane %v3891_v48, 4  ;;  %v2966_v45 = vsel %vm11813_vm11, %v2961_v37, %v2965_v33  ;;  %v3431_v36 = vrot.slane %v3429_v16, 4  ;;  %16635 = vst [vmem:[#allocation45_spill] sm:$0xff] %v14873_v54  ;;  %16636 = vst [vmem:[#allocation67_spill] sm:$0xff] %v14875_v6 }
 0x384   : > { %v2971_v41 = vrot.slane %v2970_v43, 4  ;;  %v4649_v38 = vsel %vm11781_vm8, %v4647_v50, %v4648_v59  ;;  %v5393_v8 = vshll.u32 %v14845_v61, 16  ;;  %v7541_v48 = vsel %vm7253_vm15, %v14522_v25, %v14446_v39  ;;  %v14881_v39 = vpop.permute.xlu0 %6961  ;;  %v8051_v25 = vpop.f32.mrb[33].mxu1 }
 0x385   : > { %v5392_v40 = vrot.slane %v5390_v56, 4  ;;  %v9917_v29 = vcombine.low %v11290_v55, %v11289_v19  ;;  %v10093_v30 = vcombine.low %v4646_v14, %v4649_v38  ;;  %v3430_v23 = vsel %vm11781_vm8, %v9837_v18, %v3429_v16  ;;  %v1125_v18 = vld [vmem:[#allocation2 + $0x198] sm:$0x1]  ;;  %v14891_v16 = vpop.f32.mrb[34].mxu1  ;;  %v14904_v19 = vld [vmem:[%s16323_s2] ss:$0 sm:$0xff] }
 0x386   : > { %v2976_v33 = vsel %vm11813_vm11, %v2971_v41, %v2975_v34  ;;  %v3433_v20 = vsel %vm11781_vm8, %v3431_v36, %v3432_v31  ;;  %v5395_v59 = vrot.slane %v5393_v8, 5  ;;  %v14886_v34 = vsel %vm7350_vm1, %v7541_v48, %v14591_v12  ;;  %16637 = vst [vmem:[#allocation66_spill] sm:$0xff] %v14891_v16  ;;  %v3526_v12 = vld [vmem:[#allocation2 + $0x150] sm:$0xf]  ;;  %v1122_v41 = vld [vmem:[#allocation2 + $0x18c] sm:$0x1] }
 0x387   : > { %v9965_v7 = vcombine.low %v2966_v45, %v2976_v33  ;;  %6791 = vrot.lane.b32.xlu0 %v10093_v30, %s11516_s12  ;;  %v5399_v43 = vshll.u32 %v14754_v24, 16  ;;  %v5403_v14 = vshrl.u32 %v14754_v24, 16  ;;  %v14895_v50 = vsel %vm7253_vm15, %v9917_v29, %v14666_v51  ;;  %v8054_v36 = vpop.f32.mrb[35].mxu1  ;;  %v16638_v51 = vld [vmem:[#allocation93_spill] sm:$0xff]  ;;  %v14918_v25 = vld [vmem:[#allocation2 + $0x158] sm:$0x1] }
 0x388   : > { %v10125_v31 = vcombine.low %v14845_v61, %v14754_v24  ;;  %v5396_v56 = vor.u32 %v5395_v59, %v5392_v40  ;;  %v5409_v45 = vshll.u32 %v14769_v3, 16  ;;  %v9997_v38 = vcombine.low %v3430_v23, %v3433_v20  ;;  %v2306_v29 = vld [vmem:[#allocation2 + $0x150] sm:$0xf]  ;;  %v14908_v33 = vld [vmem:[#allocation2 + $0x154] sm:$0xf]  ;;  %v16639_v23 = vld [vmem:[#allocation95_spill] sm:$0xff] }
 0x389   : > { %6183 = vrot.lane.b32.xlu1 %v9965_v7, %s11516_s12  ;;  %v5401_v8 = vrot.slane %v5399_v43, 5  ;;  %v5405_v48 = vrot.slane %v5403_v14, 4  ;;  %v911_v55 = vadd.f32 %v14904_v19, %v16638_v51  ;;  %v10029_v24 = vcombine.low %v3526_v12, %v14843_v49  ;;  %v14920_v43 = vpop.permute.xlu1 %6319  ;;  %v14926_v12 = vpop.permute.xlu0 %7117  ;;  %v3566_v16 = vld [vmem:[#allocation2 + $0x164] sm:$0x1] }
 0x38a   : > { %v5397_v61 = vrot.slane %v5396_v56, 4  ;;  %v5411_v3 = vrot.slane %v5409_v45, 5  ;;  %v1126_v40 = vsel %vm11748_vm3, 0, %v1125_v18  ;;  %v903_v20 = vadd.f32 %v14904_v19, %v16639_v23  ;;  %v1223_v23 = vld [vmem:[#allocation2 + $0x1a0] sm:$0x1] }
 0x38b   : > { %6983 = vrot.lane.b32.xlu0 %v10125_v31, %s11515_s21  ;;  %v5406_v30 = vor.u32 %v5405_v48, %v5401_v8  ;;  %v979_v7 = vmax.f32 %v911_v55, 0.0  ;;  %1127 = vst [vmem:[#allocation2 + $0x198] sm:$0x1] %v1126_v40  ;;  %v1123_v59 = vsel %vm11748_vm3, 0, %v1122_v41  ;;  %v2978_v14 = vshrl.u32 %v2306_v29, 16 }
 0x38c   : > { %v5402_v49 = vsel %vm11813_vm11, %v5397_v61, %v5401_v8  ;;  %1124 = vst [vmem:[#allocation2 + $0x18c] sm:$0x1] %v1123_v59  ;;  %v2981_v18 = vshll.u32 %v2306_v29, 16  ;;  %v2987_v31 = vshll.u32 %v14908_v33, 16  ;;  %v977_v36 = vmax.f32 %v903_v20, 0.0 }
 0x38d   : > { %6343 = vrot.lane.b32.xlu1 %v9997_v38, %s11515_s21  ;;  %v5407_v56 = vrot.slane %v5406_v30, 4  ;;  %v10416_v45 = vpack.c.bf16 %v979_v7, %v979_v7  ;;  %v2991_v41 = vshrl.u32 %v14908_v33, 16  ;;  %v2980_v48 = vrot.slane %v2978_v14, 4  ;;  %v4366_v59 = vld [vmem:[#allocation2 + $0x15c] sm:$0xe] }
 0x38e   : > { %v2983_v51 = vrot.slane %v2981_v18, 5  ;;  %v2989_v55 = vrot.slane %v2987_v31, 5  ;;  %v2997_v38 = vshll.u32 %v14918_v25, 16  ;;  %v10414_v29 = vpack.c.bf16 %v977_v36, %v977_v36  ;;  %v16640_v31 = vld [vmem:[#allocation97_spill] sm:$0xff] }
 0x38f   : > { %v5412_v8 = vsel %vm11813_vm11, %v5407_v56, %v5411_v3  ;;  %v1916_v61 = vshrl.u32 %v10416_v45, 16  ;;  %v1919_v40 = vshll.u32 %v10416_v45, 16  ;;  %v2993_v20 = vrot.slane %v2991_v41, 4  ;;  %v14937_v3 = vpop.permute.xlu1 %6515  ;;  %v14942_v41 = vpop.permute.xlu0 %6959 }
 0x390   : > { %v10157_v30 = vcombine.low %v5402_v49, %v5412_v8  ;;  %v2984_v7 = vor.u32 %v2983_v51, %v2980_v48  ;;  %v2999_v37 = vrot.slane %v2997_v38, 5  ;;  %v1899_v14 = vshrl.u32 %v10414_v29, 16  ;;  %16641 = vst [vmem:[#allocation46_spill] sm:$0xff] %v14937_v3 }
 0x391   : > { %6535 = vrot.lane.b32.xlu1 %v10029_v24, %s11517_s9  ;;  %v14933_v13 = vrot.slane %v1916_v61, 7  ;;  %v1902_v18 = vshll.u32 %v10414_v29, 16  ;;  %v914_v44 = vadd.f32 %v14904_v19, %v16640_v31  ;;  %v2994_v36 = vor.u32 %v2993_v20, %v2989_v55  ;;  %v14950_v61 = vld [vmem:[#allocation2 + $0x160] sm:$0xf] }
 0x392   : > { %7143 = vrot.lane.b32.xlu0 %v10157_v30, %s11517_s9  ;;  %v2247_v56 = vld [vmem:[#allocation2 + $0x198] sm:$0xf]  ;;  %v2985_v45 = vrot.slane %v2984_v7, 4  ;;  %v1224_v24 = vsel %vm11762_vm5, 0, %v1223_v23  ;;  %v9870_v49 = vrot.slane %v4366_v59, 9  ;;  %v7544_v48 = vsel %vm7253_vm15, %v14827_v27, %v14672_v28 }
 0x393   : > { %v1921_v51 = vor.u32 %v1919_v40, %v14933_v13  ;;  %v14948_v38 = vrot.slane %v1899_v14, 7  ;;  %v980_v8 = vmax.f32 %v914_v44, 0.0  ;;  %1225 = vst [vmem:[#allocation2 + $0x1a0] sm:$0x1] %v1224_v24  ;;  %v2240_v29 = vld [vmem:[#allocation2 + $0x18c] sm:$0xf]  ;;  %v14968_v24 = vpop.permute.xlu1 %6161 }
 0x394   : > { %v2990_v30 = vsel %vm11813_vm11, %v2985_v45, %v2989_v55  ;;  %v2995_v23 = vrot.slane %v2994_v36, 4  ;;  %v4652_v59 = vrot.slane %v14950_v61, 5  ;;  %v4655_v7 = vrot.slane %v3566_v16, 5  ;;  %v1220_v44 = vld [vmem:[#allocation2 + $0x194] sm:$0x1] }
 0x395   : > { %v1922_v20 = vrot.slane %v14933_v13, 4  ;;  %v2248_v28 = vsel %vm11915_vm13, %v1921_v51, %v2247_v56  ;;  %v1904_v27 = vor.u32 %v1902_v18, %v14948_v38  ;;  %v10417_v40 = vpack.c.bf16 %v980_v8, %v980_v8  ;;  %v3147_v36 = vld [vmem:[#allocation2 + $0x150] sm:$0xe]  ;;  %v14979_v8 = vpop.permute.xlu0 %7115 }
 0x396   : > { %2249 = vst [vmem:[#allocation2 + $0x198] sm:$0xf] %v2248_v28  ;;  %v3000_v14 = vsel %vm11813_vm11, %v2995_v23, %v2999_v37  ;;  %v4653_v55 = vsel %vm11781_vm8, %v9870_v49, %v4652_v59  ;;  %v4654_v31 = vrot.slane %v4652_v59, 4  ;;  %v7700_v16 = vsel %vm7415_vm2, %v14886_v34, %v14788_v63  ;;  %v16642_v49 = vld [vmem:[#allocation98_spill] sm:$0xff]  ;;  %v16643_v34 = vld [vmem:[#allocation39_spill] sm:$0xff] }
 0x397   : > { %v2241_v13 = vsel %vm11915_vm13, %v1904_v27, %v2240_v29  ;;  %v9966_v56 = vcombine.low %v2990_v30, %v3000_v14  ;;  %v1924_v45 = vshrl.u32 %v10417_v40, 16  ;;  %v1927_v18 = vshll.u32 %v10417_v40, 16  ;;  %8119 = vmatprep.mubr.bf16.mxu1 %v7700_v16  ;;  %v16644_v23 = vld [vmem:[#allocation99_spill] sm:$0xff]  ;;  %v11292_v27 = vld [vmem:[#allocation2 + $0xb0] sm:$0x1] }
 0x398   : > { %2242 = vst [vmem:[#allocation2 + $0x18c] sm:$0xf] %v2241_v13  ;;  %v4656_v37 = vsel %vm11781_vm8, %v4654_v31, %v4655_v7  ;;  %v906_v51 = vadd.f32 %v14904_v19, %v16642_v49  ;;  %v1221_v63 = vsel %vm11762_vm5, 0, %v1220_v44  ;;  %v7370_v22 = vsel %vm7350_vm1, %v14895_v50, %v16643_v34  ;;  %v16646_v44 = vld [vmem:[#allocation72_spill] sm:$0xff]  ;;  %v5584_v34 = vld [vmem:[#allocation2 + $0x174] sm:$0xe] }
 0x399   : > { %6185 = vrot.lane.b32.xlu1 %v9966_v56, %s11516_s12  ;;  %v1926_v29 = vrot.slane %v1924_v45, 7  ;;  %v10094_v30 = vcombine.low %v4653_v55, %v4656_v37  ;;  %1222 = vst [vmem:[#allocation2 + $0x194] sm:$0x1] %v1221_v63  ;;  %v7444_v59 = vsel %vm7415_vm2, %v7370_v22, %v16644_v23  ;;  %v16645_v7 = vshll.u32 %v14758_v53, 16  ;;  %v4745_v49 = vld [vmem:[#allocation2 + $0x168] sm:$0xf] }
 0x39a   : > { %v2251_v28 = vld [vmem:[#allocation2 + $0x1a0] sm:$0x1]  ;;  %v978_v2 = vmax.f32 %v906_v51, 0.0  ;;  %8120 = vmatmul.mubr.bf16.gmra.mrb[68].mxu1 %v7444_v59  ;;  %v3904_v40 = vshll.u32 %v11292_v27, 16  ;;  %v7629_v50 = vsel %vm7350_vm1, %v7544_v48, %v16646_v44  ;;  %v9838_v14 = vrot.slane %v3147_v36, 9  ;;  %v15001_v51 = vpop.permute.xlu1 %6513 }
 0x39b   : > { %v3896_v19 = vrot.slane %v16645_v7, 5  ;;  %v1929_v31 = vor.u32 %v1927_v18, %v1926_v29  ;;  %v1931_v16 = vrot.slane %v1926_v29, 4  ;;  %6793 = vrot.lane.b32.xlu0 %v10094_v30, %s11516_s12  ;;  %v7703_v45 = vsel %vm7415_vm2, %v7629_v50, %v14725_v42  ;;  %16647 = vst [vmem:[#allocation73_spill] sm:$0xff] %v15001_v51 }
 0x39c   : > { %v10415_v13 = vpack.c.bf16 %v978_v2, %v978_v2  ;;  %v3906_v56 = vrot.slane %v3904_v40, 5  ;;  %v3436_v37 = vrot.slane %v14908_v33, 5  ;;  %8127 = vmatprep.mubr.bf16.mxu1 %v7703_v45  ;;  %v5414_v29 = vshrl.u32 %v4745_v49, 16  ;;  %v15018_v2 = vld [vmem:[#allocation2 + $0x17c] sm:$0x1] }
 0x39d   : > { %v3897_v55 = vsel %vm11813_vm11, %v14858_v4, %v3896_v19  ;;  %v3901_v53 = vor.u32 %v14804_v10, %v3896_v19  ;;  %v1930_v48 = vsel %vm11949_vm14, %v1922_v20, %v1929_v31  ;;  %v2252_v18 = vsel %vm11748_vm3, %v1931_v16, %v2251_v28  ;;  %v15006_v20 = vpop.permute.xlu0 %6771  ;;  %v15016_v28 = vld [vmem:[#allocation2 + $0x178] sm:$0xf] }
 0x39e   : > { %v3439_v4 = vrot.slane %v14918_v25, 5  ;;  %2250 = vst.msk [vmem:[#allocation2 + $0x19c] sm:$0xf] %vm1013_vm0, %v1930_v48  ;;  %2253 = vst [vmem:[#allocation2 + $0x1a0] sm:$0x1] %v2252_v18  ;;  %v1907_v10 = vshrl.u32 %v10415_v13, 16  ;;  %v3437_v33 = vsel %vm11781_vm8, %v9838_v14, %v3436_v37  ;;  %v10126_v25 = vcombine.low %v4745_v49, %v14819_v15 }
 0x39f   : > { %v3902_v36 = vrot.slane %v3901_v53, 4  ;;  %v1910_v42 = vshll.u32 %v10415_v13, 16  ;;  %v3438_v63 = vrot.slane %v3436_v37, 4  ;;  %v5417_v30 = vshll.u32 %v4745_v49, 16  ;;  %v15028_v37 = vpop.permute.xlu1 %6159  ;;  %v11293_v49 = vld [vmem:[#allocation2 + $0x7c] sm:$0xf] }
 0x3a0   : > { %v1905_v23 = vrot.slane %v14948_v38, 4  ;;  %v1909_v59 = vrot.slane %v1907_v10, 7  ;;  %v2244_v27 = vld [vmem:[#allocation2 + $0x194] sm:$0x1]  ;;  %6985 = vrot.lane.b32.xlu0 %v10126_v25, %s11515_s21  ;;  %v9903_v44 = vrot.slane %v5584_v34, 9  ;;  %v16648_v50 = vshrl.u32 %v14862_v52, 16 }
 0x3a1   : > { %v3907_v22 = vsel %vm11813_vm11, %v3902_v36, %v3906_v56  ;;  %v3440_v19 = vsel %vm11781_vm8, %v3438_v63, %v3439_v4  ;;  %v16649_v38 = vshll.u32 %v14862_v52, 16  ;;  %v5416_v53 = vrot.slane %v5414_v29, 4  ;;  %v11294_v48 = vld [vmem:[#allocation2 + $0x78] sm:$0xf]  ;;  %v11295_v4 = vld [vmem:[#allocation2 + $0xa0] sm:$0xf] }
 0x3a2   : > { %v15012_v7 = vcombine.low %v3897_v55, %v3907_v22  ;;  %v9998_v40 = vcombine.low %v3437_v33, %v3440_v19  ;;  %v3863_v14 = vrot.slane %v16648_v50, 4  ;;  %v1912_v16 = vor.u32 %v1910_v42, %v1909_v59  ;;  %v15034_v42 = vpop.permute.xlu0 %6769  ;;  %v16650_v22 = vld [vmem:[#allocation43_spill] sm:$0xff] }
 0x3a3   : > { %v3866_v31 = vrot.slane %v16649_v38, 5  ;;  %v1914_v55 = vrot.slane %v1909_v59, 4  ;;  %v5419_v13 = vrot.slane %v5417_v30, 5  ;;  %v5876_v56 = vrot.slane %v15016_v28, 5  ;;  %v3528_v30 = vld [vmem:[#allocation2 + $0x15c] sm:$0xf] }
 0x3a4   : > { %6345 = vrot.lane.b32.xlu1 %v9998_v40, %s11515_s21  ;;  %v5879_v45 = vrot.slane %v15018_v2, 5  ;;  %v9918_v18 = vcombine.low %v11294_v48, %v11293_v49  ;;  %v1913_v36 = vsel %vm11949_vm14, %v1905_v23, %v1912_v16  ;;  %v3870_v10 = vshll.u32 %v11295_v4, 16  ;;  %v16651_v25 = vld [vmem:[#allocation63_spill] sm:$0xff]  ;;  %v15049_v40 = vld [vmem:[#allocation2 + $0x88] sm:$0xf]  ;;  %v16653_v48 = vld [vmem:[#allocation70_spill] sm:$0xff] }
 0x3a5   : > { %v2245_v52 = vsel %vm11748_vm3, %v1914_v55, %v2244_v27  ;;  %2243 = vst.msk [vmem:[#allocation2 + $0x190] sm:$0xf] %vm1013_vm0, %v1913_v36  ;;  %v5877_v33 = vsel %vm11781_vm8, %v9903_v44, %v5876_v56  ;;  %v5878_v63 = vrot.slane %v5876_v56, 4  ;;  %v3874_v34 = vshrl.u32 %v11295_v4, 16  ;;  %v5585_v27 = vld [vmem:[#allocation2 + $0x180] sm:$0xe] }
 0x3a6   : > { %2246 = vst [vmem:[#allocation2 + $0x194] sm:$0x1] %v2245_v52  ;;  %v7286_v29 = vsel %vm7253_vm15, %v9918_v18, %v16650_v22  ;;  %v3867_v57 = vor.u32 %v3866_v31, %v3863_v14  ;;  %v15044_v32 = vsel %vm7253_vm15, %v14765_v0, %v16651_v25  ;;  %v10030_v59 = vcombine.low %v3528_v30, %v14950_v61  ;;  %v15051_v44 = vld [vmem:[#allocation2 + $0x84] sm:$0xf]  ;;  %v15065_v56 = vld [vmem:[#allocation2 + $0x188] sm:$0x1] }
 0x3a7   : > { %v5880_v23 = vsel %vm11781_vm8, %v5878_v63, %v5879_v45  ;;  %v5420_v19 = vor.u32 %v5419_v13, %v5416_v53  ;;  %v15055_v38 = vrot.slane %v3870_v10, 5  ;;  %v11298_v31 = vld [vmem:[#allocation2 + $0xa4] sm:$0x1]  ;;  %v15059_v55 = vrot.slane %v3874_v34, 4  ;;  %v15067_v45 = vpop.permute.xlu1 %6323  ;;  %v2308_v4 = vld [vmem:[#allocation2 + $0x15c] sm:$0xf]  ;;  %v15075_v10 = vpop.permute.xlu0 %7121 }
 0x3a8   : > { %v10191_v14 = vcombine.low %v5877_v33, %v5880_v23  ;;  %v3880_v0 = vshll.u32 %v11298_v31, 16  ;;  %v15057_v16 = vld [vmem:[#allocation2 + $0x184] sm:$0xf]  ;;  %6537 = vrot.lane.b32.xlu1 %v10030_v59, %s11517_s9  ;;  %v5423_v61 = vshll.u32 %v14819_v15, 16  ;;  %v5427_v53 = vshrl.u32 %v14819_v15, 16  ;;  %16652 = vst [vmem:[#allocation75_spill] sm:$0xff] %v15067_v45 }
 0x3a9   : > { %v5433_v13 = vshll.u32 %v14808_v35, 16  ;;  %v15070_v49 = vrot.slane %v3867_v57, 4  ;;  %v7372_v18 = vsel %vm7350_vm1, %v7286_v29, %v16653_v48  ;;  %v9904_v36 = vrot.slane %v5585_v27, 9  ;;  %v16654_v63 = vld [vmem:[#allocation64_spill] sm:$0xff]  ;;  %v15079_v22 = vld [vmem:[#allocation2 + $0x160] sm:$0xf] }
 0x3aa   : > { %10920 = vmatmul.mubr.msk.bf16.gmra.mrb[84].mxu0 %vm7253_vm15, %v10191_v14  ;;  %v5883_v52 = vrot.slane %v15057_v16, 5  ;;  %v5421_v15 = vrot.slane %v5420_v19, 4  ;;  %v5425_v33 = vrot.slane %v5423_v61, 5  ;;  %v5429_v35 = vrot.slane %v5427_v53, 4  ;;  %v2345_v27 = vld [vmem:[#allocation2 + $0x164] sm:$0x1] }
 0x3ab   : > { %v7447_v34 = vsel %vm7415_vm2, %v7372_v18, %v16654_v63  ;;  %v15081_v30 = vrot.slane %v3880_v0, 5  ;;  %v5886_v25 = vrot.slane %v15065_v56, 5  ;;  %v3877_v23 = vor.u32 %v15059_v55, %v15055_v38  ;;  %v4367_v31 = vld [vmem:[#allocation2 + $0x168] sm:$0xe]  ;;  %v3567_v18 = vld [vmem:[#allocation2 + $0x170] sm:$0x1] }
 0x3ac   : > { %8128 = vmatmul.mubr.bf16.gmra.mrb[72].mxu1 %v7447_v34  ;;  %v5884_v29 = vsel %vm11781_vm8, %v9904_v36, %v5883_v52  ;;  %v5885_v57 = vrot.slane %v5883_v52, 4  ;;  %v5430_v59 = vor.u32 %v5429_v35, %v5425_v33  ;;  %v5435_v19 = vrot.slane %v5433_v13, 5  ;;  %v3148_v35 = vld [vmem:[#allocation2 + $0x15c] sm:$0xe]  ;;  %v15094_v13 = vpop.permute.xlu1 %6173 }
 0x3ad   : > { %v3002_v14 = vshrl.u32 %v2308_v4, 16  ;;  %v3005_v0 = vshll.u32 %v2308_v4, 16  ;;  %v3011_v53 = vshll.u32 %v15079_v22, 16  ;;  %v3015_v48 = vshrl.u32 %v15079_v22, 16  ;;  %16655 = vst [vmem:[#allocation77_spill] sm:$0xff] %v15094_v13  ;;  %v15098_v4 = vpop.permute.xlu0 %7119 }
 0x3ae   : > { %v5887_v61 = vsel %vm11781_vm8, %v5885_v57, %v5886_v25  ;;  %v5426_v36 = vsel %vm11813_vm11, %v5421_v15, %v5425_v33  ;;  %v5431_v52 = vrot.slane %v5430_v59, 4  ;;  %v3021_v45 = vshll.u32 %v2345_v27, 16  ;;  %v15096_v57 = vld [vmem:[#allocation2 + $0x16c] sm:$0xf]  ;;  %v4747_v59 = vld [vmem:[#allocation2 + $0x174] sm:$0xf] }
 0x3af   : > { %v10192_v63 = vcombine.low %v5884_v29, %v5887_v61  ;;  %v3004_v55 = vrot.slane %v3002_v14, 4  ;;  %v3007_v34 = vrot.slane %v3005_v0, 5  ;;  %v3013_v50 = vrot.slane %v3011_v53, 5 }
 0x3b0   : > { %v3017_v3 = vrot.slane %v3015_v48, 4  ;;  %v5436_v25 = vsel %vm11813_vm11, %v5431_v52, %v5435_v19  ;;  %v9871_v15 = vrot.slane %v4367_v31, 9  ;;  %v4659_v33 = vrot.slane %v15096_v57, 5 }
 0x3b1   : > { %10923 = vmatprep.mubr.msk.bf16.mxu0 %vm7253_vm15, %v10192_v63  ;;  %v4662_v29 = vrot.slane %v3567_v18, 5  ;;  %v10158_v14 = vcombine.low %v5426_v36, %v5436_v25  ;;  %v3008_v61 = vor.u32 %v3007_v34, %v3004_v55  ;;  %v3023_v53 = vrot.slane %v3021_v45, 5  ;;  %v15112_v36 = vpop.permute.xlu1 %6333  ;;  %v15114_v55 = vpop.f32.mrb[36].mxu1 }
 0x3b2   : > { %v3018_v0 = vor.u32 %v3017_v3, %v3013_v50  ;;  %v4660_v48 = vsel %vm11781_vm8, %v9871_v15, %v4659_v33  ;;  %v4661_v13 = vrot.slane %v4659_v33, 4  ;;  %v9839_v6 = vrot.slane %v3148_v35, 9  ;;  %v15123_v25 = vpop.permute.xlu0 %6781 }
 0x3b3   : > { %v3443_v51 = vrot.slane %v15079_v22, 5  ;;  %7145 = vrot.lane.b32.xlu0 %v10158_v14, %s11517_s9  ;;  %v3009_v19 = vrot.slane %v3008_v61, 4  ;;  %v3446_v31 = vrot.slane %v2345_v27, 5  ;;  %v5438_v63 = vshrl.u32 %v4747_v59, 16  ;;  %v11176_v22 = vld [vmem:[%s16326_s5] sm:$0xff]  }
 0x3b4   : > { %v3019_v52 = vrot.slane %v3018_v0, 4  ;;  %v15108_v54 = vrot.slane %v3877_v23, 4  ;;  %v4663_v18 = vsel %vm11781_vm8, %v4661_v13, %v4662_v29  ;;  %v5441_v45 = vshll.u32 %v4747_v59, 16  ;;  %v8059_v13 = vpop.f32.mrb[37].mxu1  ;;  %10931 = vmatprep.subr.bf16.mxu0 %v11176_v22 }
 0x3b5   : > { %v3445_v3 = vrot.slane %v3443_v51, 4  ;;  %v3014_v35 = vsel %vm11813_vm11, %v3009_v19, %v3013_v50  ;;  %v10095_v27 = vcombine.low %v4660_v48, %v4663_v18  ;;  %v5440_v34 = vrot.slane %v5438_v63, 4  ;;  %v15129_v61 = vpop.f32.mrb[38].mxu1  ;;  %10932 = vmatpush3.bf16.msra.mxu0 %v11176_v22  ;;  %v4368_v22 = vld [vmem:[#allocation2 + $0x174] sm:$0xe] }
 0x3b6   : > { %v3024_v23 = vsel %vm11813_vm11, %v3019_v52, %v3023_v53  ;;  %v3444_v33 = vsel %vm11781_vm8, %v9839_v6, %v3443_v51  ;;  %v5443_v14 = vrot.slane %v5441_v45, 5  ;;  %v7631_v50 = vsel %vm7350_vm1, %v15044_v32, %v14756_v26  ;;  %v2310_v6 = vld [vmem:[#allocation2 + $0x168] sm:$0xf]  ;;  %v8062_v51 = vpop.f32.mrb[39].mxu1 }
 0x3b7   : > { %v9967_v15 = vcombine.low %v3014_v35, %v3024_v23  ;;  %v3447_v29 = vsel %vm11781_vm8, %v3445_v3, %v3446_v31  ;;  %v16656_v0 = vcombine.low %v15051_v44, %v15049_v40  ;;  %6795 = vrot.lane.b32.xlu0 %v10095_v27, %s11516_s12  ;;  %v3873_v48 = vsel %vm11813_vm11, %v15070_v49, %v15055_v38  ;;  %v15147_v40 = vld [vmem:[#allocation2 + $0x16c] sm:$0xf]  ;;  %v3530_v31 = vld [vmem:[#allocation2 + $0x168] sm:$0xf]  ;;  %v15155_v49 = vld [vmem:[#allocation2 + $0x170] sm:$0x1]  ;;  %v15157_v35 = vpop.permute.xlu1 %6525  ;;  %v15162_v27 = vpop.permute.xlu0 %6973 }
 0x3b8   : > { %v5444_v19 = vor.u32 %v5443_v14, %v5440_v34  ;;  %v5447_v26 = vshll.u32 %v15016_v28, 16  ;;  %v5451_v32 = vshrl.u32 %v15016_v28, 16  ;;  %v9999_v44 = vcombine.low %v3444_v33, %v3447_v29  ;;  %v15168_v33 = vld [vmem:[#allocation2 + $0x178] sm:$0xf]  ;;  %v15173_v29 = vpop.f32.mrb[40].mxu1 }
 0x3b9   : > { %v7289_v53 = vsel %vm7253_vm15, %v16656_v0, %v14847_v11  ;;  %6187 = vrot.lane.b32.xlu1 %v9967_v15, %s11516_s12  ;;  %v3883_v11 = vsel %vm11813_vm11, %v15108_v54, %v15081_v30  ;;  %v10127_v52 = vcombine.low %v4747_v59, %v15016_v28  ;;  %v5457_v38 = vshll.u32 %v15018_v2, 16  ;;  %v3568_v59 = vld [vmem:[#allocation2 + $0x17c] sm:$0x1] }
 0x3ba   : > { %v5445_v63 = vrot.slane %v5444_v19, 4  ;;  %v5449_v18 = vrot.slane %v5447_v26, 5  ;;  %v5453_v3 = vrot.slane %v5451_v32, 4  ;;  %v3026_v45 = vshrl.u32 %v2310_v6, 16  ;;  %v8067_v19 = vpop.f32.mrb[41].mxu1 }
 0x3bb   : > { %6987 = vrot.lane.b32.xlu0 %v10127_v52, %s11515_s21  ;;  %v10031_v23 = vcombine.low %v3530_v31, %v15096_v57  ;;  %v5459_v54 = vrot.slane %v5457_v38, 5  ;;  %v3029_v30 = vshll.u32 %v2310_v6, 16  ;;  %v3035_v28 = vshll.u32 %v15147_v40, 16  ;;  %v11177_v57 = vld [vmem:[%s16326_s5 + $0x8] sm:$0xff]   ;;  %v15177_v31 = vpop.f32.mrb[42].mxu1 }
 0x3bc   : > { %v5450_v2 = vsel %vm11813_vm11, %v5445_v63, %v5449_v18  ;;  %v5454_v34 = vor.u32 %v5453_v3, %v5449_v18  ;;  %v3028_v13 = vrot.slane %v3026_v45, 4  ;;  %v3039_v15 = vshrl.u32 %v15147_v40, 16  ;;  %10933 = vmatprep.subr.bf16.mxu0 %v11177_v57  ;;  %v8070_v45 = vpop.f32.mrb[43].mxu1 }
 0x3bd   : > { %6347 = vrot.lane.b32.xlu1 %v9999_v44, %s11515_s21  ;;  %v3031_v14 = vrot.slane %v3029_v30, 5  ;;  %v3037_v0 = vrot.slane %v3035_v28, 5  ;;  %v3045_v6 = vshll.u32 %v15155_v49, 16  ;;  %v9872_v51 = vrot.slane %v4368_v22, 9  ;;  %10934 = vmatpush3.bf16.msra.mxu0 %v11177_v57 }
 0x3be   : > { %v5455_v26 = vrot.slane %v5454_v34, 4  ;;  %v3041_v32 = vrot.slane %v3039_v15, 4  ;;  %v4666_v44 = vrot.slane %v15168_v33, 5  ;;  %v4669_v52 = vrot.slane %v3568_v59, 5  ;;  %v15186_v34 = vpop.permute.xlu1 %6163 }
 0x3bf   : > { %v10048_v38 = vcombine.low %v3873_v48, %v3883_v11  ;;  %v3032_v63 = vor.u32 %v3031_v14, %v3028_v13  ;;  %v7706_v18 = vsel %vm7415_vm2, %v7631_v50, %v14979_v8  ;;  %v7374_v3 = vsel %vm7350_vm1, %v7289_v53, %v14714_v17  ;;  %v16657_v11 = vld [vmem:[#allocation38_spill] sm:$0xff]  ;;  %v15192_v53 = vpop.permute.xlu0 %7133  ;;  %v3149_v14 = vld [vmem:[#allocation2 + $0x168] sm:$0xe] }
 0x3c0   : > { %v5460_v22 = vsel %vm11813_vm11, %v5455_v26, %v5459_v54  ;;  %v3042_v30 = vor.u32 %v3041_v32, %v3037_v0  ;;  %v3047_v28 = vrot.slane %v3045_v6, 5  ;;  %v4668_v59 = vrot.slane %v4666_v44, 4  ;;  %8135 = vmatprep.mubr.bf16.mxu1 %v7706_v18 }
 0x3c1   : > { %6539 = vrot.lane.b32.xlu1 %v10031_v23, %s11517_s9  ;;  %v7550_v48 = vsel %vm7253_vm15, %v10048_v38, %v14850_v5  ;;  %v10159_v8 = vcombine.low %v5450_v2, %v5460_v22  ;;  %v3033_v50 = vrot.slane %v3032_v63, 4  ;;  %v7450_v17 = vsel %vm7415_vm2, %v7374_v3, %v16657_v11  ;;  %v11299_v23 = vld [vmem:[#allocation2 + $0xc0] sm:$0xf]  ;;  %v11300_v5 = vld [vmem:[#allocation2 + $0xb4] sm:$0xf] }
 0x3c2   : > { %v3933_v13 = vshrl.u32 %v11299_v23, 16  ;;  %v3043_v15 = vrot.slane %v3042_v30, 4  ;;  %v4667_v54 = vsel %vm11781_vm8, %v9872_v51, %v4666_v44  ;;  %v4670_v57 = vsel %vm11781_vm8, %v4668_v59, %v4669_v52  ;;  %8136 = vmatmul.mubr.bf16.gmra.mrb[76].mxu1 %v7450_v17  ;;  %v4749_v44 = vld [vmem:[#allocation2 + $0x180] sm:$0xf]  ;;  %v5586_v3 = vld [vmem:[#allocation2 + $0x18c] sm:$0xe] }
 0x3c3   : > { %v3936_v6 = vshll.u32 %v11299_v23, 16  ;;  %v3909_v2 = vshrl.u32 %v11300_v5, 16  ;;  %7147 = vrot.lane.b32.xlu0 %v10159_v8, %s11517_s9  ;;  %v3038_v19 = vsel %vm11813_vm11, %v3033_v50, %v3037_v0  ;;  %v3912_v26 = vshll.u32 %v11300_v5, 16  ;;  %v15211_v30 = vld [vmem:[#allocation2 + $0x190] sm:$0xf]  ;;  %v15223_v50 = vpop.permute.xlu0 %6783 }
 0x3c4   : > { %v3048_v32 = vsel %vm11813_vm11, %v3043_v15, %v3047_v28  ;;  %v7633_v51 = vsel %vm7350_vm1, %v7550_v48, %v14688_v9  ;;  %v10096_v52 = vcombine.low %v4667_v54, %v4670_v57  ;;  %v9840_v18 = vrot.slane %v3149_v14, 9  ;;  %v15213_v28 = vpop.permute.xlu1 %6175  ;;  %v15221_v8 = vld [vmem:[#allocation2 + $0x194] sm:$0x1]  ;;  %v11303_v54 = vld [vmem:[#allocation2 + $0xc4] sm:$0xf] }
 0x3c5   : > { %v9968_v38 = vcombine.low %v3038_v19, %v3048_v32  ;;  %v7709_v63 = vsel %vm7415_vm2, %v7633_v51, %v14926_v12  ;;  %v15207_v45 = vrot.slane %v3933_v13, 4  ;;  %v3450_v0 = vrot.slane %v15147_v40, 5  ;;  %16658 = vst [vmem:[#allocation80_spill] sm:$0xff] %v15213_v28  ;;  %v11301_v23 = vld [vmem:[#allocation2 + $0x94] sm:$0xf] }
 0x3c6   : > { %8143 = vmatprep.mubr.bf16.mxu1 %v7709_v63  ;;  %v3453_v22 = vrot.slane %v15155_v49, 5  ;;  %v15215_v9 = vrot.slane %v3936_v6, 5  ;;  %v15217_v59 = vrot.slane %v3909_v2, 4  ;;  %v5462_v12 = vshrl.u32 %v4749_v44, 16  ;;  %v11302_v13 = vld [vmem:[#allocation2 + $0x90] sm:$0xf] }
 0x3c7   : > { %6189 = vrot.lane.b32.xlu1 %v9968_v38, %s11516_s12  ;;  %6797 = vrot.lane.b32.xlu0 %v10096_v52, %s11516_s12  ;;  %v5465_v48 = vshll.u32 %v4749_v44, 16  ;;  %v3914_v40 = vrot.slane %v3912_v26, 5  ;;  %v3451_v49 = vsel %vm11781_vm8, %v9840_v18, %v3450_v0  ;;  %v3452_v11 = vrot.slane %v3450_v0, 4  ;;  %v11304_v18 = vld [vmem:[#allocation2 + $0xb8] sm:$0xf] }
 0x3c8   : > { %v9905_v17 = vrot.slane %v5586_v3, 9  ;;  %v9920_v15 = vcombine.low %v11302_v13, %v11301_v23  ;;  %v3942_v57 = vshll.u32 %v11303_v54, 16  ;;  %v10128_v14 = vcombine.low %v4749_v44, %v15057_v16 }
 0x3c9   : > { %v5890_v6 = vrot.slane %v15211_v30, 5  ;;  %v3946_v5 = vshrl.u32 %v11303_v54, 16  ;;  %v3454_v2 = vsel %vm11781_vm8, %v3452_v11, %v3453_v22  ;;  %v5464_v19 = vrot.slane %v5462_v12, 4  ;;  %v15240_v22 = vpop.permute.xlu1 %6335 }
 0x3ca   : > { %v5893_v26 = vrot.slane %v15221_v8, 5  ;;  %v10000_v32 = vcombine.low %v3451_v49, %v3454_v2  ;;  %v5467_v51 = vrot.slane %v5465_v48, 5  ;;  %v7292_v44 = vsel %vm7253_vm15, %v9920_v15, %v14779_v21  ;;  %16659 = vst [vmem:[#allocation57_spill] sm:$0xff] %v15240_v22  ;;  %v15255_v11 = vpop.f32.mrb[44].mxu1  ;;  %v5587_v15 = vld [vmem:[#allocation2 + $0x198] sm:$0xe] }
 0x3cb   : > { %6989 = vrot.lane.b32.xlu0 %v10128_v14, %s11515_s21  ;;  %v5891_v38 = vsel %vm11781_vm8, %v9905_v17, %v5890_v6  ;;  %v5892_v52 = vrot.slane %v5890_v6, 4  ;;  %v7553_v63 = vsel %vm7253_vm15, %v15012_v7, %v14831_v47  ;;  %v3918_v3 = vshll.u32 %v11304_v18, 16  ;;  %v3532_v47 = vld [vmem:[#allocation2 + $0x174] sm:$0xf]  ;;  %v15253_v7 = vpop.permute.xlu0 %6975  ;;  %16660 = vst [vmem:[#allocation93_spill] sm:$0xff] %v15255_v11  ;;  %v8075_v54 = vpop.f32.mrb[45].mxu1 }
 0x3cc   : > { %v3922_v0 = vshrl.u32 %v11304_v18, 16  ;;  %v15244_v12 = vsel %vm7350_vm1, %v7553_v63, %v14942_v41  ;;  %v15248_v49 = vrot.slane %v3942_v57, 5  ;;  %6349 = vrot.lane.b32.xlu1 %v10000_v32, %s11515_s21  ;;  %v3915_v23 = vor.u32 %v3914_v40, %v15217_v59  ;;  %v11305_v14 = vld [vmem:[#allocation2 + $0xbc] sm:$0x1]  ;;  %v11306_v32 = vld [vmem:[#allocation2 + $0xa0] sm:$0xf] }
 0x3cd   : > { %v5894_v21 = vsel %vm11781_vm8, %v5892_v52, %v5893_v26  ;;  %v15258_v41 = vrot.slane %v3918_v3, 5  ;;  %v15260_v57 = vrot.slane %v3946_v5, 4  ;;  %v3928_v6 = vshll.u32 %v11305_v14, 16  ;;  %v11307_v52 = vld [vmem:[#allocation2 + $0x9c] sm:$0xf]  ;;  %v15279_v14 = vpop.permute.xlu1 %6527 }
 0x3ce   : > { %v10193_v17 = vcombine.low %v5891_v38, %v5894_v21  ;;  %v3924_v13 = vrot.slane %v3922_v0, 4  ;;  %v10032_v2 = vcombine.low %v3532_v47, %v15168_v33  ;;  %v5468_v26 = vor.u32 %v5467_v51, %v5464_v19  ;;  %v15267_v18 = vld [vmem:[#allocation2 + $0x1a0] sm:$0x1]  ;;  %v2312_v5 = vld [vmem:[#allocation2 + $0x174] sm:$0xf]  ;;  %16661 = vst [vmem:[#allocation95_spill] sm:$0xff] %v15279_v14 }
 0x3cf   : > { %v9921_v63 = vcombine.low %v11307_v52, %v11306_v32  ;;  %v5471_v59 = vshll.u32 %v15057_v16, 16  ;;  %v5475_v40 = vshrl.u32 %v15057_v16, 16  ;;  %v5481_v33 = vshll.u32 %v15065_v56, 16  ;;  %v15273_v0 = vld [vmem:[#allocation2 + $0x178] sm:$0xf] }
 0x3d0   : > { %10924 = vmatmul.mubr.msk.bf16.gmra.mrb[88].mxu0 %vm7253_vm15, %v10193_v17  ;;  %v3925_v38 = vor.u32 %v3924_v13, %v15258_v41  ;;  %6541 = vrot.lane.b32.xlu1 %v10032_v2, %s11517_s9  ;;  %v5469_v3 = vrot.slane %v5468_v26, 4  ;;  %v7376_v19 = vsel %vm7350_vm1, %v7292_v44, %v14683_v62  ;;  %v9906_v51 = vrot.slane %v5587_v15, 9  ;;  %v15277_v13 = vld [vmem:[#allocation2 + $0x19c] sm:$0xf]  ;;  %v4369_v54 = vld [vmem:[#allocation2 + $0x180] sm:$0xe]  ;;  %v15283_v15 = vpop.permute.xlu0 %7135 }
 0x3d1   : > { %v3916_v21 = vrot.slane %v3915_v23, 4  ;;  %v5473_v47 = vrot.slane %v5471_v59, 5  ;;  %v5477_v17 = vrot.slane %v5475_v40, 4  ;;  %v7453_v16 = vsel %vm7415_vm2, %v7376_v19, %v14823_v1  ;;  %v15285_v23 = vpop.f32.mrb[46].mxu1  ;;  %v15287_v1 = vld [vmem:[#allocation2 + $0x17c] sm:$0x1] }
 0x3d2   : > { %v3930_v2 = vrot.slane %v3928_v6, 5  ;;  %8144 = vmatmul.mubr.bf16.gmra.mrb[80].mxu1 %v7453_v16  ;;  %v5897_v56 = vrot.slane %v15277_v13, 5  ;;  %v5900_v62 = vrot.slane %v15267_v18, 5  ;;  %v3050_v44 = vshrl.u32 %v2312_v5, 16  ;;  %16662 = vst [vmem:[#allocation97_spill] sm:$0xff] %v15285_v23  ;;  %v8078_v40 = vpop.f32.mrb[47].mxu1 }
 0x3d3   : > { %v3926_v26 = vrot.slane %v3925_v38, 4  ;;  %v5478_v32 = vor.u32 %v5477_v17, %v5473_v47  ;;  %v5483_v52 = vrot.slane %v5481_v33, 5  ;;  %v3053_v59 = vshll.u32 %v2312_v5, 16  ;;  %v15305_v40 = vpop.permute.xlu1 %6177 }
 0x3d4   : > { %v5474_v6 = vsel %vm11813_vm11, %v5469_v3, %v5473_v47  ;;  %v5898_v19 = vsel %vm11781_vm8, %v9906_v51, %v5897_v56  ;;  %v5899_v16 = vrot.slane %v5897_v56, 4  ;;  %v3052_v48 = vrot.slane %v3050_v44, 4  ;;  %v3569_v47 = vld [vmem:[#allocation2 + $0x188] sm:$0x1]  ;;  %v15310_v28 = vpop.permute.xlu0 %6785 }
 0x3d5   : > { %v5479_v11 = vrot.slane %v5478_v32, 4  ;;  %v3055_v14 = vrot.slane %v3053_v59, 5  ;;  %v3059_v22 = vshll.u32 %v15273_v0, 16  ;;  %v3063_v38 = vshrl.u32 %v15273_v0, 16  ;;  %v15303_v59 = vld [vmem:[#allocation2 + $0x184] sm:$0xf] }
 0x3d6   : > { %v3921_v33 = vsel %vm11813_vm11, %v3916_v21, %v15258_v41  ;;  %v5901_v5 = vsel %vm11781_vm8, %v5899_v16, %v5900_v62  ;;  %v3069_v3 = vshll.u32 %v15287_v1, 16  ;;  %v9873_v17 = vrot.slane %v4369_v54, 9  ;;  %v3150_v16 = vld [vmem:[#allocation2 + $0x174] sm:$0xe] }
 0x3d7   : > { %v5484_v51 = vsel %vm11813_vm11, %v5479_v11, %v5483_v52  ;;  %v10194_v56 = vcombine.low %v5898_v19, %v5901_v5  ;;  %v3056_v44 = vor.u32 %v3055_v14, %v3052_v48  ;;  %v3061_v32 = vrot.slane %v3059_v22, 5  ;;  %v4751_v14 = vld [vmem:[#allocation2 + $0x18c] sm:$0xf] }
 0x3d8   : > { %v3931_v41 = vsel %vm11813_vm11, %v3926_v26, %v3930_v2  ;;  %v10160_v21 = vcombine.low %v5474_v6, %v5484_v51  ;;  %v3065_v23 = vrot.slane %v3063_v38, 4  ;;  %v4673_v62 = vrot.slane %v15303_v59, 5 }
 0x3d9   : > { %v7295_v11 = vsel %vm7253_vm15, %v9921_v63, %v15028_v37  ;;  %10927 = vmatprep.mubr.msk.bf16.mxu0 %vm7253_vm15, %v10194_v56  ;;  %v3057_v22 = vrot.slane %v3056_v44, 4  ;;  %v3071_v48 = vrot.slane %v3069_v3, 5  ;;  %v4676_v54 = vrot.slane %v3569_v47, 5 }
 0x3da   : > { %7149 = vrot.lane.b32.xlu0 %v10160_v21, %s11517_s9  ;;  %v3066_v52 = vor.u32 %v3065_v23, %v3061_v32  ;;  %v4674_v2 = vsel %vm11781_vm8, %v9873_v17, %v4673_v62  ;;  %v4675_v26 = vrot.slane %v4673_v62, 4  ;;  %v3457_v6 = vrot.slane %v15273_v0, 5  ;;  %v11308_v17 = vld [vmem:[#allocation2 + $0xc8] sm:$0x1] }
 0x3db   : > { %v10050_v19 = vcombine.low %v3921_v33, %v3931_v41  ;;  %v3062_v38 = vsel %vm11813_vm11, %v3057_v22, %v3061_v32  ;;  %v9841_v37 = vrot.slane %v3150_v16, 9  ;;  %v3460_v63 = vrot.slane %v15287_v1, 5  ;;  %v15326_v33 = vpop.permute.xlu1 %6337 }
 0x3dc   : > { %v3067_v5 = vrot.slane %v3066_v52, 4  ;;  %v4677_v3 = vsel %vm11781_vm8, %v4675_v26, %v4676_v54  ;;  %v3459_v47 = vrot.slane %v3457_v6, 4  ;;  %v5486_v51 = vshrl.u32 %v4751_v14, 16 }
 0x3dd   : > { %v3949_v23 = vor.u32 %v15260_v57, %v15248_v49  ;;  %v3952_v56 = vshll.u32 %v11308_v17, 16  ;;  %v10097_v44 = vcombine.low %v4674_v2, %v4677_v3  ;;  %v5489_v0 = vshll.u32 %v4751_v14, 16  ;;  %v15337_v57 = vpop.permute.xlu0 %6977  ;;  %v2314_v2 = vld [vmem:[#allocation2 + $0x180] sm:$0xf] }
 0x3de   : > { %v7556_v32 = vsel %vm7253_vm15, %v10050_v19, %v15034_v42  ;;  %v3072_v1 = vsel %vm11813_vm11, %v3067_v5, %v3071_v48  ;;  %v7712_v41 = vsel %vm7415_vm2, %v15244_v12, %v15098_v4  ;;  %v7378_v21 = vsel %vm7350_vm1, %v7295_v11, %v14920_v43  ;;  %v15360_v19 = vld [vmem:[#allocation2 + $0x184] sm:$0xf] }
 0x3df   : > { %v16663_v62 = vor.u32 %v15215_v9, %v15207_v45  ;;  %v9969_v22 = vcombine.low %v3062_v38, %v3072_v1  ;;  %6799 = vrot.lane.b32.xlu0 %v10097_v44, %s11516_s12  ;;  %8151 = vmatprep.mubr.bf16.mxu1 %v7712_v41  ;;  %v7456_v42 = vsel %vm7415_vm2, %v7378_v21, %v14749_v58  ;;  %v5488_v12 = vrot.slane %v5486_v51, 4  ;;  %v15362_v38 = vpop.permute.xlu1 %6529  ;;  %v15378_v41 = vld [vmem:[#allocation2 + $0x188] sm:$0x1] }
 0x3e0   : > { %v3458_v4 = vsel %vm11781_vm8, %v9841_v37, %v3457_v6  ;;  %v3461_v43 = vsel %vm11781_vm8, %v3459_v47, %v3460_v63  ;;  %v5491_v11 = vrot.slane %v5489_v0, 5  ;;  %8152 = vmatmul.mubr.bf16.gmra.mrb[84].mxu1 %v7456_v42  ;;  %v10129_v45 = vcombine.low %v4751_v14, %v15211_v30  ;;  %v15355_v48 = vpop.f32.mrb[48].mxu1  ;;  %v11310_v37 = vld [vmem:[#allocation2 + $0xa8] sm:$0xf] }
 0x3e1   : > { %v15342_v16 = vrot.slane %v16663_v62, 4  ;;  %6191 = vrot.lane.b32.xlu1 %v9969_v22, %s11516_s12  ;;  %v7637_v9 = vsel %vm7350_vm1, %v7556_v32, %v14881_v39  ;;  %v3950_v54 = vrot.slane %v3949_v23, 4  ;;  %v3954_v58 = vrot.slane %v3952_v56, 5  ;;  %v8083_v26 = vpop.f32.mrb[49].mxu1  ;;  %v11309_v39 = vld [vmem:[#allocation2 + $0xac] sm:$0xf]  ;;  %v15371_v47 = vpop.permute.xlu0 %7137 }
 0x3e2   : > { %v7715_v52 = vsel %vm7415_vm2, %v7637_v9, %v15075_v10  ;;  %v10001_v6 = vcombine.low %v3458_v4, %v3461_v43  ;;  %v15364_v14 = vpop.f32.mrb[50].mxu1  ;;  %v9922_v63 = vcombine.low %v11310_v37, %v11309_v39  ;;  %v5492_v5 = vor.u32 %v5491_v11, %v5488_v12  ;;  %v3534_v23 = vld [vmem:[#allocation2 + $0x180] sm:$0xf]  ;;  %v4370_v4 = vld [vmem:[#allocation2 + $0x18c] sm:$0xe] }
 0x3e3   : > { %6991 = vrot.lane.b32.xlu0 %v10129_v45, %s11515_s21  ;;  %8159 = vmatprep.mubr.bf16.mxu1 %v7715_v52  ;;  %v3945_v10 = vsel %vm11813_vm11, %v15342_v16, %v15248_v49  ;;  %v5495_v3 = vshll.u32 %v15211_v30, 16  ;;  %v8086_v51 = vpop.f32.mrb[51].mxu1  ;;  %v5499_v17 = vshrl.u32 %v15211_v30, 16  ;;  %v5505_v56 = vshll.u32 %v15221_v8, 16  ;;  %v3570_v12 = vld [vmem:[#allocation2 + $0x194] sm:$0x1]  ;;  %v15391_v52 = vpop.permute.xlu1 %6179 }
 0x3e4   : > { %v3074_v44 = vshrl.u32 %v2314_v2, 16  ;;  %v3077_v0 = vshll.u32 %v2314_v2, 16  ;;  %v3955_v32 = vsel %vm11813_vm11, %v3950_v54, %v3954_v58  ;;  %v5493_v1 = vrot.slane %v5492_v5, 4  ;;  %v15389_v58 = vld [vmem:[#allocation2 + $0x190] sm:$0xf] }
 0x3e5   : > { %6351 = vrot.lane.b32.xlu1 %v10001_v6, %s11515_s21  ;;  %v5497_v49 = vrot.slane %v5495_v3, 5  ;;  %v3083_v21 = vshll.u32 %v15360_v19, 16  ;;  %v10033_v62 = vcombine.low %v3534_v23, %v15303_v59  ;;  %v5501_v16 = vrot.slane %v5499_v17, 4  ;;  %v15398_v37 = vpop.permute.xlu0 %6787 }
 0x3e6   : > { %v3076_v22 = vrot.slane %v3074_v44, 4  ;;  %v3079_v42 = vrot.slane %v3077_v0, 5  ;;  %v7298_v30 = vsel %vm7253_vm15, %v9922_v63, %v14968_v24  ;;  %v3087_v43 = vshrl.u32 %v15360_v19, 16 }
 0x3e7   : > { %v3085_v8 = vrot.slane %v3083_v21, 5  ;;  %v5502_v45 = vor.u32 %v5501_v16, %v5497_v49  ;;  %v5507_v9 = vrot.slane %v5505_v56, 5  ;;  %v3093_v59 = vshll.u32 %v15378_v41, 16 }
 0x3e8   : > { %v15385_v11 = vpop.f32.mrb[72].mxu0  ;;  %v3080_v54 = vor.u32 %v3079_v42, %v3076_v22  ;;  %v10051_v24 = vcombine.low %v3945_v10, %v3955_v32  ;;  %v5498_v26 = vsel %vm11813_vm11, %v5493_v1, %v5497_v49  ;;  %v3089_v6 = vrot.slane %v3087_v43, 4  ;;  %v3151_v32 = vld [vmem:[#allocation2 + $0x180] sm:$0xe]  ;;  %v16668_v49 = vld [vmem:[#allocation45_spill] sm:$0xff] }
 0x3e9   : > { %16664 = vst [vmem:[#allocation98_spill] sm:$0xff] %v15385_v11  ;;  %6543 = vrot.lane.b32.xlu1 %v10033_v62, %s11517_s9  ;;  %v15393_v2 = vpop.f32.mrb[73].mxu0  ;;  %v4680_v39 = vrot.slane %v15389_v58, 5  ;;  %v5503_v5 = vrot.slane %v5502_v45, 4  ;;  %v9874_v51 = vrot.slane %v4370_v4, 9  ;;  %v4683_v23 = vrot.slane %v3570_v12, 5 }
 0x3ea   : > { %16665 = vst [vmem:[#allocation39_spill] sm:$0xff] %v15393_v2  ;;  %v15400_v63 = vpop.f32.mrb[74].mxu0  ;;  %v3081_v3 = vrot.slane %v3080_v54, 4  ;;  %v7559_v56 = vsel %vm7253_vm15, %v10051_v24, %v15006_v20  ;;  %v3090_v10 = vor.u32 %v3089_v6, %v3085_v8  ;;  %v3095_v44 = vrot.slane %v3093_v59, 5  ;;  %v16669_v42 = vld [vmem:[#allocation73_spill] sm:$0xff]  ;;  %v16670_v45 = vld [vmem:[#allocation24_spill] sm:$0xff]  ;;  %v15420_v54 = vpop.permute.xlu1 %6339 }
 0x3eb   : > { %16666 = vst [vmem:[#allocation99_spill] sm:$0xff] %v15400_v63  ;;  %v15402_v17 = vpop.f32.mrb[75].mxu0  ;;  %v4682_v0 = vrot.slane %v4680_v39, 4  ;;  %v5508_v1 = vsel %vm11813_vm11, %v5503_v5, %v5507_v9  ;;  %v7380_v21 = vsel %vm7350_vm1, %v7298_v30, %v16668_v49  ;;  %v4753_v43 = vld [vmem:[#allocation2 + $0x198] sm:$0xf]  ;;  %v4681_v20 = vsel %vm11781_vm8, %v9874_v51, %v4680_v39  ;;  %16671 = vst [vmem:[#allocation43_spill] sm:$0xff] %v15420_v54  ;;  %v15429_v39 = vpop.permute.xlu0 %6979 }
 0x3ec   : > { %16667 = vst [vmem:[#allocation72_spill] sm:$0xff] %v15402_v17  ;;  %v10161_v62 = vcombine.low %v5498_v26, %v5508_v1  ;;  %v3086_v16 = vsel %vm11813_vm11, %v3081_v3, %v3085_v8  ;;  %v3091_v22 = vrot.slane %v3090_v10, 4  ;;  %v7459_v4 = vsel %vm7415_vm2, %v7380_v21, %v16669_v42  ;;  %v16672_v59 = vld [vmem:[#allocation27_spill] sm:$0xff] }
 0x3ed   : > { %v4684_v12 = vsel %vm11781_vm8, %v4682_v0, %v4683_v23  ;;  %8160 = vmatmul.mubr.bf16.gmra.mrb[88].mxu1 %v7459_v4  ;;  %v7639_v9 = vsel %vm7350_vm1, %v7559_v56, %v16670_v45  ;;  %v9842_v30 = vrot.slane %v3151_v32, 9  ;;  %v3464_v26 = vrot.slane %v15360_v19, 5  ;;  %v11311_v19 = vld [vmem:[#allocation2 + $0xb8] sm:$0xf]  ;;  %v11312_v32 = vld [vmem:[#allocation2 + $0xb4] sm:$0xf] }
 0x3ee   : > { %7151 = vrot.lane.b32.xlu0 %v10161_v62, %s11517_s9  ;;  %v3096_v8 = vsel %vm11813_vm11, %v3091_v22, %v3095_v44  ;;  %v7718_v24 = vsel %vm7415_vm2, %v7639_v9, %v16672_v59  ;;  %v3467_v6 = vrot.slane %v15378_v41, 5  ;;  %v5510_v3 = vshrl.u32 %v4753_v43, 16  ;;  %v15437_v21 = vpop.permute.xlu1 %6531  ;;  %v15445_v42 = vld [vmem:[%s16325_s4] ss:$0 sm:$0xff] }
 0x3ef   : > { %v9970_v5 = vcombine.low %v3086_v16, %v3096_v8  ;;  %8167 = vmatprep.mubr.bf16.mxu1 %v7718_v24  ;;  %v5513_v51 = vshll.u32 %v4753_v43, 16  ;;  %v10098_v23 = vcombine.low %v4681_v20, %v4684_v12  ;;  %v3465_v56 = vsel %vm11781_vm8, %v9842_v30, %v3464_v26  ;;  %16673 = vst [vmem:[#allocation63_spill] sm:$0xff] %v15437_v21  ;;  %v15447_v4 = vpop.permute.xlu0 %7139  ;;  %v11313_v20 = vld [vmem:[#allocation2 + $0xdc] sm:$0xf]  ;;  %v11314_v12 = vld [vmem:[#allocation2 + $0xd8] sm:$0xf] }
 0x3f0   : > { %v3466_v10 = vrot.slane %v3464_v26, 4  ;;  %v5512_v44 = vrot.slane %v5510_v3, 4  ;;  %v9923_v41 = vcombine.low %v11312_v32, %v11311_v19  ;;  %v10130_v16 = vcombine.low %v4753_v43, %v15277_v13  ;;  %v16674_v30 = vld [vmem:[#allocation36_spill] sm:$0xff]  ;;  %v16675_v8 = vld [vmem:[#allocation41_spill] sm:$0xff]  ;;  %v16677_v3 = vld [vmem:[#allocation67_spill] sm:$0xff] }
 0x3f1   : > { %6193 = vrot.lane.b32.xlu1 %v9970_v5, %s11516_s12  ;;  %v5515_v0 = vrot.slane %v5513_v51, 5  ;;  %v9924_v45 = vcombine.low %v11314_v12, %v11313_v20  ;;  %v5519_v9 = vshll.u32 %v15277_v13, 16  ;;  %v15455_v43 = vld [vmem:[#allocation2 + $0x18c] sm:$0xf]  ;;  %v5523_v59 = vshrl.u32 %v15277_v13, 16  ;;  %v16680_v32 = vld [vmem:[#allocation30_spill] sm:$0xff] }
 0x3f2   : > { %6801 = vrot.lane.b32.xlu0 %v10098_v23, %s11516_s12  ;;  %v3468_v1 = vsel %vm11781_vm8, %v3466_v10, %v3467_v6  ;;  %v7301_v62 = vsel %vm7253_vm15, %v9923_v41, %v15186_v34  ;;  %v7562_v34 = vsel %vm7253_vm15, %v16675_v8, %v16674_v30  ;;  %16676 = vst [vmem:[#allocation70_spill] sm:$0xff] %v15455_v43  ;;  %v5529_v24 = vshll.u32 %v15267_v18, 16  ;;  %v2316_v26 = vld [vmem:[#allocation2 + $0x18c] sm:$0xf]  ;;  %v16678_v23 = vld [vmem:[#allocation75_spill] sm:$0xff]  ;;  %v16682_v41 = vld [vmem:[#allocation34_spill] sm:$0xff] }
 0x3f3   : > { %v10002_v49 = vcombine.low %v3465_v56, %v3468_v1  ;;  %v5516_v22 = vor.u32 %v5515_v0, %v5512_v44  ;;  %v10034_v6 = vcombine.low %v15455_v43, %v15389_v58  ;;  %v5521_v5 = vrot.slane %v5519_v9, 5  ;;  %v16679_v0 = vld [vmem:[#allocation46_spill] sm:$0xff]  ;;  %v16681_v18 = vld [vmem:[#allocation31_spill] sm:$0xff]  ;;  %v16686_v30 = vld [vmem:[#allocation28_spill] sm:$0xff] }
 0x3f4   : > { %v8050_v51 = vadd.f32 %v15445_v42, %v16677_v3  ;;  %v7382_v56 = vsel %vm7350_vm1, %v7301_v62, %v16678_v23  ;;  %v5525_v44 = vrot.slane %v5523_v59, 4  ;;  %v15469_v13 = vsel %vm7253_vm15, %v9924_v45, %v16680_v32  ;;  %v16683_v1 = vld [vmem:[#allocation58_spill] sm:$0xff]  ;;  %v15484_v59 = vld [vmem:[#allocation2 + $0x194] sm:$0x1]  ;;  %v15486_v3 = vpop.permute.xlu0 %6789 }
 0x3f5   : > { %6353 = vrot.lane.b32.xlu1 %v10002_v49, %s11515_s21  ;;  %v5517_v10 = vrot.slane %v5516_v22, 4  ;;  %v7462_v19 = vsel %vm7415_vm2, %v7382_v56, %v16679_v0  ;;  %v7565_v58 = vsel %vm7253_vm15, %v16682_v41, %v16681_v18  ;;  %v3098_v62 = vshrl.u32 %v2316_v26, 16  ;;  %v15478_v22 = vpop.permute.xlu1 %6181  ;;  %v16685_v9 = vld [vmem:[#allocation66_spill] sm:$0xff]  ;;  %16687 = vst [vmem:[#allocation38_spill] sm:$0xff] %v15486_v3  ;;  %v16689_v23 = vld [vmem:[#allocation49_spill] sm:$0xff] }
 0x3f6   : > { %6993 = vrot.lane.b32.xlu0 %v10130_v16, %s11515_s21  ;;  %v8339_v49 = vadd.f32 %v16683_v1, %v8050_v51  ;;  %8168 = vmatmul.mubr.bf16.gmra.mrb[92].mxu1 %v7462_v19  ;;  %v15476_v16 = vld [vmem:[#allocation2 + $0x190] sm:$0xf]  ;;  %16684 = vst [vmem:[#allocation64_spill] sm:$0xff] %v15478_v22  ;;  %v5526_v20 = vor.u32 %v5525_v44, %v5521_v5  ;;  %v5531_v12 = vrot.slane %v5529_v24, 5  ;;  %v3101_v44 = vshll.u32 %v2316_v26, 16 }
 0x3f7   : > { %v8053_v45 = vadd.f32 %v15445_v42, %v16685_v9  ;;  %v7641_v8 = vsel %vm7350_vm1, %v7562_v34, %v16686_v30  ;;  %v3100_v0 = vrot.slane %v3098_v62, 4  ;;  %v4371_v24 = vld [vmem:[#allocation2 + $0x198] sm:$0xe]  ;;  %v5522_v19 = vsel %vm11813_vm11, %v5517_v10, %v5521_v5  ;;  %v16690_v18 = vld [vmem:[#allocation21_spill] sm:$0xff]  ;;  %v3152_v5 = vld [vmem:[#allocation2 + $0x18c] sm:$0xe] }
 0x3f8   : > { %v7721_v56 = vsel %vm7415_vm2, %v7641_v8, %v16689_v23  ;;  %v5527_v32 = vrot.slane %v5526_v20, 4  ;;  %v3107_v41 = vshll.u32 %v15476_v16, 16  ;;  %v8593_v1 = vmax.f32 %v8339_v49, 0.0  ;;  %v15502_v10 = vld [vmem:[#allocation2 + $0xf4] sm:$0xf] }
 0x3f9   : > { %6545 = vrot.lane.b32.xlu1 %v10034_v6, %s11517_s9  ;;  %v16688_v6 = vld [vmem:[#allocation55_spill] sm:$0xff]  ;;  %v8342_v34 = vadd.f32 %v16690_v18, %v8053_v45  ;;  %8175 = vmatprep.mubr.bf16.mxu1 %v7721_v56  ;;  %v3103_v9 = vrot.slane %v3101_v44, 5  ;;  %v3117_v30 = vshll.u32 %v15484_v59, 16  ;;  %v9875_v23 = vrot.slane %v4371_v24, 9  ;;  %v15504_v20 = vld [vmem:[#allocation2 + $0xf0] sm:$0xf]  ;;  %v15510_v63 = vpop.permute.xlu1 %6341 }
 0x3fa   : > { %v15490_v51 = vsel %vm7350_vm1, %v7565_v58, %v16688_v6  ;;  %v3111_v58 = vshrl.u32 %v15476_v16, 16  ;;  %v3571_v6 = vld [vmem:[#allocation2 + $0x1a0] sm:$0x1]  ;;  %v5532_v26 = vsel %vm11813_vm11, %v5527_v32, %v5531_v12  ;;  %v3109_v8 = vrot.slane %v3107_v41, 5  ;;  %v15508_v18 = vld [vmem:[#allocation2 + $0x19c] sm:$0xf] }
 0x3fb   : > { %v8594_v62 = vmax.f32 %v8342_v34, 0.0  ;;  %v10162_v45 = vcombine.low %v5522_v19, %v5532_v26  ;;  %v3104_v56 = vor.u32 %v3103_v9, %v3100_v0  ;;  %16691 = vst [vmem:[#allocation45_spill] sm:$0xff] %v15508_v18  ;;  %16692 = vst [vmem:[#allocation73_spill] sm:$0xff] %v15510_v63  ;;  %v3119_v12 = vrot.slane %v3117_v30, 5  ;;  %v15515_v34 = vpop.permute.xlu0 %6981  ;;  %v4755_v19 = vld [vmem:[#allocation2 + $0x1a4] sm:$0xf] }
 0x3fc   : > { %v3113_v44 = vrot.slane %v3111_v58, 4  ;;  %v4687_v24 = vrot.slane %v15508_v18, 5  ;;  %v4690_v32 = vrot.slane %v3571_v6, 5  ;;  %16693 = vst [vmem:[#allocation24_spill] sm:$0xff] %v15515_v34  ;;  %v9843_v49 = vrot.slane %v3152_v5, 9 }
 0x3fd   : > { %v15512_v11 = vpack.c.bf16 %v8594_v62, %v8593_v1  ;;  %7153 = vrot.lane.b32.xlu0 %v10162_v45, %s11517_s9  ;;  %v3105_v41 = vrot.slane %v3104_v56, 4  ;;  %v3471_v0 = vrot.slane %v15476_v16, 5  ;;  %v11317_v9 = vld [vmem:[#allocation2 + $0x114] sm:$0xf]  ;;  %v3474_v30 = vrot.slane %v15484_v59, 5 }
 0x3fe   : > { %v3114_v17 = vor.u32 %v3113_v44, %v3109_v8  ;;  %v4053_v58 = vshrl.u32 %v11317_v9, 16  ;;  %v4688_v1 = vsel %vm11781_vm8, %v9875_v23, %v4687_v24  ;;  %v4689_v26 = vrot.slane %v4687_v24, 4  ;;  %v11318_v56 = vld [vmem:[#allocation2 + $0xe8] sm:$0xf]  ;;  %v11319_v44 = vld [vmem:[#allocation2 + $0xe4] sm:$0xf] }
 0x3ff   : > { %v4056_v62 = vshll.u32 %v11317_v9, 16  ;;  %v3110_v6 = vsel %vm11813_vm11, %v3105_v41, %v3109_v8  ;;  %v3473_v45 = vrot.slane %v3471_v0, 4  ;;  %v9925_v5 = vcombine.low %v11319_v44, %v11318_v56  ;;  %v15526_v22 = vld [vmem:[#allocation2 + $0x1ac] sm:$0x1]  ;;  %v5588_v23 = vld [vmem:[#allocation2 + $0x1a4] sm:$0xe]  ;;  %v15532_v41 = vpop.permute.xlu1 %6533  ;;  %v15539_v3 = vpop.permute.xlu0 %7141 }
 0x400   : > { %v3115_v2 = vrot.slane %v3114_v17, 4  ;;  %v4691_v16 = vsel %vm11781_vm8, %v4689_v26, %v4690_v32  ;;  %v5534_v43 = vshrl.u32 %v4755_v19, 16  ;;  %v5537_v63 = vshll.u32 %v4755_v19, 16  ;;  %v11320_v24 = vld [vmem:[#allocation2 + $0x120] sm:$0xf]  ;;  %16694 = vst [vmem:[#allocation27_spill] sm:$0xff] %v15532_v41 }
 0x401   : > { %v4077_v21 = vshrl.u32 %v11320_v24, 16  ;;  %v10099_v9 = vcombine.low %v4688_v1, %v4691_v16  ;;  %v3472_v17 = vsel %vm11781_vm8, %v9843_v49, %v3471_v0  ;;  %v4756_v8 = vld [vmem:[#allocation2 + $0x1a8] sm:$0xf]  ;;  %v3475_v32 = vsel %vm11781_vm8, %v3473_v45, %v3474_v30  ;;  %v16695_v44 = vld [vmem:[#allocation29_spill] sm:$0xff]  ;;  %16696 = vst [vmem:[#allocation36_spill] sm:$0xff] %v15539_v3 }
 0x402   : > { %v3120_v59 = vsel %vm11813_vm11, %v3115_v2, %v3119_v12  ;;  %v10131_v26 = vcombine.low %v4755_v19, %v4756_v8  ;;  %v7384_v34 = vsel %vm7350_vm1, %v15469_v13, %v16695_v44  ;;  %v16697_v2 = vld [vmem:[#allocation44_spill] sm:$0xff]  ;;  %v9907_v49 = vrot.slane %v5588_v23, 9  ;;  %v16701_v41 = vld [vmem:[#allocation61_spill] sm:$0xff] }
 0x403   : > { %v9971_v56 = vcombine.low %v3110_v6, %v3120_v59  ;;  %6803 = vrot.lane.b32.xlu0 %v10099_v9, %s11516_s12  ;;  %v7465_v12 = vsel %vm7415_vm2, %v7384_v34, %v16697_v2  ;;  %v5904_v0 = vrot.slane %v4756_v8, 5  ;;  %v5907_v1 = vrot.slane %v15526_v22, 5  ;;  %v11321_v6 = vld [vmem:[#allocation2 + $0x118] sm:$0xf]  ;;  %v16698_v44 = vld [vmem:[#allocation32_spill] sm:$0xff]  ;;  %v16702_v3 = vld [vmem:[#allocation69_spill] sm:$0xff] }
 0x404   : > { %v4062_v16 = vshll.u32 %v11321_v6, 16  ;;  %v4066_v59 = vshrl.u32 %v11321_v6, 16  ;;  %v5536_v19 = vrot.slane %v5534_v43, 4  ;;  %v5539_v30 = vrot.slane %v5537_v63, 5  ;;  %8176 = vmatmul.mubr.bf16.gmra.mrb[96].mxu1 %v7465_v12  ;;  %v16700_v2 = vld [vmem:[#allocation60_spill] sm:$0xff] }
 0x405   : > { %6195 = vrot.lane.b32.xlu1 %v9971_v56, %s11516_s12  ;;  %v5547_v13 = vshrl.u32 %v4756_v8, 16  ;;  %v5905_v45 = vsel %vm11781_vm8, %v9907_v49, %v5904_v0  ;;  %v5906_v9 = vrot.slane %v5904_v0, 4  ;;  %v7724_v34 = vsel %vm7415_vm2, %v15490_v51, %v16698_v44  ;;  %v15563_v44 = vpop.permute.xlu1 %6183  ;;  %s11443_s12 = scalar_lea.vmem %s16274_s8, 4096 }
 0x406   : > { %v7568_v6 = vsel %vm7253_vm15, %v16701_v41, %v16700_v2  ;;  %v7307_v43 = vsel %vm7253_vm15, %v9925_v5, %v16702_v3  ;;  %v4080_v63 = vshll.u32 %v11320_v24, 16  ;;  %v10003_v56 = vcombine.low %v3472_v17, %v3475_v32  ;;  %8183 = vmatprep.mubr.bf16.mxu1 %v7724_v34  ;;  %v11322_v5 = vld [vmem:[#allocation2 + $0x124] sm:$0xf]  ;;  %v15572_v32 = vld [vmem:[#allocation2 + $0x198] sm:$0xf]  ;;  %v16704_v34 = vld [vmem:[#allocation56_spill] sm:$0xff]  ;;  %p11444_p6 = scmp.ne.s32.totalorder %s16274_s8, %s11443_s12 }
 0x407   : > { %v4055_v54 = vrot.slane %v4053_v58, 4  ;;  %v4058_v49 = vrot.slane %v4056_v62, 5  ;;  %v15558_v0 = vrot.slane %v4077_v21, 4  ;;  %6995 = vrot.lane.b32.xlu0 %v10131_v26, %s11515_s21  ;;  %v5908_v51 = vsel %vm11781_vm8, %v5906_v9, %v5907_v1  ;;  %v15570_v62 = vpop.permute.xlu0 %6791  ;;  %16703 = vst [vmem:[#allocation67_spill] sm:$0xff] %v15572_v32 }
 0x408   : > { %v15567_v41 = vrot.slane %v4062_v16, 5  ;;  %v4068_v3 = vrot.slane %v4066_v59, 4  ;;  %v4086_v24 = vshll.u32 %v11322_v5, 16  ;;  %v10195_v58 = vcombine.low %v5905_v45, %v5908_v51  ;;  %v11323_v51 = vld [vmem:[#allocation2 + $0x11c] sm:$0x1]  ;;  %p11445_p11 = pnand %p11444_p6, %p16789_p10 }
 0x409   : > { %6355 = vrot.lane.b32.xlu1 %v10003_v56, %s11515_s21  ;;  %v4090_v17 = vshrl.u32 %v11322_v5, 16  ;;  %v5540_v60 = vor.u32 %v5539_v30, %v5536_v19  ;;  %v5543_v26 = vshll.u32 %v4756_v8, 16  ;;  %v5549_v1 = vrot.slane %v5547_v13, 4  ;;  %v16705_v19 = vld [vmem:[#allocation37_spill] sm:$0xff]  ;;  %v16706_v30 = vld [vmem:[#allocation42_spill] sm:$0xff] }
 0x40a   : > { %v15574_v9 = vrot.slane %v4080_v63, 5  ;;  %10928 = vmatmul.mubr.msk.bf16.gmra.mrb[92].mxu0 %vm7253_vm15, %v10195_v58  ;;  %v10035_v16 = vcombine.low %v15572_v32, %v15508_v18  ;;  %v5553_v59 = vshll.u32 %v15526_v22, 16  ;;  %v7386_v45 = vsel %vm7350_vm1, %v7307_v43, %v16704_v34  ;;  %v16707_v22 = vld [vmem:[#allocation68_spill] sm:$0xff]  ;;  %p11446_p12 = pneg %p11445_p11 }
 0x40b   : > { %10935 = vmatprep.mubr.msk.bf16.mxu0 %vm7253_vm15, %v15512_v11  ;;  %v5541_v2 = vrot.slane %v5540_v60, 4  ;;  %v5545_v56 = vrot.slane %v5543_v26, 5  ;;  %v7468_v8 = vsel %vm7415_vm2, %v7386_v45, %v16705_v19  ;;  %v7645_v13 = vsel %vm7350_vm1, %v7568_v6, %v16706_v30  ;;  %v15594_v26 = vpop.permute.xlu1 %6343  ;;  %v16708_v6 = vld [vmem:[#allocation22_spill] sm:$0xff]  ;;  %v15604_v45 = vpop.permute.xlu0 %6983 }
 0x40c   : > { %v15551_v23 = vpop.f32.mrb[52].mxu1  ;;  %v4059_v63 = vor.u32 %v4058_v49, %v4055_v54  ;;  %v4072_v5 = vshll.u32 %v11323_v51, 16  ;;  %8184 = vmatmul.mubr.bf16.gmra.mrb[100].mxu1 %v7468_v8  ;;  %v7727_v43 = vsel %vm7415_vm2, %v7645_v13, %v16707_v22  ;;  %v15592_v11 = vrot.slane %v4086_v24, 5  ;;  %v16709_v54 = vld [vmem:[#allocation59_spill] sm:$0xff]  ;;  %v11325_v19 = vld [vmem:[#allocation2 + $0xfc] sm:$0xf] }
 0x40d   : > { %16699 = vst [vmem:[#allocation41_spill] sm:$0xff] %v15551_v23  ;;  %v8091_v12 = vpop.f32.mrb[53].mxu1  ;;  %6547 = vrot.lane.b32.xlu1 %v10035_v16, %s11517_s9  ;;  %v4092_v58 = vrot.slane %v4090_v17, 4  ;;  %v5555_v60 = vrot.slane %v5553_v59, 5  ;;  %8191 = vmatprep.mubr.bf16.mxu1 %v7727_v43  ;;  %v7571_v49 = vsel %vm7253_vm15, %v16709_v54, %v16708_v6  ;;  %v16711_v16 = vcombine.low %v15504_v20, %v15502_v10  ;;  %v11324_v24 = vld [vmem:[#allocation2 + $0x100] sm:$0xf] }
 0x40e   : > { %v15565_v23 = vpop.f32.mrb[54].mxu1  ;;  %v4069_v12 = vor.u32 %v4068_v3, %v15567_v41  ;;  %v16710_v3 = vld [vmem:[#allocation62_spill] sm:$0xff]  ;;  %v9927_v17 = vcombine.low %v11325_v19, %v11324_v24  ;;  %v5546_v8 = vsel %vm11813_vm11, %v5541_v2, %v5545_v56  ;;  %v4060_v51 = vrot.slane %v4059_v63, 4  ;;  %v11327_v6 = vld [vmem:[#allocation2 + $0x128] sm:$0x1]  ;;  %v16713_v63 = vld [vmem:[#allocation71_spill] sm:$0xff] }
 0x40f   : > { %v8094_v21 = vpop.f32.mrb[55].mxu1  ;;  %v7310_v34 = vsel %vm7253_vm15, %v16711_v16, %v16710_v3  ;;  %v4074_v43 = vrot.slane %v4072_v5, 5  ;;  %v4083_v10 = vor.u32 %v15574_v9, %v15558_v0  ;;  %v4093_v20 = vor.u32 %v4092_v58, %v15592_v11  ;;  %v11328_v16 = vld [vmem:[#allocation2 + $0x130] sm:$0xf]  ;;  %v16712_v2 = vld [vmem:[#allocation48_spill] sm:$0xff]  ;;  %v16714_v5 = vld [vmem:[#allocation79_spill] sm:$0xff] }
 0x410   : > { %v5550_v21 = vor.u32 %v5549_v1, %v5545_v56  ;;  %v11326_v1 = vld [vmem:[#allocation2 + $0x12c] sm:$0xf]  ;;  %v4070_v22 = vrot.slane %v4069_v12, 4  ;;  %v4096_v54 = vshll.u32 %v11327_v6, 16  ;;  %v4110_v24 = vshll.u32 %v11328_v16, 16  ;;  %v16715_v9 = vld [vmem:[#allocation65_spill] sm:$0xff]  ;;  %v15633_v6 = vpop.permute.xlu0 %7143 }
 0x411   : > { %v4101_v59 = vshrl.u32 %v11326_v1, 16  ;;  %v4104_v13 = vshll.u32 %v11326_v1, 16  ;;  %v4114_v19 = vshrl.u32 %v11328_v16, 16  ;;  %v7388_v56 = vsel %vm7350_vm1, %v7310_v34, %v16712_v2 }
 0x412   : > { %v5551_v30 = vrot.slane %v5550_v21, 4  ;;  %v7647_v12 = vsel %vm7350_vm1, %v7571_v49, %v16713_v63  ;;  %v7313_v0 = vsel %vm7253_vm15, %v9927_v17, %v16714_v5  ;;  %v7471_v58 = vsel %vm7415_vm2, %v7388_v56, %v16715_v9  ;;  %v15621_v21 = vpop.permute.xlu1 %6535  ;;  %v16717_v49 = vld [vmem:[#allocation26_spill] sm:$0xff] }
 0x413   : > { %v4075_v34 = vsel %vm11813_vm11, %v4070_v22, %v4074_v43  ;;  %v7730_v17 = vsel %vm7415_vm2, %v7647_v12, %v16717_v49  ;;  %v4103_v16 = vrot.slane %v4101_v59, 4  ;;  %v4106_v2 = vrot.slane %v4104_v13, 5  ;;  %v11330_v13 = vld [vmem:[#allocation2 + $0x144] sm:$0xf] }
 0x414   : > { %v5556_v3 = vsel %vm11813_vm11, %v5551_v30, %v5555_v60  ;;  %v11329_v60 = vld [vmem:[#allocation2 + $0x138] sm:$0xf]  ;;  %8192 = vmatmul.mubr.bf16.gmra.mrb[104].mxu1 %v7471_v58  ;;  %v4084_v63 = vrot.slane %v4083_v10, 4  ;;  %v4098_v22 = vrot.slane %v4096_v54, 5  ;;  %v4116_v43 = vrot.slane %v4114_v19, 4 }
 0x415   : > { %v10163_v18 = vcombine.low %v5546_v8, %v5556_v3  ;;  %v4125_v30 = vshrl.u32 %v11329_v60, 16  ;;  %v4065_v8 = vsel %vm11813_vm11, %v4060_v51, %v15567_v41  ;;  %v4128_v56 = vshll.u32 %v11329_v60, 16  ;;  %8199 = vmatprep.mubr.bf16.mxu1 %v7730_v17  ;;  %v16721_v60 = vld [vmem:[#allocation9_spill] sm:$0xff] }
 0x416   : > { %v4094_v51 = vrot.slane %v4093_v20, 4  ;;  %v10056_v58 = vcombine.low %v4065_v8, %v4075_v34  ;;  %v4149_v10 = vshrl.u32 %v11330_v13, 16  ;;  %v7390_v17 = vsel %vm7350_vm1, %v7313_v0, %v16721_v60  ;;  %v11331_v34 = vld [vmem:[#allocation2 + $0x134] sm:$0x1]  ;;  %v15661_v0 = vpop.permute.xlu0 %6793  ;;  %v11334_v60 = vld [vmem:[#allocation2 + $0x10c] sm:$0xf] }
 0x417   : > { %7155 = vrot.lane.b32.xlu0 %v10163_v18, %s11517_s9  ;;  %v15641_v18 = vrot.slane %v4110_v24, 5  ;;  %v15647_v59 = vrot.slane %v4125_v30, 4  ;;  %v4152_v20 = vshll.u32 %v11330_v13, 16  ;;  %v4107_v24 = vor.u32 %v4106_v2, %v4103_v16  ;;  %v16722_v16 = vld [vmem:[#allocation25_spill] sm:$0xff]  ;;  %s11518_s9 = smov [#allocation6]  }
 0x418   : > { %v7574_v54 = vsel %vm7253_vm15, %v10056_v58, %v15123_v25  ;;  %v4089_v19 = vsel %vm11813_vm11, %v4084_v63, %v15592_v11  ;;  %v4099_v30 = vsel %vm11813_vm11, %v4094_v51, %v4098_v22  ;;  %v7474_v2 = vsel %vm7415_vm2, %v7390_v17, %v16722_v16  ;;  %v15675_v22 = vpop.permute.xlu1 %6185  ;;  %v16724_v16 = vld [vmem:[#allocation20_spill] sm:$0xff]  ;;  %s11447_s22 = sshll.u32 %s11518_s9, 4  ;;  %s11448_s22 = int_to_ptr.vmem [resolvable:$false] %s11447_s22 }
 0x419   : > { %v4117_v8 = vor.u32 %v4116_v43, %v15641_v18  ;;  %v15667_v58 = vrot.slane %v4149_v10, 4  ;;  %v8058_v63 = vadd.f32 %v15445_v42, %v15114_v55  ;;  %v8061_v51 = vadd.f32 %v15445_v42, %v15129_v61  ;;  %16723 = vst [vmem:[#allocation34_spill] sm:$0xff] %v15675_v22  ;;  %v11333_v43 = vld [vmem:[#allocation2 + $0x108] sm:$0xf]  ;;  %v11335_v55 = vld [vmem:[#allocation2 + $0x150] sm:$0xf]  ;;  %p11450_p8 = scmp.lt.s32.totalorder %s16274_s8, %s11448_s22 }
 0x41a   : > { %v15623_v1 = vpop.f32.mrb[76].mxu0  ;;  %v10057_v17 = vcombine.low %v4089_v19, %v4099_v30  ;;  %v4108_v10 = vrot.slane %v4107_v24, 4  ;;  %s11449_s23 = scalar_lea.vmem %s11448_s22, 8192 }
 0x41b   : > { %16716 = vst [vmem:[#allocation75_spill] sm:$0xff] %v15623_v1  ;;  %v15635_v3 = vpop.f32.mrb[77].mxu0  ;;  %v15651_v1 = vrot.slane %v4128_v56, 5  ;;  %v7649_v56 = vsel %vm7350_vm1, %v7574_v54, %v15162_v27  ;;  %v15677_v27 = vrot.slane %v4152_v20, 5  ;;  %v9928_v54 = vcombine.low %v11333_v43, %v11334_v60  ;;  %v16726_v20 = vld [vmem:[#allocation77_spill] sm:$0xff]  ;;  %p11451_p9 = scmp.lt.s32.totalorder %s11449_s23, %s11443_s12 }
 0x41c   : > { %16718 = vst [vmem:[#allocation46_spill] sm:$0xff] %v15635_v3  ;;  %v15637_v5 = vpop.f32.mrb[78].mxu0  ;;  %8200 = vmatmul.mubr.bf16.gmra.mrb[108].mxu1 %v7474_v2  ;;  %v7733_v11 = vsel %vm7415_vm2, %v7649_v56, %v15192_v53  ;;  %v8347_v53 = vadd.f32 %v16724_v16, %v8058_v63  ;;  %v16725_v56 = vld [vmem:[#allocation13_spill] sm:$0xff]  ;;  %v4176_v3 = vshll.u32 %v11335_v55, 16  ;;  %v7577_v19 = vsel %vm7253_vm15, %v10057_v17, %v15223_v50  ;;  %v11338_v17 = vld [vmem:[#allocation2 + $0x148] sm:$0xf] }
 0x41d   : > { %16719 = vst [vmem:[#allocation30_spill] sm:$0xff] %v15637_v5  ;;  %v15639_v41 = vpop.f32.mrb[56].mxu1  ;;  %v15643_v9 = vpop.f32.mrb[79].mxu0  ;;  %8207 = vmatprep.mubr.bf16.mxu1 %v7733_v11  ;;  %v8350_v2 = vadd.f32 %v16725_v56, %v8061_v51  ;;  %v7316_v22 = vsel %vm7253_vm15, %v9928_v54, %v16726_v20  ;;  %v4131_v50 = vor.u32 %v15651_v1, %v15647_v59  ;;  %v4158_v16 = vshll.u32 %v11338_v17, 16  ;;  %v16727_v59 = vld [vmem:[#allocation16_spill] sm:$0xff]  ;;  %p11452_p13 = por %p11451_p9, %p11450_p8 }
 0x41e   : > { %16720 = vst [vmem:[#allocation31_spill] sm:$0xff] %v15643_v9  ;;  %v8099_v12 = vpop.f32.mrb[57].mxu1  ;;  %v4173_v9 = vshrl.u32 %v11335_v55, 16  ;;  %v8595_v24 = vmax.f32 %v8347_v53, 0.0  ;;  %v7392_v63 = vsel %vm7350_vm1, %v7316_v22, %v15112_v36  ;;  %v8066_v60 = vadd.f32 %v15445_v42, %v15173_v29  ;;  %v15702_v54 = vpop.permute.xlu1 %6345  ;;  %v11337_v22 = vld [vmem:[#allocation2 + $0x140] sm:$0x1] }
 0x41f   : > { %v15645_v49 = vpop.f32.mrb[58].mxu1  ;;  %v4120_v12 = vshll.u32 %v11331_v34, 16  ;;  %v4118_v34 = vrot.slane %v4117_v8, 4  ;;  %v8596_v30 = vmax.f32 %v8350_v2, 0.0  ;;  %v15687_v8 = vpop.permute.xlu0 %6985  ;;  %v8069_v29 = vadd.f32 %v15445_v42, %v15177_v31  ;;  %v11339_v53 = vld [vmem:[#allocation2 + $0x114] sm:$0xf]  ;;  %p11453_p1 = pnand %p11452_p13, %p11446_p12 }
 0x420   : > { %v8102_v5 = vpop.f32.mrb[59].mxu1  ;;  %v11340_v56 = vld [vmem:[#allocation2 + $0x118] sm:$0xf]  ;;  %v16729_v31 = vld [vmem:[#allocation80_spill] sm:$0xff] }
 0x421   : > { %v11332_v5 = vld [vmem:[#allocation2 + $0x13c] sm:$0xf]  ;;  %v8658_v43 = vpack.c.bf16 %v8596_v30, %v8595_v24  ;;  %v9929_v2 = vcombine.low %v11339_v53, %v11340_v56  ;;  %v16731_v53 = vld [vmem:[#allocation95_spill] sm:$0xff] }
 0x422   : > { %v4134_v13 = vshll.u32 %v11332_v5, 16  ;;  %v4138_v25 = vshrl.u32 %v11332_v5, 16  ;;  %v4122_v5 = vrot.slane %v4120_v12, 5  ;;  %v11336_v12 = vld [vmem:[#allocation2 + $0x15c] sm:$0xf] }
 0x423   : > { %v4197_v11 = vshrl.u32 %v11336_v12, 16  ;;  %10936 = vmatmul.mubr.msk.bf16.vlgmr.msra.gmra.mrb[96].mxu0 %vm7253_vm15, %v8658_v43  ;;  %v15726_v43 = vrot.slane %v4158_v16, 5 }
 0x424   : > { %v15681_v61 = vrot.slane %v4134_v13, 5  ;;  %v4140_v32 = vrot.slane %v4138_v25, 4  ;;  %v7651_v13 = vsel %vm7350_vm1, %v7577_v19, %v15253_v7  ;;  %v4113_v25 = vsel %vm11813_vm11, %v4108_v10, %v15641_v18  ;;  %v16728_v19 = vld [vmem:[#allocation33_spill] sm:$0xff] }
 0x425   : > { %v4123_v51 = vsel %vm11813_vm11, %v4118_v34, %v4122_v5  ;;  %v4144_v7 = vshll.u32 %v11337_v22, 16  ;;  %v7477_v18 = vsel %vm7415_vm2, %v7392_v63, %v15157_v35  ;;  %v4162_v10 = vshrl.u32 %v11338_v17, 16  ;;  %v15720_v30 = vpop.permute.xlu0 %7145  ;;  %v11341_v17 = vld [vmem:[#allocation2 + $0x120] sm:$0xf] }
 0x426   : > { %v4141_v36 = vor.u32 %v4140_v32, %v15681_v61  ;;  %8208 = vmatmul.mubr.bf16.gmra.mrb[112].mxu1 %v7477_v18  ;;  %v7736_v1 = vsel %vm7415_vm2, %v7651_v13, %v15283_v15  ;;  %v8355_v34 = vadd.f32 %v16727_v59, %v8066_v60  ;;  %v15713_v32 = vrot.slane %v4173_v9, 4  ;;  %v16730_v60 = vld [vmem:[#allocation57_spill] sm:$0xff]  ;;  %v11342_v18 = vld [vmem:[#allocation2 + $0x124] sm:$0xf] }
 0x427   : > { %v4200_v5 = vshll.u32 %v11336_v12, 16  ;;  %v10058_v55 = vcombine.low %v4113_v25, %v4123_v51  ;;  %8215 = vmatprep.mubr.bf16.mxu1 %v7736_v1  ;;  %v15715_v35 = vrot.slane %v4176_v3, 5  ;;  %v15717_v20 = vrot.slane %v4197_v11, 4  ;;  %v15728_v11 = vpop.permute.xlu1 %6537 }
 0x428   : > { %v4132_v15 = vrot.slane %v4131_v50, 4  ;;  %v8358_v24 = vadd.f32 %v16728_v19, %v8069_v29  ;;  %v7319_v63 = vsel %vm7253_vm15, %v9929_v2, %v16729_v31  ;;  %v4142_v12 = vrot.slane %v4141_v36, 4  ;;  %v11344_v29 = vld [vmem:[#allocation2 + $0x14c] sm:$0x1]  ;;  %v16732_v2 = vld [vmem:[#allocation93_spill] sm:$0xff] }
 0x429   : > { %v7580_v9 = vsel %vm7253_vm15, %v10058_v55, %v15310_v28  ;;  %v4146_v13 = vrot.slane %v4144_v7, 5  ;;  %v4164_v25 = vrot.slane %v4162_v10, 4  ;;  %v8597_v3 = vmax.f32 %v8355_v34, 0.0  ;;  %v11343_v7 = vld [vmem:[#allocation2 + $0x154] sm:$0xf] }
 0x42a   : > { %v8598_v51 = vmax.f32 %v8358_v24, 0.0  ;;  %v15730_v50 = vrot.slane %v4200_v5, 5  ;;  %v7394_v22 = vsel %vm7350_vm1, %v7319_v63, %v16730_v60  ;;  %v9930_v1 = vcombine.low %v11341_v17, %v11342_v18  ;;  %v16733_v63 = vld [vmem:[#allocation17_spill] sm:$0xff] }
 0x42b   : > { %v7653_v28 = vsel %vm7350_vm1, %v7580_v9, %v15337_v57  ;;  %v4137_v36 = vsel %vm11813_vm11, %v4132_v15, %v15681_v61  ;;  %v4182_v16 = vshll.u32 %v11343_v7, 16  ;;  %v4186_v10 = vshrl.u32 %v11343_v7, 16  ;;  %v15745_v57 = vld [vmem:[#allocation2 + $0x168] sm:$0xf]  ;;  %v15766_v17 = vpop.permute.xlu1 %6187 }
 0x42c   : > { %v8659_v59 = vpack.c.bf16 %v8598_v51, %v8597_v3  ;;  %v4155_v34 = vor.u32 %v15677_v27, %v15667_v58  ;;  %v4168_v5 = vshll.u32 %v11344_v29, 16  ;;  %v7480_v56 = vsel %vm7415_vm2, %v7394_v22, %v16731_v53  ;;  %v15753_v27 = vpop.permute.xlu0 %6795  ;;  %v16734_v3 = vld [vmem:[#allocation97_spill] sm:$0xff]  ;;  %v11348_v53 = vld [vmem:[#allocation2 + $0x160] sm:$0xf] }
 0x42d   : > { %v8074_v55 = vadd.f32 %v15445_v42, %v16732_v2  ;;  %v4221_v19 = vshrl.u32 %v15745_v57, 16  ;;  %v4147_v61 = vsel %vm11813_vm11, %v4142_v12, %v4146_v13  ;;  %v4165_v15 = vor.u32 %v4164_v25, %v15726_v43  ;;  %v11346_v25 = vld [vmem:[#allocation2 + $0x12c] sm:$0xf] }
 0x42e   : > { %8216 = vmatmul.mubr.bf16.gmra.mrb[116].mxu1 %v7480_v56  ;;  %v7739_v58 = vsel %vm7415_vm2, %v7653_v28, %v15371_v47  ;;  %10939 = vmatprep.mubr.msk.bf16.mxu0 %vm7253_vm15, %v8659_v59  ;;  %v4224_v24 = vshll.u32 %v15745_v57, 16  ;;  %v7322_v31 = vsel %vm7253_vm15, %v9930_v1, %v15305_v40  ;;  %v8077_v12 = vadd.f32 %v15445_v42, %v16734_v3  ;;  %v11347_v47 = vld [vmem:[#allocation2 + $0x130] sm:$0xf]  ;;  %v16735_v1 = vld [vmem:[#allocation40_spill] sm:$0xff] }
 0x42f   : > { %8223 = vmatprep.mubr.bf16.mxu1 %v7739_v58  ;;  %v8363_v9 = vadd.f32 %v16733_v63, %v8074_v55  ;;  %v7396_v13 = vsel %vm7350_vm1, %v7322_v31, %v15326_v33  ;;  %v9931_v51 = vcombine.low %v11346_v25, %v11347_v47  ;;  %v15764_v60 = vrot.slane %v4182_v16, 5  ;;  %v16737_v31 = vld [vmem:[#allocation35_spill] sm:$0xff] }
 0x430   : > { %v4188_v22 = vrot.slane %v4186_v10, 4  ;;  %v10059_v18 = vcombine.low %v4137_v36, %v4147_v61  ;;  %v4156_v28 = vrot.slane %v4155_v34, 4  ;;  %v4170_v40 = vrot.slane %v4168_v5, 5  ;;  %v11349_v5 = vld [vmem:[#allocation2 + $0x158] sm:$0x1]  ;;  %v15778_v61 = vpop.permute.xlu0 %6987 }
 0x431   : > { %v8366_v7 = vadd.f32 %v16735_v1, %v8077_v12  ;;  %v4166_v59 = vrot.slane %v4165_v15, 4  ;;  %v4179_v29 = vor.u32 %v15715_v35, %v15713_v32  ;;  %v4206_v56 = vshll.u32 %v11348_v53, 16  ;;  %v16736_v32 = vld [vmem:[#allocation23_spill] sm:$0xff]  ;;  %v15793_v12 = vpop.permute.xlu1 %6347 }
 0x432   : > { %v8082_v33 = vadd.f32 %v15445_v42, %v15355_v48  ;;  %v4210_v2 = vshrl.u32 %v11348_v53, 16  ;;  %v8599_v16 = vmax.f32 %v8363_v9, 0.0  ;;  %v8085_v10 = vadd.f32 %v15445_v42, %v15364_v14 }
 0x433   : > { %v8600_v55 = vmax.f32 %v8366_v7, 0.0  ;;  %v7583_v36 = vsel %vm7253_vm15, %v10059_v18, %v15398_v37  ;;  %v4189_v34 = vor.u32 %v4188_v22, %v15764_v60  ;;  %v4192_v57 = vshll.u32 %v11349_v5, 16  ;;  %v16740_v5 = vld [vmem:[#allocation24_spill] sm:$0xff] }
 0x434   : > { %v8371_v35 = vadd.f32 %v16736_v32, %v8082_v33  ;;  %v7655_v48 = vsel %vm7350_vm1, %v7583_v36, %v15429_v39  ;;  %v7483_v15 = vsel %vm7415_vm2, %v7396_v13, %v15362_v38  ;;  %v8374_v14 = vadd.f32 %v16737_v31, %v8085_v10  ;;  %v11351_v33 = vld [vmem:[#allocation2 + $0x13c] sm:$0xf]  ;;  %v11352_v36 = vld [vmem:[#allocation2 + $0x164] sm:$0x1]  ;;  %v16741_v32 = vld [vmem:[#allocation41_spill] sm:$0xff] }
 0x435   : > { %v8660_v58 = vpack.c.bf16 %v8600_v55, %v8599_v16  ;;  %v4161_v37 = vsel %vm11813_vm11, %v4156_v28, %v15726_v43  ;;  %v4171_v63 = vsel %vm11813_vm11, %v4166_v59, %v4170_v40  ;;  %v4180_v9 = vrot.slane %v4179_v29, 4  ;;  %v16738_v29 = vld [vmem:[#allocation43_spill] sm:$0xff]  ;;  %v15808_v55 = vpop.permute.xlu0 %7147  ;;  %v16739_v10 = vld [vmem:[#allocation38_spill] sm:$0xff] }
 0x436   : > { %8224 = vmatmul.mubr.bf16.gmra.mrb[120].mxu1 %v7483_v15  ;;  %v7742_v3 = vsel %vm7415_vm2, %v7655_v48, %v15447_v4  ;;  %v15795_v39 = vrot.slane %v4206_v56, 5  ;;  %v4212_v38 = vrot.slane %v4210_v2, 4  ;;  %v8601_v13 = vmax.f32 %v8371_v35, 0.0  ;;  %v11350_v56 = vld [vmem:[#allocation2 + $0x138] sm:$0xf]  ;;  %v16742_v48 = vld [vmem:[#allocation63_spill] sm:$0xff] }
 0x437   : > { %8231 = vmatprep.mubr.bf16.mxu1 %v7742_v3  ;;  %v8602_v25 = vmax.f32 %v8374_v14, 0.0  ;;  %10940 = vmatmul.mubr.msk.bf16.gmra.mrb[100].mxu0 %vm7253_vm15, %v8660_v58  ;;  %v4190_v43 = vrot.slane %v4189_v34, 4  ;;  %v4194_v22 = vrot.slane %v4192_v57, 5  ;;  %v15798_v28 = vrot.slane %v4221_v19, 4  ;;  %v11353_v58 = vld [vmem:[#allocation2 + $0x16c] sm:$0xf] }
 0x438   : > { %v7325_v40 = vsel %vm7253_vm15, %v9931_v51, %v15391_v52  ;;  %v10060_v4 = vcombine.low %v4161_v37, %v4171_v63  ;;  %v15802_v59 = vrot.slane %v4224_v24, 5  ;;  %v9932_v2 = vcombine.low %v11350_v56, %v11351_v33 }
 0x439   : > { %v8661_v1 = vpack.c.bf16 %v8602_v25, %v8601_v13  ;;  %v7398_v53 = vsel %vm7350_vm1, %v7325_v40, %v16738_v29  ;;  %v4203_v16 = vor.u32 %v15730_v50, %v15717_v20  ;;  %v4185_v24 = vsel %vm11813_vm11, %v4180_v9, %v15764_v60  ;;  %v15821_v50 = vpop.permute.xlu1 %6539  ;;  %v16743_v9 = vld [vmem:[#allocation36_spill] sm:$0xff]  ;;  %v16745_v25 = vld [vmem:[#allocation11_spill] sm:$0xff]  ;;  %v15840_v56 = vpop.permute.xlu0 %6797 }
 0x43a   : > { %v7586_v52 = vsel %vm7253_vm15, %v10060_v4, %v16739_v10  ;;  %v4213_v51 = vor.u32 %v4212_v38, %v15795_v39  ;;  %v4216_v34 = vshll.u32 %v11352_v36, 16  ;;  %v4195_v20 = vsel %vm11813_vm11, %v4190_v43, %v4194_v22  ;;  %v16744_v38 = vld [vmem:[#allocation10_spill] sm:$0xff]  ;;  %v16747_v29 = vld [vmem:[#allocation64_spill] sm:$0xff]  ;;  %v16748_v10 = vld [vmem:[#allocation73_spill] sm:$0xff] }
 0x43b   : > { %10943 = vmatprep.mubr.msk.bf16.mxu0 %vm7253_vm15, %v8661_v1  ;;  %v7657_v57 = vsel %vm7350_vm1, %v7586_v52, %v16740_v5  ;;  %v8090_v35 = vadd.f32 %v15445_v42, %v16741_v32  ;;  %v8093_v60 = vadd.f32 %v15445_v42, %v15565_v23  ;;  %v7486_v15 = vsel %vm7415_vm2, %v7398_v53, %v16742_v48  ;;  %v11354_v23 = vld [vmem:[#allocation2 + $0x174] sm:$0xf]  ;;  %v16746_v4 = vld [vmem:[#allocation18_spill] sm:$0xff] }
 0x43c   : > { %v4230_v31 = vshll.u32 %v11353_v58, 16  ;;  %v4234_v14 = vshrl.u32 %v11353_v58, 16  ;;  %v8098_v37 = vadd.f32 %v15445_v42, %v15639_v41  ;;  %v15831_v63 = vrot.slane %v4203_v16, 4  ;;  %v16750_v58 = vld [vmem:[#allocation52_spill] sm:$0xff] }
 0x43d   : > { %v8105_v47 = vpop.f32.mrb[60].mxu1  ;;  %v7745_v3 = vsel %vm7415_vm2, %v7657_v57, %v16743_v9  ;;  %v8379_v13 = vadd.f32 %v16744_v38, %v8090_v35  ;;  %v8382_v43 = vadd.f32 %v16745_v25, %v8093_v60  ;;  %v4245_v22 = vshrl.u32 %v11354_v23, 16  ;;  %v11355_v60 = vld [vmem:[#allocation2 + $0x170] sm:$0x1]  ;;  %v16752_v25 = vld [vmem:[#allocation19_spill] sm:$0xff] }
 0x43e   : > { %v8107_v18 = vpop.f32.mrb[61].mxu1  ;;  %8232 = vmatmul.mubr.bf16.gmra.mrb[124].mxu1 %v7486_v15  ;;  %v4218_v40 = vrot.slane %v4216_v34, 5  ;;  %v8387_v1 = vadd.f32 %v16746_v4, %v8098_v37  ;;  %v7328_v41 = vsel %vm7253_vm15, %v9932_v2, %v16747_v29  ;;  %v10061_v53 = vcombine.low %v4185_v24, %v4195_v20  ;;  %v15852_v24 = vpop.permute.xlu1 %6189  ;;  %v11356_v37 = vld [vmem:[#allocation2 + $0x178] sm:$0xf] }
 0x43f   : > { %v8108_v7 = vpop.f32.mrb[62].mxu1  ;;  %v4214_v18 = vrot.slane %v4213_v51, 4  ;;  %8239 = vmatprep.mubr.bf16.mxu1 %v7745_v3  ;;  %v8603_v33 = vmax.f32 %v8379_v13, 0.0  ;;  %v8604_v16 = vmax.f32 %v8382_v43, 0.0  ;;  %v7400_v52 = vsel %vm7350_vm1, %v7328_v41, %v16748_v10  ;;  %v15874_v3 = vpop.permute.xlu0 %6989  ;;  %v11357_v10 = vld [vmem:[#allocation2 + $0x144] sm:$0xf] }
 0x440   : > { %v8110_v19 = vpop.f32.mrb[63].mxu1  ;;  %v15844_v36 = vrot.slane %v4230_v31, 5  ;;  %v4236_v5 = vrot.slane %v4234_v14, 4  ;;  %v7589_v51 = vsel %vm7253_vm15, %v10061_v53, %v15570_v62  ;;  %v4209_v2 = vsel %vm11813_vm11, %v15831_v63, %v15795_v39  ;;  %v16749_v39 = vld [vmem:[#allocation27_spill] sm:$0xff] }
 0x441   : > { %v4248_v19 = vshll.u32 %v11354_v23, 16  ;;  %v8662_v34 = vpack.c.bf16 %v8604_v16, %v8603_v33  ;;  %v8101_v57 = vadd.f32 %v15445_v42, %v15645_v49  ;;  %v7659_v20 = vsel %vm7350_vm1, %v7589_v51, %v15604_v45 }
 0x442   : > { %v4219_v32 = vsel %vm11813_vm11, %v4214_v18, %v4218_v40  ;;  %v4227_v62 = vor.u32 %v15802_v59, %v15798_v28  ;;  %v8106_v35 = vadd.f32 %v15445_v42, %v8105_v47  ;;  %v4240_v48 = vshll.u32 %v11355_v60, 16  ;;  %v16751_v59 = vld [vmem:[#allocation47_spill] sm:$0xff]  ;;  %v15881_v29 = vpop.permute.xlu1 %6349 }
 0x443   : > { %v7489_v15 = vsel %vm7415_vm2, %v7400_v52, %v16749_v39  ;;  %v8390_v31 = vadd.f32 %v16750_v58, %v8101_v57  ;;  %10944 = vmatmul.mubr.msk.bf16.gmra.mrb[104].mxu0 %vm7253_vm15, %v8662_v34  ;;  %v8109_v49 = vadd.f32 %v15445_v42, %v8108_v7  ;;  %v4237_v45 = vor.u32 %v4236_v5, %v15844_v36  ;;  %v11358_v52 = vld [vmem:[#allocation2 + $0x148] sm:$0xf] }
 0x444   : > { %v7748_v14 = vsel %vm7415_vm2, %v7659_v20, %v15633_v6  ;;  %v4254_v28 = vshll.u32 %v11356_v37, 16  ;;  %v8395_v47 = vadd.f32 %v16751_v59, %v8106_v35  ;;  %v4258_v9 = vshrl.u32 %v11356_v37, 16  ;;  %v16753_v35 = vld [vmem:[#allocation12_spill] sm:$0xff] }
 0x445   : > { %v8605_v38 = vmax.f32 %v8387_v1, 0.0  ;;  %v8606_v13 = vmax.f32 %v8390_v31, 0.0  ;;  %v8398_v43 = vadd.f32 %v16752_v25, %v8109_v49  ;;  %v4247_v23 = vrot.slane %v4245_v22, 4  ;;  %v16754_v59 = vld [vmem:[#allocation76_spill] sm:$0xff] }
 0x446   : > { %8240 = vmatmul.mubr.bf16.gmra.mrb[128].mxu1 %v7489_v15  ;;  %v4250_v18 = vrot.slane %v4248_v19, 5  ;;  %v4228_v40 = vrot.slane %v4227_v62, 4  ;;  %v8607_v53 = vmax.f32 %v8395_v47, 0.0  ;;  %v9933_v5 = vcombine.low %v11357_v10, %v11358_v52  ;;  %v11359_v15 = vld [vmem:[#allocation2 + $0x180] sm:$0xf] }
 0x447   : > { %8247 = vmatprep.mubr.bf16.mxu1 %v7748_v14  ;;  %v8663_v41 = vpack.c.bf16 %v8606_v13, %v8605_v38  ;;  %v8608_v33 = vmax.f32 %v8398_v43, 0.0  ;;  %v10062_v51 = vcombine.low %v4209_v2, %v4219_v32  ;;  %v4238_v22 = vrot.slane %v4237_v45, 4 }
 0x448   : > { %v4242_v19 = vrot.slane %v4240_v48, 5  ;;  %v15886_v57 = vrot.slane %v4254_v28, 5  ;;  %v4260_v20 = vrot.slane %v4258_v9, 4  ;;  %v4269_v58 = vshrl.u32 %v11359_v15, 16 }
 0x449   : > { %10947 = vmatprep.mubr.msk.bf16.mxu0 %vm7253_vm15, %v8663_v41  ;;  %v8664_v62 = vpack.c.bf16 %v8608_v33, %v8607_v53  ;;  %v7331_v31 = vsel %vm7253_vm15, %v9933_v5, %v15563_v44  ;;  %v4272_v32 = vshll.u32 %v11359_v15, 16  ;;  %v7592_v45 = vsel %vm7253_vm15, %v10062_v51, %v15661_v0 }
 0x44a   : > { %v7402_v48 = vsel %vm7350_vm1, %v7331_v31, %v15594_v26  ;;  %v4233_v14 = vsel %vm11813_vm11, %v4228_v40, %v15844_v36  ;;  %v7661_v37 = vsel %vm7350_vm1, %v7592_v45, %v15687_v8  ;;  %v4251_v44 = vor.u32 %v4250_v18, %v4247_v23  ;;  %v11360_v36 = vld [vmem:[#allocation2 + $0x17c] sm:$0x1]  ;;  %v15913_v8 = vpop.permute.xlu1 %6541  ;;  %v11362_v18 = vld [vmem:[#allocation2 + $0x150] sm:$0xf]  ;;  %v11363_v40 = vld [vmem:[#allocation2 + $0x154] sm:$0xf] }
 0x44b   : > { %v15872_v63 = vpop.f32.mrb[80].mxu0  ;;  %10948 = vmatmul.mubr.msk.bf16.gmra.mrb[108].mxu0 %vm7253_vm15, %v8664_v62  ;;  %v4243_v0 = vsel %vm11813_vm11, %v4238_v22, %v4242_v19  ;;  %v4261_v47 = vor.u32 %v4260_v20, %v15886_v57  ;;  %v4264_v9 = vshll.u32 %v11360_v36, 16  ;;  %v7751_v38 = vsel %vm7415_vm2, %v7661_v37, %v15720_v30 }
 0x44c   : > { %v15877_v7 = vpop.f32.mrb[81].mxu0  ;;  %v15905_v28 = vpop.permute.xlu0 %7149  ;;  %v4271_v41 = vrot.slane %v4269_v58, 4  ;;  %v4274_v33 = vrot.slane %v4272_v32, 5  ;;  %v10063_v52 = vcombine.low %v4233_v14, %v4243_v0  ;;  %v4252_v5 = vrot.slane %v4251_v44, 4  ;;  %v11366_v32 = vld [vmem:[#allocation2 + $0x160] sm:$0xf] }
 0x44d   : > { %v15879_v6 = vpop.f32.mrb[82].mxu0  ;;  %v8113_v4 = vpop.f32.mrb[64].mxu1  ;;  %v4262_v30 = vrot.slane %v4261_v47, 4  ;;  %v4266_v51 = vrot.slane %v4264_v9, 5  ;;  %v11367_v0 = vld [vmem:[#allocation2 + $0x190] sm:$0xf] }
 0x44e   : > { %v8114_v16 = vadd.f32 %v15445_v42, %v8113_v4  ;;  %v15884_v1 = vpop.f32.mrb[83].mxu0  ;;  %v8115_v34 = vpop.f32.mrb[65].mxu1  ;;  %v9934_v4 = vcombine.low %v11362_v18, %v11363_v40  ;;  %v7595_v62 = vsel %vm7253_vm15, %v10063_v52, %v15753_v27  ;;  %v4275_v58 = vor.u32 %v4274_v33, %v4271_v41  ;;  %v11369_v41 = vld [vmem:[#allocation2 + $0x16c] sm:$0xf] }
 0x44f   : > { %v8116_v39 = vpop.f32.mrb[66].mxu1  ;;  %v4267_v27 = vsel %vm11813_vm11, %v4262_v30, %v4266_v51  ;;  %v4302_v47 = vshll.u32 %v11367_v0, 16  ;;  %v4306_v36 = vshrl.u32 %v11367_v0, 16 }
 0x450   : > { %v8403_v60 = vadd.f32 %v16753_v35, %v8114_v16  ;;  %v8117_v49 = vadd.f32 %v15445_v42, %v8116_v39  ;;  %v8118_v2 = vpop.f32.mrb[67].mxu1  ;;  %v7492_v42 = vsel %vm7415_vm2, %v7402_v48, %v15621_v21  ;;  %v11361_v21 = vld [vmem:[#allocation2 + $0x184] sm:$0xf]  ;;  %v16755_v16 = vld [vmem:[#allocation34_spill] sm:$0xff] }
 0x451   : > { %8248 = vmatmul.mubr.bf16.gmra.mrb[132].mxu1 %v7492_v42  ;;  %v4278_v13 = vshll.u32 %v11361_v21, 16  ;;  %v4282_v25 = vshrl.u32 %v11361_v21, 16  ;;  %v7334_v10 = vsel %vm7253_vm15, %v9934_v4, %v16755_v16  ;;  %v6800_v34 = vpop.permute.xlu0 %6799  ;;  %v4304_v18 = vrot.slane %v4302_v47, 5  ;;  %v11368_v4 = vld [vmem:[#allocation2 + $0x168] sm:$0xf] }
 0x452   : > { %v8406_v26 = vadd.f32 %v16754_v59, %v8117_v49  ;;  %8255 = vmatprep.mubr.bf16.mxu1 %v7751_v38  ;;  %v8609_v43 = vmax.f32 %v8403_v60, 0.0  ;;  %v7404_v20 = vsel %vm7350_vm1, %v7334_v10, %v15702_v54  ;;  %v7663_v60 = vsel %vm7350_vm1, %v7595_v62, %v15778_v61  ;;  %v11364_v49 = vld [vmem:[#allocation2 + $0x188] sm:$0x1]  ;;  %v11365_v61 = vld [vmem:[#allocation2 + $0x15c] sm:$0xf] }
 0x453   : > { %v4280_v22 = vrot.slane %v4278_v13, 5  ;;  %v4284_v19 = vrot.slane %v4282_v25, 4  ;;  %v15922_v35 = vpop.permute.xlu1 %6191  ;;  %v7495_v39 = vsel %vm7415_vm2, %v7404_v20, %v15728_v11  ;;  %v7754_v15 = vsel %vm7415_vm2, %v7663_v60, %v15808_v55  ;;  %v16756_v11 = vld [vmem:[#allocation70_spill] sm:$0xff]  ;;  %v11370_v10 = vld [vmem:[#allocation2 + $0x194] sm:$0x1] }
 0x454   : > { %v8610_v23 = vmax.f32 %v8406_v26, 0.0  ;;  %v4257_v54 = vsel %vm11813_vm11, %v4252_v5, %v15886_v57  ;;  %v4288_v2 = vshll.u32 %v11364_v49, 16  ;;  %v9935_v48 = vcombine.low %v11365_v61, %v11366_v32  ;;  %v16757_v49 = vld [vmem:[#allocation51_spill] sm:$0xff] }
 0x455   : > { %v4285_v31 = vor.u32 %v4284_v19, %v4280_v22  ;;  %v4293_v45 = vshrl.u32 %v16756_v11, 16  ;;  %v6992_v14 = vpop.permute.xlu0 %6991  ;;  %v4296_v55 = vshll.u32 %v16756_v11, 16  ;;  %v10064_v42 = vcombine.low %v4257_v54, %v4267_v27  ;;  %v11372_v54 = vld [vmem:[#allocation2 + $0x174] sm:$0xf] }
 0x456   : > { %v8665_v53 = vpack.c.bf16 %v8610_v23, %v8609_v43  ;;  %v7337_v37 = vsel %vm7253_vm15, %v9935_v48, %v15766_v17  ;;  %v4276_v57 = vrot.slane %v4275_v58, 4  ;;  %v4290_v26 = vrot.slane %v4288_v2, 5 }
 0x457   : > { %v6352_v44 = vpop.permute.xlu1 %6351  ;;  %v4286_v59 = vrot.slane %v4285_v31, 4  ;;  %v7406_v9 = vsel %vm7350_vm1, %v7337_v37, %v15793_v12  ;;  %v7598_v38 = vsel %vm7253_vm15, %v10064_v42, %v15840_v56  ;;  %v4295_v13 = vrot.slane %v4293_v45, 4  ;;  %v16758_v42 = vld [vmem:[#allocation74_spill] sm:$0xff] }
 0x458   : > { %10951 = vmatprep.mubr.msk.bf16.mxu0 %vm7253_vm15, %v8665_v53  ;;  %v7665_v21 = vsel %vm7350_vm1, %v7598_v38, %v15874_v3  ;;  %v7498_v17 = vsel %vm7415_vm2, %v7406_v9, %v15821_v50  ;;  %v4298_v25 = vrot.slane %v4296_v55, 5  ;;  %v4281_v23 = vsel %vm11813_vm11, %v4276_v57, %v4280_v22  ;;  %v16759_v9 = vld [vmem:[#allocation67_spill] sm:$0xff] }
 0x459   : > { %8256 = vmatmul.mubr.bf16.gmra.mrb[136].mxu1 %v7495_v39  ;;  %v7757_v43 = vsel %vm7415_vm2, %v7665_v21, %v15905_v28  ;;  %v4291_v12 = vsel %vm11813_vm11, %v4286_v59, %v4290_v26  ;;  %v4308_v40 = vrot.slane %v4306_v36, 4  ;;  %v9936_v50 = vcombine.low %v11368_v4, %v11369_v41  ;;  %v11374_v21 = vld [vmem:[#allocation2 + $0x180] sm:$0xf] }
 0x45a   : > { %8263 = vmatprep.mubr.bf16.mxu1 %v7754_v15  ;;  %v10065_v53 = vcombine.low %v4281_v23, %v4291_v12  ;;  %v4299_v16 = vor.u32 %v4298_v25, %v4295_v13  ;;  %v4312_v52 = vshll.u32 %v11370_v10, 16  ;;  %v4317_v38 = vshrl.u32 %v16759_v9, 16 }
 0x45b   : > { %v6544_v3 = vpop.permute.xlu1 %6543  ;;  %v7340_v33 = vsel %vm7253_vm15, %v9936_v50, %v15852_v24  ;;  %v4309_v28 = vor.u32 %v4308_v40, %v4304_v18  ;;  %v11376_v40 = vld [vmem:[#allocation2 + $0x19c] sm:$0xf] }
 0x45c   : > { %v7408_v5 = vsel %vm7350_vm1, %v7340_v33, %v15881_v29  ;;  %v7601_v30 = vsel %vm7253_vm15, %v10065_v53, %v6800_v34  ;;  %v4300_v24 = vrot.slane %v4299_v16, 4  ;;  %v4314_v39 = vrot.slane %v4312_v52, 5  ;;  %v15965_v29 = vld [vmem:[%s16325_s4] ss:$0 sm:$0xff] }
 0x45d   : > { %v7667_v51 = vsel %vm7350_vm1, %v7601_v30, %v6992_v14  ;;  %v7501_v22 = vsel %vm7415_vm2, %v7408_v5, %v15913_v8  ;;  %v4310_v60 = vrot.slane %v4309_v28, 4  ;;  %v11373_v8 = vld [vmem:[#allocation2 + $0x178] sm:$0xf]  ;;  %v4319_v53 = vrot.slane %v4317_v38, 4 }
 0x45e   : > { %v9937_v27 = vcombine.low %v11372_v54, %v11373_v8  ;;  %v4305_v11 = vsel %vm11813_vm11, %v4300_v24, %v4304_v18 }
 0x45f   : > { %v4315_v45 = vsel %vm11813_vm11, %v4310_v60, %v4314_v39 }
 0x460   : > { %v7152_v56 = vpop.permute.xlu0 %7151  ;;  %v7343_v48 = vsel %vm7253_vm15, %v9937_v27, %v15922_v35  ;;  %v10066_v26 = vcombine.low %v4305_v11, %v4315_v45 }
 0x461   : > { %8264 = vmatmul.mubr.bf16.gmra.mrb[140].mxu1 %v7498_v17  ;;  %v7760_v62 = vsel %vm7415_vm2, %v7667_v51, %v7152_v56  ;;  %v7410_v55 = vsel %vm7350_vm1, %v7343_v48, %v6352_v44  ;;  %v11375_v17 = vld [vmem:[#allocation2 + $0x184] sm:$0xf]  ;;  %v16760_v56 = vld [vmem:[#allocation45_spill] sm:$0xff] }
 0x462   : > { %8271 = vmatprep.mubr.bf16.mxu1 %v7757_v43  ;;  %v7504_v59 = vsel %vm7415_vm2, %v7410_v55, %v6544_v3  ;;  %v9938_v13 = vcombine.low %v11374_v21, %v11375_v17  ;;  %v4320_v43 = vshll.u32 %v16759_v9, 16  ;;  %v4326_v18 = vshll.u32 %v16760_v56, 16 }
 0x463   : > { %v6194_v20 = vpop.permute.xlu1 %6193  ;;  %v4330_v3 = vshrl.u32 %v11376_v40, 16  ;;  %v16764_v40 = vld [vmem:[#allocation82_spill] sm:$0xff] }
 0x464   : > { %v6802_v19 = vpop.permute.xlu0 %6801  ;;  %v7346_v4 = vsel %vm7253_vm15, %v9938_v13, %v6194_v20  ;;  %v4322_v33 = vrot.slane %v4320_v43, 5  ;;  %v4328_v16 = vrot.slane %v4326_v18, 5 }
 0x465   : > { %v7604_v35 = vsel %vm7253_vm15, %v10066_v26, %v6802_v19  ;;  %v4332_v28 = vrot.slane %v4330_v3, 4  ;;  %v11377_v19 = vld [vmem:[#allocation2 + $0x1a0] sm:$0x1]  ;;  %v11379_v26 = vld [vmem:[#allocation2 + $0x190] sm:$0xf] }
 0x466   : > { %v4323_v51 = vor.u32 %v4322_v33, %v4319_v53  ;;  %v4336_v20 = vshll.u32 %v11377_v19, 16 }
 0x467   : > { %v6354_v37 = vpop.permute.xlu1 %6353 }
 0x468   : > { %v6994_v14 = vpop.permute.xlu0 %6993  ;;  %v7412_v41 = vsel %vm7350_vm1, %v7346_v4, %v6354_v37 }
 0x469   : > { %8272 = vmatmul.mubr.bf16.gmra.mrb[144].mxu1 %v7501_v22  ;;  %v7669_v25 = vsel %vm7350_vm1, %v7604_v35, %v6994_v14  ;;  %v4333_v22 = vor.u32 %v4332_v28, %v4328_v16 }
 0x46a   : > { %8279 = vmatprep.mubr.bf16.mxu1 %v7760_v62 }
 0x46b   : > { %v6546_v23 = vpop.permute.xlu1 %6545 }
 0x46c   : > { %v7507_v50 = vsel %vm7415_vm2, %v7412_v41, %v6546_v23  ;;  %v16763_v23 = vld [vmem:[#allocation78_spill] sm:$0xff] }
 0x46d   : > { %v8121_v15 = vpop.f32.mrb[68].mxu1 }
 0x46e   : > { %v8122_v34 = vadd.f32 %v15965_v29, %v8121_v15  ;;  %v8123_v58 = vpop.f32.mrb[69].mxu1 }
 0x46f   : > { %v8124_v31 = vpop.f32.mrb[70].mxu1  ;;  %v7154_v44 = vpop.permute.xlu0 %7153  ;;  %v16761_v58 = vld [vmem:[#allocation81_spill] sm:$0xff] }
 0x470   : > { %v8411_v2 = vadd.f32 %v16757_v49, %v8122_v34  ;;  %v8125_v61 = vadd.f32 %v15965_v29, %v8124_v31  ;;  %v8126_v32 = vpop.f32.mrb[71].mxu1  ;;  %v7763_v12 = vsel %vm7415_vm2, %v7669_v25, %v7154_v44  ;;  %v4324_v31 = vrot.slane %v4323_v51, 4 }
 0x471   : > { %8280 = vmatmul.mubr.bf16.gmra.mrb[148].mxu1 %v7504_v59  ;;  %v4334_v49 = vrot.slane %v4333_v22, 4  ;;  %v11378_v59 = vld [vmem:[#allocation2 + $0x18c] sm:$0xf] }
 0x472   : > { %v8414_v57 = vadd.f32 %v16758_v42, %v8125_v61  ;;  %v8611_v0 = vmax.f32 %v8411_v2, 0.0  ;;  %8287 = vmatprep.mubr.bf16.mxu1 %v7763_v12  ;;  %v4338_v2 = vrot.slane %v4336_v20, 5  ;;  %v16762_v61 = vld [vmem:[#allocation83_spill] sm:$0xff]  ;;  %v4329_v14 = vsel %vm11813_vm11, %v4324_v31, %v4328_v16  ;;  %v16765_v20 = vld [vmem:[#allocation85_spill] sm:$0xff] }
 0x474   : > { %v8612_v47 = vmax.f32 %v8414_v57, 0.0  ;;  %v4339_v55 = vsel %vm11813_vm11, %v4334_v49, %v4338_v2 }
 0x475   : > { %v6804_v34 = vpop.permute.xlu0 %6803  ;;  %v10067_v57 = vcombine.low %v4329_v14, %v4339_v55 }
 0x476   : > { %v8666_v36 = vpack.c.bf16 %v8612_v47, %v8611_v0  ;;  %v9939_v0 = vcombine.low %v11378_v59, %v11379_v26 }
 0x477   : > { %v6196_v39 = vpop.permute.xlu1 %6195  ;;  %v7607_v47 = vsel %vm7253_vm15, %v10067_v57, %v6804_v34 }
 0x478   : > { %10952 = vmatmul.mubr.msk.bf16.gmra.mrb[112].mxu0 %vm7253_vm15, %v8666_v36  ;;  %v7349_v36 = vsel %vm7253_vm15, %v9939_v0, %v6196_v39 }
 0x479   : > { %8288 = vmatmul.mubr.bf16.gmra.mrb[152].mxu1 %v7507_v50  ;;  %v6996_v37 = vpop.permute.xlu0 %6995 }
 0x47a   : > { %v7671_v9 = vsel %vm7350_vm1, %v7607_v47, %v6996_v37  ;;  %v16769_v47 = vld [vmem:[#allocation14_spill] sm:$0xff] }
 0x47b   : > { %v6356_v45 = vpop.permute.xlu1 %6355 }
 0x47c   : > { %v7414_v21 = vsel %vm7350_vm1, %v7349_v36, %v6356_v45  ;;  %v16768_v45 = vld [vmem:[#allocation86_spill] sm:$0xff] }
 0x47d   : > { %v15989_v10 = vpop.f32.mrb[84].mxu0 }
 0x47e   : > { %v15991_v52 = vpop.f32.mrb[85].mxu0 }
 0x47f   : > { %v15993_v5 = vpop.f32.mrb[86].mxu0  ;;  %v8129_v30 = vpop.f32.mrb[72].mxu1 }
 0x480   : > { %v8130_v62 = vadd.f32 %v15965_v29, %v8129_v30  ;;  %v15996_v24 = vpop.f32.mrb[87].mxu0  ;;  %v8131_v60 = vpop.f32.mrb[73].mxu1 }
 0x481   : > { %v8132_v15 = vpop.f32.mrb[74].mxu1  ;;  %v6548_v35 = vpop.permute.xlu1 %6547 }
 0x482   : > { %v8419_v54 = vadd.f32 %v16761_v58, %v8130_v62  ;;  %v8133_v8 = vadd.f32 %v15965_v29, %v8132_v15  ;;  %v8134_v27 = vpop.f32.mrb[75].mxu1  ;;  %v7510_v17 = vsel %vm7415_vm2, %v7414_v21, %v6548_v35  ;;  %v16766_v15 = vld [vmem:[#allocation50_spill] sm:$0xff] }
 0x484   : > { %v8422_v32 = vadd.f32 %v16762_v61, %v8133_v8  ;;  %v8613_v48 = vmax.f32 %v8419_v54, 0.0  ;;  %v16767_v61 = vld [vmem:[#allocation84_spill] sm:$0xff] }
 0x486   : > { %v8614_v11 = vmax.f32 %v8422_v32, 0.0 }
 0x488   : > { %v8667_v42 = vpack.c.bf16 %v8614_v11, %v8613_v48 }
 0x489   : > { %v7156_v38 = vpop.permute.xlu0 %7155 }
 0x48a   : > { %10955 = vmatprep.mubr.msk.bf16.mxu0 %vm7253_vm15, %v8667_v42  ;;  %v7766_v46 = vsel %vm7415_vm2, %v7671_v9, %v7156_v38  ;;  %v16770_v38 = vld [vmem:[#allocation88_spill] sm:$0xff] }
 0x48b   : > { %8295 = vmatprep.mubr.bf16.mxu1 %v7766_v46 }
 0x48c   : > { %8296 = vmatmul.mubr.bf16.gmra.mrb[156].mxu1 %v7510_v17 }
 0x495   : > { %v8137_v13 = vpop.f32.mrb[76].mxu1 }
 0x496   : > { %v8138_v25 = vadd.f32 %v15965_v29, %v8137_v13  ;;  %v8139_v44 = vpop.f32.mrb[77].mxu1 }
 0x497   : > { %v8140_v43 = vpop.f32.mrb[78].mxu1 }
 0x498   : > { %v8427_v12 = vadd.f32 %v16763_v23, %v8138_v25  ;;  %v8141_v56 = vadd.f32 %v15965_v29, %v8140_v43  ;;  %v8142_v18 = vpop.f32.mrb[79].mxu1 }
 0x49a   : > { %v8430_v3 = vadd.f32 %v16764_v40, %v8141_v56  ;;  %v8615_v4 = vmax.f32 %v8427_v12, 0.0  ;;  %v16771_v12 = vld [vmem:[#allocation15_spill] sm:$0xff] }
 0x49c   : > { %v8616_v41 = vmax.f32 %v8430_v3, 0.0  ;;  %v16772_v3 = vld [vmem:[#allocation87_spill] sm:$0xff] }
 0x49e   : > { %v8668_v50 = vpack.c.bf16 %v8616_v41, %v8615_v4 }
 0x4a0   : > { %10956 = vmatmul.mubr.msk.bf16.gmra.mrb[116].mxu0 %vm7253_vm15, %v8668_v50 }
 0x4a3   : > { %v16017_v53 = vpop.f32.mrb[88].mxu0 }
 0x4a4   : > { %v16019_v33 = vpop.f32.mrb[89].mxu0 }
 0x4a5   : > { %v16021_v16 = vpop.f32.mrb[90].mxu0  ;;  %v8145_v28 = vpop.f32.mrb[80].mxu1 }
 0x4a6   : > { %v16023_v30 = vpop.f32.mrb[91].mxu0  ;;  %v8146_v51 = vadd.f32 %v15965_v29, %v8145_v28  ;;  %v8147_v22 = vpop.f32.mrb[81].mxu1 }
 0x4a7   : > { %v8148_v19 = vpop.f32.mrb[82].mxu1 }
 0x4a8   : > { %v8435_v62 = vadd.f32 %v16765_v20, %v8146_v51  ;;  %v8149_v60 = vadd.f32 %v15965_v29, %v8148_v19  ;;  %v8150_v39 = vpop.f32.mrb[83].mxu1 }
 0x4aa   : > { %v8438_v34 = vadd.f32 %v16766_v15, %v8149_v60  ;;  %v8617_v58 = vmax.f32 %v8435_v62, 0.0  ;;  %v16773_v62 = vld [vmem:[#allocation53_spill] sm:$0xff] }
 0x4ac   : > { %v8618_v54 = vmax.f32 %v8438_v34, 0.0  ;;  %v16774_v34 = vld [vmem:[#allocation90_spill] sm:$0xff] }
 0x4ae   : > { %v8669_v8 = vpack.c.bf16 %v8618_v54, %v8617_v58 }
 0x4b0   : > { %10959 = vmatprep.mubr.msk.bf16.mxu0 %vm7253_vm15, %v8669_v8 }
 0x4b3   : > { %v8153_v27 = vpop.f32.mrb[84].mxu1 }
 0x4b4   : > { %v8154_v31 = vadd.f32 %v15965_v29, %v8153_v27  ;;  %v8155_v49 = vpop.f32.mrb[85].mxu1 }
 0x4b5   : > { %v8156_v2 = vpop.f32.mrb[86].mxu1 }
 0x4b6   : > { %v8443_v32 = vadd.f32 %v16767_v61, %v8154_v31  ;;  %v8157_v48 = vadd.f32 %v15965_v29, %v8156_v2  ;;  %v8158_v11 = vpop.f32.mrb[87].mxu1 }
 0x4b8   : > { %v8446_v14 = vadd.f32 %v16768_v45, %v8157_v48  ;;  %v8619_v55 = vmax.f32 %v8443_v32, 0.0 }
 0x4ba   : > { %v8620_v37 = vmax.f32 %v8446_v14, 0.0  ;;  %v16775_v14 = vld [vmem:[#allocation89_spill] sm:$0xff] }
 0x4bc   : > { %v8670_v42 = vpack.c.bf16 %v8620_v37, %v8619_v55 }
 0x4be   : > { %10960 = vmatmul.mubr.msk.bf16.gmra.mrb[120].mxu0 %vm7253_vm15, %v8670_v42 }
 0x4c0   : > { %v8161_v57 = vpop.f32.mrb[88].mxu1 }
 0x4c1   : > { %v8162_v59 = vadd.f32 %v15965_v29, %v8161_v57  ;;  %v8163_v26 = vpop.f32.mrb[89].mxu1  ;;  %v16776_v57 = vld [vmem:[#allocation54_spill] sm:$0xff] }
 0x4c2   : > { %v8164_v0 = vpop.f32.mrb[90].mxu1 }
 0x4c3   : > { %v8451_v35 = vadd.f32 %v16769_v47, %v8162_v59  ;;  %v8165_v36 = vadd.f32 %v15965_v29, %v8164_v0  ;;  %v8166_v9 = vpop.f32.mrb[91].mxu1 }
 0x4c5   : > { %v8454_v21 = vadd.f32 %v16770_v38, %v8165_v36  ;;  %v8621_v46 = vmax.f32 %v8451_v35, 0.0 }
 0x4c7   : > { %v8622_v17 = vmax.f32 %v8454_v21, 0.0  ;;  %v16777_v21 = vld [vmem:[#allocation92_spill] sm:$0xff] }
 0x4c9   : > { %v8671_v13 = vpack.c.bf16 %v8622_v17, %v8621_v46  ;;  %v8169_v25 = vpop.f32.mrb[92].mxu1 }
 0x4ca   : > { %v8170_v44 = vadd.f32 %v15965_v29, %v8169_v25  ;;  %v8171_v43 = vpop.f32.mrb[93].mxu1  ;;  %v16778_v25 = vld [vmem:[#allocation96_spill] sm:$0xff] }
 0x4cb   : > { %10963 = vmatprep.mubr.msk.bf16.mxu0 %vm7253_vm15, %v8671_v13  ;;  %v8172_v23 = vpop.f32.mrb[94].mxu1 }
 0x4cc   : > { %v8459_v56 = vadd.f32 %v16771_v12, %v8170_v44  ;;  %v8173_v18 = vadd.f32 %v15965_v29, %v8172_v23  ;;  %v8174_v40 = vpop.f32.mrb[95].mxu1 }
 0x4ce   : > { %v8462_v4 = vadd.f32 %v16772_v3, %v8173_v18  ;;  %v8623_v41 = vmax.f32 %v8459_v56, 0.0 }
 0x4d0   : > { %v8624_v50 = vmax.f32 %v8462_v4, 0.0  ;;  %v16779_v4 = vld [vmem:[#allocation91_spill] sm:$0xff] }
 0x4d2   : > { %v8672_v28 = vpack.c.bf16 %v8624_v50, %v8623_v41 }
 0x4d4   : > { %10964 = vmatmul.mubr.msk.bf16.gmra.mrb[124].mxu0 %vm7253_vm15, %v8672_v28 }
 0x4d7   : > { %v8177_v51 = vpop.f32.mrb[96].mxu1 }
 0x4d8   : > { %v8178_v22 = vadd.f32 %v15965_v29, %v8177_v51  ;;  %v8179_v19 = vpop.f32.mrb[97].mxu1  ;;  %v16780_v51 = vld [vmem:[#allocation94_spill] sm:$0xff] }
 0x4d9   : > { %v8180_v20 = vpop.f32.mrb[98].mxu1  ;;  %v16075_v19 = vld [vmem:[%s16327_s6] ss:$0 sm:$0xff] }
 0x4da   : > { %v8467_v60 = vadd.f32 %v16773_v62, %v8178_v22  ;;  %v8181_v39 = vadd.f32 %v15965_v29, %v8180_v20  ;;  %v8182_v15 = vpop.f32.mrb[99].mxu1 }
 0x4db   : > { %v11381_v15 = vld [vmem:[%s11669_s15] sm:$0xff]  }
 0x4dc   : > { %v8470_v58 = vadd.f32 %v16774_v34, %v8181_v39  ;;  %v8625_v8 = vmax.f32 %v8467_v60, 0.0  ;;  %v11380_v60 = vld [vmem:[%s11669_s15 + $0x8] sm:$0xff]   ;;  %v9097_v34 = vunpack.c.l.bf16 %v11381_v15 }
 0x4dd   : > { %v16049_v54 = vpop.f32.mrb[92].mxu0  ;;  %v9099_v39 = vunpack.c.l.bf16 %v11380_v60 }
 0x4de   : > { %v8626_v27 = vmax.f32 %v8470_v58, 0.0  ;;  %v16051_v31 = vpop.f32.mrb[93].mxu0 }
 0x4df   : > { %v8185_v49 = vpop.f32.mrb[100].mxu1  ;;  %v16053_v2 = vpop.f32.mrb[94].mxu0 }
 0x4e0   : > { %v8673_v61 = vpack.c.bf16 %v8626_v27, %v8625_v8  ;;  %v8186_v32 = vadd.f32 %v15965_v29, %v8185_v49  ;;  %v8187_v48 = vpop.f32.mrb[101].mxu1  ;;  %v16056_v11 = vpop.f32.mrb[95].mxu0 }
 0x4e1   : > { %v8188_v45 = vpop.f32.mrb[102].mxu1 }
 0x4e2   : > { %v8475_v55 = vadd.f32 %v16775_v14, %v8186_v32  ;;  %v8189_v37 = vadd.f32 %v15965_v29, %v8188_v45  ;;  %v8190_v42 = vpop.f32.mrb[103].mxu1  ;;  %10967 = vmatprep.mubr.msk.bf16.mxu0 %vm7253_vm15, %v8673_v61  ;;  %v9100_v45 = vunpack.c.h.bf16 %v11380_v60  ;;  %v9098_v14 = vunpack.c.h.bf16 %v11381_v15  ;;  %v16784_v60 = vld [vmem:[#allocation99_spill] sm:$0xff] }
 0x4e4   : > { %v8478_v59 = vadd.f32 %v16776_v57, %v8189_v37  ;;  %v8627_v26 = vmax.f32 %v8475_v55, 0.0  ;;  %v16781_v57 = vld [vmem:[#allocation39_spill] sm:$0xff] }
 0x4e6   : > { %v8628_v0 = vmax.f32 %v8478_v59, 0.0 }
 0x4e7   : > { %v8193_v47 = vpop.f32.mrb[104].mxu1 }
 0x4e8   : > { %v8674_v35 = vpack.c.bf16 %v8628_v0, %v8627_v26  ;;  %v8194_v36 = vadd.f32 %v15965_v29, %v8193_v47  ;;  %v8195_v9 = vpop.f32.mrb[105].mxu1 }
 0x4e9   : > { %v8196_v38 = vpop.f32.mrb[106].mxu1 }
 0x4ea   : > { %v8483_v46 = vadd.f32 %v16777_v21, %v8194_v36  ;;  %v8197_v17 = vadd.f32 %v15965_v29, %v8196_v38  ;;  %v8198_v13 = vpop.f32.mrb[107].mxu1  ;;  %10968 = vmatmul.mubr.msk.bf16.gmra.mrb[128].mxu0 %vm7253_vm15, %v8674_v35  ;;  %v16782_v21 = vld [vmem:[#allocation72_spill] sm:$0xff] }
 0x4ec   : > { %v8486_v44 = vadd.f32 %v16778_v25, %v8197_v17  ;;  %v8629_v43 = vmax.f32 %v8483_v46, 0.0 }
 0x4ee   : > { %v8630_v23 = vmax.f32 %v8486_v44, 0.0 }
 0x4ef   : > { %v8201_v12 = vpop.f32.mrb[108].mxu1 }
 0x4f0   : > { %v8675_v56 = vpack.c.bf16 %v8630_v23, %v8629_v43  ;;  %v8202_v18 = vadd.f32 %v15965_v29, %v8201_v12  ;;  %v8203_v40 = vpop.f32.mrb[109].mxu1 }
 0x4f1   : > { %v8204_v3 = vpop.f32.mrb[110].mxu1 }
 0x4f2   : > { %v8491_v41 = vadd.f32 %v16779_v4, %v8202_v18  ;;  %v8205_v50 = vadd.f32 %v15965_v29, %v8204_v3  ;;  %v8206_v28 = vpop.f32.mrb[111].mxu1  ;;  %10971 = vmatprep.mubr.msk.bf16.mxu0 %vm7253_vm15, %v8675_v56 }
 0x4f4   : > { %v8494_v22 = vadd.f32 %v16780_v51, %v8205_v50  ;;  %v8631_v20 = vmax.f32 %v8491_v41, 0.0  ;;  %v16783_v51 = vld [vmem:[#allocation98_spill] sm:$0xff] }
 0x4f6   : > { %v8632_v62 = vmax.f32 %v8494_v22, 0.0  ;;  %v10937_v8 = vpop.f32.mrb[96].mxu0 }
 0x4f7   : > { %v8851_v32 = vadd.f32 %v10937_v8, %v16075_v19  ;;  %v8842_v48 = vpop.f32.mrb[97].mxu0  ;;  %v11382_v8 = vld [vmem:[%s11669_s15 + $0x18] sm:$0xff]  }
 0x4f8   : > { %v8676_v27 = vpack.c.bf16 %v8632_v62, %v8631_v20  ;;  %v8843_v37 = vadd.f32 %v16075_v19, %v8842_v48  ;;  %v10938_v42 = vpop.f32.mrb[98].mxu0 }
 0x4f9   : > { %v8209_v58 = vpop.f32.mrb[112].mxu1  ;;  %v9163_v47 = vadd.f32 %v9099_v39, %v8851_v32  ;;  %v8854_v35 = vadd.f32 %v10938_v42, %v16075_v19  ;;  %v8845_v36 = vpop.f32.mrb[99].mxu0 }
 0x4fa   : > { %v8210_v49 = vadd.f32 %v15965_v29, %v8209_v58  ;;  %v8211_v61 = vpop.f32.mrb[113].mxu1  ;;  %10972 = vmatmul.mubr.msk.bf16.gmra.mrb[132].mxu0 %vm7253_vm15, %v8676_v27  ;;  %v9161_v9 = vadd.f32 %v9097_v34, %v8843_v37  ;;  %v8846_v38 = vadd.f32 %v16075_v19, %v8845_v36  ;;  %v9103_v27 = vunpack.c.l.bf16 %v11382_v8 }
 0x4fb   : > { %v8212_v55 = vpop.f32.mrb[114].mxu1  ;;  %v9164_v17 = vadd.f32 %v9100_v45, %v8854_v35  ;;  %v9227_v43 = vmax.f32 %v9163_v47, 0.0  ;;  %v11383_v45 = vld [vmem:[%s11669_s15 + $0x10] sm:$0xff]  }
 0x4fc   : > { %v8499_v59 = vadd.f32 %v16781_v57, %v8210_v49  ;;  %v8213_v26 = vadd.f32 %v15965_v29, %v8212_v55  ;;  %v8214_v0 = vpop.f32.mrb[115].mxu1  ;;  %v9162_v13 = vadd.f32 %v9098_v14, %v8846_v38  ;;  %v9225_v56 = vmax.f32 %v9161_v9, 0.0 }
 0x4fd   : > { %v9228_v23 = vmax.f32 %v9164_v17, 0.0  ;;  %v9101_v14 = vunpack.c.l.bf16 %v11383_v45  ;;  %v9104_v57 = vunpack.c.h.bf16 %v11382_v8  ;;  %v9102_v9 = vunpack.c.h.bf16 %v11383_v45  ;;  %v16786_v17 = vld [vmem:[#allocation31_spill] sm:$0xff] }
 0x4fe   : > { %v8502_v46 = vadd.f32 %v16782_v21, %v8213_v26  ;;  %v8633_v25 = vmax.f32 %v8499_v59, 0.0  ;;  %v9226_v18 = vmax.f32 %v9162_v13, 0.0  ;;  %v16785_v59 = vld [vmem:[#allocation46_spill] sm:$0xff] }
 0x4ff   : > { %v10492_v41 = vpack.c.bf16 %v9228_v23, %v9227_v43 }
 0x500   : > { %v8634_v44 = vmax.f32 %v8502_v46, 0.0  ;;  %v10487_v28 = vpack.c.bf16 %v9226_v18, %v9225_v56 }
 0x501   : > { %v8217_v12 = vpop.f32.mrb[116].mxu1  ;;  %10644 = vst [vmem:[%s16094_s29 + $0x8] sm:$0xff] %v10492_v41  }
 0x502   : > { %v8677_v40 = vpack.c.bf16 %v8634_v44, %v8633_v25  ;;  %v8218_v3 = vadd.f32 %v15965_v29, %v8217_v12  ;;  %v8219_v4 = vpop.f32.mrb[117].mxu1  ;;  %10488 = vst [vmem:[%s16094_s29] sm:$0xff] %v10487_v28  }
 0x503   : > { %v8220_v50 = vpop.f32.mrb[118].mxu1 }
 0x504   : > { %v8507_v22 = vadd.f32 %v16783_v51, %v8218_v3  ;;  %v8221_v20 = vadd.f32 %v15965_v29, %v8220_v50  ;;  %v8222_v62 = vpop.f32.mrb[119].mxu1  ;;  %10975 = vmatprep.mubr.msk.bf16.mxu0 %vm7253_vm15, %v8677_v40 }
 0x505   : > { %v16787_v62 = vld [vmem:[#allocation75_spill] sm:$0xff] }
 0x506   : > { %v8510_v39 = vadd.f32 %v16784_v60, %v8221_v20  ;;  %v8635_v15 = vmax.f32 %v8507_v22, 0.0 }
 0x508   : > { %v8636_v34 = vmax.f32 %v8510_v39, 0.0 }
 0x509   : > { %v8225_v58 = vpop.f32.mrb[120].mxu1 }
 0x50a   : > { %v8678_v49 = vpack.c.bf16 %v8636_v34, %v8635_v15  ;;  %v8226_v61 = vadd.f32 %v15965_v29, %v8225_v58  ;;  %v8227_v32 = vpop.f32.mrb[121].mxu1  ;;  %v10941_v48 = vpop.f32.mrb[100].mxu0  ;;  %v16788_v58 = vld [vmem:[#allocation30_spill] sm:$0xff] }
 0x50b   : > { %v8228_v55 = vpop.f32.mrb[122].mxu1  ;;  %v8867_v37 = vadd.f32 %v10941_v48, %v16075_v19  ;;  %v8858_v42 = vpop.f32.mrb[101].mxu0  ;;  %v11385_v32 = vld [vmem:[%s11669_s15 + $0x20] sm:$0xff]  }
 0x50c   : > { %v8515_v26 = vadd.f32 %v16785_v59, %v8226_v61  ;;  %v8229_v0 = vadd.f32 %v15965_v29, %v8228_v55  ;;  %v8230_v47 = vpop.f32.mrb[123].mxu1  ;;  %10976 = vmatmul.mubr.msk.bf16.gmra.mrb[136].mxu0 %vm7253_vm15, %v8678_v49  ;;  %v8859_v35 = vadd.f32 %v16075_v19, %v8858_v42  ;;  %v10942_v36 = vpop.f32.mrb[102].mxu0  ;;  %v9105_v48 = vunpack.c.l.bf16 %v11385_v32 }
 0x50d   : > { %v9167_v38 = vadd.f32 %v9103_v27, %v8867_v37  ;;  %v8870_v21 = vadd.f32 %v10942_v36, %v16075_v19  ;;  %v8861_v46 = vpop.f32.mrb[103].mxu0  ;;  %v11384_v27 = vld [vmem:[%s11669_s15 + $0x28] sm:$0xff]  }
 0x50e   : > { %v8518_v13 = vadd.f32 %v16786_v17, %v8229_v0  ;;  %v9165_v25 = vadd.f32 %v9101_v14, %v8859_v35  ;;  %v8862_v44 = vadd.f32 %v16075_v19, %v8861_v46  ;;  %v8637_v23 = vmax.f32 %v8515_v26, 0.0 }
 0x50f   : > { %v9168_v43 = vadd.f32 %v9104_v57, %v8870_v21  ;;  %v9231_v40 = vmax.f32 %v9167_v38, 0.0  ;;  %v9107_v49 = vunpack.c.l.bf16 %v11384_v27  ;;  %v9108_v42 = vunpack.c.h.bf16 %v11384_v27 }
 0x510   : > { %v8638_v12 = vmax.f32 %v8518_v13, 0.0  ;;  %v9166_v56 = vadd.f32 %v9102_v9, %v8862_v44  ;;  %v9229_v28 = vmax.f32 %v9165_v25, 0.0  ;;  %v9106_v0 = vunpack.c.h.bf16 %v11385_v32 }
 0x511   : > { %v8233_v18 = vpop.f32.mrb[124].mxu1  ;;  %v9232_v3 = vmax.f32 %v9168_v43, 0.0 }
 0x512   : > { %v8679_v4 = vpack.c.bf16 %v8638_v12, %v8637_v23  ;;  %v8234_v41 = vadd.f32 %v15965_v29, %v8233_v18  ;;  %v8235_v50 = vpop.f32.mrb[125].mxu1  ;;  %v9230_v51 = vmax.f32 %v9166_v56, 0.0 }
 0x513   : > { %v8236_v22 = vpop.f32.mrb[126].mxu1  ;;  %v10502_v20 = vpack.c.bf16 %v9232_v3, %v9231_v40  ;;  %v11386_v3 = vld [vmem:[%s11669_s15 + $0x38] sm:$0xff]  }
 0x514   : > { %v8523_v60 = vadd.f32 %v16787_v62, %v8234_v41  ;;  %v8237_v39 = vadd.f32 %v15965_v29, %v8236_v22  ;;  %v8238_v15 = vpop.f32.mrb[127].mxu1  ;;  %10979 = vmatprep.mubr.msk.bf16.mxu0 %vm7253_vm15, %v8679_v4  ;;  %v10497_v34 = vpack.c.bf16 %v9230_v51, %v9229_v28  ;;  %v9111_v4 = vunpack.c.l.bf16 %v11386_v3  ;;  %v11387_v51 = vld [vmem:[%s11669_s15 + $0x30] sm:$0xff]  }
 0x515   : > { %10646 = vst [vmem:[%s16094_s29 + $0x18] sm:$0xff] %v10502_v20   ;;  %v9109_v22 = vunpack.c.l.bf16 %v11387_v51  ;;  %v9110_v27 = vunpack.c.h.bf16 %v11387_v51 }
 0x516   : > { %v8526_v8 = vadd.f32 %v16788_v58, %v8237_v39  ;;  %10645 = vst [vmem:[%s16094_s29 + $0x10] sm:$0xff] %v10497_v34   ;;  %v10945_v61 = vpop.f32.mrb[104].mxu0  ;;  %v8639_v45 = vmax.f32 %v8523_v60, 0.0 }
 0x517   : > { %v8883_v55 = vadd.f32 %v10945_v61, %v16075_v19  ;;  %v8874_v37 = vpop.f32.mrb[105].mxu0 }
 0x518   : > { %v8640_v14 = vmax.f32 %v8526_v8, 0.0  ;;  %v8875_v59 = vadd.f32 %v16075_v19, %v8874_v37  ;;  %v10946_v26 = vpop.f32.mrb[106].mxu0 }
 0x519   : > { %v8241_v57 = vpop.f32.mrb[128].mxu1  ;;  %v9171_v9 = vadd.f32 %v9107_v49, %v8883_v55  ;;  %v8886_v38 = vadd.f32 %v10946_v26, %v16075_v19  ;;  %v8877_v21 = vpop.f32.mrb[107].mxu0 }
 0x51a   : > { %v8680_v47 = vpack.c.bf16 %v8640_v14, %v8639_v45  ;;  %v8242_v35 = vadd.f32 %v15965_v29, %v8241_v57  ;;  %v8243_v36 = vpop.f32.mrb[129].mxu1  ;;  %v9169_v17 = vadd.f32 %v9105_v48, %v8875_v59  ;;  %v8878_v13 = vadd.f32 %v16075_v19, %v8877_v21 }
 0x51b   : > { %v8244_v46 = vpop.f32.mrb[130].mxu1  ;;  %v9172_v23 = vadd.f32 %v9108_v42, %v8886_v38  ;;  %v9235_v18 = vmax.f32 %v9171_v9, 0.0 }
 0x51c   : > { %v8531_v25 = vadd.f32 %v15877_v7, %v8242_v35  ;;  %v8245_v44 = vadd.f32 %v15965_v29, %v8244_v46  ;;  %v8246_v43 = vpop.f32.mrb[131].mxu1  ;;  %10980 = vmatmul.mubr.msk.bf16.gmra.mrb[140].mxu0 %vm7253_vm15, %v8680_v47  ;;  %v9170_v12 = vadd.f32 %v9106_v0, %v8878_v13  ;;  %v9233_v41 = vmax.f32 %v9169_v17, 0.0 }
 0x51d   : > { %v9236_v40 = vmax.f32 %v9172_v23, 0.0  ;;  %v9112_v7 = vunpack.c.h.bf16 %v11386_v3 }
 0x51e   : > { %v8534_v56 = vadd.f32 %v15884_v1, %v8245_v44  ;;  %v9234_v50 = vmax.f32 %v9170_v12, 0.0  ;;  %v10949_v28 = vpop.f32.mrb[108].mxu0  ;;  %v8641_v20 = vmax.f32 %v8531_v25, 0.0 }
 0x51f   : > { %v10512_v60 = vpack.c.bf16 %v9236_v40, %v9235_v18  ;;  %v8899_v39 = vadd.f32 %v10949_v28, %v16075_v19  ;;  %v8890_v15 = vpop.f32.mrb[109].mxu0 }
 0x520   : > { %v8642_v62 = vmax.f32 %v8534_v56, 0.0  ;;  %v10507_v1 = vpack.c.bf16 %v9234_v50, %v9233_v41  ;;  %v8891_v58 = vadd.f32 %v16075_v19, %v8890_v15  ;;  %v10950_v8 = vpop.f32.mrb[110].mxu0 }
 0x521   : > { %10648 = vst [vmem:[%s16094_s29 + $0x28] sm:$0xff] %v10512_v60   ;;  %v9175_v48 = vadd.f32 %v9111_v4, %v8899_v39  ;;  %v8902_v45 = vadd.f32 %v10950_v8, %v16075_v19  ;;  %v8893_v14 = vpop.f32.mrb[111].mxu0 }
 0x522   : > { %v8681_v49 = vpack.c.bf16 %v8642_v62, %v8641_v20  ;;  %10647 = vst [vmem:[%s16094_s29 + $0x20] sm:$0xff] %v10507_v1   ;;  %v9173_v37 = vadd.f32 %v9109_v22, %v8891_v58  ;;  %v8894_v42 = vadd.f32 %v16075_v19, %v8893_v14 }
 0x523   : > { %v9176_v0 = vadd.f32 %v9112_v7, %v8902_v45  ;;  %v9239_v36 = vmax.f32 %v9175_v48, 0.0 }
 0x524   : > { %v8249_v34 = vpop.f32.mrb[132].mxu1  ;;  %10983 = vmatprep.mubr.msk.bf16.mxu0 %vm7253_vm15, %v8681_v49  ;;  %v9174_v47 = vadd.f32 %v9110_v27, %v8894_v42  ;;  %v9237_v38 = vmax.f32 %v9173_v37, 0.0 }
 0x525   : > { %v8250_v61 = vadd.f32 %v15965_v29, %v8249_v34  ;;  %v8251_v32 = vpop.f32.mrb[133].mxu1  ;;  %v9240_v9 = vmax.f32 %v9176_v0, 0.0  ;;  %v11389_v0 = vld [vmem:[%s11669_s15 + $0x40] sm:$0xff]  }
 0x526   : > { %v8252_v55 = vpop.f32.mrb[134].mxu1  ;;  %v9238_v21 = vmax.f32 %v9174_v47, 0.0 }
 0x527   : > { %v8539_v57 = vadd.f32 %v15872_v63, %v8250_v61  ;;  %v8253_v59 = vadd.f32 %v15965_v29, %v8252_v55  ;;  %v8254_v26 = vpop.f32.mrb[135].mxu1  ;;  %v10522_v13 = vpack.c.bf16 %v9240_v9, %v9239_v36 }
 0x528   : > { %v10517_v63 = vpack.c.bf16 %v9238_v21, %v9237_v38 }
 0x529   : > { %v8542_v35 = vadd.f32 %v15879_v6, %v8253_v59  ;;  %v8643_v46 = vmax.f32 %v8539_v57, 0.0  ;;  %10650 = vst [vmem:[%s16094_s29 + $0x38] sm:$0xff] %v10522_v13   ;;  %v11388_v57 = vld [vmem:[%s11669_s15 + $0x48] sm:$0xff]  }
 0x52a   : > { %10649 = vst [vmem:[%s16094_s29 + $0x30] sm:$0xff] %v10517_v63   ;;  %v9115_v59 = vunpack.c.l.bf16 %v11388_v57  ;;  %v9116_v9 = vunpack.c.h.bf16 %v11388_v57 }
 0x52b   : > { %v8644_v17 = vmax.f32 %v8542_v35, 0.0 }
 0x52c   : > { %v8257_v25 = vpop.f32.mrb[136].mxu1 }
 0x52d   : > { %v8682_v44 = vpack.c.bf16 %v8644_v17, %v8643_v46  ;;  %v8258_v43 = vadd.f32 %v15965_v29, %v8257_v25  ;;  %v8259_v23 = vpop.f32.mrb[137].mxu1 }
 0x52e   : > { %v8260_v12 = vpop.f32.mrb[138].mxu1 }
 0x52f   : > { %v8547_v56 = vadd.f32 %v15991_v52, %v8258_v43  ;;  %v8261_v6 = vadd.f32 %v15965_v29, %v8260_v12  ;;  %v8262_v18 = vpop.f32.mrb[139].mxu1  ;;  %10984 = vmatmul.mubr.msk.bf16.gmra.mrb[144].mxu0 %vm7253_vm15, %v8682_v44 }
 0x531   : > { %v8550_v40 = vadd.f32 %v15996_v24, %v8261_v6  ;;  %v8645_v3 = vmax.f32 %v8547_v56, 0.0 }
 0x533   : > { %v8646_v4 = vmax.f32 %v8550_v40, 0.0 }
 0x534   : > { %v8265_v41 = vpop.f32.mrb[140].mxu1 }
 0x535   : > { %v8683_v50 = vpack.c.bf16 %v8646_v4, %v8645_v3  ;;  %v8266_v28 = vadd.f32 %v15965_v29, %v8265_v41  ;;  %v8267_v51 = vpop.f32.mrb[141].mxu1 }
 0x536   : > { %v8268_v22 = vpop.f32.mrb[142].mxu1 }
 0x537   : > { %v8555_v7 = vadd.f32 %v15989_v10, %v8266_v28  ;;  %v8269_v20 = vadd.f32 %v15965_v29, %v8268_v22  ;;  %v8270_v52 = vpop.f32.mrb[143].mxu1  ;;  %10987 = vmatprep.mubr.msk.bf16.mxu0 %vm7253_vm15, %v8683_v50 }
 0x539   : > { %v8558_v62 = vadd.f32 %v15993_v5, %v8269_v20  ;;  %v8647_v60 = vmax.f32 %v8555_v7, 0.0 }
 0x53b   : > { %v8648_v39 = vmax.f32 %v8558_v62, 0.0 }
 0x53c   : > { %v8273_v24 = vpop.f32.mrb[144].mxu1 }
 0x53d   : > { %v8684_v15 = vpack.c.bf16 %v8648_v39, %v8647_v60  ;;  %v8274_v34 = vadd.f32 %v15965_v29, %v8273_v24  ;;  %v8275_v1 = vpop.f32.mrb[145].mxu1 }
 0x53e   : > { %v8276_v58 = vpop.f32.mrb[146].mxu1 }
 0x53f   : > { %v8563_v8 = vadd.f32 %v16019_v33, %v8274_v34  ;;  %v8277_v10 = vadd.f32 %v15965_v29, %v8276_v58  ;;  %v8278_v27 = vpop.f32.mrb[147].mxu1  ;;  %10988 = vmatmul.mubr.msk.bf16.gmra.mrb[148].mxu0 %vm7253_vm15, %v8684_v15 }
 0x541   : > { %v8566_v49 = vadd.f32 %v16023_v30, %v8277_v10  ;;  %v8649_v5 = vmax.f32 %v8563_v8, 0.0  ;;  %v9113_v30 = vunpack.c.l.bf16 %v11389_v0 }
 0x543   : > { %v8650_v61 = vmax.f32 %v8566_v49, 0.0 }
 0x544   : > { %v8281_v32 = vpop.f32.mrb[148].mxu1 }
 0x545   : > { %v8685_v48 = vpack.c.bf16 %v8650_v61, %v8649_v5  ;;  %v8282_v45 = vadd.f32 %v15965_v29, %v8281_v32  ;;  %v8283_v14 = vpop.f32.mrb[149].mxu1  ;;  %v11390_v5 = vld [vmem:[%s11669_s15 + $0x58] sm:$0xff]  }
 0x546   : > { %v8284_v55 = vpop.f32.mrb[150].mxu1  ;;  %v9119_v61 = vunpack.c.l.bf16 %v11390_v5 }
 0x547   : > { %v8571_v37 = vadd.f32 %v16017_v53, %v8282_v45  ;;  %v8285_v33 = vadd.f32 %v15965_v29, %v8284_v55  ;;  %v8286_v42 = vpop.f32.mrb[151].mxu1  ;;  %10991 = vmatprep.mubr.msk.bf16.mxu0 %vm7253_vm15, %v8685_v48  ;;  %v9114_v53 = vunpack.c.h.bf16 %v11389_v0  ;;  %v11391_v48 = vld [vmem:[%s11669_s15 + $0x50] sm:$0xff]  }
 0x548   : > { %v9117_v45 = vunpack.c.l.bf16 %v11391_v48 }
 0x549   : > { %v8574_v47 = vadd.f32 %v16021_v16, %v8285_v33  ;;  %v8651_v46 = vmax.f32 %v8571_v37, 0.0  ;;  %v9120_v37 = vunpack.c.h.bf16 %v11390_v5 }
 0x54b   : > { %v10953_v26 = vpop.f32.mrb[112].mxu0  ;;  %v8652_v17 = vmax.f32 %v8574_v47, 0.0 }
 0x54c   : > { %v8915_v35 = vadd.f32 %v10953_v26, %v16075_v19  ;;  %v8906_v36 = vpop.f32.mrb[113].mxu0  ;;  %v8289_v44 = vpop.f32.mrb[152].mxu1 }
 0x54d   : > { %v8907_v38 = vadd.f32 %v16075_v19, %v8906_v36  ;;  %v10954_v21 = vpop.f32.mrb[114].mxu0  ;;  %v8686_v12 = vpack.c.bf16 %v8652_v17, %v8651_v46  ;;  %v8290_v16 = vadd.f32 %v15965_v29, %v8289_v44  ;;  %v8291_v56 = vpop.f32.mrb[153].mxu1 }
 0x54e   : > { %v9179_v13 = vadd.f32 %v9115_v59, %v8915_v35  ;;  %v8918_v25 = vadd.f32 %v10954_v21, %v16075_v19  ;;  %v8909_v63 = vpop.f32.mrb[115].mxu0  ;;  %v8292_v18 = vpop.f32.mrb[154].mxu1 }
 0x54f   : > { %v9177_v43 = vadd.f32 %v9113_v30, %v8907_v38  ;;  %v8910_v23 = vadd.f32 %v16075_v19, %v8909_v63  ;;  %v8579_v3 = vadd.f32 %v16051_v31, %v8290_v16  ;;  %v8293_v4 = vadd.f32 %v15965_v29, %v8292_v18  ;;  %v8294_v41 = vpop.f32.mrb[155].mxu1  ;;  %10992 = vmatmul.mubr.msk.bf16.gmra.mrb[152].mxu0 %vm7253_vm15, %v8686_v12 }
 0x550   : > { %v9180_v6 = vadd.f32 %v9116_v9, %v8918_v25  ;;  %v9243_v50 = vmax.f32 %v9179_v13, 0.0  ;;  %v11393_v13 = vld [vmem:[%s11669_s15 + $0x60] sm:$0xff]  }
 0x551   : > { %v9178_v40 = vadd.f32 %v9114_v53, %v8910_v23  ;;  %v9241_v51 = vmax.f32 %v9177_v43, 0.0  ;;  %v8582_v7 = vadd.f32 %v16056_v11, %v8293_v4  ;;  %v8653_v62 = vmax.f32 %v8579_v3, 0.0  ;;  %v11392_v53 = vld [vmem:[%s11669_s15 + $0x68] sm:$0xff]  }
 0x552   : > { %v9244_v28 = vmax.f32 %v9180_v6, 0.0  ;;  %v9123_v46 = vunpack.c.l.bf16 %v11392_v53  ;;  %v9121_v25 = vunpack.c.l.bf16 %v11393_v13  ;;  %v9124_v43 = vunpack.c.h.bf16 %v11392_v53 }
 0x553   : > { %v9242_v22 = vmax.f32 %v9178_v40, 0.0  ;;  %v8654_v60 = vmax.f32 %v8582_v7, 0.0  ;;  %v9122_v16 = vunpack.c.h.bf16 %v11393_v13 }
 0x554   : > { %v10532_v20 = vpack.c.bf16 %v9244_v28, %v9243_v50 }
 0x555   : > { %v10527_v52 = vpack.c.bf16 %v9242_v22, %v9241_v51  ;;  %v8687_v39 = vpack.c.bf16 %v8654_v60, %v8653_v62 }
 0x556   : > { %10652 = vst [vmem:[%s16094_s29 + $0x48] sm:$0xff] %v10532_v20  }
 0x557   : > { %10651 = vst [vmem:[%s16094_s29 + $0x40] sm:$0xff] %v10527_v52   ;;  %10995 = vmatprep.mubr.msk.bf16.mxu0 %vm7253_vm15, %v8687_v39  ;;  %v11394_v52 = vld [vmem:[%s11669_s15 + $0x78] sm:$0xff]   ;;  %v11395_v39 = vld [vmem:[%s11669_s15 + $0x70] sm:$0xff]  }
 0x558   : > { %v9127_v62 = vunpack.c.l.bf16 %v11394_v52 }
 0x55f   : > { %v8297_v31 = vpop.f32.mrb[156].mxu1 }
 0x560   : > { %v8298_v24 = vadd.f32 %v15965_v29, %v8297_v31  ;;  %v8299_v15 = vpop.f32.mrb[157].mxu1  ;;  %v9125_v31 = vunpack.c.l.bf16 %v11395_v39 }
 0x561   : > { %v8300_v34 = vpop.f32.mrb[158].mxu1 }
 0x562   : > { %v8587_v1 = vadd.f32 %v16049_v54, %v8298_v24  ;;  %v8301_v11 = vadd.f32 %v15965_v29, %v8300_v34  ;;  %v8302_v58 = vpop.f32.mrb[159].mxu1  ;;  %v9128_v34 = vunpack.c.h.bf16 %v11394_v52 }
 0x563   : > { %v9126_v58 = vunpack.c.h.bf16 %v11395_v39 }
 0x564   : > { %v8590_v8 = vadd.f32 %v16053_v2, %v8301_v11  ;;  %v8655_v10 = vmax.f32 %v8587_v1, 0.0  ;;  %v9118_v2 = vunpack.c.h.bf16 %v11391_v48 }
 0x566   : > { %v8656_v27 = vmax.f32 %v8590_v8, 0.0 }
 0x568   : > { %v8688_v49 = vpack.c.bf16 %v8656_v27, %v8655_v10 }
 0x56a   : > { %10996 = vmatmul.mubr.msk.bf16.gmra.mrb[156].mxu0 %vm7253_vm15, %v8688_v49 }
 0x573   : > { %v10957_v32 = vpop.f32.mrb[116].mxu0 }
 0x574   : > { %v8931_v14 = vadd.f32 %v10957_v32, %v16075_v19  ;;  %v8922_v55 = vpop.f32.mrb[117].mxu0 }
 0x575   : > { %v8923_v54 = vadd.f32 %v16075_v19, %v8922_v55  ;;  %v10958_v29 = vpop.f32.mrb[118].mxu0 }
 0x576   : > { %v9183_v33 = vadd.f32 %v9119_v61, %v8931_v14  ;;  %v8934_v42 = vadd.f32 %v10958_v29, %v16075_v19  ;;  %v8925_v57 = vpop.f32.mrb[119].mxu0  ;;  %v11396_v29 = vld [vmem:[%s11669_s15 + $0x88] sm:$0xff]  }
 0x577   : > { %v9181_v59 = vadd.f32 %v9117_v45, %v8923_v54  ;;  %v8926_v26 = vadd.f32 %v16075_v19, %v8925_v57 }
 0x578   : > { %v9184_v0 = vadd.f32 %v9120_v37, %v8934_v42  ;;  %v9247_v47 = vmax.f32 %v9183_v33, 0.0  ;;  %v11397_v33 = vld [vmem:[%s11669_s15 + $0x80] sm:$0xff]  }
 0x579   : > { %v9182_v30 = vadd.f32 %v9118_v2, %v8926_v26  ;;  %v9245_v36 = vmax.f32 %v9181_v59, 0.0  ;;  %v9131_v2 = vunpack.c.l.bf16 %v11396_v29  ;;  %v9129_v42 = vunpack.c.l.bf16 %v11397_v33 }
 0x57a   : > { %v9248_v35 = vmax.f32 %v9184_v0, 0.0  ;;  %v9132_v0 = vunpack.c.h.bf16 %v11396_v29 }
 0x57b   : > { %v9246_v9 = vmax.f32 %v9182_v30, 0.0  ;;  %v9130_v30 = vunpack.c.h.bf16 %v11397_v33 }
 0x57c   : > { %v10542_v38 = vpack.c.bf16 %v9248_v35, %v9247_v47 }
 0x57d   : > { %v10537_v21 = vpack.c.bf16 %v9246_v9, %v9245_v36 }
 0x57e   : > { %10654 = vst [vmem:[%s16094_s29 + $0x58] sm:$0xff] %v10542_v38  }
 0x57f   : > { %10653 = vst [vmem:[%s16094_s29 + $0x50] sm:$0xff] %v10537_v21  }
 0x591   : > { %v10961_v17 = vpop.f32.mrb[120].mxu0 }
 0x592   : > { %v8947_v63 = vadd.f32 %v10961_v17, %v16075_v19  ;;  %v8938_v44 = vpop.f32.mrb[121].mxu0 }
 0x593   : > { %v8939_v23 = vadd.f32 %v16075_v19, %v8938_v44  ;;  %v10962_v12 = vpop.f32.mrb[122].mxu0 }
 0x594   : > { %v9187_v56 = vadd.f32 %v9123_v46, %v8947_v63  ;;  %v8950_v6 = vadd.f32 %v10962_v12, %v16075_v19  ;;  %v8941_v18 = vpop.f32.mrb[123].mxu0  ;;  %v11398_v12 = vld [vmem:[%s11669_s15 + $0x98] sm:$0xff]  }
 0x595   : > { %v9185_v40 = vadd.f32 %v9121_v25, %v8939_v23  ;;  %v8942_v3 = vadd.f32 %v16075_v19, %v8941_v18 }
 0x596   : > { %v9188_v4 = vadd.f32 %v9124_v43, %v8950_v6  ;;  %v9251_v50 = vmax.f32 %v9187_v56, 0.0  ;;  %v11399_v6 = vld [vmem:[%s11669_s15 + $0x90] sm:$0xff]  }
 0x597   : > { %v9186_v41 = vadd.f32 %v9122_v16, %v8942_v3  ;;  %v9249_v51 = vmax.f32 %v9185_v40, 0.0  ;;  %v9135_v16 = vunpack.c.l.bf16 %v11398_v12  ;;  %v9133_v18 = vunpack.c.l.bf16 %v11399_v6 }
 0x598   : > { %v9252_v28 = vmax.f32 %v9188_v4, 0.0  ;;  %v9136_v4 = vunpack.c.h.bf16 %v11398_v12 }
 0x599   : > { %v9250_v22 = vmax.f32 %v9186_v41, 0.0 }
 0x59a   : > { %v10552_v7 = vpack.c.bf16 %v9252_v28, %v9251_v50  ;;  %v9134_v28 = vunpack.c.h.bf16 %v11399_v6 }
 0x59b   : > { %v10547_v20 = vpack.c.bf16 %v9250_v22, %v9249_v51 }
 0x59c   : > { %10656 = vst [vmem:[%s16094_s29 + $0x68] sm:$0xff] %v10552_v7  }
 0x59d   : > { %10655 = vst [vmem:[%s16094_s29 + $0x60] sm:$0xff] %v10547_v20  }
 0x5a7   : > { %v10965_v60 = vpop.f32.mrb[124].mxu0 }
 0x5a8   : > { %v8963_v24 = vadd.f32 %v10965_v60, %v16075_v19  ;;  %v8954_v15 = vpop.f32.mrb[125].mxu0 }
 0x5a9   : > { %v8955_v1 = vadd.f32 %v16075_v19, %v8954_v15  ;;  %v10966_v11 = vpop.f32.mrb[126].mxu0 }
 0x5aa   : > { %v9191_v8 = vadd.f32 %v9127_v62, %v8963_v24  ;;  %v8966_v10 = vadd.f32 %v10966_v11, %v16075_v19  ;;  %v8957_v27 = vpop.f32.mrb[127].mxu0  ;;  %v11400_v11 = vld [vmem:[%s11669_s15 + $0xa8] sm:$0xff]  }
 0x5ab   : > { %v9189_v49 = vadd.f32 %v9125_v31, %v8955_v1  ;;  %v8958_v5 = vadd.f32 %v16075_v19, %v8957_v27 }
 0x5ac   : > { %v9192_v61 = vadd.f32 %v9128_v34, %v8966_v10  ;;  %v9255_v48 = vmax.f32 %v9191_v8, 0.0  ;;  %v11401_v10 = vld [vmem:[%s11669_s15 + $0xa0] sm:$0xff]  }
 0x5ad   : > { %v9190_v32 = vadd.f32 %v9126_v58, %v8958_v5  ;;  %v9253_v14 = vmax.f32 %v9189_v49, 0.0  ;;  %v9139_v58 = vunpack.c.l.bf16 %v11400_v11  ;;  %v9137_v27 = vunpack.c.l.bf16 %v11401_v10 }
 0x5ae   : > { %v9256_v45 = vmax.f32 %v9192_v61, 0.0  ;;  %v9140_v61 = vunpack.c.h.bf16 %v11400_v11 }
 0x5af   : > { %v9254_v55 = vmax.f32 %v9190_v32, 0.0 }
 0x5b0   : > { %v10562_v37 = vpack.c.bf16 %v9256_v45, %v9255_v48  ;;  %v9138_v45 = vunpack.c.h.bf16 %v11401_v10 }
 0x5b1   : > { %v10557_v54 = vpack.c.bf16 %v9254_v55, %v9253_v14 }
 0x5b2   : > { %10658 = vst [vmem:[%s16094_s29 + $0x78] sm:$0xff] %v10562_v37  }
 0x5b3   : > { %10657 = vst [vmem:[%s16094_s29 + $0x70] sm:$0xff] %v10557_v54  }
 0x5bd   : > { %v10969_v57 = vpop.f32.mrb[128].mxu0 }
 0x5be   : > { %v8979_v59 = vadd.f32 %v10969_v57, %v16075_v19  ;;  %v8970_v26 = vpop.f32.mrb[129].mxu0 }
 0x5bf   : > { %v8971_v47 = vadd.f32 %v16075_v19, %v8970_v26  ;;  %v10970_v35 = vpop.f32.mrb[130].mxu0 }
 0x5c0   : > { %v9195_v36 = vadd.f32 %v9131_v2, %v8979_v59  ;;  %v8982_v9 = vadd.f32 %v10970_v35, %v16075_v19  ;;  %v8973_v38 = vpop.f32.mrb[131].mxu0 }
 0x5c1   : > { %v9193_v21 = vadd.f32 %v9129_v42, %v8971_v47  ;;  %v8974_v53 = vadd.f32 %v16075_v19, %v8973_v38  ;;  %v11402_v47 = vld [vmem:[%s11669_s15 + $0xb8] sm:$0xff]  }
 0x5c2   : > { %v9196_v46 = vadd.f32 %v9132_v0, %v8982_v9  ;;  %v9259_v13 = vmax.f32 %v9195_v36, 0.0  ;;  %v9143_v35 = vunpack.c.l.bf16 %v11402_v47  ;;  %v11403_v9 = vld [vmem:[%s11669_s15 + $0xb0] sm:$0xff]  }
 0x5c3   : > { %v9194_v17 = vadd.f32 %v9130_v30, %v8974_v53  ;;  %v9257_v63 = vmax.f32 %v9193_v21, 0.0  ;;  %v9141_v38 = vunpack.c.l.bf16 %v11403_v9 }
 0x5c4   : > { %v9260_v25 = vmax.f32 %v9196_v46, 0.0  ;;  %v9144_v46 = vunpack.c.h.bf16 %v11402_v47 }
 0x5c5   : > { %v9258_v44 = vmax.f32 %v9194_v17, 0.0 }
 0x5c6   : > { %v10572_v43 = vpack.c.bf16 %v9260_v25, %v9259_v13  ;;  %v9142_v25 = vunpack.c.h.bf16 %v11403_v9 }
 0x5c7   : > { %v10567_v23 = vpack.c.bf16 %v9258_v44, %v9257_v63 }
 0x5c8   : > { %10660 = vst [vmem:[%s16094_s29 + $0x88] sm:$0xff] %v10572_v43  }
 0x5c9   : > { %10659 = vst [vmem:[%s16094_s29 + $0x80] sm:$0xff] %v10567_v23  }
 0x5cd   : > { %v10973_v56 = vpop.f32.mrb[132].mxu0 }
 0x5ce   : > { %v8995_v40 = vadd.f32 %v10973_v56, %v16075_v19  ;;  %v8986_v3 = vpop.f32.mrb[133].mxu0 }
 0x5cf   : > { %v8987_v41 = vadd.f32 %v16075_v19, %v8986_v3  ;;  %v10974_v50 = vpop.f32.mrb[134].mxu0 }
 0x5d0   : > { %v9199_v51 = vadd.f32 %v9135_v16, %v8995_v40  ;;  %v8998_v22 = vadd.f32 %v10974_v50, %v16075_v19  ;;  %v8989_v7 = vpop.f32.mrb[135].mxu0  ;;  %v11404_v50 = vld [vmem:[%s11669_s15 + $0xc8] sm:$0xff]  }
 0x5d1   : > { %v9197_v20 = vadd.f32 %v9133_v18, %v8987_v41  ;;  %v8990_v52 = vadd.f32 %v16075_v19, %v8989_v7 }
 0x5d2   : > { %v9200_v62 = vadd.f32 %v9136_v4, %v8998_v22  ;;  %v9263_v39 = vmax.f32 %v9199_v51, 0.0  ;;  %v11405_v22 = vld [vmem:[%s11669_s15 + $0xc0] sm:$0xff]  }
 0x5d3   : > { %v9198_v60 = vadd.f32 %v9134_v28, %v8990_v52  ;;  %v9261_v24 = vmax.f32 %v9197_v20, 0.0  ;;  %v9147_v28 = vunpack.c.l.bf16 %v11404_v50  ;;  %v9145_v7 = vunpack.c.l.bf16 %v11405_v22 }
 0x5d4   : > { %v9264_v31 = vmax.f32 %v9200_v62, 0.0  ;;  %v9148_v62 = vunpack.c.h.bf16 %v11404_v50 }
 0x5d5   : > { %v9262_v15 = vmax.f32 %v9198_v60, 0.0 }
 0x5d6   : > { %v10582_v34 = vpack.c.bf16 %v9264_v31, %v9263_v39  ;;  %v9146_v31 = vunpack.c.h.bf16 %v11405_v22 }
 0x5d7   : > { %v10577_v1 = vpack.c.bf16 %v9262_v15, %v9261_v24 }
 0x5d8   : > { %10662 = vst [vmem:[%s16094_s29 + $0x98] sm:$0xff] %v10582_v34  }
 0x5d9   : > { %10661 = vst [vmem:[%s16094_s29 + $0x90] sm:$0xff] %v10577_v1  }
 0x5df   : > { %v10977_v8 = vpop.f32.mrb[136].mxu0 }
 0x5e0   : > { %v9011_v49 = vadd.f32 %v10977_v8, %v16075_v19  ;;  %v9002_v5 = vpop.f32.mrb[137].mxu0 }
 0x5e1   : > { %v9003_v32 = vadd.f32 %v16075_v19, %v9002_v5  ;;  %v10978_v48 = vpop.f32.mrb[138].mxu0 }
 0x5e2   : > { %v9203_v14 = vadd.f32 %v9139_v58, %v9011_v49  ;;  %v9014_v55 = vadd.f32 %v10978_v48, %v16075_v19  ;;  %v9005_v37 = vpop.f32.mrb[139].mxu0  ;;  %v11406_v48 = vld [vmem:[%s11669_s15 + $0xd8] sm:$0xff]  }
 0x5e3   : > { %v9201_v54 = vadd.f32 %v9137_v27, %v9003_v32  ;;  %v9006_v29 = vadd.f32 %v16075_v19, %v9005_v37 }
 0x5e4   : > { %v9204_v2 = vadd.f32 %v9140_v61, %v9014_v55  ;;  %v9267_v42 = vmax.f32 %v9203_v14, 0.0  ;;  %v11407_v55 = vld [vmem:[%s11669_s15 + $0xd0] sm:$0xff]  }
 0x5e5   : > { %v9202_v33 = vadd.f32 %v9138_v45, %v9006_v29  ;;  %v9265_v59 = vmax.f32 %v9201_v54, 0.0  ;;  %v9151_v45 = vunpack.c.l.bf16 %v11406_v48  ;;  %v9149_v37 = vunpack.c.l.bf16 %v11407_v55 }
 0x5e6   : > { %v9268_v57 = vmax.f32 %v9204_v2, 0.0  ;;  %v9152_v2 = vunpack.c.h.bf16 %v11406_v48 }
 0x5e7   : > { %v9266_v26 = vmax.f32 %v9202_v33, 0.0 }
 0x5e8   : > { %v10592_v0 = vpack.c.bf16 %v9268_v57, %v9267_v42  ;;  %v9150_v57 = vunpack.c.h.bf16 %v11407_v55 }
 0x5e9   : > { %v10587_v30 = vpack.c.bf16 %v9266_v26, %v9265_v59 }
 0x5ea   : > { %10664 = vst [vmem:[%s16094_s29 + $0xa8] sm:$0xff] %v10592_v0  }
 0x5eb   : > { %10663 = vst [vmem:[%s16094_s29 + $0xa0] sm:$0xff] %v10587_v30  }
 0x5ef   : > { %v10981_v36 = vpop.f32.mrb[140].mxu0 }
 0x5f0   : > { %v9027_v21 = vadd.f32 %v10981_v36, %v16075_v19  ;;  %v9018_v53 = vpop.f32.mrb[141].mxu0 }
 0x5f1   : > { %v9019_v17 = vadd.f32 %v16075_v19, %v9018_v53  ;;  %v10982_v13 = vpop.f32.mrb[142].mxu0 }
 0x5f2   : > { %v9207_v63 = vadd.f32 %v9143_v35, %v9027_v21  ;;  %v9030_v44 = vadd.f32 %v10982_v13, %v16075_v19  ;;  %v9021_v43 = vpop.f32.mrb[143].mxu0  ;;  %v11408_v13 = vld [vmem:[%s11669_s15 + $0xe8] sm:$0xff]  }
 0x5f3   : > { %v9205_v23 = vadd.f32 %v9141_v38, %v9019_v17  ;;  %v9022_v12 = vadd.f32 %v16075_v19, %v9021_v43 }
 0x5f4   : > { %v9208_v16 = vadd.f32 %v9144_v46, %v9030_v44  ;;  %v9271_v6 = vmax.f32 %v9207_v63, 0.0  ;;  %v11409_v44 = vld [vmem:[%s11669_s15 + $0xe0] sm:$0xff]  }
 0x5f5   : > { %v9206_v56 = vadd.f32 %v9142_v25, %v9022_v12  ;;  %v9269_v40 = vmax.f32 %v9205_v23, 0.0  ;;  %v9155_v25 = vunpack.c.l.bf16 %v11408_v13  ;;  %v9153_v43 = vunpack.c.l.bf16 %v11409_v44 }
 0x5f6   : > { %v9272_v18 = vmax.f32 %v9208_v16, 0.0  ;;  %v9156_v16 = vunpack.c.h.bf16 %v11408_v13 }
 0x5f7   : > { %v9270_v3 = vmax.f32 %v9206_v56, 0.0 }
 0x5f8   : > { %v10602_v4 = vpack.c.bf16 %v9272_v18, %v9271_v6  ;;  %v9154_v18 = vunpack.c.h.bf16 %v11409_v44 }
 0x5f9   : > { %v10597_v41 = vpack.c.bf16 %v9270_v3, %v9269_v40 }
 0x5fa   : > { %10666 = vst [vmem:[%s16094_s29 + $0xb8] sm:$0xff] %v10602_v4  }
 0x5fb   : > { %10665 = vst [vmem:[%s16094_s29 + $0xb0] sm:$0xff] %v10597_v41  }
 0x602   : > { %v10985_v51 = vpop.f32.mrb[144].mxu0 }
 0x603   : > { %v9043_v20 = vadd.f32 %v10985_v51, %v16075_v19  ;;  %v9034_v52 = vpop.f32.mrb[145].mxu0 }
 0x604   : > { %v9035_v60 = vadd.f32 %v16075_v19, %v9034_v52  ;;  %v10986_v39 = vpop.f32.mrb[146].mxu0 }
 0x605   : > { %v9211_v24 = vadd.f32 %v9147_v28, %v9043_v20  ;;  %v9046_v15 = vadd.f32 %v10986_v39, %v16075_v19  ;;  %v9037_v34 = vpop.f32.mrb[147].mxu0  ;;  %v11410_v39 = vld [vmem:[%s11669_s15 + $0xf8] sm:$0xff]  }
 0x606   : > { %v9209_v1 = vadd.f32 %v9145_v7, %v9035_v60  ;;  %v9038_v11 = vadd.f32 %v16075_v19, %v9037_v34 }
 0x607   : > { %v9212_v58 = vadd.f32 %v9148_v62, %v9046_v15  ;;  %v9275_v10 = vmax.f32 %v9211_v24, 0.0  ;;  %v11411_v15 = vld [vmem:[%s11669_s15 + $0xf0] sm:$0xff]   ;;  %s10483_s15 = sshll.u32 %s11581_s28, 12  ;;  %s9610_s28 = scalar_lea.sflag [#allocation5], %s11663_s16 }
 0x608   : > { %v9210_v8 = vadd.f32 %v9146_v31, %v9038_v11  ;;  %v9273_v49 = vmax.f32 %v9209_v1, 0.0  ;;  %v9159_v31 = vunpack.c.l.bf16 %v11410_v39  ;;  %v9157_v34 = vunpack.c.l.bf16 %v11411_v15  ;;  %s16272_s20 = scalar_lea.hbm %s16328_s7, %s10483_s15 }
 0x609   : > { %v9276_v27 = vmax.f32 %v9212_v58, 0.0  ;;  %v9160_v58 = vunpack.c.h.bf16 %v11410_v39 }
 0x60a   : > { %v9274_v5 = vmax.f32 %v9210_v8, 0.0 }
 0x60b   : > { %v10612_v61 = vpack.c.bf16 %v9276_v27, %v9275_v10  ;;  %v9158_v27 = vunpack.c.h.bf16 %v11411_v15 }
 0x60c   : > { %v10607_v32 = vpack.c.bf16 %v9274_v5, %v9273_v49 }
 0x60d   : > { %10668 = vst [vmem:[%s16094_s29 + $0xc8] sm:$0xff] %v10612_v61  }
 0x60e   : > { %10667 = vst [vmem:[%s16094_s29 + $0xc0] sm:$0xff] %v10607_v32  }
 0x612   : > { %v10989_v14 = vpop.f32.mrb[148].mxu0 }
 0x613   : > { %v9059_v54 = vadd.f32 %v10989_v14, %v16075_v19  ;;  %v9050_v29 = vpop.f32.mrb[149].mxu0 }
 0x614   : > { %v9051_v33 = vadd.f32 %v16075_v19, %v9050_v29  ;;  %v10990_v42 = vpop.f32.mrb[150].mxu0 }
 0x615   : > { %v9215_v59 = vadd.f32 %v9151_v45, %v9059_v54  ;;  %v9062_v26 = vadd.f32 %v10990_v42, %v16075_v19  ;;  %v9053_v0 = vpop.f32.mrb[151].mxu0 }
 0x616   : > { %v9213_v30 = vadd.f32 %v9149_v37, %v9051_v33  ;;  %v9054_v47 = vadd.f32 %v16075_v19, %v9053_v0 }
 0x617   : > { %v9216_v35 = vadd.f32 %v9152_v2, %v9062_v26  ;;  %v9279_v9 = vmax.f32 %v9215_v59, 0.0 }
 0x618   : > { %v9214_v36 = vadd.f32 %v9150_v57, %v9054_v47  ;;  %v9277_v21 = vmax.f32 %v9213_v30, 0.0 }
 0x619   : > { %v9280_v38 = vmax.f32 %v9216_v35, 0.0 }
 0x61a   : > { %v9278_v53 = vmax.f32 %v9214_v36, 0.0 }
 0x61b   : > { %v10622_v46 = vpack.c.bf16 %v9280_v38, %v9279_v9 }
 0x61c   : > { %v10617_v17 = vpack.c.bf16 %v9278_v53, %v9277_v21 }
 0x61d   : > { %10670 = vst [vmem:[%s16094_s29 + $0xd8] sm:$0xff] %v10622_v46  }
 0x61e   : > { %10669 = vst [vmem:[%s16094_s29 + $0xd0] sm:$0xff] %v10617_v17  }
 0x622   : > { %v10993_v63 = vpop.f32.mrb[152].mxu0 }
 0x623   : > { %v9075_v23 = vadd.f32 %v10993_v63, %v16075_v19  ;;  %v9066_v12 = vpop.f32.mrb[153].mxu0 }
 0x624   : > { %v9067_v56 = vadd.f32 %v16075_v19, %v9066_v12  ;;  %v10994_v6 = vpop.f32.mrb[154].mxu0 }
 0x625   : > { %v9219_v40 = vadd.f32 %v9155_v25, %v9075_v23  ;;  %v9078_v3 = vadd.f32 %v10994_v6, %v16075_v19  ;;  %v9069_v4 = vpop.f32.mrb[155].mxu0 }
 0x626   : > { %v9217_v41 = vadd.f32 %v9153_v43, %v9067_v56  ;;  %v9070_v50 = vadd.f32 %v16075_v19, %v9069_v4  ;;  %v11412_v19 = vld [vmem:[%s16327_s6] ss:$0 sm:$0xff] }
 0x627   : > { %v9220_v28 = vadd.f32 %v9156_v16, %v9078_v3  ;;  %v9283_v22 = vmax.f32 %v9219_v40, 0.0 }
 0x628   : > { %v9218_v51 = vadd.f32 %v9154_v18, %v9070_v50  ;;  %v9281_v20 = vmax.f32 %v9217_v41, 0.0 }
 0x629   : > { %v9284_v7 = vmax.f32 %v9220_v28, 0.0 }
 0x62a   : > { %v9282_v52 = vmax.f32 %v9218_v51, 0.0 }
 0x62b   : > { %v10632_v62 = vpack.c.bf16 %v9284_v7, %v9283_v22 }
 0x62c   : > { %v10627_v60 = vpack.c.bf16 %v9282_v52, %v9281_v20 }
 0x62d   : > { %10672 = vst [vmem:[%s16094_s29 + $0xe8] sm:$0xff] %v10632_v62  }
 0x62e   : > { %10671 = vst [vmem:[%s16094_s29 + $0xe0] sm:$0xff] %v10627_v60  }
 0x63d   : > { %v10997_v24 = vpop.f32.mrb[156].mxu0 }
 0x63e   : > { %v9091_v1 = vadd.f32 %v11412_v19, %v10997_v24  ;;  %v9082_v11 = vpop.f32.mrb[157].mxu0 }
 0x63f   : > { %v9083_v8 = vadd.f32 %v11412_v19, %v9082_v11  ;;  %v10998_v10 = vpop.f32.mrb[158].mxu0 }
 0x640   : > { %v9223_v49 = vadd.f32 %v9159_v31, %v9091_v1  ;;  %v9094_v5 = vadd.f32 %v11412_v19, %v10998_v10  ;;  %v9085_v61 = vpop.f32.mrb[159].mxu0 }
 0x641   : > { %v9221_v32 = vadd.f32 %v9157_v34, %v9083_v8  ;;  %v9086_v48 = vadd.f32 %v11412_v19, %v9085_v61 }
 0x642   : > { %v9224_v45 = vadd.f32 %v9160_v58, %v9094_v5  ;;  %v9287_v55 = vmax.f32 %v9223_v49, 0.0 }
 0x643   : > { %v9222_v14 = vadd.f32 %v9158_v27, %v9086_v48  ;;  %v9285_v54 = vmax.f32 %v9221_v32, 0.0 }
 0x644   : > { %v9288_v37 = vmax.f32 %v9224_v45, 0.0 }
 0x645   : > { %v9286_v29 = vmax.f32 %v9222_v14, 0.0 }
 0x646   : > { %v10642_v2 = vpack.c.bf16 %v9288_v37, %v9287_v55 }
 0x647   : > { %v10637_v33 = vpack.c.bf16 %v9286_v29, %v9285_v54 }
 0x648   : > { %10674 = vst [vmem:[%s16094_s29 + $0xf8] sm:$0xff] %v10642_v2  }
 0x649   : > { %10673 = vst [vmem:[%s16094_s29 + $0xf0] sm:$0xff] %v10637_v33  }
 0x64a   : > { %11456 = shalt.err (!%p11453_p1)
}
 0x64b   : > { %s11457_s29 = scalar_lea.hbm %s16272_s20, 4096  ;;  %s11461_s15 = scalar_lea.hbm %s16328_s7, 16384 }
 0x64c   : > { %p11458_p3 = scmp.ne.s32.totalorder %s16272_s20, %s11457_s29  ;;  %p11462_p0 = scmp.lt.u32.totalorder %s16272_s20, %s16328_s7 }
 0x64d   : > { %p11463_p2 = scmp.lt.u32.totalorder %s11461_s15, %s11457_s29  ;;  %p11465_p6 = scmp.lt.u32.totalorder %s11457_s29, %s16272_s20 }
 0x64e   : > { %p11459_p4 = pnand %p11458_p3, %p16789_p10 }
 0x64f   : > { %p11464_p7 = por %p11463_p2, %p11462_p0 }
 0x650   : > { %p11460_p5 = pneg %p11459_p4 }
 0x651   : > { %p11466_p11 = por %p11465_p6, %p11464_p7 }
 0x653   : > { %p11467_p12 = pnand %p11466_p11, %p11460_p5 }
 0x655   : > { %11470 = shalt.err (!%p11467_p12)
}
 0x656   : > { %s11519_s12 = smov 4  }
 0x657   : > { %11017 = dma.vmem_to_hbm [thread:$0]  (%p16789_p10), %s16274_s8, 4096, %s16272_s20, %s9610_s28, %s11515_s21, %s11515_s21, %s11519_s12  }
 0x658 PF: > { %p11028_p8 = scmp.ge.s32.totalorder %s11509_s27, 2  ;;  %s9639_s9 = sand.u32 1, %s11497_s24  }
 0x659   : > { %p16790_p9 = scmp.ne.s32.totalorder %s16369_s14, 0  ;;  %s9640_s22 = scalar_lea.sflag [#allocation5], %s9639_s9 }
 0x65b   : > { %p11024_p13 = pnand %p11028_p8, %p16790_p9 }
 0x65d   : > { %11492 = dma.done.wait (!%p11024_p13), %s9640_s22, 4096  }
 0x65e   : > { %11494 = vsyncadd (!%p11024_p13), %s9640_s22, 4294963200  ;;  %p20_p1 = scmp.ge.s32.totalorder %s11585_s30, 6   ;;  %s16791_s24 = smov %s11501_s25 }
 0x65f   : > { %s16792_s25 = smov %s11505_s26  ;;  %s16793_s26 = smov %s11597_s10 }
 0x660   : > { %s16794_s27 = smov %s11585_s30  ;;  %22 = sbr.rel (!%p20_p1) target bundleno = 5 (0x5), region = 96 }
 0x667   :  { %9645 = vsyncpa [#allocation4], 1 }
 0x668   :  { %9647 = vsyncpa [#allocation4 + $0x1], 1 }
 0x669   :  { %9648 = vsyncpa [#allocation5], 1 }
 0x66a   :  { %9650 = vsyncpa [#allocation5 + $0x1], 1 }

</bundles_post_ra>
